<compile_context>
chip_gen: v5e
topology: v5e:2x2
jax: 0.10.0
libtpu: 0.0.40
codegen_flags: <defaults>
</compile_context>

<pallas_src>
import functools

import jax
import jax.numpy as jnp
from jax.experimental import pallas as pl
from jax.experimental.pallas import tpu as pltpu

NUM_GROUPS = 32
EPS = 1e-5  # PyTorch GroupNorm default


def _residual_block_kernel(x_ref, w1_ref, b1_ref, g1_ref, bt1_ref,
                           w2_ref, b2_ref, g2_ref, bt2_ref,
                           agg_ref, msk_ref, o_ref, *, H, W):
    HW = H * W
    x = x_ref[0]                      # (C, HW) float32, channels on sublanes, spatial on lanes
    agg = agg_ref[...]                # (C, C) group-mean aggregation matrix, pre-scaled 1/(Cg*HW)

    def group_norm_silu(z, gamma_ref, beta_ref):
        s1 = jnp.sum(z, axis=1, keepdims=True)                          # (C, 1) per-channel sum
        s2 = jnp.sum(z * z, axis=1, keepdims=True)                      # (C, 1) per-channel sumsq
        mean = jnp.dot(agg, s1, preferred_element_type=jnp.float32)     # group mean, per channel
        ex2 = jnp.dot(agg, s2, preferred_element_type=jnp.float32)      # group E[x^2], per channel
        var = ex2 - mean * mean                                         # biased variance
        zn = (z - mean) * jax.lax.rsqrt(var + EPS)
        zn = zn * gamma_ref[...] + beta_ref[...]
        return zn * jax.nn.sigmoid(zn)                                  # SiLU

    def conv3x3(z, w_ref, b_ref):
        # z: (C, HW); w_ref: (9, C_out, C_in); b_ref: (C, 1)
        acc = jnp.zeros_like(z)
        for kh in range(3):
            for kw in range(3):
                t = kh * 3 + kw
                s = (kh - 1) * W + (kw - 1)          # flat spatial shift of this tap
                if s == 0:
                    tap = z                           # center tap: no shift, mask is all-ones
                else:
                    # tap[p] = z[p + s] where valid, 0 at the zero-padding boundary
                    tap = pltpu.roll(z, (-s) % HW, axis=1) * msk_ref[t]
                acc = acc + jnp.dot(w_ref[t], tap,
                                    preferred_element_type=jnp.float32)
        return acc + b_ref[...]

    h = conv3x3(group_norm_silu(x, g1_ref, bt1_ref), w1_ref, b1_ref)
    h = conv3x3(group_norm_silu(h, g2_ref, bt2_ref), w2_ref, b2_ref)
    o_ref[0] = (x + h).astype(o_ref.dtype)            # residual add; lane-dense store


@functools.partial(jax.jit, static_argnames=("num_groups",))
def residual_block(x_nchw, w1, b1, g1, beta1, w2, b2, g2, beta2, *,
                   num_groups=NUM_GROUPS):
    """Forward of ResidualBlock: x + Conv(SiLU(GN(Conv(SiLU(GN(x))))))  (NCHW in / NCHW out)."""
    N, C, H, W = x_nchw.shape
    HW = H * W
    assert C % num_groups == 0, "GroupNorm requires num_channels % num_groups == 0"
    Cg = C // num_groups

    x2d = x_nchw.reshape(N, C, HW).astype(jnp.float32)            # free reshape, no transpose

    # conv weights, tap-major: (CO,CI,KH,KW) -> (KH,KW,CO,CI) -> (9,CO,CI)
    w1_t = jnp.transpose(w1, (2, 3, 0, 1)).reshape(9, C, C).astype(jnp.float32)
    w2_t = jnp.transpose(w2, (2, 3, 0, 1)).reshape(9, C, C).astype(jnp.float32)

    # group-mean aggregation matrix: agg[i,j] = 1/(Cg*HW) if channels i,j share a group
    grp = jnp.arange(C) // Cg
    agg = (grp[:, None] == grp[None, :]).astype(jnp.float32) / float(Cg * HW)

    # per-tap boundary validity masks (zero-padding semantics), shape (9, 1, HW)
    hh = jnp.arange(H)
    ww = jnp.arange(W)
    masks = []
    for kh in range(3):
        for kw in range(3):
            dh, dw = kh - 1, kw - 1
            hv = (hh + dh >= 0) & (hh + dh < H)
            wv = (ww + dw >= 0) & (ww + dw < W)
            masks.append((hv[:, None] & wv[None, :]).reshape(1, HW))
    masks = jnp.stack(masks).astype(jnp.float32)

    col = lambda v: v.reshape(C, 1).astype(jnp.float32)
    full2 = lambda b: (0, 0)
    full3 = lambda b: (0, 0, 0)

    kernel = functools.partial(_residual_block_kernel, H=H, W=W)
    out = pl.pallas_call(
        kernel,
        out_shape=jax.ShapeDtypeStruct((N, C, HW), jnp.float32),
        grid=(N,),
        in_specs=[
            pl.BlockSpec((1, C, HW), lambda b: (b, 0, 0)),   # x: one image per grid step
            pl.BlockSpec((9, C, C), full3),                  # conv1 weight taps
            pl.BlockSpec((C, 1), full2),                     # conv1 bias
            pl.BlockSpec((C, 1), full2),                     # gn1 gamma
            pl.BlockSpec((C, 1), full2),                     # gn1 beta
            pl.BlockSpec((9, C, C), full3),                  # conv2 weight taps
            pl.BlockSpec((C, 1), full2),                     # conv2 bias
            pl.BlockSpec((C, 1), full2),                     # gn2 gamma
            pl.BlockSpec((C, 1), full2),                     # gn2 beta
            pl.BlockSpec((C, C), full2),                     # group aggregation matrix
            pl.BlockSpec((9, 1, HW), full3),                 # conv tap validity masks
        ],
        out_specs=pl.BlockSpec((1, C, HW), lambda b: (b, 0, 0)),
        compiler_params=pltpu.CompilerParams(
            dimension_semantics=("parallel",)),              # batch axis shards across TCs (v7x)
    )(x2d, w1_t, col(b1), col(g1), col(beta1),
      w2_t, col(b2), col(g2), col(beta2), agg, masks)

    return out.reshape(N, C, H, W)


def _reference(x, w1, b1, g1, beta1, w2, b2, g2, beta2, num_groups=NUM_GROUPS):
    """Pure-JAX reference with PyTorch semantics."""
    def gn(z, gamma, beta):
        N, C, H, W = z.shape
        zg = z.reshape(N, num_groups, C // num_groups, H, W)
        mean = zg.mean(axis=(2, 3, 4), keepdims=True)
        var = zg.var(axis=(2, 3, 4), keepdims=True)
        zn = ((zg - mean) / jnp.sqrt(var + EPS)).reshape(N, C, H, W)
        return zn * gamma[None, :, None, None] + beta[None, :, None, None]

    def conv(z, w, b):
        return jax.lax.conv_general_dilated(
            z, w, window_strides=(1, 1), padding=((1, 1), (1, 1)),
            dimension_numbers=("NCHW", "OIHW", "NCHW")) + b[None, :, None, None]

    h = conv(jax.nn.silu(gn(x, g1, beta1)), w1, b1)
    h = conv(jax.nn.silu(gn(h, g2, beta2)), w2, b2)
    return x + h


if __name__ == "__main__":
    key = jax.random.PRNGKey(0)
    ks = jax.random.split(key, 9)

    # dim must be divisible by 32 for GroupNorm(32, dim); small shapes: batch=2, dim=64, 16x16.
    N, C, H, W = 2, 64, 16, 16
    x = jax.random.normal(ks[0], (N, C, H, W), dtype=jnp.float32)
    w1 = jax.random.normal(ks[1], (C, C, 3, 3), dtype=jnp.float32) * 0.05
    b1 = jax.random.normal(ks[2], (C,), dtype=jnp.float32) * 0.1
    g1 = 1.0 + 0.1 * jax.random.normal(ks[3], (C,), dtype=jnp.float32)
    beta1 = 0.1 * jax.random.normal(ks[4], (C,), dtype=jnp.float32)
    w2 = jax.random.normal(ks[5], (C, C, 3, 3), dtype=jnp.float32) * 0.05
    b2 = jax.random.normal(ks[6], (C,), dtype=jnp.float32) * 0.1
    g2 = 1.0 + 0.1 * jax.random.normal(ks[7], (C,), dtype=jnp.float32)
    beta2 = 0.1 * jax.random.normal(ks[8], (C,), dtype=jnp.float32)

    out = residual_block(x, w1, b1, g1, beta1, w2, b2, g2, beta2, num_groups=32)
    out = jax.block_until_ready(out)

    ref = _reference(x, w1, b1, g1, beta1, w2, b2, g2, beta2)
    assert out.shape == (N, C, H, W), out.shape
    max_err = float(jnp.max(jnp.abs(out - ref)))
    assert jnp.allclose(out, ref, atol=2e-3, rtol=2e-3), max_err

    print("KERNEL_OK")
</pallas_src>

<mosaic_0001>
module attributes {stable_mosaic.version = 11 : i64} {
  func.func @_residual_block_kernel(%arg0: i32, %arg1: memref<1x64x256xf32, #tpu.memory_space<vmem>>, %arg2: memref<9x64x64xf32, #tpu.memory_space<vmem>>, %arg3: memref<64x1xf32, #tpu.memory_space<vmem>>, %arg4: memref<64x1xf32, #tpu.memory_space<vmem>>, %arg5: memref<64x1xf32, #tpu.memory_space<vmem>>, %arg6: memref<9x64x64xf32, #tpu.memory_space<vmem>>, %arg7: memref<64x1xf32, #tpu.memory_space<vmem>>, %arg8: memref<64x1xf32, #tpu.memory_space<vmem>>, %arg9: memref<64x1xf32, #tpu.memory_space<vmem>>, %arg10: memref<64x64xf32, #tpu.memory_space<vmem>>, %arg11: memref<9x1x256xf32, #tpu.memory_space<vmem>>, %arg12: memref<1x64x256xf32, #tpu.memory_space<vmem>>) attributes {dimension_semantics = [#tpu.dimension_semantics<parallel>], iteration_bounds = array<i64: 2>, scalar_prefetch = 0 : i64, scratch_operands = 0 : i64, tpu.core_type = #tpu.core_type<tc>, window_params = [{transform_indices = @transform_0, window_bounds = array<i64: 1, 64, 256>}, {pipeline_mode = #tpu.pipeline_mode<synchronous>, transform_indices = @transform_1, window_bounds = array<i64: 9, 64, 64>}, {pipeline_mode = #tpu.pipeline_mode<synchronous>, transform_indices = @transform_2, window_bounds = array<i64: 64, 1>}, {pipeline_mode = #tpu.pipeline_mode<synchronous>, transform_indices = @transform_3, window_bounds = array<i64: 64, 1>}, {pipeline_mode = #tpu.pipeline_mode<synchronous>, transform_indices = @transform_4, window_bounds = array<i64: 64, 1>}, {pipeline_mode = #tpu.pipeline_mode<synchronous>, transform_indices = @transform_5, window_bounds = array<i64: 9, 64, 64>}, {pipeline_mode = #tpu.pipeline_mode<synchronous>, transform_indices = @transform_6, window_bounds = array<i64: 64, 1>}, {pipeline_mode = #tpu.pipeline_mode<synchronous>, transform_indices = @transform_7, window_bounds = array<i64: 64, 1>}, {pipeline_mode = #tpu.pipeline_mode<synchronous>, transform_indices = @transform_8, window_bounds = array<i64: 64, 1>}, {pipeline_mode = #tpu.pipeline_mode<synchronous>, transform_indices = @transform_9, window_bounds = array<i64: 64, 64>}, {pipeline_mode = #tpu.pipeline_mode<synchronous>, transform_indices = @transform_10, window_bounds = array<i64: 9, 1, 256>}, {transform_indices = @transform_11, window_bounds = array<i64: 1, 64, 256>}]} {
    %c0 = arith.constant 0 : index
    %c0_0 = arith.constant 0 : index
    %c0_1 = arith.constant 0 : index
    %0 = vector.load %arg1[%c0, %c0_0, %c0_1] : memref<1x64x256xf32, #tpu.memory_space<vmem>>, vector<1x64x256xf32>
    %1 = vector.shape_cast %0 : vector<1x64x256xf32> to vector<64x256xf32>
    %c0_2 = arith.constant 0 : index
    %c0_3 = arith.constant 0 : index
    %2 = vector.load %arg10[%c0_2, %c0_3] : memref<64x64xf32, #tpu.memory_space<vmem>>, vector<64x64xf32>
    %cst = arith.constant dense<0.000000e+00> : vector<64xf32>
    %3 = vector.multi_reduction <add>, %1, %cst [1] : vector<64x256xf32> to vector<64xf32>
    %4 = vector.shape_cast %3 : vector<64xf32> to vector<64x1xf32>
    %5 = arith.mulf %1, %1 : vector<64x256xf32>
    %cst_4 = arith.constant dense<0.000000e+00> : vector<64xf32>
    %6 = vector.multi_reduction <add>, %5, %cst_4 [1] : vector<64x256xf32> to vector<64xf32>
    %7 = vector.shape_cast %6 : vector<64xf32> to vector<64x1xf32>
    %cst_5 = arith.constant dense<0.000000e+00> : vector<64x1xf32>
    %8 = tpu.matmul %2, %4, %cst_5 {dimension_numbers = #tpu.dot_dimension_numbers<[1], [0], [0], [1], [0, 0, 1, 1], [], []>} : vector<64x64xf32>, vector<64x1xf32>, vector<64x1xf32> -> vector<64x1xf32>
    %cst_6 = arith.constant dense<0.000000e+00> : vector<64x1xf32>
    %9 = tpu.matmul %2, %7, %cst_6 {dimension_numbers = #tpu.dot_dimension_numbers<[1], [0], [0], [1], [0, 0, 1, 1], [], []>} : vector<64x64xf32>, vector<64x1xf32>, vector<64x1xf32> -> vector<64x1xf32>
    %10 = arith.mulf %8, %8 : vector<64x1xf32>
    %11 = arith.subf %9, %10 : vector<64x1xf32>
    %12 = vector.broadcast %8 : vector<64x1xf32> to vector<64x256xf32>
    %13 = arith.subf %1, %12 : vector<64x256xf32>
    %cst_7 = arith.constant 9.99999974E-6 : f32
    %14 = vector.broadcast %cst_7 : f32 to vector<64x1xf32>
    %15 = arith.addf %11, %14 : vector<64x1xf32>
    %16 = math.rsqrt %15 : vector<64x1xf32>
    %17 = vector.broadcast %16 : vector<64x1xf32> to vector<64x256xf32>
    %18 = arith.mulf %13, %17 : vector<64x256xf32>
    %c0_8 = arith.constant 0 : index
    %c0_9 = arith.constant 0 : index
    %19 = vector.load %arg4[%c0_8, %c0_9] : memref<64x1xf32, #tpu.memory_space<vmem>>, vector<64x1xf32>
    %20 = vector.broadcast %19 : vector<64x1xf32> to vector<64x256xf32>
    %21 = arith.mulf %18, %20 : vector<64x256xf32>
    %c0_10 = arith.constant 0 : index
    %c0_11 = arith.constant 0 : index
    %22 = vector.load %arg5[%c0_10, %c0_11] : memref<64x1xf32, #tpu.memory_space<vmem>>, vector<64x1xf32>
    %23 = vector.broadcast %22 : vector<64x1xf32> to vector<64x256xf32>
    %24 = arith.addf %21, %23 : vector<64x256xf32>
    %25 = arith.negf %24 : vector<64x256xf32>
    %26 = math.exp %25 : vector<64x256xf32>
    %cst_12 = arith.constant 1.000000e+00 : f32
    %27 = vector.broadcast %cst_12 : f32 to vector<64x256xf32>
    %28 = arith.addf %27, %26 : vector<64x256xf32>
    %29 = arith.divf %27, %28 : vector<64x256xf32>
    %30 = arith.mulf %24, %29 : vector<64x256xf32>
    %cst_13 = arith.constant 0.000000e+00 : f32
    %31 = vector.broadcast %cst_13 : f32 to vector<64x256xf32>
    %c17_i32 = arith.constant 17 : i32
    %32 = tpu.dynamic_rotate %30 by %c17_i32 dim 1 : vector<64x256xf32>, i32 -> vector<64x256xf32>
    %c0_14 = arith.constant 0 : index
    %c0_15 = arith.constant 0 : index
    %c0_16 = arith.constant 0 : index
    %33 = vector.load %arg11[%c0_14, %c0_15, %c0_16] : memref<9x1x256xf32, #tpu.memory_space<vmem>>, vector<1x1x256xf32>
    %34 = vector.shape_cast %33 : vector<1x1x256xf32> to vector<1x256xf32>
    %35 = vector.broadcast %34 : vector<1x256xf32> to vector<64x256xf32>
    %36 = arith.mulf %32, %35 : vector<64x256xf32>
    %c0_17 = arith.constant 0 : index
    %c0_18 = arith.constant 0 : index
    %c0_19 = arith.constant 0 : index
    %37 = vector.load %arg2[%c0_17, %c0_18, %c0_19] : memref<9x64x64xf32, #tpu.memory_space<vmem>>, vector<1x64x64xf32>
    %38 = vector.shape_cast %37 : vector<1x64x64xf32> to vector<64x64xf32>
    %cst_20 = arith.constant dense<0.000000e+00> : vector<64x256xf32>
    %39 = tpu.matmul %38, %36, %cst_20 {dimension_numbers = #tpu.dot_dimension_numbers<[1], [0], [0], [1], [0, 0, 1, 1], [], []>} : vector<64x64xf32>, vector<64x256xf32>, vector<64x256xf32> -> vector<64x256xf32>
    %40 = arith.addf %31, %39 : vector<64x256xf32>
    %c16_i32 = arith.constant 16 : i32
    %41 = tpu.dynamic_rotate %30 by %c16_i32 dim 1 : vector<64x256xf32>, i32 -> vector<64x256xf32>
    %c1 = arith.constant 1 : index
    %c0_21 = arith.constant 0 : index
    %c0_22 = arith.constant 0 : index
    %42 = vector.load %arg11[%c1, %c0_21, %c0_22] : memref<9x1x256xf32, #tpu.memory_space<vmem>>, vector<1x1x256xf32>
    %43 = vector.shape_cast %42 : vector<1x1x256xf32> to vector<1x256xf32>
    %44 = vector.broadcast %43 : vector<1x256xf32> to vector<64x256xf32>
    %45 = arith.mulf %41, %44 : vector<64x256xf32>
    %c1_23 = arith.constant 1 : index
    %c0_24 = arith.constant 0 : index
    %c0_25 = arith.constant 0 : index
    %46 = vector.load %arg2[%c1_23, %c0_24, %c0_25] : memref<9x64x64xf32, #tpu.memory_space<vmem>>, vector<1x64x64xf32>
    %47 = vector.shape_cast %46 : vector<1x64x64xf32> to vector<64x64xf32>
    %cst_26 = arith.constant dense<0.000000e+00> : vector<64x256xf32>
    %48 = tpu.matmul %47, %45, %cst_26 {dimension_numbers = #tpu.dot_dimension_numbers<[1], [0], [0], [1], [0, 0, 1, 1], [], []>} : vector<64x64xf32>, vector<64x256xf32>, vector<64x256xf32> -> vector<64x256xf32>
    %49 = arith.addf %40, %48 : vector<64x256xf32>
    %c15_i32 = arith.constant 15 : i32
    %50 = tpu.dynamic_rotate %30 by %c15_i32 dim 1 : vector<64x256xf32>, i32 -> vector<64x256xf32>
    %c2 = arith.constant 2 : index
    %c0_27 = arith.constant 0 : index
    %c0_28 = arith.constant 0 : index
    %51 = vector.load %arg11[%c2, %c0_27, %c0_28] : memref<9x1x256xf32, #tpu.memory_space<vmem>>, vector<1x1x256xf32>
    %52 = vector.shape_cast %51 : vector<1x1x256xf32> to vector<1x256xf32>
    %53 = vector.broadcast %52 : vector<1x256xf32> to vector<64x256xf32>
    %54 = arith.mulf %50, %53 : vector<64x256xf32>
    %c2_29 = arith.constant 2 : index
    %c0_30 = arith.constant 0 : index
    %c0_31 = arith.constant 0 : index
    %55 = vector.load %arg2[%c2_29, %c0_30, %c0_31] : memref<9x64x64xf32, #tpu.memory_space<vmem>>, vector<1x64x64xf32>
    %56 = vector.shape_cast %55 : vector<1x64x64xf32> to vector<64x64xf32>
    %cst_32 = arith.constant dense<0.000000e+00> : vector<64x256xf32>
    %57 = tpu.matmul %56, %54, %cst_32 {dimension_numbers = #tpu.dot_dimension_numbers<[1], [0], [0], [1], [0, 0, 1, 1], [], []>} : vector<64x64xf32>, vector<64x256xf32>, vector<64x256xf32> -> vector<64x256xf32>
    %58 = arith.addf %49, %57 : vector<64x256xf32>
    %c1_i32 = arith.constant 1 : i32
    %59 = tpu.dynamic_rotate %30 by %c1_i32 dim 1 : vector<64x256xf32>, i32 -> vector<64x256xf32>
    %c3 = arith.constant 3 : index
    %c0_33 = arith.constant 0 : index
    %c0_34 = arith.constant 0 : index
    %60 = vector.load %arg11[%c3, %c0_33, %c0_34] : memref<9x1x256xf32, #tpu.memory_space<vmem>>, vector<1x1x256xf32>
    %61 = vector.shape_cast %60 : vector<1x1x256xf32> to vector<1x256xf32>
    %62 = vector.broadcast %61 : vector<1x256xf32> to vector<64x256xf32>
    %63 = arith.mulf %59, %62 : vector<64x256xf32>
    %c3_35 = arith.constant 3 : index
    %c0_36 = arith.constant 0 : index
    %c0_37 = arith.constant 0 : index
    %64 = vector.load %arg2[%c3_35, %c0_36, %c0_37] : memref<9x64x64xf32, #tpu.memory_space<vmem>>, vector<1x64x64xf32>
    %65 = vector.shape_cast %64 : vector<1x64x64xf32> to vector<64x64xf32>
    %cst_38 = arith.constant dense<0.000000e+00> : vector<64x256xf32>
    %66 = tpu.matmul %65, %63, %cst_38 {dimension_numbers = #tpu.dot_dimension_numbers<[1], [0], [0], [1], [0, 0, 1, 1], [], []>} : vector<64x64xf32>, vector<64x256xf32>, vector<64x256xf32> -> vector<64x256xf32>
    %67 = arith.addf %58, %66 : vector<64x256xf32>
    %c4 = arith.constant 4 : index
    %c0_39 = arith.constant 0 : index
    %c0_40 = arith.constant 0 : index
    %68 = vector.load %arg2[%c4, %c0_39, %c0_40] : memref<9x64x64xf32, #tpu.memory_space<vmem>>, vector<1x64x64xf32>
    %69 = vector.shape_cast %68 : vector<1x64x64xf32> to vector<64x64xf32>
    %cst_41 = arith.constant dense<0.000000e+00> : vector<64x256xf32>
    %70 = tpu.matmul %69, %30, %cst_41 {dimension_numbers = #tpu.dot_dimension_numbers<[1], [0], [0], [1], [0, 0, 1, 1], [], []>} : vector<64x64xf32>, vector<64x256xf32>, vector<64x256xf32> -> vector<64x256xf32>
    %71 = arith.addf %67, %70 : vector<64x256xf32>
    %c255_i32 = arith.constant 255 : i32
    %72 = tpu.dynamic_rotate %30 by %c255_i32 dim 1 : vector<64x256xf32>, i32 -> vector<64x256xf32>
    %c5 = arith.constant 5 : index
    %c0_42 = arith.constant 0 : index
    %c0_43 = arith.constant 0 : index
    %73 = vector.load %arg11[%c5, %c0_42, %c0_43] : memref<9x1x256xf32, #tpu.memory_space<vmem>>, vector<1x1x256xf32>
    %74 = vector.shape_cast %73 : vector<1x1x256xf32> to vector<1x256xf32>
    %75 = vector.broadcast %74 : vector<1x256xf32> to vector<64x256xf32>
    %76 = arith.mulf %72, %75 : vector<64x256xf32>
    %c5_44 = arith.constant 5 : index
    %c0_45 = arith.constant 0 : index
    %c0_46 = arith.constant 0 : index
    %77 = vector.load %arg2[%c5_44, %c0_45, %c0_46] : memref<9x64x64xf32, #tpu.memory_space<vmem>>, vector<1x64x64xf32>
    %78 = vector.shape_cast %77 : vector<1x64x64xf32> to vector<64x64xf32>
    %cst_47 = arith.constant dense<0.000000e+00> : vector<64x256xf32>
    %79 = tpu.matmul %78, %76, %cst_47 {dimension_numbers = #tpu.dot_dimension_numbers<[1], [0], [0], [1], [0, 0, 1, 1], [], []>} : vector<64x64xf32>, vector<64x256xf32>, vector<64x256xf32> -> vector<64x256xf32>
    %80 = arith.addf %71, %79 : vector<64x256xf32>
    %c241_i32 = arith.constant 241 : i32
    %81 = tpu.dynamic_rotate %30 by %c241_i32 dim 1 : vector<64x256xf32>, i32 -> vector<64x256xf32>
    %c6 = arith.constant 6 : index
    %c0_48 = arith.constant 0 : index
    %c0_49 = arith.constant 0 : index
    %82 = vector.load %arg11[%c6, %c0_48, %c0_49] : memref<9x1x256xf32, #tpu.memory_space<vmem>>, vector<1x1x256xf32>
    %83 = vector.shape_cast %82 : vector<1x1x256xf32> to vector<1x256xf32>
    %84 = vector.broadcast %83 : vector<1x256xf32> to vector<64x256xf32>
    %85 = arith.mulf %81, %84 : vector<64x256xf32>
    %c6_50 = arith.constant 6 : index
    %c0_51 = arith.constant 0 : index
    %c0_52 = arith.constant 0 : index
    %86 = vector.load %arg2[%c6_50, %c0_51, %c0_52] : memref<9x64x64xf32, #tpu.memory_space<vmem>>, vector<1x64x64xf32>
    %87 = vector.shape_cast %86 : vector<1x64x64xf32> to vector<64x64xf32>
    %cst_53 = arith.constant dense<0.000000e+00> : vector<64x256xf32>
    %88 = tpu.matmul %87, %85, %cst_53 {dimension_numbers = #tpu.dot_dimension_numbers<[1], [0], [0], [1], [0, 0, 1, 1], [], []>} : vector<64x64xf32>, vector<64x256xf32>, vector<64x256xf32> -> vector<64x256xf32>
    %89 = arith.addf %80, %88 : vector<64x256xf32>
    %c240_i32 = arith.constant 240 : i32
    %90 = tpu.dynamic_rotate %30 by %c240_i32 dim 1 : vector<64x256xf32>, i32 -> vector<64x256xf32>
    %c7 = arith.constant 7 : index
    %c0_54 = arith.constant 0 : index
    %c0_55 = arith.constant 0 : index
    %91 = vector.load %arg11[%c7, %c0_54, %c0_55] : memref<9x1x256xf32, #tpu.memory_space<vmem>>, vector<1x1x256xf32>
    %92 = vector.shape_cast %91 : vector<1x1x256xf32> to vector<1x256xf32>
    %93 = vector.broadcast %92 : vector<1x256xf32> to vector<64x256xf32>
    %94 = arith.mulf %90, %93 : vector<64x256xf32>
    %c7_56 = arith.constant 7 : index
    %c0_57 = arith.constant 0 : index
    %c0_58 = arith.constant 0 : index
    %95 = vector.load %arg2[%c7_56, %c0_57, %c0_58] : memref<9x64x64xf32, #tpu.memory_space<vmem>>, vector<1x64x64xf32>
    %96 = vector.shape_cast %95 : vector<1x64x64xf32> to vector<64x64xf32>
    %cst_59 = arith.constant dense<0.000000e+00> : vector<64x256xf32>
    %97 = tpu.matmul %96, %94, %cst_59 {dimension_numbers = #tpu.dot_dimension_numbers<[1], [0], [0], [1], [0, 0, 1, 1], [], []>} : vector<64x64xf32>, vector<64x256xf32>, vector<64x256xf32> -> vector<64x256xf32>
    %98 = arith.addf %89, %97 : vector<64x256xf32>
    %c239_i32 = arith.constant 239 : i32
    %99 = tpu.dynamic_rotate %30 by %c239_i32 dim 1 : vector<64x256xf32>, i32 -> vector<64x256xf32>
    %c8 = arith.constant 8 : index
    %c0_60 = arith.constant 0 : index
    %c0_61 = arith.constant 0 : index
    %100 = vector.load %arg11[%c8, %c0_60, %c0_61] : memref<9x1x256xf32, #tpu.memory_space<vmem>>, vector<1x1x256xf32>
    %101 = vector.shape_cast %100 : vector<1x1x256xf32> to vector<1x256xf32>
    %102 = vector.broadcast %101 : vector<1x256xf32> to vector<64x256xf32>
    %103 = arith.mulf %99, %102 : vector<64x256xf32>
    %c8_62 = arith.constant 8 : index
    %c0_63 = arith.constant 0 : index
    %c0_64 = arith.constant 0 : index
    %104 = vector.load %arg2[%c8_62, %c0_63, %c0_64] : memref<9x64x64xf32, #tpu.memory_space<vmem>>, vector<1x64x64xf32>
    %105 = vector.shape_cast %104 : vector<1x64x64xf32> to vector<64x64xf32>
    %cst_65 = arith.constant dense<0.000000e+00> : vector<64x256xf32>
    %106 = tpu.matmul %105, %103, %cst_65 {dimension_numbers = #tpu.dot_dimension_numbers<[1], [0], [0], [1], [0, 0, 1, 1], [], []>} : vector<64x64xf32>, vector<64x256xf32>, vector<64x256xf32> -> vector<64x256xf32>
    %107 = arith.addf %98, %106 : vector<64x256xf32>
    %c0_66 = arith.constant 0 : index
    %c0_67 = arith.constant 0 : index
    %108 = vector.load %arg3[%c0_66, %c0_67] : memref<64x1xf32, #tpu.memory_space<vmem>>, vector<64x1xf32>
    %109 = vector.broadcast %108 : vector<64x1xf32> to vector<64x256xf32>
    %110 = arith.addf %107, %109 : vector<64x256xf32>
    %cst_68 = arith.constant dense<0.000000e+00> : vector<64xf32>
    %111 = vector.multi_reduction <add>, %110, %cst_68 [1] : vector<64x256xf32> to vector<64xf32>
    %112 = vector.shape_cast %111 : vector<64xf32> to vector<64x1xf32>
    %113 = arith.mulf %110, %110 : vector<64x256xf32>
    %cst_69 = arith.constant dense<0.000000e+00> : vector<64xf32>
    %114 = vector.multi_reduction <add>, %113, %cst_69 [1] : vector<64x256xf32> to vector<64xf32>
    %115 = vector.shape_cast %114 : vector<64xf32> to vector<64x1xf32>
    %cst_70 = arith.constant dense<0.000000e+00> : vector<64x1xf32>
    %116 = tpu.matmul %2, %112, %cst_70 {dimension_numbers = #tpu.dot_dimension_numbers<[1], [0], [0], [1], [0, 0, 1, 1], [], []>} : vector<64x64xf32>, vector<64x1xf32>, vector<64x1xf32> -> vector<64x1xf32>
    %cst_71 = arith.constant dense<0.000000e+00> : vector<64x1xf32>
    %117 = tpu.matmul %2, %115, %cst_71 {dimension_numbers = #tpu.dot_dimension_numbers<[1], [0], [0], [1], [0, 0, 1, 1], [], []>} : vector<64x64xf32>, vector<64x1xf32>, vector<64x1xf32> -> vector<64x1xf32>
    %118 = arith.mulf %116, %116 : vector<64x1xf32>
    %119 = arith.subf %117, %118 : vector<64x1xf32>
    %120 = vector.broadcast %116 : vector<64x1xf32> to vector<64x256xf32>
    %121 = arith.subf %110, %120 : vector<64x256xf32>
    %cst_72 = arith.constant 9.99999974E-6 : f32
    %122 = vector.broadcast %cst_72 : f32 to vector<64x1xf32>
    %123 = arith.addf %119, %122 : vector<64x1xf32>
    %124 = math.rsqrt %123 : vector<64x1xf32>
    %125 = vector.broadcast %124 : vector<64x1xf32> to vector<64x256xf32>
    %126 = arith.mulf %121, %125 : vector<64x256xf32>
    %c0_73 = arith.constant 0 : index
    %c0_74 = arith.constant 0 : index
    %127 = vector.load %arg8[%c0_73, %c0_74] : memref<64x1xf32, #tpu.memory_space<vmem>>, vector<64x1xf32>
    %128 = vector.broadcast %127 : vector<64x1xf32> to vector<64x256xf32>
    %129 = arith.mulf %126, %128 : vector<64x256xf32>
    %c0_75 = arith.constant 0 : index
    %c0_76 = arith.constant 0 : index
    %130 = vector.load %arg9[%c0_75, %c0_76] : memref<64x1xf32, #tpu.memory_space<vmem>>, vector<64x1xf32>
    %131 = vector.broadcast %130 : vector<64x1xf32> to vector<64x256xf32>
    %132 = arith.addf %129, %131 : vector<64x256xf32>
    %133 = arith.negf %132 : vector<64x256xf32>
    %134 = math.exp %133 : vector<64x256xf32>
    %cst_77 = arith.constant 1.000000e+00 : f32
    %135 = vector.broadcast %cst_77 : f32 to vector<64x256xf32>
    %136 = arith.addf %135, %134 : vector<64x256xf32>
    %137 = arith.divf %135, %136 : vector<64x256xf32>
    %138 = arith.mulf %132, %137 : vector<64x256xf32>
    %cst_78 = arith.constant 0.000000e+00 : f32
    %139 = vector.broadcast %cst_78 : f32 to vector<64x256xf32>
    %c17_i32_79 = arith.constant 17 : i32
    %140 = tpu.dynamic_rotate %138 by %c17_i32_79 dim 1 : vector<64x256xf32>, i32 -> vector<64x256xf32>
    %c0_80 = arith.constant 0 : index
    %c0_81 = arith.constant 0 : index
    %c0_82 = arith.constant 0 : index
    %141 = vector.load %arg11[%c0_80, %c0_81, %c0_82] : memref<9x1x256xf32, #tpu.memory_space<vmem>>, vector<1x1x256xf32>
    %142 = vector.shape_cast %141 : vector<1x1x256xf32> to vector<1x256xf32>
    %143 = vector.broadcast %142 : vector<1x256xf32> to vector<64x256xf32>
    %144 = arith.mulf %140, %143 : vector<64x256xf32>
    %c0_83 = arith.constant 0 : index
    %c0_84 = arith.constant 0 : index
    %c0_85 = arith.constant 0 : index
    %145 = vector.load %arg6[%c0_83, %c0_84, %c0_85] : memref<9x64x64xf32, #tpu.memory_space<vmem>>, vector<1x64x64xf32>
    %146 = vector.shape_cast %145 : vector<1x64x64xf32> to vector<64x64xf32>
    %cst_86 = arith.constant dense<0.000000e+00> : vector<64x256xf32>
    %147 = tpu.matmul %146, %144, %cst_86 {dimension_numbers = #tpu.dot_dimension_numbers<[1], [0], [0], [1], [0, 0, 1, 1], [], []>} : vector<64x64xf32>, vector<64x256xf32>, vector<64x256xf32> -> vector<64x256xf32>
    %148 = arith.addf %139, %147 : vector<64x256xf32>
    %c16_i32_87 = arith.constant 16 : i32
    %149 = tpu.dynamic_rotate %138 by %c16_i32_87 dim 1 : vector<64x256xf32>, i32 -> vector<64x256xf32>
    %c1_88 = arith.constant 1 : index
    %c0_89 = arith.constant 0 : index
    %c0_90 = arith.constant 0 : index
    %150 = vector.load %arg11[%c1_88, %c0_89, %c0_90] : memref<9x1x256xf32, #tpu.memory_space<vmem>>, vector<1x1x256xf32>
    %151 = vector.shape_cast %150 : vector<1x1x256xf32> to vector<1x256xf32>
    %152 = vector.broadcast %151 : vector<1x256xf32> to vector<64x256xf32>
    %153 = arith.mulf %149, %152 : vector<64x256xf32>
    %c1_91 = arith.constant 1 : index
    %c0_92 = arith.constant 0 : index
    %c0_93 = arith.constant 0 : index
    %154 = vector.load %arg6[%c1_91, %c0_92, %c0_93] : memref<9x64x64xf32, #tpu.memory_space<vmem>>, vector<1x64x64xf32>
    %155 = vector.shape_cast %154 : vector<1x64x64xf32> to vector<64x64xf32>
    %cst_94 = arith.constant dense<0.000000e+00> : vector<64x256xf32>
    %156 = tpu.matmul %155, %153, %cst_94 {dimension_numbers = #tpu.dot_dimension_numbers<[1], [0], [0], [1], [0, 0, 1, 1], [], []>} : vector<64x64xf32>, vector<64x256xf32>, vector<64x256xf32> -> vector<64x256xf32>
    %157 = arith.addf %148, %156 : vector<64x256xf32>
    %c15_i32_95 = arith.constant 15 : i32
    %158 = tpu.dynamic_rotate %138 by %c15_i32_95 dim 1 : vector<64x256xf32>, i32 -> vector<64x256xf32>
    %c2_96 = arith.constant 2 : index
    %c0_97 = arith.constant 0 : index
    %c0_98 = arith.constant 0 : index
    %159 = vector.load %arg11[%c2_96, %c0_97, %c0_98] : memref<9x1x256xf32, #tpu.memory_space<vmem>>, vector<1x1x256xf32>
    %160 = vector.shape_cast %159 : vector<1x1x256xf32> to vector<1x256xf32>
    %161 = vector.broadcast %160 : vector<1x256xf32> to vector<64x256xf32>
    %162 = arith.mulf %158, %161 : vector<64x256xf32>
    %c2_99 = arith.constant 2 : index
    %c0_100 = arith.constant 0 : index
    %c0_101 = arith.constant 0 : index
    %163 = vector.load %arg6[%c2_99, %c0_100, %c0_101] : memref<9x64x64xf32, #tpu.memory_space<vmem>>, vector<1x64x64xf32>
    %164 = vector.shape_cast %163 : vector<1x64x64xf32> to vector<64x64xf32>
    %cst_102 = arith.constant dense<0.000000e+00> : vector<64x256xf32>
    %165 = tpu.matmul %164, %162, %cst_102 {dimension_numbers = #tpu.dot_dimension_numbers<[1], [0], [0], [1], [0, 0, 1, 1], [], []>} : vector<64x64xf32>, vector<64x256xf32>, vector<64x256xf32> -> vector<64x256xf32>
    %166 = arith.addf %157, %165 : vector<64x256xf32>
    %c1_i32_103 = arith.constant 1 : i32
    %167 = tpu.dynamic_rotate %138 by %c1_i32_103 dim 1 : vector<64x256xf32>, i32 -> vector<64x256xf32>
    %c3_104 = arith.constant 3 : index
    %c0_105 = arith.constant 0 : index
    %c0_106 = arith.constant 0 : index
    %168 = vector.load %arg11[%c3_104, %c0_105, %c0_106] : memref<9x1x256xf32, #tpu.memory_space<vmem>>, vector<1x1x256xf32>
    %169 = vector.shape_cast %168 : vector<1x1x256xf32> to vector<1x256xf32>
    %170 = vector.broadcast %169 : vector<1x256xf32> to vector<64x256xf32>
    %171 = arith.mulf %167, %170 : vector<64x256xf32>
    %c3_107 = arith.constant 3 : index
    %c0_108 = arith.constant 0 : index
    %c0_109 = arith.constant 0 : index
    %172 = vector.load %arg6[%c3_107, %c0_108, %c0_109] : memref<9x64x64xf32, #tpu.memory_space<vmem>>, vector<1x64x64xf32>
    %173 = vector.shape_cast %172 : vector<1x64x64xf32> to vector<64x64xf32>
    %cst_110 = arith.constant dense<0.000000e+00> : vector<64x256xf32>
    %174 = tpu.matmul %173, %171, %cst_110 {dimension_numbers = #tpu.dot_dimension_numbers<[1], [0], [0], [1], [0, 0, 1, 1], [], []>} : vector<64x64xf32>, vector<64x256xf32>, vector<64x256xf32> -> vector<64x256xf32>
    %175 = arith.addf %166, %174 : vector<64x256xf32>
    %c4_111 = arith.constant 4 : index
    %c0_112 = arith.constant 0 : index
    %c0_113 = arith.constant 0 : index
    %176 = vector.load %arg6[%c4_111, %c0_112, %c0_113] : memref<9x64x64xf32, #tpu.memory_space<vmem>>, vector<1x64x64xf32>
    %177 = vector.shape_cast %176 : vector<1x64x64xf32> to vector<64x64xf32>
    %cst_114 = arith.constant dense<0.000000e+00> : vector<64x256xf32>
    %178 = tpu.matmul %177, %138, %cst_114 {dimension_numbers = #tpu.dot_dimension_numbers<[1], [0], [0], [1], [0, 0, 1, 1], [], []>} : vector<64x64xf32>, vector<64x256xf32>, vector<64x256xf32> -> vector<64x256xf32>
    %179 = arith.addf %175, %178 : vector<64x256xf32>
    %c255_i32_115 = arith.constant 255 : i32
    %180 = tpu.dynamic_rotate %138 by %c255_i32_115 dim 1 : vector<64x256xf32>, i32 -> vector<64x256xf32>
    %c5_116 = arith.constant 5 : index
    %c0_117 = arith.constant 0 : index
    %c0_118 = arith.constant 0 : index
    %181 = vector.load %arg11[%c5_116, %c0_117, %c0_118] : memref<9x1x256xf32, #tpu.memory_space<vmem>>, vector<1x1x256xf32>
    %182 = vector.shape_cast %181 : vector<1x1x256xf32> to vector<1x256xf32>
    %183 = vector.broadcast %182 : vector<1x256xf32> to vector<64x256xf32>
    %184 = arith.mulf %180, %183 : vector<64x256xf32>
    %c5_119 = arith.constant 5 : index
    %c0_120 = arith.constant 0 : index
    %c0_121 = arith.constant 0 : index
    %185 = vector.load %arg6[%c5_119, %c0_120, %c0_121] : memref<9x64x64xf32, #tpu.memory_space<vmem>>, vector<1x64x64xf32>
    %186 = vector.shape_cast %185 : vector<1x64x64xf32> to vector<64x64xf32>
    %cst_122 = arith.constant dense<0.000000e+00> : vector<64x256xf32>
    %187 = tpu.matmul %186, %184, %cst_122 {dimension_numbers = #tpu.dot_dimension_numbers<[1], [0], [0], [1], [0, 0, 1, 1], [], []>} : vector<64x64xf32>, vector<64x256xf32>, vector<64x256xf32> -> vector<64x256xf32>
    %188 = arith.addf %179, %187 : vector<64x256xf32>
    %c241_i32_123 = arith.constant 241 : i32
    %189 = tpu.dynamic_rotate %138 by %c241_i32_123 dim 1 : vector<64x256xf32>, i32 -> vector<64x256xf32>
    %c6_124 = arith.constant 6 : index
    %c0_125 = arith.constant 0 : index
    %c0_126 = arith.constant 0 : index
    %190 = vector.load %arg11[%c6_124, %c0_125, %c0_126] : memref<9x1x256xf32, #tpu.memory_space<vmem>>, vector<1x1x256xf32>
    %191 = vector.shape_cast %190 : vector<1x1x256xf32> to vector<1x256xf32>
    %192 = vector.broadcast %191 : vector<1x256xf32> to vector<64x256xf32>
    %193 = arith.mulf %189, %192 : vector<64x256xf32>
    %c6_127 = arith.constant 6 : index
    %c0_128 = arith.constant 0 : index
    %c0_129 = arith.constant 0 : index
    %194 = vector.load %arg6[%c6_127, %c0_128, %c0_129] : memref<9x64x64xf32, #tpu.memory_space<vmem>>, vector<1x64x64xf32>
    %195 = vector.shape_cast %194 : vector<1x64x64xf32> to vector<64x64xf32>
    %cst_130 = arith.constant dense<0.000000e+00> : vector<64x256xf32>
    %196 = tpu.matmul %195, %193, %cst_130 {dimension_numbers = #tpu.dot_dimension_numbers<[1], [0], [0], [1], [0, 0, 1, 1], [], []>} : vector<64x64xf32>, vector<64x256xf32>, vector<64x256xf32> -> vector<64x256xf32>
    %197 = arith.addf %188, %196 : vector<64x256xf32>
    %c240_i32_131 = arith.constant 240 : i32
    %198 = tpu.dynamic_rotate %138 by %c240_i32_131 dim 1 : vector<64x256xf32>, i32 -> vector<64x256xf32>
    %c7_132 = arith.constant 7 : index
    %c0_133 = arith.constant 0 : index
    %c0_134 = arith.constant 0 : index
    %199 = vector.load %arg11[%c7_132, %c0_133, %c0_134] : memref<9x1x256xf32, #tpu.memory_space<vmem>>, vector<1x1x256xf32>
    %200 = vector.shape_cast %199 : vector<1x1x256xf32> to vector<1x256xf32>
    %201 = vector.broadcast %200 : vector<1x256xf32> to vector<64x256xf32>
    %202 = arith.mulf %198, %201 : vector<64x256xf32>
    %c7_135 = arith.constant 7 : index
    %c0_136 = arith.constant 0 : index
    %c0_137 = arith.constant 0 : index
    %203 = vector.load %arg6[%c7_135, %c0_136, %c0_137] : memref<9x64x64xf32, #tpu.memory_space<vmem>>, vector<1x64x64xf32>
    %204 = vector.shape_cast %203 : vector<1x64x64xf32> to vector<64x64xf32>
    %cst_138 = arith.constant dense<0.000000e+00> : vector<64x256xf32>
    %205 = tpu.matmul %204, %202, %cst_138 {dimension_numbers = #tpu.dot_dimension_numbers<[1], [0], [0], [1], [0, 0, 1, 1], [], []>} : vector<64x64xf32>, vector<64x256xf32>, vector<64x256xf32> -> vector<64x256xf32>
    %206 = arith.addf %197, %205 : vector<64x256xf32>
    %c239_i32_139 = arith.constant 239 : i32
    %207 = tpu.dynamic_rotate %138 by %c239_i32_139 dim 1 : vector<64x256xf32>, i32 -> vector<64x256xf32>
    %c8_140 = arith.constant 8 : index
    %c0_141 = arith.constant 0 : index
    %c0_142 = arith.constant 0 : index
    %208 = vector.load %arg11[%c8_140, %c0_141, %c0_142] : memref<9x1x256xf32, #tpu.memory_space<vmem>>, vector<1x1x256xf32>
    %209 = vector.shape_cast %208 : vector<1x1x256xf32> to vector<1x256xf32>
    %210 = vector.broadcast %209 : vector<1x256xf32> to vector<64x256xf32>
    %211 = arith.mulf %207, %210 : vector<64x256xf32>
    %c8_143 = arith.constant 8 : index
    %c0_144 = arith.constant 0 : index
    %c0_145 = arith.constant 0 : index
    %212 = vector.load %arg6[%c8_143, %c0_144, %c0_145] : memref<9x64x64xf32, #tpu.memory_space<vmem>>, vector<1x64x64xf32>
    %213 = vector.shape_cast %212 : vector<1x64x64xf32> to vector<64x64xf32>
    %cst_146 = arith.constant dense<0.000000e+00> : vector<64x256xf32>
    %214 = tpu.matmul %213, %211, %cst_146 {dimension_numbers = #tpu.dot_dimension_numbers<[1], [0], [0], [1], [0, 0, 1, 1], [], []>} : vector<64x64xf32>, vector<64x256xf32>, vector<64x256xf32> -> vector<64x256xf32>
    %215 = arith.addf %206, %214 : vector<64x256xf32>
    %c0_147 = arith.constant 0 : index
    %c0_148 = arith.constant 0 : index
    %216 = vector.load %arg7[%c0_147, %c0_148] : memref<64x1xf32, #tpu.memory_space<vmem>>, vector<64x1xf32>
    %217 = vector.broadcast %216 : vector<64x1xf32> to vector<64x256xf32>
    %218 = arith.addf %215, %217 : vector<64x256xf32>
    %219 = arith.addf %1, %218 : vector<64x256xf32>
    %c0_149 = arith.constant 0 : index
    %c0_150 = arith.constant 0 : index
    %c0_151 = arith.constant 0 : index
    %220 = vector.load %arg12[%c0_149, %c0_150, %c0_151] : memref<1x64x256xf32, #tpu.memory_space<vmem>>, vector<1x64x256xf32>
    %221 = vector.shape_cast %220 : vector<1x64x256xf32> to vector<64x256xf32>
    %222 = vector.shape_cast %219 : vector<64x256xf32> to vector<1x64x256xf32>
    tpu.vector_store %arg12[%c0_149, %c0_150, %c0_151], %222 {strides = array<i32>} : memref<1x64x256xf32, #tpu.memory_space<vmem>>, vector<1x64x256xf32>,
    return
  }
  func.func @transform_0(%arg0: i32) -> (i32, i32, i32) {
    %c0_i32 = arith.constant 0 : i32
    %c0_i32_0 = arith.constant 0 : i32
    %c0_i32_1 = arith.constant 0 : i32
    return %arg0, %c0_i32, %c0_i32_0 : i32, i32, i32
  }
  func.func @transform_1(%arg0: i32) -> (i32, i32, i32) {
    %c0_i32 = arith.constant 0 : i32
    %c0_i32_0 = arith.constant 0 : i32
    %c0_i32_1 = arith.constant 0 : i32
    %c0_i32_2 = arith.constant 0 : i32
    return %c0_i32, %c0_i32_0, %c0_i32_1 : i32, i32, i32
  }
  func.func @transform_2(%arg0: i32) -> (i32, i32) {
    %c0_i32 = arith.constant 0 : i32
    %c0_i32_0 = arith.constant 0 : i32
    %c0_i32_1 = arith.constant 0 : i32
    return %c0_i32, %c0_i32_0 : i32, i32
  }
  func.func @transform_3(%arg0: i32) -> (i32, i32) {
    %c0_i32 = arith.constant 0 : i32
    %c0_i32_0 = arith.constant 0 : i32
    %c0_i32_1 = arith.constant 0 : i32
    return %c0_i32, %c0_i32_0 : i32, i32
  }
  func.func @transform_4(%arg0: i32) -> (i32, i32) {
    %c0_i32 = arith.constant 0 : i32
    %c0_i32_0 = arith.constant 0 : i32
    %c0_i32_1 = arith.constant 0 : i32
    return %c0_i32, %c0_i32_0 : i32, i32
  }
  func.func @transform_5(%arg0: i32) -> (i32, i32, i32) {
    %c0_i32 = arith.constant 0 : i32
    %c0_i32_0 = arith.constant 0 : i32
    %c0_i32_1 = arith.constant 0 : i32
    %c0_i32_2 = arith.constant 0 : i32
    return %c0_i32, %c0_i32_0, %c0_i32_1 : i32, i32, i32
  }
  func.func @transform_6(%arg0: i32) -> (i32, i32) {
    %c0_i32 = arith.constant 0 : i32
    %c0_i32_0 = arith.constant 0 : i32
    %c0_i32_1 = arith.constant 0 : i32
    return %c0_i32, %c0_i32_0 : i32, i32
  }
  func.func @transform_7(%arg0: i32) -> (i32, i32) {
    %c0_i32 = arith.constant 0 : i32
    %c0_i32_0 = arith.constant 0 : i32
    %c0_i32_1 = arith.constant 0 : i32
    return %c0_i32, %c0_i32_0 : i32, i32
  }
  func.func @transform_8(%arg0: i32) -> (i32, i32) {
    %c0_i32 = arith.constant 0 : i32
    %c0_i32_0 = arith.constant 0 : i32
    %c0_i32_1 = arith.constant 0 : i32
    return %c0_i32, %c0_i32_0 : i32, i32
  }
  func.func @transform_9(%arg0: i32) -> (i32, i32) {
    %c0_i32 = arith.constant 0 : i32
    %c0_i32_0 = arith.constant 0 : i32
    %c0_i32_1 = arith.constant 0 : i32
    return %c0_i32, %c0_i32_0 : i32, i32
  }
  func.func @transform_10(%arg0: i32) -> (i32, i32, i32) {
    %c0_i32 = arith.constant 0 : i32
    %c0_i32_0 = arith.constant 0 : i32
    %c0_i32_1 = arith.constant 0 : i32
    %c0_i32_2 = arith.constant 0 : i32
    return %c0_i32, %c0_i32_0, %c0_i32_1 : i32, i32, i32
  }
  func.func @transform_11(%arg0: i32) -> (i32, i32, i32) {
    %c0_i32 = arith.constant 0 : i32
    %c0_i32_0 = arith.constant 0 : i32
    %c0_i32_1 = arith.constant 0 : i32
    return %arg0, %c0_i32, %c0_i32_0 : i32, i32, i32
  }
}

</mosaic_0001>

<bundles_post_ra>
// kernel: residual_block.1
= control target key start
LH: loop header
LB: loop body
LE: loop exit
PB: predicated region body
PF: predicated region fallthrough
CT: control target
= control target key end

     0   :  { %16 = vsyncpa [#allocation3], 0  ;;  %s6450_s17 = smov 0   ;;  %s11021_s0 = inlined_call_operand.vmem [shape: f32[2,64,256], index: 0, kind: input, shape index: {}]   ;;  %s11022_s1 = inlined_call_operand.vmem [shape: f32[9,64,64], index: 1, kind: input, shape index: {}]   ;;  %s11023_s2 = inlined_call_operand.vmem [shape: f32[64,1], index: 2, kind: input, shape index: {}]   ;;  %s11024_s3 = inlined_call_operand.vmem [shape: f32[64,1], index: 3, kind: input, shape index: {}]   ;;  %s11025_s4 = inlined_call_operand.vmem [shape: f32[64,1], index: 4, kind: input, shape index: {}]   ;;  %s11026_s5 = inlined_call_operand.hbm [shape: f32[9,64,64], index: 5, kind: input, shape index: {}]   ;;  %s11027_s6 = inlined_call_operand.vmem [shape: f32[64,1], index: 6, kind: input, shape index: {}]   ;;  %s11028_s7 = inlined_call_operand.vmem [shape: f32[64,1], index: 7, kind: input, shape index: {}]   ;;  %s11029_s8 = inlined_call_operand.vmem [shape: f32[64,1], index: 8, kind: input, shape index: {}]   ;;  %s11030_s9 = inlined_call_operand.vmem [shape: f32[64,64], index: 9, kind: input, shape index: {}]   ;;  %s11031_s10 = inlined_call_operand.vmem [shape: f32[9,1,256], index: 10, kind: input, shape index: {}]   ;;  %s11032_s11 = inlined_call_operand.vmem [shape: f32[2,64,256], index: 11, kind: output, shape index: {}]  }
   0x1 LB: > { %s312_s20 = sshll.u32 %s11026_s5, 4  ;;  %s5681_s21 = sadd.s32 4294967295, %s6376_s17   ;;  %s6376_s17 = sphi %s6450_s17, %s22_s17   ;;  %s313_s20 = int_to_ptr.hbm [resolvable:$true] %s312_s20 }
   0x2   : > { %p5683_p0 = scmp.ge.s32.totalorder %s6376_s17, 1  ;;  %p289_p1 = scmp.lt.s32.totalorder %s6376_s17, 3 }
   0x3   : > { %p6127_p2 = scmp.eq.s32.totalorder %s5681_s21, 0  ;;  %s6378_s22 = smov [#allocation2]  }
   0x4   : > { %p290_p3 = pnand %p5683_p0, %p289_p1  ;;  %s314_s23 = sshll.u32 %s6378_s22, 4  ;;  %s315_s23 = int_to_ptr.vmem [resolvable:$true] %s314_s23 }
   0x5   : > { %s6379_s24 = smov 128   ;;  %s6380_s25 = smov 8  }
   0x6   : > { %p6123_p4 = pneg %p290_p3  ;;  %353 = sbr.rel (%p290_p3) target bundleno = 2361 (0x939), region = 64 }
   0x8   : > { %p6124_p5 = pnand %p6127_p2, %p6123_p4 }
   0xa   : > { %6126 = dma.hbm_to_vmem [thread:$0]  (!%p6124_p5), %s313_s20, 9216, %s315_s23, [#allocation3], %s6379_s24, %s6379_s24, %s6380_s25  }
   0xb   : > { %6371 = dma.done.wait (%p6127_p2), [#allocation3], 9216  }
   0xc   : > { %6373 = vsyncadd (%p6127_p2), [#allocation3], 4294958080  ;;  %p394_p6 = scmp.lt.s32.totalorder %s5681_s21, 1  ;;  %v420_v61 = vld [vmem:[%s11030_s9] sm:$0xff]  ;;  %vm492_vm0 = vcmask 523264   ;;  %s6382_s14 = smov 16  }
   0xd   : > { %s6383_s15 = smov 15   ;;  %s6384_s16 = smov 17  }
   0xe   : > { %s11310_s21 = smov (!%p394_p6, %s5681_s21), 1  ;;  %s6385_s18 = smov 1  }
   0xf   : > { %s11041_s26 = sshll.u32 %s11310_s21, 7  ;;  %s6386_s19 = smov 113  }
  0x10   : > { %s6469_s29 = scalar_lea.vmem %s11021_s0, %s11041_s26  ;;  %s6387_s20 = smov 127  }
  0x11   : > { %v6472_v0 = vld [vmem:[%s6469_s29 + $0x70] sm:$0xff]  ;;  %v6475_v1 = vld [vmem:[%s6469_s29 + $0x78] sm:$0xff]  ;;  %v6486_v5 = vld [vmem:[%s6469_s29 + $0x40] sm:$0xff]  ;;  %s11074_s24 = smov 111   ;;  %s11072_s25 = smov 112  }
  0x12   : > { %v6478_v2 = vld [vmem:[%s6469_s29 + $0x50] sm:$0xff]  ;;  %v449_v3 = vadd.f32 %v6475_v1, %v6472_v0  ;;  %v6483_v4 = vld [vmem:[%s6469_s29 + $0x58] sm:$0xff]  ;;  %v6489_v6 = vld [vmem:[%s6469_s29 + $0x48] sm:$0xff]  ;;  %v466_v11 = vmul.f32 %v6472_v0, %v6472_v0  ;;  %v467_v12 = vmul.f32 %v6475_v1, %v6475_v1  ;;  %v460_v20 = vmul.f32 %v6486_v5, %v6486_v5 }
  0x13   : > { %v443_v7 = vadd.f32 %v6483_v4, %v6478_v2  ;;  %v440_v8 = vadd.f32 %v6489_v6, %v6486_v5  ;;  %v6496_v9 = vld [vmem:[%s6469_s29 + $0x60] sm:$0xff]  ;;  %v6499_v10 = vld [vmem:[%s6469_s29 + $0x68] sm:$0xff]  ;;  %v462_v18 = vmul.f32 %v6478_v2, %v6478_v2  ;;  %v463_v19 = vmul.f32 %v6483_v4, %v6483_v4  ;;  %v6520_v22 = vld [vmem:[%s6469_s29 + $0x30] sm:$0xff] }
  0x14   : > { %450 = vadd.xlane.f32.xlu0 %v449_v3  ;;  %v464_v13 = vmul.f32 %v6496_v9, %v6496_v9  ;;  %v465_v14 = vmul.f32 %v6499_v10, %v6499_v10  ;;  %v446_v15 = vadd.f32 %v6499_v10, %v6496_v9  ;;  %v489_v16 = vadd.f32 %v467_v12, %v466_v11  ;;  %v6523_v23 = vld [vmem:[%s6469_s29 + $0x38] sm:$0xff]  ;;  %v6532_v29 = vld [vmem:[%s6469_s29 + $0x20] sm:$0xff]  ;;  %v6535_v30 = vld [vmem:[%s6469_s29 + $0x28] sm:$0xff] }
  0x15   : > { %444 = vadd.xlane.f32.xlu1 %v443_v7  ;;  %441 = vadd.xlane.f32.xlu2 %v440_v8  ;;  %v461_v21 = vmul.f32 %v6489_v6, %v6489_v6  ;;  %v483_v24 = vadd.f32 %v463_v19, %v462_v18  ;;  %v437_v25 = vadd.f32 %v6523_v23, %v6520_v22  ;;  %v6538_v31 = vld [vmem:[%s6469_s29 + $0x10] sm:$0xff]  ;;  %v6541_v32 = vld [vmem:[%s6469_s29 + $0x18] sm:$0xff]  ;;  %v6556_v40 = vld [vmem:[%s6469_s29] sm:$0xff] }
  0x16   : > { %v486_v17 = vadd.f32 %v465_v14, %v464_v13  ;;  %v458_v27 = vmul.f32 %v6520_v22, %v6520_v22  ;;  %v459_v28 = vmul.f32 %v6523_v23, %v6523_v23  ;;  %v434_v33 = vadd.f32 %v6535_v30, %v6532_v29  ;;  %v6559_v41 = vld [vmem:[%s6469_s29 + $0x8] sm:$0xff]  ;;  %v422_v8 = vld [vmem:[%s11030_s9 + $0x10] sm:$0xff]  ;;  %v423_v11 = vld [vmem:[%s11030_s9 + $0x18] sm:$0xff] }
  0x17   : > { %v480_v26 = vadd.f32 %v461_v21, %v460_v20  ;;  %v431_v35 = vadd.f32 %v6541_v32, %v6538_v31  ;;  %v456_v36 = vmul.f32 %v6532_v29, %v6532_v29  ;;  %v457_v37 = vmul.f32 %v6535_v30, %v6535_v30  ;;  %v421_v7 = vld [vmem:[%s11030_s9 + $0x8] sm:$0xff]  ;;  %v424_v12 = vld [vmem:[%s11030_s9 + $0x20] sm:$0xff]  ;;  %v822_v13 = vld [vmem:[%s11024_s3 + $0x38] sm:$0xff] }
  0x18   : > { %v477_v34 = vadd.f32 %v459_v28, %v458_v27  ;;  %v454_v38 = vmul.f32 %v6538_v31, %v6538_v31  ;;  %v455_v39 = vmul.f32 %v6541_v32, %v6541_v32  ;;  %v428_v43 = vadd.f32 %v6559_v41, %v6556_v40  ;;  %v886_v14 = vld [vmem:[%s11025_s4 + $0x38] sm:$0xff]  ;;  %v885_v18 = vld [vmem:[%s11025_s4 + $0x30] sm:$0xff]  ;;  %v820_v19 = vld [vmem:[%s11024_s3 + $0x28] sm:$0xff] }
  0x19   : > { %v474_v42 = vadd.f32 %v457_v37, %v456_v36  ;;  %v452_v45 = vmul.f32 %v6556_v40, %v6556_v40  ;;  %v453_v46 = vmul.f32 %v6559_v41, %v6559_v41  ;;  %v426_v20 = vld [vmem:[%s11030_s9 + $0x30] sm:$0xff]  ;;  %v819_v21 = vld [vmem:[%s11024_s3 + $0x20] sm:$0xff] }
  0x1a   : > { %v471_v44 = vadd.f32 %v455_v39, %v454_v38  ;;  %v817_v27 = vld [vmem:[%s11024_s3 + $0x10] sm:$0xff] }
  0x1b   : > { %v468_v47 = vadd.f32 %v453_v46, %v452_v45  ;;  %v881_v28 = vld [vmem:[%s11025_s4 + $0x10] sm:$0xff] }
  0x1c   : > { %447 = vadd.xlane.f32.xlu0 %v446_v15  ;;  %v6381_v15 = vmov 0  }
  0x1d   : > { %490 = vadd.xlane.f32.xlu1 %v489_v16  ;;  %487 = vadd.xlane.f32.xlu2 %v486_v17  ;;  %v821_v16 = vld [vmem:[%s11024_s3 + $0x30] sm:$0xff]  ;;  %v425_v17 = vld [vmem:[%s11030_s9 + $0x28] sm:$0xff] }
  0x1e   : > { %6149 = vset.pattern.permute.xlu2 %v6381_v15  ;;  %6151 = vset.pattern.permute.xlu0 %v6381_v15 }
  0x1f   : > { %6150 = vset.pattern.permute.xlu1 %v6381_v15 }
  0x24   : > { %484 = vadd.xlane.f32.xlu0 %v483_v24  ;;  %v883_v24 = vld [vmem:[%s11025_s4 + $0x20] sm:$0xff] }
  0x25   : > { %438 = vadd.xlane.f32.xlu1 %v437_v25  ;;  %481 = vadd.xlane.f32.xlu2 %v480_v26  ;;  %v427_v25 = vld [vmem:[%s11030_s9 + $0x38] sm:$0xff] }
  0x26   : > { %v882_v26 = vld [vmem:[%s11025_s4 + $0x18] sm:$0xff] }
  0x2c   : > { %435 = vadd.xlane.f32.xlu0 %v434_v33  ;;  %v884_v33 = vld [vmem:[%s11025_s4 + $0x28] sm:$0xff] }
  0x2d   : > { %478 = vadd.xlane.f32.xlu1 %v477_v34  ;;  %432 = vadd.xlane.f32.xlu2 %v431_v35  ;;  %v816_v34 = vld [vmem:[%s11024_s3 + $0x8] sm:$0xff]  ;;  %v818_v35 = vld [vmem:[%s11024_s3 + $0x18] sm:$0xff] }
  0x34   : > { %475 = vadd.xlane.f32.xlu0 %v474_v42 }
  0x35   : > { %429 = vadd.xlane.f32.xlu1 %v428_v43  ;;  %472 = vadd.xlane.f32.xlu2 %v471_v44 }
  0x3c   : > { %469 = vadd.xlane.f32.xlu0 %v468_v47 }
  0x4d   : > { %860 = vperm.xlu2 %6149, %v822_v13  }
  0x4e   : > { %855 = vperm.xlu1 %6150, %v821_v16  }
  0x50   : > { %924 = vperm.xlu0 %6151, %v886_v14  }
  0x55   : > { %919 = vperm.xlu2 %6149, %v885_v18  }
  0x56   : > { %914 = vperm.xlu1 %6150, %v884_v33  }
  0x58   : > { %850 = vperm.xlu0 %6151, %v820_v19  }
  0x5d   : > { %845 = vperm.xlu2 %6149, %v819_v21  }
  0x5e   : > { %840 = vperm.xlu1 %6150, %v818_v35  }
  0x60   : > { %909 = vperm.xlu0 %6151, %v883_v24  }
  0x65   : > { %904 = vperm.xlu2 %6149, %v882_v26  }
  0x68   : > { %835 = vperm.xlu0 %6151, %v817_v27  }
  0x6d   : > { %899 = vperm.xlu2 %6149, %v881_v28  }
  0x70   : > { %830 = vperm.xlu0 %6151, %v816_v34  }
  0x87   : > { %v451_v48 = vpop.xlane.xlu0 %450 }
  0x88   : > { %v445_v49 = vpop.xlane.xlu1 %444  ;;  %525 = vmatpush.msra.mxu0 %v451_v48  ;;  %v442_v50 = vpop.xlane.xlu2 %441 }
  0x8f   : > { %v448_v51 = vpop.xlane.xlu0 %447 }
  0x90   : > { %v491_v52 = vpop.xlane.xlu1 %490  ;;  %526 = vmatpush.msra.mxu0 %v448_v51  ;;  %v488_v53 = vpop.xlane.xlu2 %487 }
  0x91   : > { %566 = vmatpush.msra.mxu1 %v491_v52 }
  0x92   : > { %527 = vmatpush.msra.mxu0 %v445_v49 }
  0x93   : > { %567 = vmatpush.msra.mxu1 %v488_v53 }
  0x94   : > { %528 = vmatpush.msra.mxu0 %v442_v50 }
  0x97   : > { %v485_v54 = vpop.xlane.xlu0 %484 }
  0x98   : > { %v439_v55 = vpop.xlane.xlu1 %438  ;;  %568 = vmatpush.msra.mxu1 %v485_v54  ;;  %v482_v56 = vpop.xlane.xlu2 %481 }
  0x99   : > { %529 = vmatpush.msra.mxu0 %v439_v55 }
  0x9a   : > { %569 = vmatpush.msra.mxu1 %v482_v56 }
  0x9f   : > { %v436_v57 = vpop.xlane.xlu0 %435 }
  0xa0   : > { %v479_v58 = vpop.xlane.xlu1 %478  ;;  %530 = vmatpush.msra.mxu0 %v436_v57  ;;  %v433_v59 = vpop.xlane.xlu2 %432 }
  0xa1   : > { %570 = vmatpush.msra.mxu1 %v479_v58 }
  0xa2   : > { %531 = vmatpush.msra.mxu0 %v433_v59 }
  0xa7   : > { %v476_v60 = vpop.xlane.xlu0 %475 }
  0xa8   : > { %v430_v62 = vpop.xlane.xlu1 %429  ;;  %571 = vmatpush.msra.mxu1 %v476_v60  ;;  %v473_v63 = vpop.xlane.xlu2 %472 }
  0xa9   : > { %532 = vmatpush.msra.mxu0 %v430_v62 }
  0xaa   : > { %5692 = vmatmul.msk.f32.vlgmr.msra.gmra.mxu0 %vm492_vm0, %v420_v61  ;;  %572 = vmatpush.msra.mxu1 %v473_v63 }
  0xaf   : > { %v470_v3 = vpop.xlane.xlu0 %469 }
  0xb0   : > { %573 = vmatpush.msra.mxu1 %v470_v3 }
  0xb1   : > { %5700 = vmatmul.msk.f32.vlgmr.msra.gmra.mxu1 %vm492_vm0, %v420_v61 }
  0xb2   : > { %5693 = vmatmul.msk.f32.gmra.mxu0 %vm492_vm0, %v421_v7 }
  0xb9   : > { %5701 = vmatmul.msk.f32.gmra.mxu1 %vm492_vm0, %v421_v7 }
  0xba   : > { %5694 = vmatmul.msk.f32.gmra.mxu0 %vm492_vm0, %v422_v8 }
  0xc1   : > { %5702 = vmatmul.msk.f32.gmra.mxu1 %vm492_vm0, %v422_v8 }
  0xc2   : > { %5695 = vmatmul.msk.f32.gmra.mxu0 %vm492_vm0, %v423_v11 }
  0xc9   : > { %5703 = vmatmul.msk.f32.gmra.mxu1 %vm492_vm0, %v423_v11 }
  0xca   : > { %5696 = vmatmul.msk.f32.gmra.mxu0 %vm492_vm0, %v424_v12 }
  0xd1   : > { %5704 = vmatmul.msk.f32.gmra.mxu1 %vm492_vm0, %v424_v12 }
  0xd2   : > { %5697 = vmatmul.msk.f32.gmra.mxu0 %vm492_vm0, %v425_v17 }
  0xd9   : > { %5705 = vmatmul.msk.f32.gmra.mxu1 %vm492_vm0, %v425_v17 }
  0xda   : > { %5698 = vmatmul.msk.f32.gmra.mxu0 %vm492_vm0, %v426_v20 }
  0xe1   : > { %5706 = vmatmul.msk.f32.gmra.mxu1 %vm492_vm0, %v426_v20 }
  0xe2   : > { %5699 = vmatmul.msk.f32.gmra.mxu0 %vm492_vm0, %v427_v25 }
  0xe9   : > { %5707 = vmatmul.msk.f32.gmra.mxu1 %vm492_vm0, %v427_v25 }
 0x127   : > { %v534_v36 = vpop.f32.mrf.mxu0 }
 0x128   : > { %617 = vperm.xlu2 %6149, %v534_v36   ;;  %v599_v37 = vmul.f32 %v534_v36, %v534_v36 }
 0x12e   : > { %v575_v38 = vpop.f32.mrf.mxu1 }
 0x12f   : > { %v537_v39 = vpop.f32.mrf.mxu0  ;;  %v607_v42 = vsub.f32 %v575_v38, %v599_v37 }
 0x130   : > { %622 = vperm.xlu0 %6151, %v537_v39   ;;  %v600_v44 = vmul.f32 %v537_v39, %v537_v39 }
 0x131   : > { %v671_v43 = vadd.f32 1e-05, %v607_v42 }
 0x133   : > { %6152 = vrsqrt.f32 %v671_v43  ;;  %vm685_vm2 = vweird.f32 %v671_v43 }
 0x136   : > { %v578_v45 = vpop.f32.mrf.mxu1 }
 0x137   : > { %v540_v46 = vpop.f32.mrf.mxu0  ;;  %v608_v47 = vsub.f32 %v578_v45, %v600_v44 }
 0x138   : > { %627 = vperm.xlu1 %6150, %v540_v46   ;;  %v601_v51 = vmul.f32 %v540_v46, %v540_v46 }
 0x139   : > { %v6153_v48 = vpop.eup %6152  ;;  %v672_v49 = vadd.f32 1e-05, %v608_v47 }
 0x13a   : > { %v680_v50 = vmul.f32 %v6153_v48, %v671_v43  ;;  %vm686_vm1 = vweird.f32 %v6153_v48 }
 0x13b   : > { %6154 = vrsqrt.f32 %v672_v49  ;;  %vm687_vm3 = vmor %vm685_vm2, %vm686_vm1  ;;  %vm695_vm5 = vweird.f32 %v672_v49 }
 0x13c   : > { %v681_v52 = vmul.f32 %v6153_v48, %v680_v50 }
 0x13e   : > { %v581_v53 = vpop.f32.mrf.mxu1  ;;  %v682_v54 = vmul.f32 0.5, %v681_v52 }
 0x13f   : > { %v543_v55 = vpop.f32.mrf.mxu0  ;;  %v609_v56 = vsub.f32 %v581_v53, %v601_v51 }
 0x140   : > { %v683_v57 = vsub.f32 1.5, %v682_v54  ;;  %632 = vperm.xlu2 %6149, %v543_v55   ;;  %v602_v62 = vmul.f32 %v543_v55, %v543_v55 }
 0x141   : > { %v6155_v58 = vpop.eup %6154  ;;  %v673_v59 = vadd.f32 1e-05, %v609_v56 }
 0x142   : > { %v690_v60 = vmul.f32 %v6155_v58, %v672_v49  ;;  %v684_v61 = vmul.f32 %v6153_v48, %v683_v57  ;;  %vm696_vm4 = vweird.f32 %v6155_v58 }
 0x143   : > { %6156 = vrsqrt.f32 %v673_v59  ;;  %vm697_vm6 = vmor %vm695_vm5, %vm696_vm4  ;;  %vm705_vm8 = vweird.f32 %v673_v59 }
 0x144   : > { %v691_v63 = vmul.f32 %v6155_v58, %v690_v60  ;;  %v688_v3 = vsel %vm687_vm3, %v6153_v48, %v684_v61 }
 0x145   : > { %761 = vperm.xlu1 %6150, %v688_v3  }
 0x146   : > { %v584_v7 = vpop.f32.mrf.mxu1  ;;  %v692_v12 = vmul.f32 0.5, %v691_v63 }
 0x147   : > { %v546_v8 = vpop.f32.mrf.mxu0  ;;  %v610_v11 = vsub.f32 %v584_v7, %v602_v62 }
 0x148   : > { %v603_v16 = vmul.f32 %v546_v8, %v546_v8  ;;  %v693_v18 = vsub.f32 1.5, %v692_v12 }
 0x149   : > { %v6157_v13 = vpop.eup %6156  ;;  %v674_v14 = vadd.f32 1e-05, %v610_v11 }
 0x14a   : > { %v700_v15 = vmul.f32 %v6157_v13, %v673_v59  ;;  %v694_v25 = vmul.f32 %v6155_v58, %v693_v18  ;;  %vm706_vm7 = vweird.f32 %v6157_v13 }
 0x14b   : > { %6158 = vrsqrt.f32 %v674_v14  ;;  %vm707_vm9 = vmor %vm705_vm8, %vm706_vm7  ;;  %vm715_vm11 = vweird.f32 %v674_v14 }
 0x14c   : > { %v701_v17 = vmul.f32 %v6157_v13, %v700_v15  ;;  %v698_v37 = vsel %vm697_vm6, %v6155_v58, %v694_v25  ;;  %v879_v25 = vld [vmem:[%s11025_s4] sm:$0xff] }
 0x14d   : > { %637 = vperm.xlu1 %6150, %v546_v8  }
 0x14e   : > { %v587_v19 = vpop.f32.mrf.mxu1  ;;  %v702_v20 = vmul.f32 0.5, %v701_v17 }
 0x14f   : > { %v549_v21 = vpop.f32.mrf.mxu0  ;;  %v611_v24 = vsub.f32 %v587_v19, %v603_v16 }
 0x150   : > { %642 = vperm.xlu2 %6149, %v549_v21   ;;  %v703_v26 = vsub.f32 1.5, %v702_v20  ;;  %v604_v34 = vmul.f32 %v549_v21, %v549_v21 }
 0x151   : > { %v6159_v27 = vpop.eup %6158  ;;  %v675_v28 = vadd.f32 1e-05, %v611_v24 }
 0x152   : > { %v710_v33 = vmul.f32 %v6159_v27, %v674_v14  ;;  %v704_v35 = vmul.f32 %v6157_v13, %v703_v26  ;;  %vm716_vm10 = vweird.f32 %v6159_v27 }
 0x153   : > { %6160 = vrsqrt.f32 %v675_v28  ;;  %vm717_vm12 = vmor %vm715_vm11, %vm716_vm10  ;;  %vm725_vm14 = vweird.f32 %v675_v28 }
 0x154   : > { %v711_v36 = vmul.f32 %v6159_v27, %v710_v33  ;;  %v708_v44 = vsel %vm707_vm9, %v6157_v13, %v704_v35  ;;  %v815_v35 = vld [vmem:[%s11024_s3] sm:$0xff] }
 0x155   : > { %766 = vperm.xlu1 %6150, %v698_v37  }
 0x156   : > { %v590_v38 = vpop.f32.mrf.mxu1  ;;  %v712_v39 = vmul.f32 0.5, %v711_v36 }
 0x157   : > { %v552_v42 = vpop.f32.mrf.mxu0  ;;  %v612_v43 = vsub.f32 %v590_v38, %v604_v34  ;;  %v6652_v38 = vpop.permute.xlu2 %860 }
 0x158   : > { %771 = vperm.xlu2 %6149, %v708_v44   ;;  %v713_v45 = vsub.f32 1.5, %v712_v39  ;;  %v605_v50 = vmul.f32 %v552_v42, %v552_v42  ;;  %v880_v39 = vld [vmem:[%s11025_s4 + $0x8] sm:$0xff] }
 0x159   : > { %v6161_v46 = vpop.eup %6160  ;;  %v676_v47 = vadd.f32 1e-05, %v612_v43  ;;  %v6659_v43 = vpop.permute.xlu1 %855 }
 0x15a   : > { %v720_v48 = vmul.f32 %v6161_v46, %v675_v28  ;;  %v714_v49 = vmul.f32 %v6159_v27, %v713_v45  ;;  %vm726_vm13 = vweird.f32 %v6161_v46 }
 0x15b   : > { %6162 = vrsqrt.f32 %v676_v47  ;;  %vm727_vm15 = vmor %vm725_vm14, %vm726_vm13  ;;  %vm735_vm2 = vweird.f32 %v676_v47 }
 0x15c   : > { %v721_v51 = vmul.f32 %v6161_v46, %v720_v48  ;;  %v718_v52 = vsel %vm717_vm12, %v6159_v27, %v714_v49 }
 0x15d   : > { %776 = vperm.xlu0 %6151, %v718_v52  }
 0x15e   : > { %v593_v53 = vpop.f32.mrf.mxu1  ;;  %v722_v54 = vmul.f32 0.5, %v721_v51 }
 0x15f   : > { %v555_v55 = vpop.f32.mrf.mxu0  ;;  %v613_v56 = vsub.f32 %v593_v53, %v605_v50 }
 0x160   : > { %647 = vperm.xlu2 %6149, %v552_v42   ;;  %652 = vperm.xlu1 %6150, %v555_v55   ;;  %v723_v57 = vsub.f32 1.5, %v722_v54  ;;  %v606_v61 = vmul.f32 %v555_v55, %v555_v55  ;;  %v6657_v42 = vpop.permute.xlu2 %919 }
 0x161   : > { %v6163_v58 = vpop.eup %6162  ;;  %v677_v59 = vadd.f32 1e-05, %v613_v56  ;;  %v6663_v45 = vpop.permute.xlu1 %914 }
 0x162   : > { %v730_v60 = vmul.f32 %v6163_v58, %v676_v47  ;;  %v724_v62 = vmul.f32 %v6161_v46, %v723_v57  ;;  %vm736_vm1 = vweird.f32 %v6163_v58  ;;  %v6665_v47 = vpop.permute.xlu0 %924 }
 0x163   : > { %6164 = vrsqrt.f32 %v677_v59  ;;  %vm737_vm3 = vmor %vm735_vm2, %vm736_vm1  ;;  %vm745_vm5 = vweird.f32 %v677_v59 }
 0x164   : > { %v731_v63 = vmul.f32 %v6163_v58, %v730_v60  ;;  %v728_v11 = vsel %vm727_vm15, %v6161_v46, %v724_v62 }
 0x166   : > { %v596_v3 = vpop.f32.mrf.mxu1  ;;  %v732_v7 = vmul.f32 0.5, %v731_v63 }
 0x167   : > { %v614_v8 = vsub.f32 %v596_v3, %v606_v61 }
 0x168   : > { %781 = vperm.xlu1 %6150, %v728_v11   ;;  %v733_v12 = vsub.f32 1.5, %v732_v7  ;;  %v6661_v44 = vpop.permute.xlu2 %845 }
 0x169   : > { %v6165_v13 = vpop.eup %6164  ;;  %v678_v14 = vadd.f32 1e-05, %v614_v8  ;;  %v841_v48 = vpop.permute.xlu1 %840 }
 0x16a   : > { %v740_v15 = vmul.f32 %v6165_v13, %v677_v59  ;;  %v734_v16 = vmul.f32 %v6163_v58, %v733_v12  ;;  %vm746_vm4 = vweird.f32 %v6165_v13  ;;  %v851_v50 = vpop.permute.xlu0 %850 }
 0x16b   : > { %6166 = vrsqrt.f32 %v678_v14  ;;  %vm747_vm6 = vmor %vm745_vm5, %vm746_vm4  ;;  %vm755_vm8 = vweird.f32 %v678_v14 }
 0x16c   : > { %v741_v17 = vmul.f32 %v6165_v13, %v740_v15  ;;  %v738_v18 = vsel %vm737_vm3, %v6163_v58, %v734_v16 }
 0x16d   : > { %786 = vperm.xlu2 %6149, %v738_v18  }
 0x16e   : > { %v742_v19 = vmul.f32 0.5, %v741_v17 }
 0x170   : > { %v743_v20 = vsub.f32 1.5, %v742_v19  ;;  %v905_v46 = vpop.permute.xlu2 %904 }
 0x171   : > { %v6167_v21 = vpop.eup %6166 }
 0x172   : > { %v750_v24 = vmul.f32 %v6167_v21, %v678_v14  ;;  %v744_v26 = vmul.f32 %v6165_v13, %v743_v20  ;;  %vm756_vm7 = vweird.f32 %v6167_v21  ;;  %v6667_v53 = vpop.permute.xlu0 %909 }
 0x173   : > { %vm757_vm9 = vmor %vm755_vm8, %vm756_vm7 }
 0x174   : > { %v751_v27 = vmul.f32 %v6167_v21, %v750_v24  ;;  %v748_v28 = vsel %vm747_vm6, %v6165_v13, %v744_v26 }
 0x175   : > { %889 = vperm.xlu2 %6149, %v879_v25   ;;  %791 = vperm.xlu1 %6150, %v748_v28  }
 0x176   : > { %v752_v33 = vmul.f32 0.5, %v751_v27 }
 0x178   : > { %v753_v34 = vsub.f32 1.5, %v752_v33  ;;  %v900_v49 = vpop.permute.xlu2 %899 }
 0x17a   : > { %v754_v36 = vmul.f32 %v6167_v21, %v753_v34  ;;  %v836_v56 = vpop.permute.xlu0 %835 }
 0x17c   : > { %v758_v37 = vsel %vm757_vm9, %v6167_v21, %v754_v36 }
 0x17d   : > { %825 = vperm.xlu1 %6150, %v815_v35   ;;  %796 = vperm.xlu0 %6151, %v758_v37  }
 0x182   : > { %v618_v52 = vpop.permute.xlu2 %617  ;;  %v6671_v59 = vpop.permute.xlu0 %830 }
 0x185   : > { %894 = vperm.xlu0 %6151, %v880_v39  }
 0x19a   : > { %v633_v55 = vpop.permute.xlu2 %632 }
 0x19b   : > { %v662_v25 = vsub.f32 %v6523_v23, %v633_v55 }
 0x1a2   : > { %v6679_v12 = vpop.permute.xlu0 %622 }
 0x1aa   : > { %v628_v51 = vpop.permute.xlu1 %627  ;;  %v643_v57 = vpop.permute.xlu2 %642 }
 0x1ab   : > { %v660_v62 = vsub.f32 %v6535_v30, %v628_v51  ;;  %v659_v3 = vsub.f32 %v6532_v29, %v628_v51  ;;  %v661_v30 = vsub.f32 %v6520_v22, %v633_v55  ;;  %v666_v24 = vsub.f32 %v6483_v4, %v643_v57 }
 0x1ac   : > { %v665_v39 = vsub.f32 %v6478_v2, %v643_v57  ;;  %v656_v2 = vsub.f32 %v6559_v41, %v618_v52 }
 0x1b2   : > { %v772_v60 = vpop.permute.xlu2 %771 }
 0x1b3   : > { %v804_v63 = vmul.f32 %v772_v60, %v660_v62  ;;  %v803_v7 = vmul.f32 %v772_v60, %v659_v3 }
 0x1b5   : > { %v868_v8 = vmul.f32 %v836_v56, %v804_v63  ;;  %v867_v13 = vmul.f32 %v836_v56, %v803_v7  ;;  %v655_v63 = vsub.f32 %v6556_v40, %v618_v52 }
 0x1b7   : > { %v762_v54 = vpop.permute.xlu1 %761  ;;  %v6681_v14 = vadd.f32 %v900_v49, %v868_v8  ;;  %v6685_v16 = vadd.f32 %v900_v49, %v867_v13 }
 0x1b8   : > { %v799_v7 = vmul.f32 %v762_v54, %v655_v63  ;;  %v800_v13 = vmul.f32 %v762_v54, %v656_v2  ;;  %v657_v54 = vsub.f32 %v6538_v31, %v6679_v12 }
 0x1b9   : > { %v5713_v17 = vmul.f32 -1.442695, %v6681_v14  ;;  %v5712_v29 = vmul.f32 -1.442695, %v6685_v16 }
 0x1ba   : > { %v6683_v15 = vpop.permute.xlu2 %647 }
 0x1bb   : > { %6168 = vpow2.f32 %v5713_v17 }
 0x1bc   : > { %6170 = vpow2.f32 %v5712_v29 }
 0x1bf   : > { %v6669_v58 = vpop.permute.xlu1 %637 }
 0x1c0   : > { %v663_v4 = vsub.f32 %v6486_v5, %v6669_v58 }
 0x1c1   : > { %v6169_v28 = vpop.eup %6168 }
 0x1c2   : > { %v6171_v35 = vpop.eup %6170  ;;  %v6694_v36 = vadd.f32 1.0, %v6169_v28 }
 0x1c3   : > { %v6699_v51 = vadd.f32 1.0, %v6171_v35 }
 0x1c4   : > { %6172 = vrcp.f32 %v6694_v36  ;;  %vm1087_vm11 = vweird.f32 %v6694_v36 }
 0x1c5   : > { %6174 = vrcp.f32 %v6699_v51  ;;  %vm1072_vm14 = vweird.f32 %v6699_v51 }
 0x1c7   : > { %v6673_v61 = vpop.permute.xlu1 %766  ;;  %v787_v21 = vpop.permute.xlu2 %786 }
 0x1c8   : > { %v810_v26 = vmul.f32 %v787_v21, %v666_v24  ;;  %v809_v23 = vmul.f32 %v787_v21, %v665_v39  ;;  %v658_v21 = vsub.f32 %v6541_v32, %v6679_v12  ;;  %v668_v39 = vsub.f32 %v6499_v10, %v6683_v15 }
 0x1ca   : > { %v874_v22 = vmul.f32 %v851_v50, %v810_v26  ;;  %v6716_v8 = vpop.eup %6172 }
 0x1cb   : > { %v6725_v29 = vpop.eup %6174  ;;  %vm1088_vm10 = vweird.f32 %v6716_v8 }
 0x1cc   : > { %v6705_v55 = vadd.f32 %v6663_v45, %v874_v22  ;;  %v1068_v31 = vmul.f32 %v6725_v29, %v6699_v51  ;;  %vm6788_vm12 = vmor %vm1087_vm11, %vm1088_vm10  ;;  %vm1073_vm13 = vweird.f32 %v6725_v29 }
 0x1cd   : > { %vm6812_vm1 = vmor %vm1072_vm14, %vm1073_vm13 }
 0x1ce   : > { %v5719_v5 = vmul.f32 -1.442695, %v6705_v55 }
 0x1cf   : > { %v777_v18 = vpop.permute.xlu0 %776 }
 0x1d0   : > { %v805_v20 = vmul.f32 %v777_v18, %v661_v30  ;;  %v806_v33 = vmul.f32 %v777_v18, %v662_v25 }
 0x1d2   : > { %v6677_v11 = vpop.permute.xlu1 %652  ;;  %v869_v27 = vmul.f32 %v841_v48, %v805_v20  ;;  %v870_v49 = vmul.f32 %v841_v48, %v806_v33  ;;  %v873_v48 = vmul.f32 %v851_v50, %v809_v23  ;;  %v890_v50 = vpop.permute.xlu2 %889 }
 0x1d4   : > { %v6696_v37 = vadd.f32 %v905_v46, %v869_v27  ;;  %v6708_v60 = vadd.f32 %v905_v46, %v870_v49  ;;  %v664_v46 = vsub.f32 %v6489_v6, %v6669_v58  ;;  %v6723_v41 = vadd.f32 %v6663_v45, %v873_v48 }
 0x1d5   : > { %v1083_v6 = vmul.f32 %v6716_v8, %v6694_v36  ;;  %v802_v27 = vmul.f32 %v6673_v61, %v658_v21 }
 0x1d6   : > { %v5714_v56 = vmul.f32 -1.442695, %v6696_v37  ;;  %v5715_v40 = vmul.f32 -1.442695, %v6708_v60  ;;  %v5718_v26 = vmul.f32 -1.442695, %v6723_v41 }
 0x1d7   : > { %v1084_v32 = vsub.f32 1.0, %v1083_v6 }
 0x1d8   : > { %6176 = vpow2.f32 %v5714_v56  ;;  %v1069_v56 = vsub.f32 1.0, %v1068_v31 }
 0x1d9   : > { %6178 = vpow2.f32 %v5719_v5 }
 0x1da   : > { %v782_v19 = vpop.permute.xlu1 %781  ;;  %6180 = vpow2.f32 %v5715_v40 }
 0x1db   : > { %v807_v62 = vmul.f32 %v782_v19, %v663_v4  ;;  %v808_v52 = vmul.f32 %v782_v19, %v664_v46  ;;  %v801_v19 = vmul.f32 %v6673_v61, %v657_v54  ;;  %v866_v61 = vmul.f32 %v6671_v59, %v802_v27 }
 0x1dd   : > { %v871_v17 = vmul.f32 %v6661_v44, %v807_v62  ;;  %v872_v28 = vmul.f32 %v6661_v44, %v808_v52  ;;  %v865_v4 = vmul.f32 %v6671_v59, %v801_v19  ;;  %v1085_v62 = vmul.f32 %v6716_v8, %v1084_v32 }
 0x1de   : > { %v6177_v20 = vpop.eup %6176  ;;  %v1091_v52 = vand.u32 2147483647, %v6694_v36 }
 0x1df   : > { %v6736_v45 = vadd.f32 %v6667_v53, %v871_v17  ;;  %v6747_v12 = vadd.f32 1.0, %v6177_v20  ;;  %v6179_v33 = vpop.eup %6178  ;;  %v6755_v44 = vadd.f32 %v6667_v53, %v872_v28  ;;  %v1093_v17 = vand.u32 2147483648, %v6694_v36 }
 0x1e0   : > { %v6181_v23 = vpop.eup %6180  ;;  %v6759_v63 = vadd.f32 1.0, %v6179_v33  ;;  %v667_v20 = vsub.f32 %v6496_v9, %v6683_v15  ;;  %vm1092_vm15 = vcmp.eq.f32.partialorder %v1091_v52, 8.507059e+37 }
 0x1e1   : > { %v5716_v35 = vmul.f32 -1.442695, %v6736_v45  ;;  %v6766_v5 = vadd.f32 1.0, %v6181_v23  ;;  %v5717_v53 = vmul.f32 -1.442695, %v6755_v44  ;;  %vm1102_vm5 = vweird.f32 %v6747_v12 }
 0x1e7   : > { %v6692_v34 = vpop.permute.xlu1 %791 }
 0x1e8   : > { %v811_v31 = vmul.f32 %v6692_v34, %v667_v20 }
 0x1ef   : > { %v6714_v57 = vpop.permute.xlu0 %796  ;;  %v826_v3 = vpop.permute.xlu1 %825 }
 0x1f0   : > { %v863_v18 = vmul.f32 %v826_v3, %v799_v7  ;;  %v864_v30 = vmul.f32 %v826_v3, %v800_v13  ;;  %v812_v3 = vmul.f32 %v6692_v34, %v668_v39  ;;  %v1070_v7 = vmul.f32 %v6725_v29, %v1069_v56 }
 0x1f1   : > { %v1086_v13 = vadd.f32 %v6716_v8, %v1085_v62  ;;  %v669_v56 = vsub.f32 %v6472_v0, %v6677_v11  ;;  %v875_v62 = vmul.f32 %v6659_v43, %v811_v31 }
 0x1f2   : > { %v6731_v58 = vadd.f32 %v890_v50, %v863_v18  ;;  %v6739_v24 = vadd.f32 %v890_v50, %v864_v30  ;;  %v876_v30 = vmul.f32 %v6659_v43, %v812_v3  ;;  %v6795_v19 = vadd.f32 %v6725_v29, %v1070_v7 }
 0x1f3   : > { %v1090_v36 = vsel %vm6788_vm12, %v6716_v8, %v1086_v13  ;;  %v1183_v8 = vand.u32 2147483648, %v6759_v63 }
 0x1f4   : > { %v5708_v25 = vmul.f32 -1.442695, %v6731_v58  ;;  %v5709_v49 = vmul.f32 -1.442695, %v6739_v24  ;;  %v6808_v15 = vadd.f32 %v6657_v42, %v876_v30  ;;  %v6853_v30 = vadd.f32 %v6657_v42, %v875_v62 }
 0x1f6   : > { %6182 = vpow2.f32 %v5708_v25  ;;  %v1094_v25 = vor.u32 1.1754944e-38, %v1093_v17 }
 0x1f7   : > { %v895_v22 = vpop.permute.xlu0 %894  ;;  %6184 = vpow2.f32 %v5718_v26 }
 0x1f8   : > { %6186 = vrcp.f32 %v6747_v12  ;;  %v6762_v2 = vadd.f32 %v895_v22, %v865_v4  ;;  %v6764_v10 = vadd.f32 %v895_v22, %v866_v61  ;;  %v1095_v32 = vsel %vm1092_vm15, %v1094_v25, %v1090_v36 }
 0x1f9   : > { %6188 = vpow2.f32 %v5716_v35  ;;  %v670_v61 = vsub.f32 %v6475_v1, %v6677_v11  ;;  %v6836_v3 = vmul.f32 %v1095_v32, %v6681_v14  ;;  %v1108_v25 = vand.u32 2147483648, %v6747_v12 }
 0x1fa   : > { %6190 = vpow2.f32 %v5709_v49  ;;  %v5710_v46 = vmul.f32 -1.442695, %v6762_v2  ;;  %v5711_v18 = vmul.f32 -1.442695, %v6764_v10  ;;  %v1078_v49 = vand.u32 2147483648, %v6699_v51 }
 0x1fb   : > { %6192 = vrcp.f32 %v6759_v63  ;;  %vm1117_vm15 = vweird.f32 %v6766_v5 }
 0x1fc   : > { %v6183_v48 = vpop.eup %6182 }
 0x1fd   : > { %v6771_v59 = vadd.f32 1.0, %v6183_v48  ;;  %v6185_v40 = vpop.eup %6184 }
 0x1fe   : > { %v6780_v50 = vpop.eup %6186  ;;  %v6805_v9 = vadd.f32 1.0, %v6185_v40  ;;  %v1106_v40 = vand.u32 2147483647, %v6747_v12 }
 0x1ff   : > { %6194 = vrcp.f32 %v6771_v59  ;;  %v6189_v54 = vpop.eup %6188  ;;  %v1098_v34 = vmul.f32 %v6780_v50, %v6747_v12  ;;  %v1018_v43 = vand.u32 2147483648, %v6771_v59  ;;  %v1016_v14 = vand.u32 2147483647, %v6771_v59 }
 0x200   : > { %6196 = vrcp.f32 %v6766_v5  ;;  %v6191_v21 = vpop.eup %6190  ;;  %v6818_v33 = vadd.f32 1.0, %v6189_v54  ;;  %vm1012_vm3 = vweird.f32 %v6771_v59  ;;  %vm6871_vm7 = vcmp.eq.f32.partialorder %v1106_v40, 8.507059e+37 }
 0x201   : > { %6198 = vpow2.f32 %v5717_v53  ;;  %v6803_v26 = vpop.eup %6192  ;;  %v6810_v27 = vadd.f32 1.0, %v6191_v21  ;;  %v5721_v53 = vmul.f32 -1.442695, %v6808_v15  ;;  %v1019_v31 = vor.u32 1.1754944e-38, %v1018_v43 }
 0x202   : > { %6200 = vpow2.f32 %v5710_v46  ;;  %v6842_v0 = vmul.f32 %v6803_v26, %v6759_v63  ;;  %v1099_v46 = vsub.f32 1.0, %v1098_v34  ;;  %vm1017_vm6 = vcmp.eq.f32.partialorder %v1016_v14, 8.507059e+37 }
 0x203   : > { %6202 = vpow2.f32 %v5711_v18  ;;  %vm1103_vm8 = vweird.f32 %v6780_v50  ;;  %v1033_v43 = vand.u32 2147483648, %v6810_v27  ;;  %vm1027_vm11 = vweird.f32 %v6810_v27 }
 0x204   : > { %6204 = vrcp.f32 %v6810_v27  ;;  %v1100_v36 = vmul.f32 %v6780_v50, %v1099_v46  ;;  %v1109_v46 = vor.u32 1.1754944e-38, %v1108_v25  ;;  %v1123_v25 = vand.u32 2147483648, %v6766_v5  ;;  %vm6896_vm10 = vmor %vm1102_vm5, %vm1103_vm8 }
 0x205   : > { %v6195_v28 = vpop.eup %6194  ;;  %6206 = vrcp.f32 %v6805_v9  ;;  %v1136_v12 = vand.u32 2147483647, %v6818_v33 }
 0x206   : > { %v6820_v35 = vpop.eup %6196  ;;  %v1008_v4 = vmul.f32 %v6195_v28, %v6771_v59  ;;  %6208 = vrcp.f32 %v6818_v33  ;;  %vm1013_vm2 = vweird.f32 %v6195_v28 }
 0x207   : > { %v6199_v23 = vpop.eup %6198  ;;  %v1113_v18 = vmul.f32 %v6820_v35, %v6766_v5  ;;  %6210 = vpow2.f32 %v5721_v53  ;;  %vm1014_vm4 = vmor %vm1012_vm3, %vm1013_vm2  ;;  %v5720_v53 = vmul.f32 -1.442695, %v6853_v30  ;;  %vm1118_vm12 = vweird.f32 %v6820_v35 }
 0x208   : > { %v6201_v48 = vpop.eup %6200  ;;  %v1009_v7 = vsub.f32 1.0, %v1008_v4  ;;  %v6850_v52 = vadd.f32 1.0, %v6199_v23  ;;  %v1174_v4 = vsub.f32 1.0, %v6842_v0  ;;  %vm1132_vm2 = vweird.f32 %v6818_v33 }
 0x209   : > { %v6203_v13 = vpop.eup %6202  ;;  %v6855_v54 = vadd.f32 1.0, %v6201_v48  ;;  %v1114_v23 = vsub.f32 1.0, %v1113_v18  ;;  %v1031_v18 = vand.u32 2147483647, %v6810_v27 }
 0x20a   : > { %v1010_v17 = vmul.f32 %v6195_v28, %v1009_v7  ;;  %v6858_v20 = vadd.f32 1.0, %v6203_v13  ;;  %v6205_v21 = vpop.eup %6204  ;;  %v1101_v13 = vadd.f32 %v6780_v50, %v1100_v36 }
 0x20b   : > { %6212 = vrcp.f32 %v6855_v54  ;;  %v6863_v32 = vpop.eup %6206  ;;  %v1023_v34 = vmul.f32 %v6205_v21, %v6810_v27  ;;  %vm1028_vm9 = vweird.f32 %v6205_v21  ;;  %vm1032_vm14 = vcmp.eq.f32.partialorder %v1031_v18, 8.507059e+37 }
 0x20c   : > { %v1011_v6 = vadd.f32 %v6195_v28, %v1010_v17  ;;  %v6867_v59 = vpop.eup %6208  ;;  %6214 = vrcp.f32 %v6850_v52  ;;  %vm1029_vm13 = vmor %vm1027_vm11, %vm1028_vm9  ;;  %vm1057_vm8 = vweird.f32 %v6858_v20 }
 0x20d   : > { %v1024_v7 = vsub.f32 1.0, %v1023_v34  ;;  %6216 = vrcp.f32 %v6858_v20  ;;  %v6211_v17 = vpop.eup %6210  ;;  %v1128_v40 = vmul.f32 %v6867_v59, %v6818_v33  ;;  %vm1133_vm9 = vweird.f32 %v6867_v59 }
 0x20e   : > { %v1015_v42 = vsel %vm1014_vm4, %v6195_v28, %v1011_v6  ;;  %v1115_v6 = vmul.f32 %v6820_v35, %v1114_v23  ;;  %6218 = vpow2.f32 %v5720_v53  ;;  %v1034_v53 = vor.u32 1.1754944e-38, %v1033_v43 }
 0x20f   : > { %v1020_v62 = vsel %vm1017_vm6, %v1019_v31, %v1015_v42  ;;  %v1025_v14 = vmul.f32 %v6205_v21, %v1024_v7  ;;  %v813_v31 = vmul.f32 %v6714_v57, %v669_v56  ;;  %v1105_v56 = vsel %vm6896_vm10, %v6780_v50, %v1101_v13 }
 0x210   : > { %v6877_v28 = vmul.f32 %v1020_v62, %v6731_v58  ;;  %v6909_v7 = vadd.f32 1.0, %v6211_v17  ;;  %v1129_v22 = vsub.f32 1.0, %v1128_v40  ;;  %v1048_v50 = vand.u32 2147483648, %v6855_v54 }
 0x211   : > { %v6213_v58 = vpop.eup %6212  ;;  %v1026_v34 = vadd.f32 %v6205_v21, %v1025_v14  ;;  %v877_v39 = vmul.f32 %v6652_v38, %v813_v31  ;;  %v1110_v40 = vsel %vm6871_vm7, %v1109_v46, %v1105_v56  ;;  %vm1042_vm4 = vweird.f32 %v6855_v54 }
 0x212   : > { %1344 = vrot.lane.b32.xlu2 %v6877_v28, %s6382_s14  ;;  %v1038_v23 = vmul.f32 %v6213_v58, %v6855_v54  ;;  %v6902_v62 = vpop.eup %6214  ;;  %vm1043_vm3 = vweird.f32 %v6213_v58  ;;  %6220 = vrcp.f32 %v6909_v7  ;;  %v1049_v48 = vor.u32 1.1754944e-38, %v1048_v50 }
 0x213   : > { %v6217_v14 = vpop.eup %6216  ;;  %v1030_v27 = vsel %vm1029_vm13, %v6205_v21, %v1026_v34  ;;  %v1046_v21 = vand.u32 2147483647, %v6855_v54  ;;  %v1143_v18 = vmul.f32 %v6902_v62, %v6850_v52  ;;  %vm1044_vm5 = vmor %vm1042_vm4, %vm1043_vm3  ;;  %v6939_v54 = vadd.f32 %v6665_v47, %v877_v39 }
 0x214   : > { %v1039_v36 = vsub.f32 1.0, %v1038_v23  ;;  %v1035_v42 = vsel %vm1032_vm14, %v1034_v53, %v1030_v27  ;;  %v1053_v13 = vmul.f32 %v6217_v14, %v6858_v20  ;;  %v6219_v34 = vpop.eup %6218  ;;  %v1130_v23 = vmul.f32 %v6867_v59, %v1129_v22  ;;  %vm6954_vm13 = vmor %vm1117_vm15, %vm1118_vm12 }
 0x215   : > { %v6918_v17 = vmul.f32 %v1035_v42, %v6739_v24  ;;  %v1063_v24 = vand.u32 2147483648, %v6858_v20  ;;  %vm1058_vm6 = vweird.f32 %v6217_v14  ;;  %v814_v22 = vmul.f32 %v6714_v57, %v670_v61  ;;  %vm6970_vm14 = vmor %vm1132_vm2, %vm1133_vm9 }
 0x216   : > { %v1040_v43 = vmul.f32 %v6213_v58, %v1039_v36  ;;  %v1054_v31 = vsub.f32 1.0, %v1053_v13  ;;  %v1061_v36 = vand.u32 2147483647, %v6858_v20  ;;  %vm1047_vm7 = vcmp.eq.f32.partialorder %v1046_v21, 8.507059e+37  ;;  %vm1059_vm10 = vmor %vm1057_vm8, %vm1058_vm6 }
 0x217   : > { %1360 = vrot.lane.b32.xlu1 %v6918_v17, %s6382_s14  ;;  %v6941_v27 = vadd.f32 1.0, %v6219_v34  ;;  %v1116_v50 = vadd.f32 %v6820_v35, %v1115_v6  ;;  %v1064_v1 = vor.u32 1.1754944e-38, %v1063_v24  ;;  %v1138_v57 = vand.u32 2147483648, %v6818_v33 }
 0x218   : > { %v1041_v53 = vadd.f32 %v6213_v58, %v1040_v43  ;;  %v1055_v46 = vmul.f32 %v6217_v14, %v1054_v31  ;;  %v1131_v43 = vadd.f32 %v6867_v59, %v1130_v23  ;;  %v6947_v11 = vpop.eup %6220  ;;  %v1144_v39 = vsub.f32 1.0, %v1143_v18 }
 0x219   : > { %vm1062_vm11 = vcmp.eq.f32.partialorder %v1061_v36, 8.507059e+37  ;;  %v5722_v6 = vmul.f32 -1.442695, %v6939_v54  ;;  %6222 = vrcp.f32 %v6941_v27  ;;  %v1120_v0 = vsel %vm6954_vm13, %v6820_v35, %v1116_v50 }
 0x21a   : > { %1364 = vrot.lane.b32.xlu2 %v6836_v3, %s6382_s14  ;;  %v1045_v56 = vsel %vm1044_vm5, %v6213_v58, %v1041_v53  ;;  %v1056_v13 = vadd.f32 %v6217_v14, %v1055_v46  ;;  %v6959_v58 = vmul.f32 %v1110_v40, %v6696_v37  ;;  %v878_v37 = vmul.f32 %v6652_v38, %v814_v22 }
 0x21b   : > { %v1050_v42 = vsel %vm1047_vm7, %v1049_v48, %v1045_v56  ;;  %v1203_v34 = vmul.f32 %v6947_v11, %v6909_v7  ;;  %v1158_v38 = vmul.f32 %v6863_v32, %v6805_v9  ;;  %v1139_v35 = vor.u32 1.1754944e-38, %v1138_v57 }
 0x21c   : > { %v1060_v61 = vsel %vm1059_vm10, %v6217_v14, %v1056_v13  ;;  %v6963_v31 = vmul.f32 %v1050_v42, %v6762_v2  ;;  %v1175_v14 = vmul.f32 %v6803_v26, %v1174_v4  ;;  %v1079_v2 = vor.u32 1.1754944e-38, %v1078_v49 }
 0x21d   : > { %v1065_v21 = vsel %vm1062_vm11, %v1064_v1, %v1060_v61  ;;  %v1135_v4 = vsel %vm6970_vm14, %v6867_v59, %v1131_v43  ;;  %v1145_v49 = vmul.f32 %v6902_v62, %v1144_v39  ;;  %v11090_v59 = vand.u32 2147483647, %v6699_v51 }
 0x21e   : > { %v6977_v40 = vmul.f32 %v1065_v21, %v6764_v10  ;;  %v1124_v10 = vor.u32 1.1754944e-38, %v1123_v25  ;;  %v11091_v23 = vand.u32 2147483647, %v6766_v5  ;;  %vm1137_vm2 = vcmp.eq.f32.partialorder %v1136_v12, 8.507059e+37 }
 0x21f   : > { %1346 = vrot.lane.b32.xlu1 %v6963_v31, %s6382_s14  ;;  %vm1077_vm12 = vcmp.eq.f32.partialorder %v11090_v59, 8.507059e+37  ;;  %6224 = vpow2.f32 %v5722_v6  ;;  %v11092_v25 = vsel %vm6812_vm1, %v6725_v29, %v6795_v19  ;;  %v1140_v48 = vsel %vm1137_vm2, %v1139_v35, %v1135_v4  ;;  %v7017_v33 = vpop.eup %6222 }
 0x220   : > { %1362 = vrot.lane.b32.xlu0 %v6977_v40, %s6382_s14  ;;  %vm1122_vm15 = vcmp.eq.f32.partialorder %v11091_v23, 8.507059e+37  ;;  %v1080_v53 = vsel %vm1077_vm12, %v1079_v2, %v11092_v25  ;;  %v7012_v46 = vadd.f32 %v6665_v47, %v878_v37  ;;  %v1176_v51 = vadd.f32 %v6803_v26, %v1175_v14 }
 0x221   : > { %v1125_v24 = vsel %vm1122_vm15, %v1124_v10, %v1120_v0  ;;  %vm1177_vm3 = vweird.f32 %v6759_v63  ;;  %vm1178_vm4 = vweird.f32 %v6803_v26  ;;  %v1204_v5 = vsub.f32 1.0, %v1203_v34 }
 0x222   : > { %1350 = vrot.lane.b32.xlu2 %v6959_v58, %s6382_s14  ;;  %v1159_v12 = vsub.f32 1.0, %v1158_v38  ;;  %v1146_v29 = vadd.f32 %v6902_v62, %v1145_v49  ;;  %vm1148_vm1 = vweird.f32 %v6902_v62  ;;  %v1181_v19 = vand.u32 2147483647, %v6759_v63  ;;  %vm7033_vm5 = vmor %vm1177_vm3, %vm1178_vm4 }
 0x223   : > { %v7024_v47 = vmul.f32 %v1125_v24, %v6708_v60  ;;  %v1153_v36 = vand.u32 2147483648, %v6850_v52  ;;  %v7028_v22 = vmul.f32 %v1140_v48, %v6736_v45  ;;  %v7031_v56 = vmul.f32 %v1080_v53, %v6685_v16 }
 0x224   : > { %vm1147_vm6 = vweird.f32 %v6850_v52  ;;  %v1151_v13 = vand.u32 2147483647, %v6850_v52  ;;  %v5723_v63 = vmul.f32 -1.442695, %v7012_v46  ;;  %v1180_v50 = vsel %vm7033_vm5, %v6803_v26, %v1176_v51 }
 0x225   : > { %v6225_v60 = vpop.eup %6224  ;;  %vm7043_vm7 = vmor %vm1147_vm6, %vm1148_vm1  ;;  %v1188_v16 = vmul.f32 %v7017_v33, %v6941_v27  ;;  %v1205_v43 = vmul.f32 %v6947_v11, %v1204_v5  ;;  %v1160_v52 = vmul.f32 %v6863_v32, %v1159_v12  ;;  %v1184_v1 = vor.u32 1.1754944e-38, %v1183_v8 }
 0x226   : > { %v1150_v26 = vsel %vm7043_vm7, %v6902_v62, %v1146_v29  ;;  %vm1182_vm8 = vcmp.eq.f32.partialorder %v1181_v19, 8.507059e+37  ;;  %v1154_v57 = vor.u32 1.1754944e-38, %v1153_v36  ;;  %vm1152_vm9 = vcmp.eq.f32.partialorder %v1151_v13, 8.507059e+37 }
 0x227   : > { %1366 = vrot.lane.b32.xlu1 %v7024_v47, %s6382_s14  ;;  %v1185_v39 = vsel %vm1182_vm8, %v1184_v1, %v1180_v50  ;;  %6226 = vpow2.f32 %v5723_v63  ;;  %v7060_v61 = vadd.f32 1.0, %v6225_v60  ;;  %v1189_v6 = vsub.f32 1.0, %v1188_v16 }
 0x228   : > { %1348 = vrot.lane.b32.xlu0 %v7031_v56, %s6382_s14  ;;  %v1155_v20 = vsel %vm1152_vm9, %v1154_v57, %v1150_v26  ;;  %v1206_v21 = vadd.f32 %v6947_v11, %v1205_v43  ;;  %vm1208_vm10 = vweird.f32 %v6947_v11  ;;  %v1161_v14 = vadd.f32 %v6863_v32, %v1160_v52 }
 0x229   : > { %vm1163_vm11 = vweird.f32 %v6863_v32  ;;  %v1213_v62 = vand.u32 2147483648, %v6909_v7  ;;  %v1168_v18 = vand.u32 2147483648, %v6805_v9  ;;  %v7069_v37 = vmul.f32 %v1185_v39, %v6705_v55 }
 0x22a   : > { %1645 = vrot.lane.b32.xlu2 %v7028_v22, %s6383_s15  ;;  %vm1207_vm13 = vweird.f32 %v6909_v7  ;;  %v1211_v2 = vand.u32 2147483647, %v6909_v7  ;;  %vm1162_vm14 = vweird.f32 %v6805_v9  ;;  %v1166_v0 = vand.u32 2147483647, %v6805_v9 }
 0x22b   : > { %v7076_v4 = vmul.f32 %v1155_v20, %v6755_v44  ;;  %vm1209_vm12 = vmor %vm1207_vm13, %vm1208_vm10  ;;  %6228 = vrcp.f32 %v7060_v61  ;;  %v1190_v34 = vmul.f32 %v7017_v33, %v1189_v6  ;;  %v1214_v38 = vor.u32 1.1754944e-38, %v1213_v62 }
 0x22c   : > { %vm1164_vm15 = vmor %vm1162_vm14, %vm1163_vm11  ;;  %v1210_v55 = vsel %vm1209_vm12, %v6947_v11, %v1206_v21  ;;  %v1169_v44 = vor.u32 1.1754944e-38, %v1168_v18  ;;  %vm1212_vm2 = vcmp.eq.f32.partialorder %v1211_v2, 8.507059e+37  ;;  %vm1167_vm3 = vcmp.eq.f32.partialorder %v1166_v0, 8.507059e+37 }
 0x22d   : > { %v6227_v7 = vpop.eup %6226  ;;  %v1165_v9 = vsel %vm1164_vm15, %v6863_v32, %v1161_v14  ;;  %v1215_v10 = vsel %vm1212_vm2, %v1214_v38, %v1210_v55  ;;  %v1191_v11 = vadd.f32 %v7017_v33, %v1190_v34  ;;  %vm1193_vm4 = vweird.f32 %v7017_v33 }
 0x22e   : > { %v1170_v35 = vsel %vm1167_vm3, %v1169_v44, %v1165_v9  ;;  %v1006_v49 = vadd.f32 1.0, %v6227_v7  ;;  %v1198_v23 = vand.u32 2147483648, %v6941_v27  ;;  %vm1192_vm1 = vweird.f32 %v6941_v27 }
 0x22f   : > { %1352 = vrot.lane.b32.xlu1 %v7028_v22, %s6382_s14  ;;  %v1196_v32 = vand.u32 2147483647, %v6941_v27  ;;  %v7094_v25 = vmul.f32 %v1215_v10, %v6808_v15  ;;  %v7097_v53 = vmul.f32 %v1170_v35, %v6723_v41  ;;  %vm1194_vm5 = vmor %vm1192_vm1, %vm1193_vm4  ;;  %v1228_v29 = vand.u32 2147483648, %v7060_v61 }
 0x230   : > { %1368 = vrot.lane.b32.xlu0 %v7076_v4, %s6382_s14  ;;  %v1195_v24 = vsel %vm1194_vm5, %v7017_v33, %v1191_v11  ;;  %6230 = vrcp.f32 %v1006_v49  ;;  %v1199_v51 = vor.u32 1.1754944e-38, %v1198_v23  ;;  %vm1222_vm8 = vweird.f32 %v7060_v61 }
 0x231   : > { %v6229_v59 = vpop.eup %6228  ;;  %vm1197_vm6 = vcmp.eq.f32.partialorder %v1196_v32, 8.507059e+37  ;;  %v1229_v42 = vor.u32 1.1754944e-38, %v1228_v29  ;;  %v1243_v50 = vand.u32 2147483648, %v1006_v49  ;;  %vm1237_vm13 = vweird.f32 %v1006_v49 }
 0x232   : > { %1370 = vrot.lane.b32.xlu2 %v7069_v37, %s6382_s14  ;;  %v1218_v48 = vmul.f32 %v6229_v59, %v7060_v61  ;;  %v1200_v15 = vsel %vm1197_vm6, %v1199_v51, %v1195_v24  ;;  %vm1223_vm7 = vweird.f32 %v6229_v59  ;;  %v1241_v16 = vand.u32 2147483647, %v1006_v49 }
 0x233   : > { %v7108_v5 = vmul.f32 %v1200_v15, %v6853_v30  ;;  %v1226_v30 = vand.u32 2147483647, %v7060_v61  ;;  %vm1224_vm9 = vmor %vm1222_vm8, %vm1223_vm7  ;;  %v1244_v52 = vor.u32 1.1754944e-38, %v1243_v50  ;;  %v5724_v15 = vld [vmem:[%s11031_s10 + $0x2] sm:$0x3] }
 0x234   : > { %v1219_v41 = vsub.f32 1.0, %v1218_v48  ;;  %vm1242_vm12 = vcmp.eq.f32.partialorder %v1241_v16, 8.507059e+37  ;;  %v1295_v48 = vlaneseq }
 0x235   : > { %vm1227_vm10 = vcmp.eq.f32.partialorder %v1226_v30, 8.507059e+37 }
 0x236   : > { %v6231_v27 = vpop.eup %6230  ;;  %v1220_v33 = vmul.f32 %v6229_v59, %v1219_v41  ;;  %v7263_v51 = vand.u32 127, %v1295_v48 }
 0x237   : > { %1372 = vrot.lane.b32.xlu1 %v7094_v25, %s6382_s14  ;;  %v1233_v12 = vmul.f32 %v6231_v27, %v1006_v49  ;;  %vm1238_vm11 = vweird.f32 %v6231_v27 }
 0x238   : > { %1354 = vrot.lane.b32.xlu0 %v7097_v53, %s6382_s14  ;;  %v1221_v8 = vadd.f32 %v6229_v59, %v1220_v33  ;;  %vm1239_vm14 = vmor %vm1237_vm13, %vm1238_vm11  ;;  %11097 = vst [vmem:[#allocation5_spill] sm:$0xff] %v7263_v51  ;;  %vm1376_vm15 = vcmp.lt.s32.totalorder %v7263_v51, 16  ;;  %vm1669_vm2 = vcmp.lt.s32.totalorder %v7263_v51, 15  ;;  %vm1297_vm3 = vcmp.lt.s32.totalorder %v7263_v51, 17 }
 0x239   : > { %v1234_v19 = vsub.f32 1.0, %v1233_v12  ;;  %v7279_v12 = vperm.slane %v5724_v15, 0  ;;  %vm1872_vm4 = vcmp.lt.s32.totalorder %v7263_v51, 1  ;;  %vm2409_vm1 = vcmp.lt.s32.totalorder %v7263_v51, 113 }
 0x23a   : > { %1663 = vrot.lane.b32.xlu2 %v7069_v37, %s6383_s15  ;;  %v1225_v36 = vsel %vm1224_vm9, %v6229_v59, %v1221_v8  ;;  %v7281_v8 = vperm.slane %v5724_v15, 1  ;;  %vm2206_vm5 = vcmp.lt.s32.totalorder %v7263_v51, 127  ;;  %vm11077_vm6 = vcmp.lt.s32.totalorder %v7263_v51, 111 }
 0x23b   : > { %v1235_v13 = vmul.f32 %v6231_v27, %v1234_v19  ;;  %v1230_v63 = vsel %vm1227_vm10, %v1229_v42, %v1225_v36  ;;  %11098 = vst [vmem:[#allocation6_spill] sm:$0xff] %v7279_v12  ;;  %vm11076_vm7 = vcmp.lt.s32.totalorder %v7263_v51, 112 }
 0x23c   : > { %v7126_v45 = vmul.f32 %v1230_v63, %v6939_v54  ;;  %11099 = vst [vmem:[#allocation7_spill] sm:$0xff] %v7281_v8 }
 0x23d   : > { %v1236_v60 = vadd.f32 %v6231_v27, %v1235_v13 }
 0x23f   : > { %1649 = vrot.lane.b32.xlu1 %v7108_v5, %s6383_s15  ;;  %v1240_v43 = vsel %vm1239_vm14, %v6231_v27, %v1236_v60 }
 0x240   : > { %1647 = vrot.lane.b32.xlu0 %v7097_v53, %s6383_s15  ;;  %v1245_v1 = vsel %vm1242_vm12, %v1244_v52, %v1240_v43 }
 0x241   : > { %v7135_v26 = vmul.f32 %v1245_v1, %v7012_v46 }
 0x242   : > { %1356 = vrot.lane.b32.xlu2 %v7108_v5, %s6382_s14 }
 0x247   : > { %1275 = vrot.lane.b32.xlu1 %v7108_v5, %s6384_s16 }
 0x248   : > { %1665 = vrot.lane.b32.xlu0 %v7094_v25, %s6383_s15 }
 0x24a   : > { %1289 = vrot.lane.b32.xlu2 %v7069_v37, %s6384_s16 }
 0x24f   : > { %1358 = vrot.lane.b32.xlu1 %v7126_v45, %s6382_s14 }
 0x250   : > { %1291 = vrot.lane.b32.xlu0 %v7094_v25, %s6384_s16 }
 0x252   : > { %1271 = vrot.lane.b32.xlu2 %v7028_v22, %s6384_s16 }
 0x257   : > { %1661 = vrot.lane.b32.xlu1 %v7076_v4, %s6383_s15 }
 0x258   : > { %1374 = vrot.lane.b32.xlu0 %v7135_v26, %s6382_s14 }
 0x25a   : > { %1657 = vrot.lane.b32.xlu2 %v6836_v3, %s6383_s15 }
 0x25f   : > { %1643 = vrot.lane.b32.xlu1 %v6959_v58, %s6383_s15 }
 0x260   : > { %1273 = vrot.lane.b32.xlu0 %v7097_v53, %s6384_s16 }
 0x262   : > { %1639 = vrot.lane.b32.xlu2 %v6963_v31, %s6383_s15 }
 0x267   : > { %1287 = vrot.lane.b32.xlu1 %v7076_v4, %s6384_s16 }
 0x268   : > { %1659 = vrot.lane.b32.xlu0 %v7024_v47, %s6383_s15 }
 0x26a   : > { %1283 = vrot.lane.b32.xlu2 %v6836_v3, %s6384_s16 }
 0x26c   : > { %v7155_v54 = vpop.permute.xlu2 %1344 }
 0x26f   : > { %1269 = vrot.lane.b32.xlu1 %v6959_v58, %s6384_s16 }
 0x270   : > { %1641 = vrot.lane.b32.xlu0 %v7031_v56, %s6383_s15 }
 0x272   : > { %1265 = vrot.lane.b32.xlu2 %v6963_v31, %s6384_s16 }
 0x274   : > { %v7163_v46 = vpop.permute.xlu2 %1364 }
 0x277   : > { %1655 = vrot.lane.b32.xlu1 %v6977_v40, %s6383_s15 }
 0x278   : > { %1285 = vrot.lane.b32.xlu0 %v7024_v47, %s6384_s16 }
 0x27a   : > { %1279 = vrot.lane.b32.xlu2 %v6918_v17, %s6384_s16 }
 0x27c   : > { %v7171_v57 = vpop.permute.xlu2 %1350 }
 0x27f   : > { %1637 = vrot.lane.b32.xlu1 %v6877_v28, %s6383_s15 }
 0x280   : > { %1267 = vrot.lane.b32.xlu0 %v7031_v56, %s6384_s16 }
 0x282   : > { %1667 = vrot.lane.b32.xlu2 %v7135_v26, %s6383_s15 }
 0x284   : > { %v7179_v39 = vpop.permute.xlu2 %1645 }
 0x287   : > { %1281 = vrot.lane.b32.xlu1 %v6977_v40, %s6384_s16 }
 0x288   : > { %1653 = vrot.lane.b32.xlu0 %v6918_v17, %s6383_s15 }
 0x289   : > { %v7187_v61 = vpop.permute.xlu1 %1360 }
 0x28a   : > { %1277 = vrot.lane.b32.xlu2 %v7126_v45, %s6384_s16 }
 0x28c   : > { %v7189_v20 = vpop.permute.xlu2 %1370 }
 0x28f   : > { %1868 = vrot.lane.b32.xlu1 %v7094_v25, %s6385_s18 }
 0x290   : > { %1263 = vrot.lane.b32.xlu0 %v6877_v28, %s6384_s16 }
 0x291   : > { %v7197_v6 = vpop.permute.xlu1 %1346 }
 0x292   : > { %1852 = vrot.lane.b32.xlu2 %v7108_v5, %s6385_s18  ;;  %v7201_v14 = vpop.permute.xlu0 %1362 }
 0x294   : > { %v7199_v21 = vpop.permute.xlu2 %1663 }
 0x297   : > { %1293 = vrot.lane.b32.xlu1 %v7135_v26, %s6384_s16 }
 0x298   : > { %1651 = vrot.lane.b32.xlu0 %v7126_v45, %s6383_s15 }
 0x299   : > { %v7209_v62 = vpop.permute.xlu1 %1366 }
 0x29a   : > { %1866 = vrot.lane.b32.xlu2 %v7069_v37, %s6385_s18  ;;  %v7211_v2 = vpop.permute.xlu0 %1348 }
 0x29b   : > { %v1387_v15 = vsel %vm1376_vm15, %v7163_v46, %v7211_v2 }
 0x29c   : > { %v1357_v18 = vpop.permute.xlu2 %1356 }
 0x29f   : > { %1848 = vrot.lane.b32.xlu1 %v7028_v22, %s6385_s18 }
 0x2a0   : > { %1850 = vrot.lane.b32.xlu0 %v7097_v53, %s6385_s18 }
 0x2a1   : > { %v1353_v0 = vpop.permute.xlu1 %1352 }
 0x2a2   : > { %1846 = vrot.lane.b32.xlu2 %v6959_v58, %s6385_s18  ;;  %v1369_v55 = vpop.permute.xlu0 %1368 }
 0x2a3   : > { %v1389_v43 = vsel %vm1376_vm15, %v1369_v55, %v1353_v0  ;;  %v1381_v1 = vsel %vm1376_vm15, %v1353_v0, %v1369_v55  ;;  %v1380_v0 = vsel %vm1376_vm15, %v7171_v57, %v7209_v62 }
 0x2a4   : > { %v7219_v34 = vpop.permute.xlu2 %1289  ;;  %v1408_v48 = vmul.f32 %v7279_v12, %v1389_v43  ;;  %v1409_v55 = vmul.f32 %v7281_v8, %v1381_v1 }
 0x2a7   : > { %1862 = vrot.lane.b32.xlu1 %v7024_v47, %s6385_s18 }
 0x2a8   : > { %1864 = vrot.lane.b32.xlu0 %v7076_v4, %s6385_s18 }
 0x2a9   : > { %v1373_v7 = vpop.permute.xlu1 %1372 }
 0x2aa   : > { %1860 = vrot.lane.b32.xlu2 %v6836_v3, %s6385_s18  ;;  %v1355_v38 = vpop.permute.xlu0 %1354  ;;  %v1391_v30 = vsel %vm1376_vm15, %v1373_v7, %v1357_v18  ;;  %v1383_v13 = vsel %vm1376_vm15, %v1357_v18, %v1373_v7  ;;  %v1388_v7 = vsel %vm1376_vm15, %v7209_v62, %v7171_v57  ;;  %v1386_v57 = vsel %vm1376_vm15, %v7201_v14, %v7197_v6 }
 0x2ab   : > { %v1390_v63 = vsel %vm1376_vm15, %v7189_v20, %v1355_v38  ;;  %v1412_v60 = vmul.f32 %v7279_v12, %v1391_v30  ;;  %v1382_v50 = vsel %vm1376_vm15, %v1355_v38, %v7189_v20  ;;  %v1413_v16 = vmul.f32 %v7281_v8, %v1383_v13 }
 0x2ac   : > { %v7227_v9 = vpop.permute.xlu2 %1271  ;;  %v1410_v52 = vmul.f32 %v7279_v12, %v1390_v63  ;;  %v1411_v20 = vmul.f32 %v7281_v8, %v1382_v50  ;;  %v1404_v62 = vmul.f32 %v7279_v12, %v1387_v15  ;;  %v1378_v30 = vsel %vm1376_vm15, %v7197_v6, %v7201_v14  ;;  %v5725_v50 = vld [vmem:[%s11022_s1 + $0x40] sm:$0xff]  ;;  %v5728_v15 = vld [vmem:[%s11022_s1 + $0x58] sm:$0xff] }
 0x2ad   : > { %v1377_v6 = vsel %vm1376_vm15, %v7155_v54, %v7187_v61  ;;  %v1403_v14 = vmul.f32 %v7281_v8, %v1378_v30 }
 0x2af   : > { %1842 = vrot.lane.b32.xlu1 %v6963_v31, %s6385_s18 }
 0x2b0   : > { %1844 = vrot.lane.b32.xlu0 %v7031_v56, %s6385_s18 }
 0x2b1   : > { %v7235_v44 = vpop.permute.xlu1 %1649 }
 0x2b2   : > { %1840 = vrot.lane.b32.xlu2 %v6877_v28, %s6385_s18  ;;  %v7239_v35 = vpop.permute.xlu0 %1647 }
 0x2b4   : > { %v7237_v10 = vpop.permute.xlu2 %1657 }
 0x2b7   : > { %1856 = vrot.lane.b32.xlu1 %v6918_v17, %s6385_s18 }
 0x2b8   : > { %1858 = vrot.lane.b32.xlu0 %v6977_v40, %s6385_s18 }
 0x2b9   : > { %v7247_v11 = vpop.permute.xlu1 %1275 }
 0x2ba   : > { %2403 = vrot.lane.b32.xlu2 %v7069_v37, %s6386_s19  ;;  %v7251_v59 = vpop.permute.xlu0 %1665 }
 0x2bc   : > { %v7249_v49 = vpop.permute.xlu2 %1639 }
 0x2bf   : > { %2389 = vrot.lane.b32.xlu1 %v7108_v5, %s6386_s19 }
 0x2c0   : > { %2405 = vrot.lane.b32.xlu0 %v7094_v25, %s6386_s19 }
 0x2c1   : > { %v1359_v23 = vpop.permute.xlu1 %1358 }
 0x2c2   : > { %2385 = vrot.lane.b32.xlu2 %v7028_v22, %s6386_s19  ;;  %v7261_v24 = vpop.permute.xlu0 %1291 }
 0x2c4   : > { %v7259_v32 = vpop.permute.xlu2 %1283 }
 0x2c7   : > { %2186 = vrot.lane.b32.xlu1 %v7108_v5, %s6387_s20 }
 0x2c8   : > { %2387 = vrot.lane.b32.xlu0 %v7097_v53, %s6386_s19 }
 0x2c9   : > { %v7274_v41 = vpop.permute.xlu1 %1661 }
 0x2ca   : > { %2200 = vrot.lane.b32.xlu2 %v7069_v37, %s6387_s20  ;;  %v1375_v33 = vpop.permute.xlu0 %1374 }
 0x2cb   : > { %v1392_v29 = vsel %vm1376_vm15, %v1375_v33, %v1359_v23  ;;  %v1384_v19 = vsel %vm1376_vm15, %v1359_v23, %v1375_v33  ;;  %v1406_v33 = vmul.f32 %v7279_v12, %v1388_v7 }
 0x2cc   : > { %v7276_v27 = vpop.permute.xlu2 %1265  ;;  %v1414_v36 = vmul.f32 %v7279_v12, %v1392_v29  ;;  %v1415_v42 = vmul.f32 %v7281_v8, %v1384_v19  ;;  %v1379_v29 = vsel %vm1376_vm15, %v7211_v2, %v7163_v46  ;;  %v1407_v19 = vmul.f32 %v7281_v8, %v1380_v0 }
 0x2cd   : > { %v1385_v46 = vsel %vm1376_vm15, %v7187_v61, %v7155_v54  ;;  %v1402_v2 = vmul.f32 %v7279_v12, %v1386_v57  ;;  %v1401_v54 = vmul.f32 %v7281_v8, %v1377_v6  ;;  %v5729_v57 = vld [vmem:[%s11022_s1 + $0x60] sm:$0xff] }
 0x2ce   : > { %1457 = vmatpush.msra.mxu2 %v1414_v36  ;;  %1498 = vmatpush.msra.mxu3 %v1415_v42  ;;  %v1405_v36 = vmul.f32 %v7281_v8, %v1379_v29  ;;  %v5765_v6 = vld [vmem:[%s11031_s10 + $0x4] sm:$0x3] }
 0x2cf   : > { %2401 = vrot.lane.b32.xlu1 %v7076_v4, %s6386_s19 }
 0x2d0   : > { %2202 = vrot.lane.b32.xlu0 %v7094_v25, %s6387_s20  ;;  %1458 = vmatpush.msra.mxu2 %v1412_v60  ;;  %v1400_v60 = vmul.f32 %v7279_v12, %v1385_v46  ;;  %v5730_v46 = vld [vmem:[%s11022_s1 + $0x68] sm:$0xff] }
 0x2d1   : > { %1499 = vmatpush.msra.mxu3 %v1413_v16  ;;  %v7313_v18 = vpop.permute.xlu1 %1643 }
 0x2d2   : > { %2182 = vrot.lane.b32.xlu2 %v7028_v22, %s6387_s20  ;;  %v7321_v23 = vpop.permute.xlu0 %1273  ;;  %1459 = vmatpush.msra.mxu2 %v1410_v52  ;;  %v5726_v52 = vld [vmem:[%s11022_s1 + $0x48] sm:$0xff] }
 0x2d3   : > { %1500 = vmatpush.msra.mxu3 %v1411_v20 }
 0x2d4   : > { %v7319_v38 = vpop.permute.xlu2 %1279  ;;  %1460 = vmatpush.msra.mxu2 %v1408_v48  ;;  %v5727_v48 = vld [vmem:[%s11022_s1 + $0x50] sm:$0xff] }
 0x2d5   : > { %1501 = vmatpush.msra.mxu3 %v1409_v55 }
 0x2d6   : > { %1461 = vmatpush.msra.mxu2 %v1406_v33 }
 0x2d7   : > { %1502 = vmatpush.msra.mxu3 %v1407_v19  ;;  %1854 = vrot.lane.b32.xlu1 %v7126_v45, %s6385_s18 }
 0x2d8   : > { %2184 = vrot.lane.b32.xlu0 %v7097_v53, %s6387_s20  ;;  %1462 = vmatpush.msra.mxu2 %v1404_v62 }
 0x2d9   : > { %1503 = vmatpush.msra.mxu3 %v1405_v36  ;;  %v7363_v42 = vpop.permute.xlu1 %1287 }
 0x2da   : > { %2397 = vrot.lane.b32.xlu2 %v6836_v3, %s6386_s19  ;;  %v7369_v63 = vpop.permute.xlu0 %1659  ;;  %1463 = vmatpush.msra.mxu2 %v1402_v2 }
 0x2db   : > { %1504 = vmatpush.msra.mxu3 %v1403_v14  ;;  %v1314_v14 = vld [vmem:[%s11031_s10] sm:$0x3] }
 0x2dc   : > { %v7367_v13 = vpop.permute.xlu2 %1667  ;;  %1464 = vmatpush.msra.mxu2 %v1400_v60 }
 0x2dd   : > { %1505 = vmatpush.msra.mxu3 %v1401_v54  ;;  %5733 = vmatmul.msk.f32.vlgmr.msra.gmra.mxu2 %vm492_vm0, %v5725_v50  ;;  %v7475_v54 = vperm.slane %v1314_v14, 0 }
 0x2de   : > { %5741 = vmatmul.msk.f32.vlgmr.msra.gmra.mxu3 %vm492_vm0, %v5725_v50  ;;  %v7472_v50 = vperm.slane %v5765_v6, 0 }
 0x2df   : > { %2383 = vrot.lane.b32.xlu1 %v6959_v58, %s6386_s19  ;;  %11105 = vst [vmem:[#allocation13_spill] sm:$0xff] %v7475_v54 }
 0x2e0   : > { %1870 = vrot.lane.b32.xlu0 %v7135_v26, %s6385_s18  ;;  %11104 = vst [vmem:[#allocation12_spill] sm:$0xff] %v7472_v50 }
 0x2e1   : > { %v7382_v61 = vpop.permute.xlu1 %1269 }
 0x2e2   : > { %2379 = vrot.lane.b32.xlu2 %v6963_v31, %s6386_s19  ;;  %v7386_v43 = vpop.permute.xlu0 %1641 }
 0x2e4   : > { %v1278_v16 = vpop.permute.xlu2 %1277 }
 0x2e5   : > { %5734 = vmatmul.msk.f32.gmra.mxu2 %vm492_vm0, %v5726_v52 }
 0x2e6   : > { %5742 = vmatmul.msk.f32.gmra.mxu3 %vm492_vm0, %v5726_v52  ;;  %v7477_v52 = vperm.slane %v1314_v14, 1  ;;  %v1684_v14 = vsel %vm1669_vm2, %v7251_v59, %v7235_v44 }
 0x2e7   : > { %2198 = vrot.lane.b32.xlu1 %v7076_v4, %s6387_s20 }
 0x2e8   : > { %2399 = vrot.lane.b32.xlu0 %v7024_v47, %s6386_s19  ;;  %11106 = vst [vmem:[#allocation14_spill] sm:$0xff] %v7477_v52 }
 0x2e9   : > { %v7397_v1 = vpop.permute.xlu1 %1655 }
 0x2ea   : > { %2194 = vrot.lane.b32.xlu2 %v6836_v3, %s6387_s20  ;;  %v7403_v7 = vpop.permute.xlu0 %1285 }
 0x2ec   : > { %v7401_v20 = vpop.permute.xlu2 %1852 }
 0x2ed   : > { %5735 = vmatmul.msk.f32.gmra.mxu2 %vm492_vm0, %v5727_v48 }
 0x2ee   : > { %5743 = vmatmul.msk.f32.gmra.mxu3 %vm492_vm0, %v5727_v48 }
 0x2ef   : > { %2180 = vrot.lane.b32.xlu1 %v6959_v58, %s6387_s20 }
 0x2f0   : > { %2381 = vrot.lane.b32.xlu0 %v7031_v56, %s6386_s19 }
 0x2f1   : > { %v7414_v0 = vpop.permute.xlu1 %1637 }
 0x2f2   : > { %2176 = vrot.lane.b32.xlu2 %v6963_v31, %s6387_s20  ;;  %v7418_v55 = vpop.permute.xlu0 %1267 }
 0x2f4   : > { %v7423_v33 = vpop.permute.xlu2 %1866 }
 0x2f5   : > { %11100 = vst [vmem:[#allocation8_spill] sm:$0xff] %v7423_v33  ;;  %5736 = vmatmul.msk.f32.gmra.mxu2 %vm492_vm0, %v5728_v15 }
 0x2f6   : > { %5744 = vmatmul.msk.f32.gmra.mxu3 %vm492_vm0, %v5728_v15  ;;  %v5731_v15 = vld [vmem:[%s11022_s1 + $0x70] sm:$0xff] }
 0x2f7   : > { %2395 = vrot.lane.b32.xlu1 %v6977_v40, %s6386_s19 }
 0x2f8   : > { %2196 = vrot.lane.b32.xlu0 %v7024_v47, %s6387_s20 }
 0x2f9   : > { %v7431_v29 = vpop.permute.xlu1 %1281 }
 0x2fa   : > { %2190 = vrot.lane.b32.xlu2 %v6918_v17, %s6387_s20  ;;  %v7435_v19 = vpop.permute.xlu0 %1653 }
 0x2fc   : > { %v7440_v62 = vpop.permute.xlu2 %1846 }
 0x2fd   : > { %11101 = vst [vmem:[#allocation9_spill] sm:$0xff] %v7440_v62  ;;  %5737 = vmatmul.msk.f32.gmra.mxu2 %vm492_vm0, %v5729_v57 }
 0x2fe   : > { %5745 = vmatmul.msk.f32.gmra.mxu3 %vm492_vm0, %v5729_v57  ;;  %v7484_v57 = vperm.slane %v5765_v6, 1 }
 0x2ff   : > { %2377 = vrot.lane.b32.xlu1 %v6877_v28, %s6386_s19 }
 0x300   : > { %2178 = vrot.lane.b32.xlu0 %v7031_v56, %s6387_s20  ;;  %11107 = vst [vmem:[#allocation15_spill] sm:$0xff] %v7484_v57 }
 0x301   : > { %v7448_v30 = vpop.permute.xlu1 %1868 }
 0x302   : > { %11102 = vst [vmem:[#allocation10_spill] sm:$0xff] %v7448_v30  ;;  %2407 = vrot.lane.b32.xlu2 %v7135_v26, %s6386_s19  ;;  %v7452_v36 = vpop.permute.xlu0 %1263  ;;  %v1683_v30 = vsel %vm1669_vm2, %v7199_v21, %v7239_v35 }
 0x304   : > { %v7459_v2 = vpop.permute.xlu2 %1860 }
 0x305   : > { %5738 = vmatmul.msk.f32.gmra.mxu2 %vm492_vm0, %v5730_v46  ;;  %11103 = vst [vmem:[#allocation11_spill] sm:$0xff] %v7459_v2 }
 0x306   : > { %5746 = vmatmul.msk.f32.gmra.mxu3 %vm492_vm0, %v5730_v46 }
 0x307   : > { %2192 = vrot.lane.b32.xlu1 %v6977_v40, %s6387_s20 }
 0x308   : > { %2393 = vrot.lane.b32.xlu0 %v6918_v17, %s6386_s19 }
 0x309   : > { %v1294_v60 = vpop.permute.xlu1 %1293 }
 0x30a   : > { %2188 = vrot.lane.b32.xlu2 %v7126_v45, %s6387_s20  ;;  %v1652_v48 = vpop.permute.xlu0 %1651  ;;  %v1313_v46 = vsel %vm1297_vm3, %v1294_v60, %v1278_v16  ;;  %v1305_v8 = vsel %vm1297_vm3, %v1278_v16, %v1294_v60  ;;  %v1676_v60 = vsel %vm1669_vm2, %v7235_v44, %v7251_v59  ;;  %v1675_v44 = vsel %vm1669_vm2, %v7239_v35, %v7199_v21 }
 0x30b   : > { %v1685_v12 = vsel %vm1669_vm2, %v7367_v13, %v1652_v48  ;;  %v1677_v6 = vsel %vm1669_vm2, %v1652_v48, %v7367_v13  ;;  %v1334_v2 = vmul.f32 %v7475_v54, %v1313_v46  ;;  %v1335_v62 = vmul.f32 %v7477_v52, %v1305_v8 }
 0x30c   : > { %v1707_v33 = vmul.f32 %v7472_v50, %v1685_v12  ;;  %v1708_v16 = vmul.f32 %v7484_v57, %v1677_v6  ;;  %v1312_v12 = vsel %vm1297_vm3, %v7261_v24, %v7247_v11  ;;  %v1304_v8 = vsel %vm1297_vm3, %v7247_v11, %v7261_v24  ;;  %v7549_v48 = vpop.permute.xlu2 %1840 }
 0x30d   : > { %5739 = vmatmul.msk.f32.gmra.mxu2 %vm492_vm0, %v5731_v15  ;;  %1563 = vmatpush.msrb.mxu0 %v1334_v2  ;;  %v1705_v59 = vmul.f32 %v7472_v50, %v1684_v14  ;;  %v1311_v13 = vsel %vm1297_vm3, %v7219_v34, %v7321_v23  ;;  %v1682_v11 = vsel %vm1669_vm2, %v7274_v41, %v7179_v39 }
 0x30e   : > { %5747 = vmatmul.msk.f32.gmra.mxu3 %vm492_vm0, %v5731_v15  ;;  %1750 = vmatpush.msrb.mxu2 %v1707_v33  ;;  %v1706_v24 = vmul.f32 %v7484_v57, %v1676_v60  ;;  %v1703_v21 = vmul.f32 %v7472_v50, %v1683_v30  ;;  %v1303_v35 = vsel %vm1297_vm3, %v7321_v23, %v7219_v34 }
 0x30f   : > { %1791 = vmatpush.msrb.mxu3 %v1708_v16  ;;  %1604 = vmatpush.msrb.mxu1 %v1335_v62  ;;  %v1332_v33 = vmul.f32 %v7475_v54, %v1312_v12  ;;  %v1333_v2 = vmul.f32 %v7477_v52, %v1304_v8  ;;  %v1674_v62 = vsel %vm1669_vm2, %v7179_v39, %v7274_v41  ;;  %v5732_v16 = vld [vmem:[%s11022_s1 + $0x78] sm:$0xff] }
 0x310   : > { %2174 = vrot.lane.b32.xlu0 %v6877_v28, %s6387_s20  ;;  %1751 = vmatpush.msrb.mxu2 %v1705_v59  ;;  %v1704_v34 = vmul.f32 %v7484_v57, %v1675_v44  ;;  %v1330_v30 = vmul.f32 %v7475_v54, %v1311_v13  ;;  %v1701_v15 = vmul.f32 %v7472_v50, %v1682_v11 }
 0x311   : > { %1792 = vmatpush.msrb.mxu3 %v1706_v24  ;;  %2811 = vrot.lane.b32.xlu1 %v7094_v25, %s11074_s24  ;;  %v7554_v23 = vpop.permute.xlu1 %1848  ;;  %v1331_v39 = vmul.f32 %v7477_v52, %v1303_v35  ;;  %v1310_v41 = vsel %vm1297_vm3, %v7363_v42, %v7227_v9  ;;  %v1302_v14 = vsel %vm1297_vm3, %v7227_v9, %v7363_v42 }
 0x312   : > { %v7558_v46 = vpop.permute.xlu0 %1850  ;;  %1564 = vmatpush.msrb.mxu0 %v1332_v33  ;;  %1605 = vmatpush.msrb.mxu1 %v1333_v2  ;;  %v1702_v6 = vmul.f32 %v7484_v57, %v1674_v62  ;;  %v1681_v60 = vsel %vm1669_vm2, %v7369_v63, %v7313_v18  ;;  %v1673_v12 = vsel %vm1669_vm2, %v7313_v18, %v7369_v63 }
 0x313   : > { %1752 = vmatpush.msrb.mxu2 %v1703_v21  ;;  %1793 = vmatpush.msrb.mxu3 %v1704_v34  ;;  %v1309_v9 = vsel %vm1297_vm3, %v7403_v7, %v7382_v61  ;;  %v1680_v42 = vsel %vm1669_vm2, %v7237_v10, %v7386_v43  ;;  %v1328_v8 = vmul.f32 %v7475_v54, %v1310_v41 }
 0x314   : > { %1565 = vmatpush.msrb.mxu0 %v1330_v30  ;;  %1606 = vmatpush.msrb.mxu1 %v1331_v39  ;;  %v1329_v44 = vmul.f32 %v7477_v52, %v1302_v14  ;;  %v1301_v18 = vsel %vm1297_vm3, %v7382_v61, %v7403_v7  ;;  %v1699_v63 = vmul.f32 %v7472_v50, %v1681_v60  ;;  %v5766_v14 = vld [vmem:[%s11022_s1 + $0x80] sm:$0xff] }
 0x315   : > { %1753 = vmatpush.msrb.mxu2 %v1701_v15  ;;  %1794 = vmatpush.msrb.mxu3 %v1702_v6  ;;  %v1700_v59 = vmul.f32 %v7484_v57, %v1673_v12  ;;  %v1672_v13 = vsel %vm1669_vm2, %v7386_v43, %v7237_v10  ;;  %v1326_v11 = vmul.f32 %v7475_v54, %v1309_v9  ;;  %v1336_v60 = vld [vmem:[%s11022_s1] sm:$0xff] }
 0x316   : > { %5740 = vmatmul.msk.f32.gmra.mxu2 %vm492_vm0, %v5732_v16  ;;  %5748 = vmatmul.msk.f32.gmra.mxu3 %vm492_vm0, %v5732_v16  ;;  %v1697_v24 = vmul.f32 %v7472_v50, %v1680_v42  ;;  %v1308_v61 = vsel %vm1297_vm3, %v7259_v32, %v7418_v55  ;;  %v1327_v7 = vmul.f32 %v7477_v52, %v1301_v18  ;;  %v5767_v42 = vld [vmem:[%s11022_s1 + $0x88] sm:$0xff] }
 0x317   : > { %1566 = vmatpush.msrb.mxu0 %v1328_v8  ;;  %1607 = vmatpush.msrb.mxu1 %v1329_v44  ;;  %v1300_v10 = vsel %vm1297_vm3, %v7418_v55, %v7259_v32  ;;  %v1679_v43 = vsel %vm1669_vm2, %v7397_v1, %v7249_v49  ;;  %v1698_v21 = vmul.f32 %v7484_v57, %v1672_v13  ;;  %v1337_v8 = vld [vmem:[%s11022_s1 + $0x8] sm:$0xff] }
 0x318   : > { %1754 = vmatpush.msrb.mxu2 %v1699_v63  ;;  %1795 = vmatpush.msrb.mxu3 %v1700_v59  ;;  %v1671_v35 = vsel %vm1669_vm2, %v7249_v49, %v7397_v1  ;;  %v1307_v32 = vsel %vm1297_vm3, %v7431_v29, %v7276_v27  ;;  %v1324_v2 = vmul.f32 %v7475_v54, %v1308_v61  ;;  %v7642_v1 = vpop.permute.xlu2 %2403  ;;  %v5768_v63 = vld [vmem:[%s11022_s1 + $0x90] sm:$0xff]  ;;  %v1339_v61 = vld [vmem:[%s11022_s1 + $0x18] sm:$0xff] }
 0x319   : > { %2391 = vrot.lane.b32.xlu0 %v7126_v45, %s6386_s19  ;;  %1567 = vmatpush.msrb.mxu0 %v1326_v11  ;;  %v7625_v33 = vpop.permute.xlu1 %1862  ;;  %v1299_v62 = vsel %vm1297_vm3, %v7276_v27, %v7431_v29  ;;  %v1678_v49 = vsel %vm1669_vm2, %v7435_v19, %v7414_v0  ;;  %v1325_v34 = vmul.f32 %v7477_v52, %v1300_v10  ;;  %v1338_v59 = vld [vmem:[%s11022_s1 + $0x10] sm:$0xff]  ;;  %v5769_v11 = vld [vmem:[%s11022_s1 + $0x98] sm:$0xff]  ;;  %v1340_v10 = vld [vmem:[%s11022_s1 + $0x20] sm:$0xff] }
 0x31a   : > { %1608 = vmatpush.msrb.mxu1 %v1327_v7  ;;  %1755 = vmatpush.msrb.mxu2 %v1697_v24  ;;  %v7631_v55 = vpop.permute.xlu0 %1864  ;;  %v1695_v30 = vmul.f32 %v7472_v50, %v1679_v43  ;;  %v1670_v27 = vsel %vm1669_vm2, %v7414_v0, %v7435_v19  ;;  %v1696_v29 = vmul.f32 %v7484_v57, %v1671_v35  ;;  %v1341_v35 = vld [vmem:[%s11022_s1 + $0x28] sm:$0xff] }
 0x31b   : > { %1796 = vmatpush.msrb.mxu3 %v1698_v21  ;;  %2204 = vrot.lane.b32.xlu1 %v7135_v26, %s6387_s20  ;;  %v1322_v15 = vmul.f32 %v7475_v54, %v1307_v32  ;;  %v1323_v39 = vmul.f32 %v7477_v52, %v1299_v62  ;;  %v1693_v41 = vmul.f32 %v7472_v50, %v1678_v49  ;;  %v5790_v49 = vld [vmem:[%s11031_s10 + $0x6] sm:$0x3]  ;;  %v5870_v50 = vld [vmem:[%s11022_s1 + $0x1a8] sm:$0xff] }
 0x31c   : > { %2795 = vrot.lane.b32.xlu2 %v7108_v5, %s11074_s24  ;;  %1568 = vmatpush.msrb.mxu0 %v1324_v2  ;;  %v1306_v0 = vsel %vm1297_vm3, %v7319_v38, %v7452_v36  ;;  %v1694_v19 = vmul.f32 %v7484_v57, %v1670_v27  ;;  %v1298_v6 = vsel %vm1297_vm3, %v7452_v36, %v7319_v38  ;;  %v7829_v27 = vperm.slane %v5790_v49, 1 }
 0x31d   : > { %1609 = vmatpush.msrb.mxu1 %v1325_v34  ;;  %1756 = vmatpush.msrb.mxu2 %v1695_v30  ;;  %v1320_v16 = vmul.f32 %v7475_v54, %v1306_v0  ;;  %v1321_v12 = vmul.f32 %v7477_v52, %v1298_v6  ;;  %v1342_v34 = vld [vmem:[%s11022_s1 + $0x30] sm:$0xff]  ;;  %v7827_v30 = vperm.slane %v5790_v49, 0 }
 0x31e   : > { %1797 = vmatpush.msrb.mxu3 %v1696_v29  ;;  %1569 = vmatpush.msrb.mxu0 %v1322_v15  ;;  %11109 = vst [vmem:[#allocation17_spill] sm:$0xff] %v7829_v27  ;;  %v11110_v15 = vld [vmem:[#allocation10_spill] sm:$0xff] }
 0x31f   : > { %1610 = vmatpush.msrb.mxu1 %v1323_v39  ;;  %1757 = vmatpush.msrb.mxu2 %v1693_v41  ;;  %11108 = vst [vmem:[#allocation16_spill] sm:$0xff] %v7827_v30  ;;  %v1887_v39 = vsel %vm1872_vm4, %v11110_v15, %v7401_v20  ;;  %v1879_v0 = vsel %vm1872_vm4, %v7401_v20, %v11110_v15 }
 0x320   : > { %1798 = vmatpush.msrb.mxu3 %v1694_v19  ;;  %5774 = vmatmul.msk.f32.vlgmr.msrb.gmra.mxu2 %vm492_vm0, %v5766_v14  ;;  %v7686_v36 = vpop.permute.xlu2 %2385 }
 0x321   : > { %5782 = vmatmul.msk.f32.vlgmr.msrb.gmra.mxu3 %vm492_vm0, %v5766_v14  ;;  %2084 = vmatpush.msra.mxu2 %v7126_v45  ;;  %v7678_v9 = vpop.permute.xlu1 %1842 }
 0x322   : > { %2125 = vmatpush.msra.mxu3 %v7135_v26  ;;  %1570 = vmatpush.msrb.mxu0 %v1320_v16  ;;  %v7681_v38 = vpop.permute.xlu0 %1844  ;;  %v11111_v16 = vld [vmem:[#allocation8_spill] sm:$0xff] }
 0x323   : > { %1611 = vmatpush.msrb.mxu1 %v1321_v12  ;;  %5749 = vmatmul.msk.f32.vlgmr.msrb.gmra.mxu0 %vm492_vm0, %v1336_v60  ;;  %v1878_v12 = vsel %vm1872_vm4, %v7558_v46, %v11111_v16 }
 0x324   : > { %5757 = vmatmul.msk.f32.vlgmr.msrb.gmra.mxu1 %vm492_vm0, %v1336_v60  ;;  %2085 = vmatpush.msra.mxu2 %v7108_v5  ;;  %v1886_v60 = vsel %vm1872_vm4, %v11111_v16, %v7558_v46  ;;  %v1909_v46 = vmul.f32 %v7829_v27, %v1879_v0 }
 0x325   : > { %2126 = vmatpush.msra.mxu3 %v7094_v25  ;;  %2809 = vrot.lane.b32.xlu0 %v7069_v37, %s11074_s24 }
 0x326   : > { %2086 = vmatpush.msra.mxu2 %v7097_v53  ;;  %2793 = vrot.lane.b32.xlu1 %v7097_v53, %s11074_s24 }
 0x327   : > { %2127 = vmatpush.msra.mxu3 %v7069_v37  ;;  %2592 = vrot.lane.b32.xlu2 %v7108_v5, %s11072_s25 }
 0x328   : > { %2087 = vmatpush.msra.mxu2 %v7028_v22  ;;  %v7722_v5 = vpop.permute.xlu2 %2200 }
 0x329   : > { %2128 = vmatpush.msra.mxu3 %v7076_v4  ;;  %5775 = vmatmul.msk.f32.gmra.mxu2 %vm492_vm0, %v5767_v42  ;;  %v7706_v44 = vpop.permute.xlu1 %1856 }
 0x32a   : > { %5783 = vmatmul.msk.f32.gmra.mxu3 %vm492_vm0, %v5767_v42  ;;  %2088 = vmatpush.msra.mxu2 %v6959_v58  ;;  %v7710_v18 = vpop.permute.xlu0 %1858  ;;  %v5773_v42 = vld [vmem:[%s11022_s1 + $0xb8] sm:$0xff] }
 0x32b   : > { %2129 = vmatpush.msra.mxu3 %v7024_v47  ;;  %5750 = vmatmul.msk.f32.gmra.mxu0 %vm492_vm0, %v1337_v8 }
 0x32c   : > { %5758 = vmatmul.msk.f32.gmra.mxu1 %vm492_vm0, %v1337_v8  ;;  %2089 = vmatpush.msra.mxu2 %v7031_v56  ;;  %v1908_v8 = vmul.f32 %v7827_v30, %v1887_v39 }
 0x32d   : > { %2130 = vmatpush.msra.mxu3 %v6836_v3  ;;  %2791 = vrot.lane.b32.xlu0 %v7028_v22, %s11074_s24 }
 0x32e   : > { %2090 = vmatpush.msra.mxu2 %v6963_v31  ;;  %2608 = vrot.lane.b32.xlu1 %v7094_v25, %s11072_s25 }
 0x32f   : > { %2131 = vmatpush.msra.mxu3 %v6977_v40  ;;  %2807 = vrot.lane.b32.xlu2 %v7076_v4, %s11074_s24 }
 0x330   : > { %2091 = vmatpush.msra.mxu2 %v6877_v28  ;;  %v7752_v24 = vpop.permute.xlu2 %2182 }
 0x331   : > { %2132 = vmatpush.msra.mxu3 %v6918_v17  ;;  %5776 = vmatmul.msk.f32.gmra.mxu2 %vm492_vm0, %v5768_v63  ;;  %v7736_v25 = vpop.permute.xlu1 %2389 }
 0x332   : > { %5784 = vmatmul.msk.f32.gmra.mxu3 %vm492_vm0, %v5768_v63  ;;  %v7739_v13 = vpop.permute.xlu0 %2405  ;;  %v1877_v63 = vsel %vm1872_vm4, %v7554_v23, %v7631_v55 }
 0x333   : > { %5751 = vmatmul.msk.f32.gmra.mxu0 %vm492_vm0, %v1338_v59  ;;  %v1905_v49 = vmul.f32 %v7829_v27, %v1877_v63 }
 0x334   : > { %5759 = vmatmul.msk.f32.gmra.mxu1 %vm492_vm0, %v1338_v59  ;;  %v1343_v59 = vld [vmem:[%s11022_s1 + $0x38] sm:$0xff] }
 0x335   : > { %2606 = vrot.lane.b32.xlu0 %v7069_v37, %s11072_s25 }
 0x336   : > { %2590 = vrot.lane.b32.xlu1 %v7097_v53, %s11072_s25  ;;  %v5770_v53 = vld [vmem:[%s11022_s1 + $0xa0] sm:$0xff] }
 0x337   : > { %2789 = vrot.lane.b32.xlu2 %v6959_v58, %s11074_s24 }
 0x338   : > { %v7780_v21 = vpop.permute.xlu2 %2397 }
 0x339   : > { %5777 = vmatmul.msk.f32.gmra.mxu2 %vm492_vm0, %v5769_v11  ;;  %v7758_v7 = vpop.permute.xlu1 %2186 }
 0x33a   : > { %5785 = vmatmul.msk.f32.gmra.mxu3 %vm492_vm0, %v5769_v11  ;;  %v7761_v37 = vpop.permute.xlu0 %2387  ;;  %v1906_v11 = vmul.f32 %v7827_v30, %v1886_v60 }
 0x33b   : > { %5752 = vmatmul.msk.f32.gmra.mxu0 %vm492_vm0, %v1339_v61 }
 0x33c   : > { %5760 = vmatmul.msk.f32.gmra.mxu1 %vm492_vm0, %v1339_v61  ;;  %v11112_v61 = vld [vmem:[#allocation9_spill] sm:$0xff] }
 0x33d   : > { %2588 = vrot.lane.b32.xlu0 %v7028_v22, %s11072_s25 }
 0x33e   : > { %2805 = vrot.lane.b32.xlu1 %v7024_v47, %s11074_s24 }
 0x33f   : > { %2604 = vrot.lane.b32.xlu2 %v7076_v4, %s11072_s25  ;;  %v5771_v4 = vld [vmem:[%s11022_s1 + $0xa8] sm:$0xff] }
 0x340   : > { %v7804_v62 = vpop.permute.xlu2 %2379 }
 0x341   : > { %5778 = vmatmul.msk.f32.gmra.mxu2 %vm492_vm0, %v5770_v53  ;;  %v7778_v43 = vpop.permute.xlu1 %2401 }
 0x342   : > { %5786 = vmatmul.msk.f32.gmra.mxu3 %vm492_vm0, %v5770_v53  ;;  %v7783_v22 = vpop.permute.xlu0 %2202  ;;  %v1884_v53 = vsel %vm1872_vm4, %v7625_v33, %v11112_v61 }
 0x343   : > { %5753 = vmatmul.msk.f32.gmra.mxu0 %vm492_vm0, %v1340_v10 }
 0x344   : > { %5761 = vmatmul.msk.f32.gmra.mxu1 %vm492_vm0, %v1340_v10  ;;  %v1907_v10 = vmul.f32 %v7829_v27, %v1878_v12  ;;  %v5791_v12 = vld [vmem:[%s11022_s1 + $0xc0] sm:$0xff] }
 0x345   : > { %2803 = vrot.lane.b32.xlu0 %v6836_v3, %s11074_s24 }
 0x346   : > { %2787 = vrot.lane.b32.xlu1 %v7031_v56, %s11074_s24 }
 0x347   : > { %2586 = vrot.lane.b32.xlu2 %v6959_v58, %s11072_s25  ;;  %v5772_v58 = vld [vmem:[%s11022_s1 + $0xb0] sm:$0xff] }
 0x348   : > { %v7857_v20 = vpop.permute.xlu2 %2194 }
 0x349   : > { %5779 = vmatmul.msk.f32.gmra.mxu2 %vm492_vm0, %v5771_v4  ;;  %v1855_v32 = vpop.permute.xlu1 %1854 }
 0x34a   : > { %5787 = vmatmul.msk.f32.gmra.mxu3 %vm492_vm0, %v5771_v4  ;;  %v7801_v2 = vpop.permute.xlu0 %2184 }
 0x34b   : > { %5754 = vmatmul.msk.f32.gmra.mxu0 %vm492_vm0, %v1341_v35 }
 0x34c   : > { %5762 = vmatmul.msk.f32.gmra.mxu1 %vm492_vm0, %v1341_v35 }
 0x34d   : > { %2785 = vrot.lane.b32.xlu0 %v6963_v31, %s11074_s24 }
 0x34e   : > { %2602 = vrot.lane.b32.xlu1 %v7024_v47, %s11072_s25 }
 0x34f   : > { %2801 = vrot.lane.b32.xlu2 %v6977_v40, %s11074_s24 }
 0x351   : > { %5780 = vmatmul.msk.f32.gmra.mxu2 %vm492_vm0, %v5772_v58  ;;  %v7824_v47 = vpop.permute.xlu1 %2383 }
 0x352   : > { %5788 = vmatmul.msk.f32.gmra.mxu3 %vm492_vm0, %v5772_v58  ;;  %v1871_v29 = vpop.permute.xlu0 %1870 }
 0x353   : > { %5755 = vmatmul.msk.f32.gmra.mxu0 %vm492_vm0, %v1342_v34  ;;  %v1880_v41 = vsel %vm1872_vm4, %v1855_v32, %v1871_v29  ;;  %v1888_v14 = vsel %vm1872_vm4, %v1871_v29, %v1855_v32  ;;  %v11113_v32 = vld [vmem:[#allocation11_spill] sm:$0xff]  ;;  %v1882_v29 = vsel %vm1872_vm4, %v7710_v18, %v7678_v9 }
 0x354   : > { %5763 = vmatmul.msk.f32.gmra.mxu1 %vm492_vm0, %v1342_v34  ;;  %v1910_v19 = vmul.f32 %v7827_v30, %v1888_v14  ;;  %v1911_v6 = vmul.f32 %v7829_v27, %v1880_v41  ;;  %v1883_v58 = vsel %vm1872_vm4, %v11113_v32, %v7681_v38  ;;  %v1902_v34 = vmul.f32 %v7827_v30, %v1884_v53  ;;  %v5815_v41 = vld [vmem:[%s11022_s1 + $0x100] sm:$0xff] }
 0x355   : > { %2600 = vrot.lane.b32.xlu0 %v6836_v3, %s11072_s25  ;;  %v1885_v3 = vsel %vm1872_vm4, %v7631_v55, %v7554_v23  ;;  %v1876_v23 = vsel %vm1872_vm4, %v11112_v61, %v7625_v33  ;;  %v1875_v33 = vsel %vm1872_vm4, %v7681_v38, %v11113_v32  ;;  %v1874_v38 = vsel %vm1872_vm4, %v7678_v9, %v7710_v18  ;;  %v7936_v18 = vpop.permute.xlu2 %2176 }
 0x356   : > { %2797 = vrot.lane.b32.xlu1 %v7126_v45, %s11074_s24  ;;  %1953 = vmatpush.msra.mxu0 %v1910_v19  ;;  %v1904_v35 = vmul.f32 %v7827_v30, %v1885_v3  ;;  %v1903_v15 = vmul.f32 %v7829_v27, %v1876_v23  ;;  %v1900_v39 = vmul.f32 %v7827_v30, %v1883_v58  ;;  %v5793_v23 = vld [vmem:[%s11022_s1 + $0xd0] sm:$0xff]  ;;  %v5818_v58 = vld [vmem:[%s11022_s1 + $0x118] sm:$0xff] }
 0x357   : > { %2610 = vrot.lane.b32.xlu2 %v7135_v26, %s11072_s25  ;;  %1994 = vmatpush.msra.mxu1 %v1911_v6  ;;  %v1901_v9 = vmul.f32 %v7829_v27, %v1875_v33  ;;  %v1898_v0 = vmul.f32 %v7827_v30, %v1882_v29  ;;  %v1899_v6 = vmul.f32 %v7829_v27, %v1874_v38  ;;  %v5794_v38 = vld [vmem:[%s11022_s1 + $0xd8] sm:$0xff] }
 0x358   : > { %1954 = vmatpush.msra.mxu0 %v1908_v8 }
 0x359   : > { %5781 = vmatmul.msk.f32.gmra.mxu2 %vm492_vm0, %v5773_v42  ;;  %1995 = vmatpush.msra.mxu1 %v1909_v46  ;;  %v7886_v4 = vpop.permute.xlu1 %2198 }
 0x35a   : > { %5789 = vmatmul.msk.f32.gmra.mxu3 %vm492_vm0, %v5773_v42  ;;  %v7893_v55 = vpop.permute.xlu0 %2399  ;;  %1955 = vmatpush.msra.mxu0 %v1906_v11  ;;  %v5816_v42 = vld [vmem:[%s11022_s1 + $0x108] sm:$0xff]  ;;  %v5817_v11 = vld [vmem:[%s11022_s1 + $0x110] sm:$0xff] }
 0x35b   : > { %5756 = vmatmul.msk.f32.gmra.mxu0 %vm492_vm0, %v1343_v59  ;;  %1996 = vmatpush.msra.mxu1 %v1907_v10 }
 0x35c   : > { %5764 = vmatmul.msk.f32.gmra.mxu1 %vm492_vm0, %v1343_v59  ;;  %1956 = vmatpush.msra.mxu0 %v1904_v35  ;;  %v2993_v59 = vld [vmem:[%s11023_s2 + $0x38] sm:$0xff]  ;;  %v2990_v35 = vld [vmem:[%s11023_s2 + $0x20] sm:$0xff] }
 0x35d   : > { %2813 = vrot.lane.b32.xlu0 %v7135_v26, %s11074_s24  ;;  %1997 = vmatpush.msra.mxu1 %v1905_v49  ;;  %v1881_v26 = vsel %vm1872_vm4, %v7706_v44, %v7549_v48  ;;  %v7976_v63 = vpop.permute.xlu2 %2190 }
 0x35e   : > { %2584 = vrot.lane.b32.xlu1 %v7031_v56, %s11072_s25  ;;  %1957 = vmatpush.msra.mxu0 %v1902_v34  ;;  %v1873_v56 = vsel %vm1872_vm4, %v7549_v48, %v7706_v44  ;;  %v1896_v48 = vmul.f32 %v7827_v30, %v1881_v26  ;;  %v2212_v30 = vsel %vm2206_vm5, %v7801_v2, %v7722_v5 }
 0x35f   : > { %2783 = vrot.lane.b32.xlu2 %v6877_v28, %s11074_s24  ;;  %1998 = vmatpush.msra.mxu1 %v1903_v15  ;;  %v1897_v44 = vmul.f32 %v7829_v27, %v1873_v56  ;;  %v2989_v15 = vld [vmem:[%s11023_s2 + $0x18] sm:$0xff] }
 0x360   : > { %v7938_v14 = vpop.f32.mrf.mxu2  ;;  %1958 = vmatpush.msra.mxu0 %v1900_v39  ;;  %v2987_v39 = vld [vmem:[%s11023_s2 + $0x8] sm:$0xff] }
 0x361   : > { %11114 = vst [vmem:[#allocation10_spill] sm:$0xff] %v7938_v14  ;;  %v7941_v19 = vpop.f32.mrf.mxu3  ;;  %1999 = vmatpush.msra.mxu1 %v1901_v9  ;;  %5823 = vmatmul.msk.f32.vlgmr.msra.gmra.mxu2 %vm492_vm0, %v5815_v41  ;;  %v7945_v16 = vpop.permute.xlu1 %2180 }
 0x362   : > { %11115 = vst [vmem:[#allocation8_spill] sm:$0xff] %v7941_v19  ;;  %5831 = vmatmul.msk.f32.vlgmr.msra.gmra.mxu3 %vm492_vm0, %v5815_v41  ;;  %v7948_v60 = vpop.permute.xlu0 %2381  ;;  %1959 = vmatpush.msra.mxu0 %v1898_v0  ;;  %v5819_v41 = vld [vmem:[%s11022_s1 + $0x120] sm:$0xff]  ;;  %v2988_v0 = vld [vmem:[%s11023_s2 + $0x10] sm:$0xff] }
 0x363   : > { %2000 = vmatpush.msra.mxu1 %v1899_v6 }
 0x364   : > { %1960 = vmatpush.msra.mxu0 %v1896_v48  ;;  %v2986_v48 = vld [vmem:[%s11023_s2] sm:$0xff] }
 0x365   : > { %2594 = vrot.lane.b32.xlu0 %v7126_v45, %s11072_s25  ;;  %2001 = vmatpush.msra.mxu1 %v1897_v44  ;;  %v2408_v32 = vpop.permute.xlu2 %2407 }
 0x366   : > { %2799 = vrot.lane.b32.xlu1 %v6918_v17, %s11074_s24  ;;  %5799 = vmatmul.msk.f32.vlgmr.msra.gmra.mxu0 %vm492_vm0, %v5791_v12 }
 0x367   : > { %2598 = vrot.lane.b32.xlu2 %v6977_v40, %s11072_s25  ;;  %5807 = vmatmul.msk.f32.vlgmr.msra.gmra.mxu1 %vm492_vm0, %v5791_v12  ;;  %v5792_v40 = vld [vmem:[%s11022_s1 + $0xc8] sm:$0xff]  ;;  %v5795_v12 = vld [vmem:[%s11022_s1 + $0xe0] sm:$0xff] }
 0x368   : > { %v7966_v8 = vpop.f32.mrf.mxu2 }
 0x369   : > { %11116 = vst [vmem:[#allocation9_spill] sm:$0xff] %v7966_v8  ;;  %v7968_v3 = vpop.f32.mrf.mxu3  ;;  %5824 = vmatmul.msk.f32.gmra.mxu2 %vm492_vm0, %v5816_v42  ;;  %v7971_v45 = vpop.permute.xlu1 %2395 }
 0x36a   : > { %11117 = vst [vmem:[#allocation11_spill] sm:$0xff] %v7968_v3  ;;  %5832 = vmatmul.msk.f32.gmra.mxu3 %vm492_vm0, %v5816_v42  ;;  %v7974_v46 = vpop.permute.xlu0 %2196  ;;  %v5820_v42 = vld [vmem:[%s11022_s1 + $0x128] sm:$0xff] }
 0x36b   : > { %v5845_v3 = vld [vmem:[%s11022_s1 + $0x168] sm:$0xff] }
 0x36d   : > { %2582 = vrot.lane.b32.xlu0 %v6963_v31, %s11072_s25  ;;  %v2992_v31 = vld [vmem:[%s11023_s2 + $0x30] sm:$0xff]  ;;  %v2189_v26 = vpop.permute.xlu2 %2188 }
 0x36e   : > { %2580 = vrot.lane.b32.xlu1 %v6877_v28, %s11072_s25  ;;  %5800 = vmatmul.msk.f32.gmra.mxu0 %vm492_vm0, %v5792_v40 }
 0x36f   : > { %3031 = vperm.xlu2 %6149, %v2993_v59   ;;  %5808 = vmatmul.msk.f32.gmra.mxu1 %vm492_vm0, %v5792_v40  ;;  %v5864_v40 = vld [vmem:[%s11031_s10 + $0xc] sm:$0x3] }
 0x370   : > { %v7993_v61 = vpop.f32.mrf.mxu2 }
 0x371   : > { %v7995_v53 = vpop.f32.mrf.mxu3  ;;  %5825 = vmatmul.msk.f32.gmra.mxu2 %vm492_vm0, %v5817_v11  ;;  %v7998_v10 = vpop.permute.xlu1 %2377 }
 0x372   : > { %5833 = vmatmul.msk.f32.gmra.mxu3 %vm492_vm0, %v5817_v11  ;;  %v8001_v28 = vpop.permute.xlu0 %2178  ;;  %v5839_v11 = vld [vmem:[%s11031_s10 + $0xa] sm:$0x3] }
 0x375   : > { %2596 = vrot.lane.b32.xlu0 %v6918_v17, %s11072_s25  ;;  %v2991_v17 = vld [vmem:[%s11023_s2 + $0x28] sm:$0xff] }
 0x376   : > { %3026 = vperm.xlu1 %6150, %v2992_v31   ;;  %5801 = vmatmul.msk.f32.gmra.mxu0 %vm492_vm0, %v5793_v23  ;;  %v8079_v31 = vpop.permute.xlu2 %2795 }
 0x377   : > { %3016 = vperm.xlu2 %6149, %v2990_v35   ;;  %5809 = vmatmul.msk.f32.gmra.mxu1 %vm492_vm0, %v5793_v23  ;;  %v8085_v35 = vperm.slane %v5864_v40, 0 }
 0x378   : > { %v8019_v49 = vpop.f32.mrf.mxu2 }
 0x379   : > { %v8021_v33 = vpop.f32.mrf.mxu3  ;;  %5826 = vmatmul.msk.f32.gmra.mxu2 %vm492_vm0, %v5818_v58  ;;  %v8024_v34 = vpop.permute.xlu1 %2192  ;;  %11118 = vst [vmem:[#allocation18_spill] sm:$0xff] %v8085_v35 }
 0x37a   : > { %5834 = vmatmul.msk.f32.gmra.mxu3 %vm492_vm0, %v5818_v58  ;;  %v8030_v29 = vpop.permute.xlu0 %2393  ;;  %v8088_v58 = vperm.slane %v5864_v40, 1  ;;  %v2423_v40 = vsel %vm2409_vm1, %v7642_v1, %v7761_v37 }
 0x37c   : > { %11119 = vst [vmem:[#allocation19_spill] sm:$0xff] %v8088_v58 }
 0x37d   : > { %3021 = vperm.xlu0 %6151, %v2991_v17  }
 0x37e   : > { %3011 = vperm.xlu1 %6150, %v2989_v15   ;;  %5802 = vmatmul.msk.f32.gmra.mxu0 %vm492_vm0, %v5794_v38  ;;  %v8090_v15 = vperm.slane %v5839_v11, 0 }
 0x37f   : > { %3001 = vperm.xlu2 %6149, %v2987_v39   ;;  %5810 = vmatmul.msk.f32.gmra.mxu1 %vm492_vm0, %v5794_v38  ;;  %v8092_v38 = vperm.slane %v5839_v11, 1  ;;  %v5796_v39 = vld [vmem:[%s11022_s1 + $0xe8] sm:$0xff] }
 0x380   : > { %v8046_v9 = vpop.f32.mrf.mxu2  ;;  %11120 = vst [vmem:[#allocation20_spill] sm:$0xff] %v8090_v15 }
 0x381   : > { %v8048_v56 = vpop.f32.mrf.mxu3  ;;  %5827 = vmatmul.msk.f32.gmra.mxu2 %vm492_vm0, %v5819_v41  ;;  %11121 = vst [vmem:[#allocation21_spill] sm:$0xff] %v8092_v38 }
 0x382   : > { %5835 = vmatmul.msk.f32.gmra.mxu3 %vm492_vm0, %v5819_v41  ;;  %v8055_v6 = vpop.permute.xlu0 %2174  ;;  %v2416_v41 = vsel %vm2409_vm1, %v7736_v25, %v7739_v13 }
 0x383   : > { %v8060_v44 = vpop.permute.xlu1 %2811 }
 0x385   : > { %3006 = vperm.xlu0 %6151, %v2988_v0   ;;  %v2424_v0 = vsel %vm2409_vm1, %v7739_v13, %v7736_v25 }
 0x386   : > { %2996 = vperm.xlu1 %6150, %v2986_v48   ;;  %5803 = vmatmul.msk.f32.gmra.mxu0 %vm492_vm0, %v5795_v12 }
 0x387   : > { %5811 = vmatmul.msk.f32.gmra.mxu1 %vm492_vm0, %v5795_v12 }
 0x388   : > { %v8073_v59 = vpop.f32.mrf.mxu2 }
 0x389   : > { %v8081_v23 = vpop.f32.mrf.mxu3  ;;  %5828 = vmatmul.msk.f32.gmra.mxu2 %vm492_vm0, %v5820_v42 }
 0x38a   : > { %5836 = vmatmul.msk.f32.gmra.mxu3 %vm492_vm0, %v5820_v42  ;;  %v2415_v42 = vsel %vm2409_vm1, %v7761_v37, %v7642_v1  ;;  %v2221_v37 = vsel %vm2206_vm5, %v7783_v22, %v7758_v7 }
 0x38b   : > { %v2392_v17 = vpop.permute.xlu0 %2391 }
 0x38c   : > { %v2417_v48 = vsel %vm2409_vm1, %v2392_v17, %v2408_v32  ;;  %v2425_v12 = vsel %vm2409_vm1, %v2408_v32, %v2392_v17  ;;  %v2213_v32 = vsel %vm2206_vm5, %v7758_v7, %v7783_v22  ;;  %v2414_v17 = vsel %vm2409_vm1, %v7686_v36, %v7778_v43 }
 0x38d   : > { %v2447_v11 = vmul.f32 %v8085_v35, %v2417_v48  ;;  %v2448_v25 = vmul.f32 %v8088_v58, %v2425_v12  ;;  %v2205_v13 = vpop.permute.xlu1 %2204  ;;  %v2445_v7 = vmul.f32 %v8085_v35, %v2416_v41  ;;  %v2446_v22 = vmul.f32 %v8088_v58, %v2424_v0 }
 0x38e   : > { %v2214_v27 = vsel %vm2206_vm5, %v2189_v26, %v2205_v13  ;;  %v2222_v1 = vsel %vm2206_vm5, %v2205_v13, %v2189_v26  ;;  %5804 = vmatmul.msk.f32.gmra.mxu0 %vm492_vm0, %v5796_v39  ;;  %v2220_v26 = vsel %vm2206_vm5, %v7722_v5, %v7801_v2  ;;  %v2443_v5 = vmul.f32 %v8085_v35, %v2415_v42 }
 0x38f   : > { %v2244_v48 = vmul.f32 %v8090_v15, %v2214_v27  ;;  %v2245_v12 = vmul.f32 %v8092_v38, %v2222_v1  ;;  %5812 = vmatmul.msk.f32.gmra.mxu1 %vm492_vm0, %v5796_v39  ;;  %2490 = vmatpush.msrb.mxu2 %v2447_v11  ;;  %v5821_v27 = vld [vmem:[%s11022_s1 + $0x130] sm:$0xff]  ;;  %v2422_v39 = vsel %vm2409_vm1, %v7778_v43, %v7686_v36  ;;  %v8169_v43 = vpop.permute.xlu2 %2592 }
 0x390   : > { %2531 = vmatpush.msrb.mxu3 %v2448_v25  ;;  %v8147_v13 = vpop.f32.mrf.mxu2  ;;  %v2444_v2 = vmul.f32 %v8088_v58, %v2423_v40  ;;  %v2242_v41 = vmul.f32 %v8090_v15, %v2213_v32  ;;  %v2243_v0 = vmul.f32 %v8092_v38, %v2221_v37  ;;  %v2441_v25 = vmul.f32 %v8085_v35, %v2414_v17 }
 0x391   : > { %v8158_v11 = vpop.f32.mrf.mxu3  ;;  %2287 = vmatpush.msrb.mxu0 %v2244_v48  ;;  %2328 = vmatpush.msrb.mxu1 %v2245_v12  ;;  %v2211_v36 = vsel %vm2206_vm5, %v7752_v24, %v7886_v4  ;;  %v2240_v42 = vmul.f32 %v8090_v15, %v2212_v30  ;;  %v2241_v40 = vmul.f32 %v8092_v38, %v2220_v26 }
 0x392   : > { %11122 = vst [vmem:[#allocation22_spill] sm:$0xff] %v8158_v11  ;;  %2491 = vmatpush.msrb.mxu2 %v2445_v7  ;;  %2532 = vmatpush.msrb.mxu3 %v2446_v22  ;;  %v2413_v32 = vsel %vm2409_vm1, %v7824_v47, %v7893_v55  ;;  %v2421_v17 = vsel %vm2409_vm1, %v7893_v55, %v7824_v47 }
 0x393   : > { %5829 = vmatmul.msk.f32.gmra.mxu2 %vm492_vm0, %v5821_v27  ;;  %5837 = vmatmul.msk.f32.gmra.mxu3 %vm492_vm0, %v5821_v27  ;;  %v2219_v1 = vsel %vm2206_vm5, %v7886_v4, %v7752_v24  ;;  %v2412_v30 = vsel %vm2409_vm1, %v7948_v60, %v7780_v21  ;;  %v2420_v37 = vsel %vm2409_vm1, %v7780_v21, %v7948_v60  ;;  %v5797_v24 = vld [vmem:[%s11022_s1 + $0xf0] sm:$0xff] }
 0x394   : > { %2288 = vmatpush.msrb.mxu0 %v2242_v41  ;;  %2329 = vmatpush.msrb.mxu1 %v2243_v0  ;;  %v2442_v47 = vmul.f32 %v8088_v58, %v2422_v39  ;;  %v2210_v4 = vsel %vm2206_vm5, %v7945_v16, %v7974_v46  ;;  %v2218_v55 = vsel %vm2206_vm5, %v7974_v46, %v7945_v16 }
 0x395   : > { %2492 = vmatpush.msrb.mxu2 %v2443_v5  ;;  %2533 = vmatpush.msrb.mxu3 %v2444_v2  ;;  %v2238_v21 = vmul.f32 %v8090_v15, %v2211_v36  ;;  %v2239_v48 = vmul.f32 %v8092_v38, %v2219_v1  ;;  %v2439_v12 = vmul.f32 %v8085_v35, %v2413_v32 }
 0x396   : > { %2289 = vmatpush.msrb.mxu0 %v2240_v42  ;;  %2330 = vmatpush.msrb.mxu1 %v2241_v40  ;;  %v2440_v26 = vmul.f32 %v8088_v58, %v2421_v17  ;;  %v2209_v7 = vsel %vm2206_vm5, %v8001_v28, %v7857_v20  ;;  %v2437_v46 = vmul.f32 %v8085_v35, %v2412_v30 }
 0x397   : > { %v8208_v60 = vpop.permute.xlu0 %2809  ;;  %2493 = vmatpush.msrb.mxu2 %v2441_v25  ;;  %2534 = vmatpush.msrb.mxu3 %v2442_v47  ;;  %v2438_v22 = vmul.f32 %v8088_v58, %v2420_v37  ;;  %v2217_v27 = vsel %vm2206_vm5, %v7857_v20, %v8001_v28  ;;  %v2236_v5 = vmul.f32 %v8090_v15, %v2210_v4  ;;  %v5822_v25 = vld [vmem:[%s11022_s1 + $0x138] sm:$0xff]  ;;  %v8262_v32 = vpop.permute.xlu2 %2807 }
 0x398   : > { %v8217_v16 = vpop.permute.xlu1 %2793  ;;  %5805 = vmatmul.msk.f32.gmra.mxu0 %vm492_vm0, %v5797_v24  ;;  %5813 = vmatmul.msk.f32.gmra.mxu1 %vm492_vm0, %v5797_v24  ;;  %v2237_v2 = vmul.f32 %v8092_v38, %v2218_v55  ;;  %v2411_v41 = vsel %vm2409_vm1, %v7804_v62, %v7971_v45  ;;  %v2419_v0 = vsel %vm2409_vm1, %v7971_v45, %v7804_v62  ;;  %v5798_v24 = vld [vmem:[%s11022_s1 + $0xf8] sm:$0xff] }
 0x399   : > { %2290 = vmatpush.msrb.mxu0 %v2238_v21  ;;  %2331 = vmatpush.msrb.mxu1 %v2239_v48  ;;  %v8227_v39 = vpop.f32.mrf.mxu2  ;;  %v2208_v20 = vsel %vm2206_vm5, %v7936_v18, %v8024_v34  ;;  %v8243_v28 = vpop.f32.mrf.mxu3  ;;  %v2216_v36 = vsel %vm2206_vm5, %v8024_v34, %v7936_v18  ;;  %v2234_v62 = vmul.f32 %v8090_v15, %v2209_v7  ;;  %v5865_v48 = vld [vmem:[%s11022_s1 + $0x180] sm:$0xff] }
 0x39a   : > { %11123 = vst [vmem:[#allocation23_spill] sm:$0xff] %v8227_v39  ;;  %2494 = vmatpush.msrb.mxu2 %v2439_v12  ;;  %2535 = vmatpush.msrb.mxu3 %v2440_v26  ;;  %v2410_v45 = vsel %vm2409_vm1, %v7998_v10, %v8030_v29  ;;  %v2418_v42 = vsel %vm2409_vm1, %v8030_v29, %v7998_v10 }
 0x39b   : > { %11124 = vst [vmem:[#allocation24_spill] sm:$0xff] %v8243_v28  ;;  %2291 = vmatpush.msrb.mxu0 %v2236_v5  ;;  %2332 = vmatpush.msrb.mxu1 %v2237_v2  ;;  %v2235_v40 = vmul.f32 %v8092_v38, %v2217_v27  ;;  %v2435_v18 = vmul.f32 %v8085_v35, %v2411_v41  ;;  %v5866_v41 = vld [vmem:[%s11022_s1 + $0x188] sm:$0xff] }
 0x39c   : > { %2495 = vmatpush.msrb.mxu2 %v2437_v46  ;;  %2536 = vmatpush.msrb.mxu3 %v2438_v22  ;;  %v2436_v34 = vmul.f32 %v8088_v58, %v2419_v0  ;;  %v2232_v17 = vmul.f32 %v8090_v15, %v2208_v20  ;;  %v2207_v10 = vsel %vm2206_vm5, %v8055_v6, %v7976_v63  ;;  %v5840_v22 = vld [vmem:[%s11022_s1 + $0x140] sm:$0xff] }
 0x39d   : > { %5830 = vmatmul.msk.f32.gmra.mxu2 %vm492_vm0, %v5822_v25  ;;  %5838 = vmatmul.msk.f32.gmra.mxu3 %vm492_vm0, %v5822_v25  ;;  %v2215_v29 = vsel %vm2206_vm5, %v7976_v63, %v8055_v6  ;;  %v2233_v1 = vmul.f32 %v8092_v38, %v2216_v36  ;;  %v2433_v37 = vmul.f32 %v8085_v35, %v2410_v45  ;;  %v5841_v36 = vld [vmem:[%s11022_s1 + $0x148] sm:$0xff] }
 0x39e   : > { %2292 = vmatpush.msrb.mxu0 %v2234_v62  ;;  %2333 = vmatpush.msrb.mxu1 %v2235_v40  ;;  %v2434_v47 = vmul.f32 %v8088_v58, %v2418_v42  ;;  %v2230_v6 = vmul.f32 %v8090_v15, %v2207_v10  ;;  %v2231_v21 = vmul.f32 %v8092_v38, %v2215_v29  ;;  %v5842_v29 = vld [vmem:[%s11022_s1 + $0x150] sm:$0xff] }
 0x39f   : > { %v8278_v30 = vpop.permute.xlu0 %2791  ;;  %2496 = vmatpush.msrb.mxu2 %v2435_v18  ;;  %2537 = vmatpush.msrb.mxu3 %v2436_v34  ;;  %v8304_v7 = vpop.permute.xlu2 %2789  ;;  %v5867_v18 = vld [vmem:[%s11022_s1 + $0x190] sm:$0xff]  ;;  %v2821_v28 = vsel %vm11077_vm6, %v8217_v16, %v8208_v60 }
 0x3a0   : > { %v8285_v4 = vpop.permute.xlu1 %2608  ;;  %v8287_v55 = vpop.f32.mrf.mxu0  ;;  %2293 = vmatpush.msrb.mxu0 %v2232_v17  ;;  %2334 = vmatpush.msrb.mxu1 %v2233_v1 }
 0x3a1   : > { %11125 = vst [vmem:[#allocation25_spill] sm:$0xff] %v8287_v55  ;;  %v8289_v63 = vpop.f32.mrf.mxu1  ;;  %2497 = vmatpush.msrb.mxu2 %v2433_v37  ;;  %2538 = vmatpush.msrb.mxu3 %v2434_v47 }
 0x3a2   : > { %11126 = vst [vmem:[#allocation26_spill] sm:$0xff] %v8289_v63  ;;  %5806 = vmatmul.msk.f32.gmra.mxu0 %vm492_vm0, %v5798_v24  ;;  %5814 = vmatmul.msk.f32.gmra.mxu1 %vm492_vm0, %v5798_v24  ;;  %v5868_v24 = vld [vmem:[%s11022_s1 + $0x198] sm:$0xff] }
 0x3a3   : > { %2294 = vmatpush.msrb.mxu0 %v2230_v6  ;;  %2335 = vmatpush.msrb.mxu1 %v2231_v21  ;;  %v8298_v12 = vpop.f32.mrf.mxu2 }
 0x3a4   : > { %11127 = vst [vmem:[#allocation27_spill] sm:$0xff] %v8298_v12  ;;  %v8300_v26 = vpop.f32.mrf.mxu3 }
 0x3a5   : > { %11128 = vst [vmem:[#allocation28_spill] sm:$0xff] %v8300_v26  ;;  %5873 = vmatmul.msk.f32.vlgmr.msrb.gmra.mxu2 %vm492_vm0, %v5865_v48  ;;  %5881 = vmatmul.msk.f32.vlgmr.msrb.gmra.mxu3 %vm492_vm0, %v5865_v48 }
 0x3a7   : > { %v8306_v46 = vpop.permute.xlu0 %2606  ;;  %v8337_v42 = vpop.permute.xlu2 %2604 }
 0x3a8   : > { %v8311_v27 = vpop.permute.xlu1 %2590  ;;  %v8313_v5 = vpop.f32.mrf.mxu0 }
 0x3a9   : > { %11129 = vst [vmem:[#allocation29_spill] sm:$0xff] %v8313_v5  ;;  %v8315_v2 = vpop.f32.mrf.mxu1  ;;  %v2822_v5 = vsel %vm11077_vm6, %v8079_v31, %v8060_v44 }
 0x3aa   : > { %11130 = vst [vmem:[#allocation30_spill] sm:$0xff] %v8315_v2  ;;  %5848 = vmatmul.msk.f32.vlgmr.msrb.gmra.mxu0 %vm492_vm0, %v5840_v22  ;;  %5856 = vmatmul.msk.f32.vlgmr.msrb.gmra.mxu1 %vm492_vm0, %v5840_v22 }
 0x3ac   : > { %v8322_v0 = vpop.f32.mrf.mxu2 }
 0x3ad   : > { %11131 = vst [vmem:[#allocation31_spill] sm:$0xff] %v8322_v0  ;;  %v8324_v20 = vpop.f32.mrf.mxu3  ;;  %5874 = vmatmul.msk.f32.gmra.mxu2 %vm492_vm0, %v5866_v41  ;;  %5882 = vmatmul.msk.f32.gmra.mxu3 %vm492_vm0, %v5866_v41  ;;  %v5843_v41 = vld [vmem:[%s11022_s1 + $0x158] sm:$0xff] }
 0x3ae   : > { %11132 = vst [vmem:[#allocation32_spill] sm:$0xff] %v8324_v20  ;;  %v5914_v20 = vld [vmem:[%s11031_s10 + $0x10] sm:$0x3] }
 0x3af   : > { %v8328_v25 = vpop.permute.xlu0 %2588  ;;  %v8368_v6 = vpop.permute.xlu2 %2586  ;;  %v8426_v12 = vperm.slane %v5914_v20, 1 }
 0x3b0   : > { %v8333_v62 = vpop.permute.xlu1 %2805  ;;  %v8335_v45 = vpop.f32.mrf.mxu0 }
 0x3b1   : > { %v8339_v40 = vpop.f32.mrf.mxu1  ;;  %11134 = vst [vmem:[#allocation34_spill] sm:$0xff] %v8426_v12 }
 0x3b2   : > { %5849 = vmatmul.msk.f32.gmra.mxu0 %vm492_vm0, %v5841_v36  ;;  %5857 = vmatmul.msk.f32.gmra.mxu1 %vm492_vm0, %v5841_v36 }
 0x3b4   : > { %v8346_v34 = vpop.f32.mrf.mxu2 }
 0x3b5   : > { %v8348_v17 = vpop.f32.mrf.mxu3  ;;  %5875 = vmatmul.msk.f32.gmra.mxu2 %vm492_vm0, %v5867_v18  ;;  %5883 = vmatmul.msk.f32.gmra.mxu3 %vm492_vm0, %v5867_v18 }
 0x3b7   : > { %v8352_v10 = vpop.permute.xlu0 %2803  ;;  %v8394_v15 = vpop.permute.xlu2 %2801 }
 0x3b8   : > { %v8357_v1 = vpop.permute.xlu1 %2787  ;;  %v8359_v37 = vpop.f32.mrf.mxu0 }
 0x3b9   : > { %v8361_v47 = vpop.f32.mrf.mxu1 }
 0x3ba   : > { %5850 = vmatmul.msk.f32.gmra.mxu0 %vm492_vm0, %v5842_v29  ;;  %5858 = vmatmul.msk.f32.gmra.mxu1 %vm492_vm0, %v5842_v29 }
 0x3bc   : > { %v8370_v21 = vpop.f32.mrf.mxu2 }
 0x3bd   : > { %v8372_v48 = vpop.f32.mrf.mxu3  ;;  %5876 = vmatmul.msk.f32.gmra.mxu2 %vm492_vm0, %v5868_v24  ;;  %5884 = vmatmul.msk.f32.gmra.mxu3 %vm492_vm0, %v5868_v24  ;;  %v5869_v24 = vld [vmem:[%s11022_s1 + $0x1a0] sm:$0xff] }
 0x3bf   : > { %v8376_v22 = vpop.permute.xlu0 %2785  ;;  %v2611_v26 = vpop.permute.xlu2 %2610 }
 0x3c0   : > { %v8381_v36 = vpop.permute.xlu1 %2602  ;;  %v8383_v18 = vpop.f32.mrf.mxu0 }
 0x3c1   : > { %v8385_v29 = vpop.f32.mrf.mxu1 }
 0x3c2   : > { %5851 = vmatmul.msk.f32.gmra.mxu0 %vm492_vm0, %v5843_v41  ;;  %5859 = vmatmul.msk.f32.gmra.mxu1 %vm492_vm0, %v5843_v41  ;;  %v5844_v41 = vld [vmem:[%s11022_s1 + $0x160] sm:$0xff] }
 0x3c4   : > { %v8392_v38 = vpop.f32.mrf.mxu2 }
 0x3c5   : > { %v8396_v58 = vpop.f32.mrf.mxu3  ;;  %5877 = vmatmul.msk.f32.gmra.mxu2 %vm492_vm0, %v5869_v24  ;;  %5885 = vmatmul.msk.f32.gmra.mxu3 %vm492_vm0, %v5869_v24 }
 0x3c7   : > { %v8400_v35 = vpop.permute.xlu0 %2600 }
 0x3c8   : > { %v2798_v52 = vpop.permute.xlu1 %2797  ;;  %v8405_v54 = vpop.f32.mrf.mxu0 }
 0x3c9   : > { %v8407_v57 = vpop.f32.mrf.mxu1 }
 0x3ca   : > { %5852 = vmatmul.msk.f32.gmra.mxu0 %vm492_vm0, %v5844_v41  ;;  %5860 = vmatmul.msk.f32.gmra.mxu1 %vm492_vm0, %v5844_v41  ;;  %v8424_v41 = vperm.slane %v5914_v20, 0 }
 0x3cc   : > { %v8414_v24 = vpop.f32.mrf.mxu2  ;;  %11133 = vst [vmem:[#allocation33_spill] sm:$0xff] %v8424_v41 }
 0x3cd   : > { %v8420_v0 = vpop.f32.mrf.mxu3  ;;  %5878 = vmatmul.msk.f32.gmra.mxu2 %vm492_vm0, %v5870_v50  ;;  %5886 = vmatmul.msk.f32.gmra.mxu3 %vm492_vm0, %v5870_v50  ;;  %v2830_v50 = vsel %vm11077_vm6, %v8060_v44, %v8079_v31  ;;  %v2829_v44 = vsel %vm11077_vm6, %v8208_v60, %v8217_v16  ;;  %v5889_v60 = vld [vmem:[%s11031_s10 + $0xe] sm:$0x3] }
 0x3ce   : > { %v8490_v39 = vperm.slane %v5889_v60, 0 }
 0x3cf   : > { %v2814_v2 = vpop.permute.xlu0 %2813 }
 0x3d0   : > { %v2823_v8 = vsel %vm11077_vm6, %v2798_v52, %v2814_v2  ;;  %v2831_v20 = vsel %vm11077_vm6, %v2814_v2, %v2798_v52  ;;  %v8445_v55 = vpop.permute.xlu1 %2584  ;;  %v8447_v14 = vpop.f32.mrf.mxu0  ;;  %v2851_v52 = vmul.f32 %v8424_v41, %v2822_v5  ;;  %v5871_v2 = vld [vmem:[%s11022_s1 + $0x1b0] sm:$0xff]  ;;  %v2849_v5 = vmul.f32 %v8424_v41, %v2821_v28  ;;  %11138 = vst [vmem:[#allocation38_spill] sm:$0xff] %v8490_v39 }
 0x3d1   : > { %v2853_v63 = vmul.f32 %v8424_v41, %v2823_v8  ;;  %v2854_v19 = vmul.f32 %v8426_v12, %v2831_v20  ;;  %v8457_v31 = vpop.f32.mrf.mxu1  ;;  %v2852_v8 = vmul.f32 %v8426_v12, %v2830_v50  ;;  %v2850_v50 = vmul.f32 %v8426_v12, %v2829_v44 }
 0x3d2   : > { %11135 = vst [vmem:[#allocation35_spill] sm:$0xff] %v8457_v31  ;;  %5853 = vmatmul.msk.f32.gmra.mxu0 %vm492_vm0, %v5845_v3  ;;  %5861 = vmatmul.msk.f32.gmra.mxu1 %vm492_vm0, %v5845_v3  ;;  %v2820_v3 = vsel %vm11077_vm6, %v8278_v30, %v8262_v32  ;;  %v2619_v20 = vsel %vm11076_vm7, %v8169_v43, %v8285_v4 }
 0x3d3   : > { %2896 = vmatpush.msra.mxu2 %v2853_v63  ;;  %2937 = vmatpush.msra.mxu3 %v2854_v19  ;;  %v2828_v19 = vsel %vm11077_vm6, %v8262_v32, %v8278_v30  ;;  %v2627_v32 = vsel %vm11076_vm7, %v8285_v4, %v8169_v43  ;;  %v2819_v28 = vsel %vm11077_vm6, %v8304_v7, %v8333_v62  ;;  %v8500_v30 = vperm.slane %v5889_v60, 1 }
 0x3d4   : > { %v8474_v16 = vpop.f32.mrf.mxu2  ;;  %v2827_v43 = vsel %vm11077_vm6, %v8333_v62, %v8304_v7  ;;  %v2848_v60 = vmul.f32 %v8426_v12, %v2828_v19  ;;  %v2826_v7 = vsel %vm11077_vm6, %v8352_v10, %v8357_v1  ;;  %v2648_v62 = vmul.f32 %v8490_v39, %v2619_v20 }
 0x3d5   : > { %11136 = vst [vmem:[#allocation36_spill] sm:$0xff] %v8474_v16  ;;  %v8480_v63 = vpop.f32.mrf.mxu3  ;;  %2897 = vmatpush.msra.mxu2 %v2851_v52  ;;  %2938 = vmatpush.msra.mxu3 %v2852_v8  ;;  %v2847_v52 = vmul.f32 %v8424_v41, %v2820_v3  ;;  %v5846_v8 = vld [vmem:[%s11022_s1 + $0x170] sm:$0xff]  ;;  %v2818_v3 = vsel %vm11077_vm6, %v8357_v1, %v8352_v10 }
 0x3d6   : > { %11137 = vst [vmem:[#allocation37_spill] sm:$0xff] %v8480_v63  ;;  %5879 = vmatmul.msk.f32.gmra.mxu2 %vm492_vm0, %v5871_v2  ;;  %5887 = vmatmul.msk.f32.gmra.mxu3 %vm492_vm0, %v5871_v2  ;;  %v2618_v19 = vsel %vm11076_vm7, %v8311_v27, %v8306_v46  ;;  %v2846_v10 = vmul.f32 %v8426_v12, %v2827_v43 }
 0x3d7   : > { %11139 = vst [vmem:[#allocation39_spill] sm:$0xff] %v8500_v30  ;;  %v2595_v44 = vpop.permute.xlu0 %2594  ;;  %2898 = vmatpush.msra.mxu2 %v2849_v5  ;;  %2939 = vmatpush.msra.mxu3 %v2850_v50  ;;  %v2784_v5 = vpop.permute.xlu2 %2783  ;;  %v2649_v1 = vmul.f32 %v8500_v30, %v2627_v32  ;;  %v2626_v20 = vsel %vm11076_vm7, %v8306_v46, %v8311_v27  ;;  %v5872_v32 = vld [vmem:[%s11022_s1 + $0x1b8] sm:$0xff] }
 0x3d8   : > { %v2620_v4 = vsel %vm11076_vm7, %v2595_v44, %v2611_v26  ;;  %v2628_v2 = vsel %vm11076_vm7, %v2611_v26, %v2595_v44  ;;  %v2845_v26 = vmul.f32 %v8424_v41, %v2819_v28  ;;  %v2800_v44 = vpop.permute.xlu1 %2799  ;;  %v2817_v28 = vsel %vm11077_vm6, %v8376_v22, %v8394_v15 }
 0x3d9   : > { %v2650_v50 = vmul.f32 %v8490_v39, %v2620_v4  ;;  %v2651_v63 = vmul.f32 %v8500_v30, %v2628_v2  ;;  %2899 = vmatpush.msra.mxu2 %v2847_v52  ;;  %2940 = vmatpush.msra.mxu3 %v2848_v60  ;;  %v8532_v4 = vpop.f32.mrf.mxu0  ;;  %v8545_v52 = vpop.f32.mrf.mxu1  ;;  %v2843_v43 = vmul.f32 %v8424_v41, %v2818_v3 }
 0x3da   : > { %5854 = vmatmul.msk.f32.gmra.mxu0 %vm492_vm0, %v5846_v8  ;;  %11140 = vst [vmem:[#allocation40_spill] sm:$0xff] %v8532_v4  ;;  %5862 = vmatmul.msk.f32.gmra.mxu1 %vm492_vm0, %v5846_v8  ;;  %v2617_v46 = vsel %vm11076_vm7, %v8328_v25, %v8337_v42  ;;  %v2825_v27 = vsel %vm11077_vm6, %v8394_v15, %v8376_v22 }
 0x3db   : > { %2693 = vmatpush.msra.mxu0 %v2650_v50  ;;  %11141 = vst [vmem:[#allocation41_spill] sm:$0xff] %v8545_v52  ;;  %2734 = vmatpush.msra.mxu1 %v2651_v63  ;;  %v2844_v2 = vmul.f32 %v8426_v12, %v2826_v7  ;;  %v2625_v60 = vsel %vm11076_vm7, %v8337_v42, %v8328_v25 }
 0x3dc   : > { %2900 = vmatpush.msra.mxu2 %v2845_v26  ;;  %v8547_v8 = vpop.f32.mrf.mxu2  ;;  %2941 = vmatpush.msra.mxu3 %v2846_v10  ;;  %v2816_v3 = vsel %vm11077_vm6, %v2784_v5, %v2800_v44  ;;  %v2646_v50 = vmul.f32 %v8490_v39, %v2618_v19  ;;  %v2824_v15 = vsel %vm11077_vm6, %v2800_v44, %v2784_v5  ;;  %v5847_v10 = vld [vmem:[%s11022_s1 + $0x178] sm:$0xff] }
 0x3dd   : > { %11142 = vst [vmem:[#allocation42_spill] sm:$0xff] %v8547_v8  ;;  %v8561_v63 = vpop.f32.mrf.mxu3  ;;  %2694 = vmatpush.msra.mxu0 %v2648_v62  ;;  %2735 = vmatpush.msra.mxu1 %v2649_v1  ;;  %v2647_v7 = vmul.f32 %v8500_v30, %v2626_v20  ;;  %v2841_v26 = vmul.f32 %v8424_v41, %v2817_v28 }
 0x3de   : > { %11143 = vst [vmem:[#allocation43_spill] sm:$0xff] %v8561_v63  ;;  %2901 = vmatpush.msra.mxu2 %v2843_v43  ;;  %2942 = vmatpush.msra.mxu3 %v2844_v2  ;;  %v2616_v25 = vsel %vm11076_vm7, %v8368_v6, %v8381_v36  ;;  %v2842_v42 = vmul.f32 %v8426_v12, %v2825_v27 }
 0x3df   : > { %5880 = vmatmul.msk.f32.gmra.mxu2 %vm492_vm0, %v5872_v32  ;;  %v2583_v22 = vpop.permute.xlu0 %2582  ;;  %5888 = vmatmul.msk.f32.gmra.mxu3 %vm492_vm0, %v5872_v32  ;;  %v2644_v5 = vmul.f32 %v8490_v39, %v2617_v46  ;;  %v2624_v62 = vsel %vm11076_vm7, %v8381_v36, %v8368_v6  ;;  %v2645_v19 = vmul.f32 %v8500_v30, %v2625_v60  ;;  %v2599_v6 = vpop.permute.xlu2 %2598 }
 0x3e0   : > { %2695 = vmatpush.msra.mxu0 %v2646_v50  ;;  %2736 = vmatpush.msra.mxu1 %v2647_v7  ;;  %v2839_v44 = vmul.f32 %v8424_v41, %v2816_v3  ;;  %v2615_v1 = vsel %vm11076_vm7, %v8445_v55, %v8400_v35  ;;  %v2840_v20 = vmul.f32 %v8426_v12, %v2824_v15  ;;  %v2581_v15 = vpop.permute.xlu1 %2580 }
 0x3e1   : > { %2902 = vmatpush.msra.mxu2 %v2841_v26  ;;  %2943 = vmatpush.msra.mxu3 %v2842_v42  ;;  %v2623_v36 = vsel %vm11076_vm7, %v8400_v35, %v8445_v55  ;;  %v2642_v28 = vmul.f32 %v8490_v39, %v2616_v25  ;;  %v2614_v32 = vsel %vm11076_vm7, %v2583_v22, %v2599_v6  ;;  %v5915_v35 = vld [vmem:[%s11022_s1 + $0x200] sm:$0xff] }
 0x3e2   : > { %2696 = vmatpush.msra.mxu0 %v2644_v5  ;;  %2737 = vmatpush.msra.mxu1 %v2645_v19  ;;  %v2643_v46 = vmul.f32 %v8500_v30, %v2624_v62  ;;  %v2622_v2 = vsel %vm11076_vm7, %v2599_v6, %v2583_v22  ;;  %v2640_v60 = vmul.f32 %v8490_v39, %v2615_v1  ;;  %v5890_v19 = vld [vmem:[%s11022_s1 + $0x1c0] sm:$0xff]  ;;  %v5916_v1 = vld [vmem:[%s11022_s1 + $0x208] sm:$0xff] }
 0x3e3   : > { %2903 = vmatpush.msra.mxu2 %v2839_v44  ;;  %v8602_v43 = vpop.f32.mrf.mxu0  ;;  %2944 = vmatpush.msra.mxu3 %v2840_v20  ;;  %v2641_v50 = vmul.f32 %v8500_v30, %v2623_v36  ;;  %v2638_v26 = vmul.f32 %v8490_v39, %v2614_v32  ;;  %v2639_v42 = vmul.f32 %v8500_v30, %v2622_v2  ;;  %v5891_v36 = vld [vmem:[%s11022_s1 + $0x1c8] sm:$0xff] }
 0x3e4   : > { %11144 = vst [vmem:[#allocation44_spill] sm:$0xff] %v8602_v43  ;;  %5855 = vmatmul.msk.f32.gmra.mxu0 %vm492_vm0, %v5847_v10  ;;  %v8608_v27 = vpop.f32.mrf.mxu1  ;;  %v8613_v55 = vpop.f32.mrf.mxu2  ;;  %5863 = vmatmul.msk.f32.gmra.mxu1 %vm492_vm0, %v5847_v10 }
 0x3e5   : > { %11145 = vst [vmem:[#allocation45_spill] sm:$0xff] %v8608_v27  ;;  %2697 = vmatpush.msra.mxu0 %v2642_v28  ;;  %v8619_v3 = vpop.f32.mrf.mxu3  ;;  %2738 = vmatpush.msra.mxu1 %v2643_v46  ;;  %v5917_v46 = vld [vmem:[%s11022_s1 + $0x210] sm:$0xff] }
 0x3e6   : > { %11146 = vst [vmem:[#allocation46_spill] sm:$0xff] %v8613_v55 }
 0x3e7   : > { %11147 = vst [vmem:[#allocation47_spill] sm:$0xff] %v8619_v3  ;;  %2698 = vmatpush.msra.mxu0 %v2640_v60  ;;  %v2597_v7 = vpop.permute.xlu0 %2596  ;;  %5923 = vmatmul.msk.f32.vlgmr.msra.gmra.mxu2 %vm492_vm0, %v5915_v35  ;;  %v5892_v60 = vld [vmem:[%s11022_s1 + $0x1d0] sm:$0xff] }
 0x3e8   : > { %2739 = vmatpush.msra.mxu1 %v2641_v50  ;;  %v2613_v22 = vsel %vm11076_vm7, %v2581_v15, %v2597_v7  ;;  %v2621_v25 = vsel %vm11076_vm7, %v2597_v7, %v2581_v15  ;;  %5931 = vmatmul.msk.f32.vlgmr.msra.gmra.mxu3 %vm492_vm0, %v5915_v35  ;;  %v5918_v7 = vld [vmem:[%s11022_s1 + $0x218] sm:$0xff] }
 0x3e9   : > { %2699 = vmatpush.msra.mxu0 %v2638_v26  ;;  %v2636_v5 = vmul.f32 %v8490_v39, %v2613_v22  ;;  %v2637_v62 = vmul.f32 %v8500_v30, %v2621_v25  ;;  %v5893_v25 = vld [vmem:[%s11022_s1 + $0x1d8] sm:$0xff]  ;;  %v5921_v39 = vld [vmem:[%s11022_s1 + $0x230] sm:$0xff] }
 0x3ea   : > { %2740 = vmatpush.msra.mxu1 %v2639_v42 }
 0x3eb   : > { %2700 = vmatpush.msra.mxu0 %v2636_v5  ;;  %v8635_v44 = vpop.f32.mrf.mxu0 }
 0x3ec   : > { %11148 = vst [vmem:[#allocation48_spill] sm:$0xff] %v8635_v44  ;;  %2741 = vmatpush.msra.mxu1 %v2637_v62  ;;  %5898 = vmatmul.msk.f32.vlgmr.msra.gmra.mxu0 %vm492_vm0, %v5890_v19  ;;  %v8638_v10 = vpop.f32.mrf.mxu1  ;;  %v8643_v20 = vpop.f32.mrf.mxu2  ;;  %v5919_v62 = vld [vmem:[%s11022_s1 + $0x220] sm:$0xff] }
 0x3ed   : > { %11149 = vst [vmem:[#allocation49_spill] sm:$0xff] %v8638_v10  ;;  %5906 = vmatmul.msk.f32.vlgmr.msra.gmra.mxu1 %vm492_vm0, %v5890_v19  ;;  %v8646_v6 = vpop.f32.mrf.mxu3 }
 0x3ee   : > { %11150 = vst [vmem:[#allocation50_spill] sm:$0xff] %v8643_v20  ;;  %v5897_v20 = vld [vmem:[%s11022_s1 + $0x1f8] sm:$0xff] }
 0x3ef   : > { %11151 = vst [vmem:[#allocation51_spill] sm:$0xff] %v8646_v6  ;;  %5924 = vmatmul.msk.f32.gmra.mxu2 %vm492_vm0, %v5916_v1 }
 0x3f0   : > { %5932 = vmatmul.msk.f32.gmra.mxu3 %vm492_vm0, %v5916_v1 }
 0x3f3   : > { %v8653_v28 = vpop.f32.mrf.mxu0 }
 0x3f4   : > { %5899 = vmatmul.msk.f32.gmra.mxu0 %vm492_vm0, %v5891_v36  ;;  %v8656_v32 = vpop.f32.mrf.mxu1  ;;  %v8661_v35 = vpop.f32.mrf.mxu2 }
 0x3f5   : > { %5907 = vmatmul.msk.f32.gmra.mxu1 %vm492_vm0, %v5891_v36  ;;  %v8664_v2 = vpop.f32.mrf.mxu3  ;;  %v5894_v36 = vld [vmem:[%s11022_s1 + $0x1e0] sm:$0xff] }
 0x3f7   : > { %5925 = vmatmul.msk.f32.gmra.mxu2 %vm492_vm0, %v5917_v46 }
 0x3f8   : > { %5933 = vmatmul.msk.f32.gmra.mxu3 %vm492_vm0, %v5917_v46 }
 0x3fb   : > { %v8671_v50 = vpop.f32.mrf.mxu0 }
 0x3fc   : > { %5900 = vmatmul.msk.f32.gmra.mxu0 %vm492_vm0, %v5892_v60  ;;  %v8674_v15 = vpop.f32.mrf.mxu1  ;;  %v8679_v26 = vpop.f32.mrf.mxu2 }
 0x3fd   : > { %5908 = vmatmul.msk.f32.gmra.mxu1 %vm492_vm0, %v5892_v60  ;;  %v8682_v22 = vpop.f32.mrf.mxu3 }
 0x3ff   : > { %5926 = vmatmul.msk.f32.gmra.mxu2 %vm492_vm0, %v5918_v7 }
 0x400   : > { %5934 = vmatmul.msk.f32.gmra.mxu3 %vm492_vm0, %v5918_v7  ;;  %v5920_v7 = vld [vmem:[%s11022_s1 + $0x228] sm:$0xff] }
 0x403   : > { %v8689_v42 = vpop.f32.mrf.mxu0 }
 0x404   : > { %5901 = vmatmul.msk.f32.gmra.mxu0 %vm492_vm0, %v5893_v25  ;;  %v8692_v5 = vpop.f32.mrf.mxu1  ;;  %v8697_v19 = vpop.f32.mrf.mxu2 }
 0x405   : > { %5909 = vmatmul.msk.f32.gmra.mxu1 %vm492_vm0, %v5893_v25  ;;  %v8700_v1 = vpop.f32.mrf.mxu3 }
 0x407   : > { %5927 = vmatmul.msk.f32.gmra.mxu2 %vm492_vm0, %v5919_v62 }
 0x408   : > { %5935 = vmatmul.msk.f32.gmra.mxu3 %vm492_vm0, %v5919_v62  ;;  %v5895_v62 = vld [vmem:[%s11022_s1 + $0x1e8] sm:$0xff] }
 0x40b   : > { %v8707_v46 = vpop.f32.mrf.mxu0 }
 0x40c   : > { %5902 = vmatmul.msk.f32.gmra.mxu0 %vm492_vm0, %v5894_v36  ;;  %v8710_v60 = vpop.f32.mrf.mxu1  ;;  %v8715_v25 = vpop.f32.mrf.mxu2 }
 0x40d   : > { %5910 = vmatmul.msk.f32.gmra.mxu1 %vm492_vm0, %v5894_v36  ;;  %v8718_v30 = vpop.f32.mrf.mxu3 }
 0x40e   : > { %11152 = vst [vmem:[#allocation52_spill] sm:$0xff] %v8718_v30 }
 0x40f   : > { %5928 = vmatmul.msk.f32.gmra.mxu2 %vm492_vm0, %v5920_v7 }
 0x410   : > { %5936 = vmatmul.msk.f32.gmra.mxu3 %vm492_vm0, %v5920_v7  ;;  %v5896_v7 = vld [vmem:[%s11022_s1 + $0x1f0] sm:$0xff] }
 0x414   : > { %5903 = vmatmul.msk.f32.gmra.mxu0 %vm492_vm0, %v5895_v62 }
 0x415   : > { %5911 = vmatmul.msk.f32.gmra.mxu1 %vm492_vm0, %v5895_v62  ;;  %v8730_v12 = vpop.f32.mrf.mxu0  ;;  %v8732_v36 = vpop.f32.mrf.mxu1  ;;  %v5922_v62 = vld [vmem:[%s11022_s1 + $0x238] sm:$0xff] }
 0x416   : > { %11153 = vst [vmem:[#allocation53_spill] sm:$0xff] %v8730_v12  ;;  %v8734_v41 = vpop.f32.mrf.mxu2  ;;  %v8736_v51 = vpop.f32.mrf.mxu3 }
 0x417   : > { %11154 = vst [vmem:[#allocation54_spill] sm:$0xff] %v8732_v36  ;;  %5929 = vmatmul.msk.f32.gmra.mxu2 %vm492_vm0, %v5921_v39 }
 0x418   : > { %11155 = vst [vmem:[#allocation55_spill] sm:$0xff] %v8734_v41  ;;  %5937 = vmatmul.msk.f32.gmra.mxu3 %vm492_vm0, %v5921_v39 }
 0x419   : > { %11156 = vst [vmem:[#allocation56_spill] sm:$0xff] %v8736_v51 }
 0x41c   : > { %5904 = vmatmul.msk.f32.gmra.mxu0 %vm492_vm0, %v5896_v7 }
 0x41d   : > { %5912 = vmatmul.msk.f32.gmra.mxu1 %vm492_vm0, %v5896_v7 }
 0x41f   : > { %v8748_v3 = vpop.f32.mrf.mxu0  ;;  %v8750_v6 = vpop.f32.mrf.mxu1  ;;  %5930 = vmatmul.msk.f32.gmra.mxu2 %vm492_vm0, %v5922_v62 }
 0x420   : > { %11157 = vst [vmem:[#allocation57_spill] sm:$0xff] %v8748_v3  ;;  %5938 = vmatmul.msk.f32.gmra.mxu3 %vm492_vm0, %v5922_v62  ;;  %v8754_v39 = vpop.f32.mrf.mxu2  ;;  %v8756_v55 = vpop.f32.mrf.mxu3 }
 0x421   : > { %11158 = vst [vmem:[#allocation58_spill] sm:$0xff] %v8750_v6 }
 0x422   : > { %11159 = vst [vmem:[#allocation59_spill] sm:$0xff] %v8754_v39 }
 0x423   : > { %11160 = vst [vmem:[#allocation60_spill] sm:$0xff] %v8756_v55 }
 0x424   : > { %5905 = vmatmul.msk.f32.gmra.mxu0 %vm492_vm0, %v5897_v20 }
 0x425   : > { %5913 = vmatmul.msk.f32.gmra.mxu1 %vm492_vm0, %v5897_v20 }
 0x427   : > { %v8763_v7 = vpop.f32.mrf.mxu0  ;;  %v8765_v27 = vpop.f32.mrf.mxu1 }
 0x428   : > { %11161 = vst [vmem:[#allocation61_spill] sm:$0xff] %v8763_v7  ;;  %v8767_v10 = vpop.f32.mrf.mxu2  ;;  %v8769_v44 = vpop.f32.mrf.mxu3 }
 0x429   : > { %11162 = vst [vmem:[#allocation62_spill] sm:$0xff] %v8765_v27 }
 0x42a   : > { %11163 = vst [vmem:[#allocation63_spill] sm:$0xff] %v8767_v10 }
 0x42b   : > { %11164 = vst [vmem:[#allocation64_spill] sm:$0xff] %v8769_v44 }
 0x42f   : > { %v8771_v62 = vpop.f32.mrf.mxu0  ;;  %v8773_v39 = vpop.f32.mrf.mxu1 }
 0x430   : > { %11165 = vst [vmem:[#allocation65_spill] sm:$0xff] %v8771_v62  ;;  %v8775_v55 = vpop.f32.mrf.mxu2  ;;  %v8777_v43 = vpop.f32.mrf.mxu3 }
 0x431   : > { %11166 = vst [vmem:[#allocation66_spill] sm:$0xff] %v8773_v39 }
 0x432   : > { %11167 = vst [vmem:[#allocation67_spill] sm:$0xff] %v8775_v55 }
 0x433   : > { %11168 = vst [vmem:[#allocation68_spill] sm:$0xff] %v8777_v43 }
 0x437   : > { %v2302_v6 = vpop.f32.mrf.mxu0  ;;  %v2343_v3 = vpop.f32.mrf.mxu1 }
 0x438   : > { %v2505_v63 = vpop.f32.mrf.mxu2  ;;  %v2546_v20 = vpop.f32.mrf.mxu3 }
 0x43f   : > { %v2305_v8 = vpop.f32.mrf.mxu0  ;;  %v2346_v7 = vpop.f32.mrf.mxu1 }
 0x440   : > { %v8779_v51 = vpop.f32.mrf.mxu2  ;;  %v8781_v27 = vpop.f32.mrf.mxu3 }
 0x447   : > { %v8783_v10 = vpop.f32.mrf.mxu0  ;;  %v8785_v44 = vpop.f32.mrf.mxu1 }
 0x448   : > { %v8787_v62 = vpop.f32.mrf.mxu2  ;;  %v8789_v39 = vpop.f32.mrf.mxu3 }
 0x44f   : > { %v8791_v55 = vpop.f32.mrf.mxu0  ;;  %v8793_v43 = vpop.f32.mrf.mxu1 }
 0x450   : > { %11169 = vst [vmem:[#allocation69_spill] sm:$0xff] %v8791_v55  ;;  %v8795_v41 = vpop.f32.mrf.mxu2  ;;  %v8797_v52 = vpop.f32.mrf.mxu3 }
 0x451   : > { %11170 = vst [vmem:[#allocation70_spill] sm:$0xff] %v8793_v43 }
 0x452   : > { %11171 = vst [vmem:[#allocation71_spill] sm:$0xff] %v8797_v52  ;;  %v1579_v52 = vadd.f32 %v8335_v45, %v7993_v61  ;;  %v1582_v61 = vadd.f32 %v8359_v37, %v8019_v49 }
 0x457   : > { %v8799_v4 = vpop.f32.mrf.mxu0  ;;  %v8801_v36 = vpop.f32.mrf.mxu1 }
 0x458   : > { %11172 = vst [vmem:[#allocation72_spill] sm:$0xff] %v8799_v4 }
 0x459   : > { %11173 = vst [vmem:[#allocation73_spill] sm:$0xff] %v8801_v36  ;;  %v8803_v12 = vpop.f32.mrf.mxu2  ;;  %v8805_v16 = vpop.f32.mrf.mxu3 }
 0x45a   : > { %11174 = vst [vmem:[#allocation74_spill] sm:$0xff] %v8803_v12 }
 0x45b   : > { %11175 = vst [vmem:[#allocation75_spill] sm:$0xff] %v8805_v16  ;;  %v1620_v16 = vadd.f32 %v8339_v40, %v7995_v53  ;;  %v1623_v40 = vadd.f32 %v8361_v47, %v8021_v33  ;;  %v1585_v33 = vadd.f32 %v8383_v18, %v8046_v9 }
 0x45d   : > { %v1831_v49 = vadd.f32 %v8372_v48, %v1623_v40  ;;  %v8856_v48 = vpop.permute.xlu1 %3026 }
 0x461   : > { %v8807_v30 = vpop.f32.mrf.mxu0  ;;  %v8809_v31 = vpop.f32.mrf.mxu1 }
 0x462   : > { %11176 = vst [vmem:[#allocation76_spill] sm:$0xff] %v8807_v30  ;;  %v8811_v11 = vpop.f32.mrf.mxu2  ;;  %v8813_v55 = vpop.f32.mrf.mxu3 }
 0x463   : > { %11177 = vst [vmem:[#allocation77_spill] sm:$0xff] %v8809_v31  ;;  %v1828_v31 = vadd.f32 %v8346_v34, %v1579_v52  ;;  %v8842_v34 = vpop.permute.xlu0 %3021 }
 0x464   : > { %11178 = vst [vmem:[#allocation78_spill] sm:$0xff] %v8811_v11  ;;  %v1829_v11 = vadd.f32 %v8348_v17, %v1620_v16 }
 0x465   : > { %11179 = vst [vmem:[#allocation79_spill] sm:$0xff] %v8813_v55  ;;  %v2031_v55 = vadd.f32 %v8653_v28, %v1828_v31 }
 0x467   : > { %v2162_v45 = vadd.f32 %v8661_v35, %v2031_v55  ;;  %v2034_v55 = vadd.f32 %v8674_v15, %v1831_v49 }
 0x469   : > { %v8815_v43 = vpop.f32.mrf.mxu0  ;;  %v2365_v16 = vadd.f32 %v2302_v6, %v2162_v45 }
 0x46a   : > { %11180 = vst [vmem:[#allocation80_spill] sm:$0xff] %v8815_v43  ;;  %v8819_v4 = vpop.f32.mrf.mxu1  ;;  %v8821_v36 = vpop.f32.mrf.mxu2  ;;  %v2032_v43 = vadd.f32 %v8656_v32, %v1829_v11  ;;  %v1830_v11 = vadd.f32 %v8370_v21, %v1582_v61  ;;  %v1626_v21 = vadd.f32 %v8385_v29, %v8048_v56 }
 0x46b   : > { %11181 = vst [vmem:[#allocation81_spill] sm:$0xff] %v8821_v36  ;;  %v8825_v12 = vpop.f32.mrf.mxu3  ;;  %v2568_v28 = vadd.f32 %v2505_v63, %v2365_v16  ;;  %v1832_v63 = vadd.f32 %v8392_v38, %v1585_v33  ;;  %v3007_v18 = vpop.permute.xlu0 %3006 }
 0x46c   : > { %11182 = vst [vmem:[#allocation82_spill] sm:$0xff] %v8825_v12  ;;  %v2163_v17 = vadd.f32 %v8664_v2, %v2032_v43  ;;  %v2033_v52 = vadd.f32 %v8671_v50, %v1830_v11  ;;  %v1833_v9 = vadd.f32 %v8396_v58, %v1626_v21  ;;  %v1588_v58 = vadd.f32 %v8405_v54, %v8073_v59  ;;  %v8876_v16 = vpop.permute.xlu2 %3031 }
 0x46d   : > { %v2035_v45 = vadd.f32 %v8689_v42, %v1832_v63 }
 0x46e   : > { %v2366_v37 = vadd.f32 %v2343_v3, %v2163_v17  ;;  %v2164_v47 = vadd.f32 %v8679_v26, %v2033_v52  ;;  %v2165_v3 = vadd.f32 %v8682_v22, %v2034_v55  ;;  %v2036_v56 = vadd.f32 %v8692_v5, %v1833_v9 }
 0x46f   : > { %v1629_v5 = vadd.f32 %v8407_v57, %v8081_v23 }
 0x470   : > { %v2569_v32 = vadd.f32 %v2546_v20, %v2366_v37  ;;  %v2367_v15 = vadd.f32 %v2305_v8, %v2164_v47  ;;  %v2368_v26 = vadd.f32 %v2346_v7, %v2165_v3  ;;  %v2166_v8 = vadd.f32 %v8697_v19, %v2035_v45  ;;  %v3012_v19 = vpop.permute.xlu1 %3011  ;;  %v11185_v3 = vld [vmem:[#allocation52_spill] sm:$0xff]  ;;  %v11190_v45 = vld [vmem:[#allocation53_spill] sm:$0xff] }
 0x471   : > { %v8831_v30 = vpop.f32.mrf.mxu0  ;;  %v1834_v37 = vadd.f32 %v8414_v24, %v1588_v58  ;;  %v1835_v59 = vadd.f32 %v8420_v0, %v1629_v5  ;;  %v11193_v5 = vld [vmem:[#allocation23_spill] sm:$0xff] }
 0x472   : > { %v8836_v36 = vpop.f32.mrf.mxu1  ;;  %v8838_v53 = vpop.f32.mrf.mxu2  ;;  %v2570_v22 = vadd.f32 %v8779_v51, %v2367_v15  ;;  %v2571_v17 = vadd.f32 %v8781_v27, %v2368_v26  ;;  %v2167_v51 = vadd.f32 %v8700_v1, %v2036_v56  ;;  %v2369_v52 = vadd.f32 %v8783_v10, %v2166_v8  ;;  %v11187_v15 = vld [vmem:[#allocation69_spill] sm:$0xff]  ;;  %v11192_v8 = vld [vmem:[#allocation71_spill] sm:$0xff] }
 0x473   : > { %v8845_v31 = vpop.f32.mrf.mxu3  ;;  %v2037_v57 = vadd.f32 %v8707_v46, %v1834_v37  ;;  %v2038_v1 = vadd.f32 %v8710_v60, %v1835_v59  ;;  %v11184_v60 = vld [vmem:[#allocation35_spill] sm:$0xff]  ;;  %v11196_v37 = vld [vmem:[#allocation41_spill] sm:$0xff] }
 0x474   : > { %v2370_v55 = vadd.f32 %v8785_v44, %v2167_v51  ;;  %v1591_v44 = vadd.f32 %v8447_v14, %v8147_v13  ;;  %v11188_v14 = vld [vmem:[#allocation37_spill] sm:$0xff]  ;;  %v11194_v51 = vld [vmem:[#allocation40_spill] sm:$0xff] }
 0x475   : > { %v2168_v33 = vadd.f32 %v8715_v25, %v2037_v57  ;;  %v11189_v25 = vld [vmem:[#allocation70_spill] sm:$0xff] }
 0x476   : > { %v2573_v24 = vadd.f32 %v8789_v39, %v2370_v55  ;;  %v11198_v57 = vld [vmem:[#allocation10_spill] sm:$0xff] }
 0x479   : > { %v2708_v35 = vpop.f32.mrf.mxu0 }
 0x47a   : > { %v2771_v43 = vadd.f32 %v2708_v35, %v2568_v28  ;;  %v2749_v2 = vpop.f32.mrf.mxu1  ;;  %v2911_v12 = vpop.f32.mrf.mxu2  ;;  %v2572_v35 = vadd.f32 %v8787_v62, %v2369_v52 }
 0x47b   : > { %v2772_v6 = vadd.f32 %v2749_v2, %v2569_v32  ;;  %v2952_v50 = vpop.f32.mrf.mxu3  ;;  %v11183_v2 = vld [vmem:[#allocation22_spill] sm:$0xff] }
 0x47c   : > { %v2974_v20 = vadd.f32 %v2911_v12, %v2771_v43  ;;  %v1632_v21 = vadd.f32 %v11184_v60, %v11183_v2 }
 0x47d   : > { %v2975_v61 = vadd.f32 %v2952_v50, %v2772_v6  ;;  %v2169_v6 = vadd.f32 %v11185_v3, %v2038_v1  ;;  %v11186_v50 = vld [vmem:[#allocation36_spill] sm:$0xff]  ;;  %v11199_v1 = vld [vmem:[#allocation25_spill] sm:$0xff] }
 0x47e   : > { %v8862_v40 = vadd.f32 %v3007_v18, %v2974_v20  ;;  %v1836_v63 = vadd.f32 %v11186_v50, %v1591_v44  ;;  %v2371_v20 = vadd.f32 %v11187_v15, %v2168_v33  ;;  %v1837_v13 = vadd.f32 %v11188_v14, %v1632_v21  ;;  %v11201_v44 = vld [vmem:[#allocation42_spill] sm:$0xff]  ;;  %v11204_v21 = vld [vmem:[#allocation73_spill] sm:$0xff]  ;;  %v11205_v50 = vld [vmem:[#allocation8_spill] sm:$0xff] }
 0x47f   : > { %v8865_v29 = vadd.f32 %v3007_v18, %v2975_v61  ;;  %v3017_v18 = vpop.permute.xlu2 %3016  ;;  %v2372_v26 = vadd.f32 %v11189_v25, %v2169_v6  ;;  %v11209_v14 = vld [vmem:[#allocation57_spill] sm:$0xff] }
 0x480   : > { %v2039_v56 = vadd.f32 %v11190_v45, %v1836_v63  ;;  %v2574_v58 = vadd.f32 %v8795_v41, %v2371_v20  ;;  %v1573_v41 = vadd.f32 %v11199_v1, %v11198_v57  ;;  %v11206_v63 = vld [vmem:[#allocation26_spill] sm:$0xff]  ;;  %v11207_v20 = vld [vmem:[#allocation9_spill] sm:$0xff]  ;;  %v11220_v57 = vld [vmem:[#allocation48_spill] sm:$0xff] }
 0x481   : > { %v2711_v38 = vpop.f32.mrf.mxu0  ;;  %v3056_v12 = vadd.f32 %v8865_v29, %v8862_v40  ;;  %v1614_v15 = vadd.f32 %v11206_v63, %v11205_v50 }
 0x482   : > { %v2773_v42 = vadd.f32 %v2711_v38, %v2570_v22  ;;  %v2752_v7 = vpop.f32.mrf.mxu1  ;;  %v2914_v11 = vpop.f32.mrf.mxu2 }
 0x483   : > { %v2774_v27 = vadd.f32 %v2752_v7, %v2571_v17  ;;  %3057 = vadd.xlane.f32.xlu2 %v3056_v12  ;;  %v2955_v49 = vpop.f32.mrf.mxu3  ;;  %v11191_v17 = vld [vmem:[#allocation54_spill] sm:$0xff] }
 0x484   : > { %v2976_v54 = vadd.f32 %v2914_v11, %v2773_v42  ;;  %v2040_v38 = vadd.f32 %v11191_v17, %v1837_v13  ;;  %v2575_v42 = vadd.f32 %v11192_v8, %v2372_v26  ;;  %v11210_v26 = vld [vmem:[#allocation11_spill] sm:$0xff] }
 0x485   : > { %v2977_v28 = vadd.f32 %v2955_v49, %v2774_v27  ;;  %v1594_v27 = vadd.f32 %v11194_v51, %v11193_v5  ;;  %v11195_v49 = vld [vmem:[#allocation24_spill] sm:$0xff]  ;;  %v11216_v51 = vld [vmem:[#allocation74_spill] sm:$0xff] }
 0x486   : > { %v8884_v23 = vadd.f32 %v3012_v19, %v2976_v54  ;;  %v1635_v52 = vadd.f32 %v11196_v37, %v11195_v49  ;;  %v11197_v54 = vld [vmem:[#allocation55_spill] sm:$0xff]  ;;  %v11217_v49 = vld [vmem:[#allocation32_spill] sm:$0xff] }
 0x487   : > { %v8887_v32 = vadd.f32 %v3012_v19, %v2977_v28  ;;  %v2170_v59 = vadd.f32 %v11197_v54, %v2039_v56  ;;  %v1838_v33 = vadd.f32 %v11201_v44, %v1594_v27  ;;  %v11212_v56 = vld [vmem:[#allocation58_spill] sm:$0xff]  ;;  %v11222_v44 = vld [vmem:[#allocation49_spill] sm:$0xff] }
 0x489   : > { %v2714_v10 = vpop.f32.mrf.mxu0  ;;  %v3059_v0 = vadd.f32 %v8887_v32, %v8884_v23  ;;  %v2041_v13 = vadd.f32 %v11209_v14, %v1838_v33 }
 0x48a   : > { %v2775_v46 = vadd.f32 %v2714_v10, %v2572_v35  ;;  %v2755_v47 = vpop.f32.mrf.mxu1  ;;  %v2917_v43 = vpop.f32.mrf.mxu2  ;;  %v11200_v35 = vld [vmem:[#allocation56_spill] sm:$0xff] }
 0x48b   : > { %v2776_v62 = vadd.f32 %v2755_v47, %v2573_v24  ;;  %3060 = vadd.xlane.f32.xlu0 %v3059_v0  ;;  %v2958_v39 = vpop.f32.mrf.mxu3  ;;  %v2171_v24 = vadd.f32 %v11200_v35, %v2040_v38 }
 0x48c   : > { %v2978_v9 = vadd.f32 %v2917_v43, %v2775_v46  ;;  %v11202_v46 = vld [vmem:[#allocation43_spill] sm:$0xff]  ;;  %v11203_v43 = vld [vmem:[#allocation72_spill] sm:$0xff] }
 0x48d   : > { %v2979_v61 = vadd.f32 %v2958_v39, %v2776_v62  ;;  %v1839_v47 = vadd.f32 %v11202_v46, %v1635_v52  ;;  %v2373_v2 = vadd.f32 %v11203_v43, %v2170_v59  ;;  %v2374_v3 = vadd.f32 %v11204_v21, %v2171_v24  ;;  %v11218_v52 = vld [vmem:[#allocation75_spill] sm:$0xff]  ;;  %v11223_v46 = vld [vmem:[#allocation60_spill] sm:$0xff] }
 0x48e   : > { %v8904_v22 = vadd.f32 %v3017_v18, %v2978_v9  ;;  %v11208_v9 = vld [vmem:[#allocation29_spill] sm:$0xff] }
 0x48f   : > { %v8907_v12 = vadd.f32 %v3017_v18, %v2979_v61  ;;  %v1576_v18 = vadd.f32 %v11208_v9, %v11207_v20  ;;  %v11211_v61 = vld [vmem:[#allocation30_spill] sm:$0xff]  ;;  %v2042_v17 = vadd.f32 %v11212_v56, %v1839_v47  ;;  %v2576_v27 = vadd.f32 %v11216_v51, %v2373_v2 }
 0x490   : > { %v3082_v62 = vmul.f32 %v8904_v22, %v8904_v22  ;;  %v1617_v45 = vadd.f32 %v11211_v61, %v11210_v26  ;;  %v2577_v54 = vadd.f32 %v11218_v52, %v2374_v3  ;;  %v11225_v3 = vld [vmem:[#allocation76_spill] sm:$0xff]  ;;  %v11227_v9 = vld [vmem:[#allocation50_spill] sm:$0xff]  ;;  %v11229_v61 = vld [vmem:[#allocation51_spill] sm:$0xff] }
 0x491   : > { %v2717_v7 = vpop.f32.mrf.mxu0  ;;  %v3062_v11 = vadd.f32 %v8907_v12, %v8904_v22  ;;  %v3083_v39 = vmul.f32 %v8907_v12, %v8907_v12  ;;  %v2173_v47 = vadd.f32 %v11223_v46, %v2042_v17  ;;  %v11230_v17 = vld [vmem:[#allocation47_spill] sm:$0xff]  ;;  %v11233_v51 = vld [vmem:[#allocation66_spill] sm:$0xff] }
 0x492   : > { %v2777_v19 = vadd.f32 %v2717_v7, %v2574_v58  ;;  %v2758_v55 = vpop.f32.mrf.mxu1  ;;  %v2920_v28 = vpop.f32.mrf.mxu2  ;;  %v11213_v58 = vld [vmem:[#allocation27_spill] sm:$0xff]  ;;  %v1827_v37 = vadd.f32 %v11217_v49, %v1617_v45 }
 0x493   : > { %v2778_v10 = vadd.f32 %v2758_v55, %v2575_v42  ;;  %3063 = vadd.xlane.f32.xlu1 %v3062_v11  ;;  %v2961_v0 = vpop.f32.mrf.mxu3  ;;  %v1824_v8 = vadd.f32 %v11213_v58, %v1573_v41  ;;  %v11214_v42 = vld [vmem:[#allocation28_spill] sm:$0xff]  ;;  %v11215_v11 = vld [vmem:[#allocation31_spill] sm:$0xff]  ;;  %v3102_v55 = vadd.f32 %v3083_v39, %v3082_v62  ;;  %v11226_v39 = vld [vmem:[#allocation77_spill] sm:$0xff] }
 0x494   : > { %v2980_v60 = vadd.f32 %v2920_v28, %v2777_v19  ;;  %v1825_v7 = vadd.f32 %v11214_v42, %v1614_v15  ;;  %v1826_v5 = vadd.f32 %v11215_v11, %v1576_v18  ;;  %v11219_v28 = vld [vmem:[#allocation44_spill] sm:$0xff]  ;;  %v11221_v41 = vld [vmem:[#allocation59_spill] sm:$0xff]  ;;  %v2030_v33 = vadd.f32 %v11222_v44, %v1827_v37 }
 0x495   : > { %v2981_v6 = vadd.f32 %v2961_v0, %v2778_v10  ;;  %v2172_v35 = vadd.f32 %v11221_v41, %v2041_v13  ;;  %v2376_v50 = vadd.f32 %v11226_v39, %v2173_v47  ;;  %v11228_v13 = vld [vmem:[#allocation46_spill] sm:$0xff]  ;;  %v11234_v49 = vld [vmem:[#allocation79_spill] sm:$0xff] }
 0x496   : > { %v8935_v25 = vadd.f32 %v8842_v34, %v2980_v60  ;;  %v2029_v1 = vadd.f32 %v11220_v57, %v1826_v5  ;;  %v11224_v60 = vld [vmem:[#allocation45_spill] sm:$0xff]  ;;  %v2161_v45 = vadd.f32 %v11229_v61, %v2030_v33  ;;  %v11236_v57 = vld [vmem:[#allocation62_spill] sm:$0xff]  ;;  %v11238_v33 = vld [vmem:[#allocation68_spill] sm:$0xff] }
 0x497   : > { %v8941_v38 = vadd.f32 %v8842_v34, %v2981_v6  ;;  %v2027_v34 = vadd.f32 %v11219_v28, %v1824_v8  ;;  %v2028_v21 = vadd.f32 %v11224_v60, %v1825_v7  ;;  %v2375_v6 = vadd.f32 %v11225_v3, %v2172_v35  ;;  %v11231_v8 = vld [vmem:[#allocation65_spill] sm:$0xff]  ;;  %v11232_v7 = vld [vmem:[#allocation78_spill] sm:$0xff] }
 0x498   : > { %v3084_v15 = vmul.f32 %v8935_v25, %v8935_v25  ;;  %v2160_v18 = vadd.f32 %v11227_v9, %v2029_v1  ;;  %v2579_v37 = vadd.f32 %v11234_v49, %v2376_v50  ;;  %v11241_v50 = vld [vmem:[#allocation80_spill] sm:$0xff] }
 0x499   : > { %v2720_v59 = vpop.f32.mrf.mxu0  ;;  %v3065_v19 = vadd.f32 %v8941_v38, %v8935_v25  ;;  %v3085_v20 = vmul.f32 %v8941_v38, %v8941_v38  ;;  %v2158_v26 = vadd.f32 %v11228_v13, %v2027_v34  ;;  %v2159_v58 = vadd.f32 %v11230_v17, %v2028_v21  ;;  %v11240_v21 = vld [vmem:[#allocation64_spill] sm:$0xff] }
 0x49a   : > { %v2779_v24 = vadd.f32 %v2720_v59, %v2576_v27  ;;  %v2761_v10 = vpop.f32.mrf.mxu1  ;;  %v2923_v0 = vpop.f32.mrf.mxu2  ;;  %v2363_v42 = vadd.f32 %v11231_v8, %v2160_v18  ;;  %v2578_v11 = vadd.f32 %v11232_v7, %v2375_v6  ;;  %v2364_v27 = vadd.f32 %v11233_v51, %v2161_v45  ;;  %v11243_v45 = vld [vmem:[#allocation82_spill] sm:$0xff] }
 0x49b   : > { %v2780_v43 = vadd.f32 %v2761_v10, %v2577_v54  ;;  %3066 = vadd.xlane.f32.xlu2 %v3065_v19  ;;  %3103 = vadd.xlane.f32.xlu1 %v3102_v55  ;;  %v2964_v2 = vpop.f32.mrf.mxu3  ;;  %v3105_v54 = vadd.f32 %v3085_v20, %v3084_v15  ;;  %v2362_v1 = vadd.f32 %v11236_v57, %v2159_v58  ;;  %v3419_v57 = vld [vmem:[%s11028_s7 + $0x38] sm:$0xff] }
 0x49c   : > { %v2982_v62 = vadd.f32 %v2923_v0, %v2779_v24  ;;  %v11237_v0 = vld [vmem:[#allocation67_spill] sm:$0xff]  ;;  %v2567_v46 = vadd.f32 %v11238_v33, %v2364_v27  ;;  %v3079_v58 = vmul.f32 %v8865_v29, %v8865_v29  ;;  %v3081_v7 = vmul.f32 %v8887_v32, %v8887_v32  ;;  %v3480_v33 = vld [vmem:[%s11029_s8 + $0x20] sm:$0xff] }
 0x49d   : > { %v2983_v63 = vadd.f32 %v2964_v2, %v2780_v43  ;;  %v2566_v44 = vadd.f32 %v11237_v0, %v2363_v42  ;;  %v11239_v43 = vld [vmem:[#allocation63_spill] sm:$0xff]  ;;  %v2565_v3 = vadd.f32 %v11240_v21, %v2362_v1  ;;  %v3080_v42 = vmul.f32 %v8884_v23, %v8884_v23  ;;  %v3417_v1 = vld [vmem:[%s11028_s7 + $0x28] sm:$0xff] }
 0x49e   : > { %v8965_v14 = vadd.f32 %v8856_v48, %v2982_v62  ;;  %v2770_v62 = vadd.f32 %v8836_v36, %v2567_v46  ;;  %v3481_v0 = vld [vmem:[%s11029_s8 + $0x28] sm:$0xff] }
 0x49f   : > { %v8970_v56 = vadd.f32 %v8856_v48, %v2983_v63  ;;  %v11235_v48 = vld [vmem:[#allocation61_spill] sm:$0xff]  ;;  %v2769_v6 = vadd.f32 %v8831_v30, %v2566_v44  ;;  %v2768_v20 = vadd.f32 %v8819_v4, %v2565_v3  ;;  %v3078_v4 = vmul.f32 %v8862_v40, %v8862_v40  ;;  %v3414_v44 = vld [vmem:[%s11028_s7 + $0x10] sm:$0xff]  ;;  %v3413_v46 = vld [vmem:[%s11028_s7 + $0x8] sm:$0xff] }
 0x4a0   : > { %v3086_v5 = vmul.f32 %v8965_v14, %v8965_v14  ;;  %v2361_v19 = vadd.f32 %v11235_v48, %v2158_v26  ;;  %v2973_v36 = vadd.f32 %v8845_v31, %v2770_v62  ;;  %v11242_v26 = vld [vmem:[#allocation81_spill] sm:$0xff]  ;;  %v3099_v49 = vadd.f32 %v3081_v7, %v3080_v42  ;;  %v6319_v42 = vld [vmem:[%s11030_s9 + $0x38] sm:$0xff] }
 0x4a1   : > { %v2723_v52 = vpop.f32.mrf.mxu0  ;;  %v3087_v59 = vmul.f32 %v8970_v56, %v8970_v56  ;;  %v3068_v9 = vadd.f32 %v8970_v56, %v8965_v14  ;;  %v2972_v30 = vadd.f32 %v8838_v53, %v2769_v6  ;;  %v2971_v17 = vadd.f32 %v11243_v45, %v2768_v20  ;;  %v3002_v53 = vpop.permute.xlu2 %3001  ;;  %v6314_v45 = vld [vmem:[%s11030_s9 + $0x10] sm:$0xff] }
 0x4a2   : > { %v2781_v55 = vadd.f32 %v2723_v52, %v2578_v11  ;;  %v2764_v28 = vpop.f32.mrf.mxu1  ;;  %v2926_v34 = vpop.f32.mrf.mxu2  ;;  %v2564_v2 = vadd.f32 %v11239_v43, %v2361_v19  ;;  %v9015_v31 = vadd.f32 %v3002_v53, %v2973_v36  ;;  %v3096_v27 = vadd.f32 %v3079_v58, %v3078_v4  ;;  %v6316_v4 = vld [vmem:[%s11030_s9 + $0x20] sm:$0xff]  ;;  %v6317_v58 = vld [vmem:[%s11030_s9 + $0x28] sm:$0xff] }
 0x4a3   : > { %v2782_v41 = vadd.f32 %v2764_v28, %v2579_v37  ;;  %3106 = vadd.xlane.f32.xlu2 %v3105_v54  ;;  %v2967_v35 = vpop.f32.mrf.mxu3  ;;  %v3108_v24 = vadd.f32 %v3087_v59, %v3086_v5  ;;  %v9013_v8 = vadd.f32 %v3002_v53, %v2972_v30  ;;  %v2997_v11 = vpop.permute.xlu1 %2996  ;;  %v6318_v53 = vld [vmem:[%s11030_s9 + $0x30] sm:$0xff] }
 0x4a4   : > { %v2984_v10 = vadd.f32 %v2926_v34, %v2781_v55  ;;  %v2767_v63 = vadd.f32 %v11241_v50, %v2564_v2  ;;  %v9023_v51 = vadd.f32 %v2997_v11, %v2971_v17  ;;  %v3077_v48 = vmul.f32 %v9015_v31, %v9015_v31  ;;  %v3418_v34 = vld [vmem:[%s11028_s7 + $0x30] sm:$0xff]  ;;  %v6315_v17 = vld [vmem:[%s11030_s9 + $0x18] sm:$0xff] }
 0x4a5   : > { %v2985_v47 = vadd.f32 %v2967_v35, %v2782_v41  ;;  %3109 = vadd.xlane.f32.xlu0 %v3108_v24  ;;  %v3053_v37 = vadd.f32 %v9015_v31, %v9013_v8  ;;  %v3076_v59 = vmul.f32 %v9013_v8, %v9013_v8  ;;  %v3483_v41 = vld [vmem:[%s11029_s8 + $0x38] sm:$0xff]  ;;  %v3416_v35 = vld [vmem:[%s11028_s7 + $0x20] sm:$0xff]  ;;  %v3482_v24 = vld [vmem:[%s11029_s8 + $0x30] sm:$0xff] }
 0x4a6   : > { %v8987_v60 = vadd.f32 %v8876_v16, %v2984_v10  ;;  %v2970_v61 = vadd.f32 %v11242_v26, %v2767_v63  ;;  %v3075_v54 = vmul.f32 %v9023_v51, %v9023_v51  ;;  %v3415_v10 = vld [vmem:[%s11028_s7 + $0x18] sm:$0xff]  ;;  %v6312_v26 = vld [vmem:[%s11030_s9] sm:$0xff] }
 0x4a7   : > { %v8993_v39 = vadd.f32 %v8876_v16, %v2985_v47  ;;  %v3093_v28 = vadd.f32 %v3077_v48, %v3076_v59  ;;  %v3479_v47 = vld [vmem:[%s11029_s8 + $0x18] sm:$0xff] }
 0x4a8   : > { %v3088_v15 = vmul.f32 %v8987_v60, %v8987_v60  ;;  %v9021_v5 = vadd.f32 %v2997_v11, %v2970_v61  ;;  %v6313_v61 = vld [vmem:[%s11030_s9 + $0x8] sm:$0xff] }
 0x4a9   : > { %v3089_v18 = vmul.f32 %v8993_v39, %v8993_v39  ;;  %v3071_v16 = vadd.f32 %v8993_v39, %v8987_v60 }
 0x4aa   : > { %v3074_v52 = vmul.f32 %v9021_v5, %v9021_v5  ;;  %v3050_v55 = vadd.f32 %v9023_v51, %v9021_v5 }
 0x4ab   : > { %3069 = vadd.xlane.f32.xlu2 %v3068_v9  ;;  %v3111_v13 = vadd.f32 %v3089_v18, %v3088_v15 }
 0x4ac   : > { %v3090_v19 = vadd.f32 %v3075_v54, %v3074_v52 }
 0x4ad   : > { %3072 = vadd.xlane.f32.xlu0 %v3071_v16  ;;  %3112 = vadd.xlane.f32.xlu1 %v3111_v13 }
 0x4b3   : > { %3097 = vadd.xlane.f32.xlu2 %v3096_v27 }
 0x4b5   : > { %3100 = vadd.xlane.f32.xlu0 %v3099_v49  ;;  %3054 = vadd.xlane.f32.xlu1 %v3053_v37 }
 0x4bb   : > { %3091 = vadd.xlane.f32.xlu2 %v3090_v19 }
 0x4bd   : > { %3051 = vadd.xlane.f32.xlu0 %v3050_v55  ;;  %3094 = vadd.xlane.f32.xlu1 %v3093_v28 }
 0x4d3   : > { %3452 = vperm.xlu2 %6149, %v3418_v34  }
 0x4d6   : > { %3457 = vperm.xlu1 %6150, %v3419_v57  }
 0x4db   : > { %3447 = vperm.xlu2 %6149, %v3417_v1  }
 0x4de   : > { %3521 = vperm.xlu1 %6150, %v3483_v41  }
 0x4e3   : > { %3442 = vperm.xlu2 %6149, %v3416_v35  }
 0x4e6   : > { %3516 = vperm.xlu1 %6150, %v3482_v24  }
 0x4eb   : > { %3437 = vperm.xlu2 %6149, %v3415_v10  }
 0x4ee   : > { %3511 = vperm.xlu1 %6150, %v3481_v0  }
 0x4f3   : > { %3432 = vperm.xlu2 %6149, %v3414_v44  }
 0x4f6   : > { %3506 = vperm.xlu1 %6150, %v3480_v33   ;;  %v3058_v43 = vpop.xlane.xlu2 %3057 }
 0x4fb   : > { %3427 = vperm.xlu2 %6149, %v3413_v46  }
 0x4fe   : > { %3501 = vperm.xlu1 %6150, %v3479_v47   ;;  %v3061_v3 = vpop.xlane.xlu0 %3060 }
 0x506   : > { %v3064_v2 = vpop.xlane.xlu1 %3063 }
 0x50e   : > { %v3067_v21 = vpop.xlane.xlu2 %3066  ;;  %v3104_v62 = vpop.xlane.xlu1 %3103 }
 0x516   : > { %v3107_v6 = vpop.xlane.xlu2 %3106 }
 0x518   : > { %v3110_v50 = vpop.xlane.xlu0 %3109 }
 0x51e   : > { %v3070_v63 = vpop.xlane.xlu2 %3069 }
 0x520   : > { %v3073_v15 = vpop.xlane.xlu0 %3072  ;;  %v3113_v20 = vpop.xlane.xlu1 %3112 }
 0x521   : > { %3122 = vmatpush.msrb.mxu0 %v3073_v15  ;;  %3163 = vmatpush.msrb.mxu1 %v3113_v20 }
 0x523   : > { %3123 = vmatpush.msrb.mxu0 %v3070_v63  ;;  %3164 = vmatpush.msrb.mxu1 %v3110_v50 }
 0x525   : > { %3124 = vmatpush.msrb.mxu0 %v3067_v21  ;;  %3165 = vmatpush.msrb.mxu1 %v3107_v6 }
 0x526   : > { %v3098_v9 = vpop.xlane.xlu2 %3097 }
 0x527   : > { %3125 = vmatpush.msrb.mxu0 %v3064_v2  ;;  %3166 = vmatpush.msrb.mxu1 %v3104_v62 }
 0x528   : > { %v3101_v18 = vpop.xlane.xlu0 %3100  ;;  %v3055_v30 = vpop.xlane.xlu1 %3054 }
 0x529   : > { %3126 = vmatpush.msrb.mxu0 %v3061_v3  ;;  %3167 = vmatpush.msrb.mxu1 %v3101_v18 }
 0x52b   : > { %3127 = vmatpush.msrb.mxu0 %v3058_v43  ;;  %3168 = vmatpush.msrb.mxu1 %v3098_v9 }
 0x52d   : > { %3128 = vmatpush.msrb.mxu0 %v3055_v30 }
 0x52e   : > { %v3092_v13 = vpop.xlane.xlu2 %3091 }
 0x530   : > { %v3052_v36 = vpop.xlane.xlu0 %3051  ;;  %v3095_v16 = vpop.xlane.xlu1 %3094 }
 0x531   : > { %3129 = vmatpush.msrb.mxu0 %v3052_v36  ;;  %3169 = vmatpush.msrb.mxu1 %v3095_v16 }
 0x532   : > { %5939 = vmatmul.msk.f32.vlgmr.msrb.gmra.mxu0 %vm492_vm0, %v6312_v26 }
 0x533   : > { %3170 = vmatpush.msrb.mxu1 %v3092_v13 }
 0x534   : > { %5947 = vmatmul.msk.f32.vlgmr.msrb.gmra.mxu1 %vm492_vm0, %v6312_v26 }
 0x53a   : > { %5940 = vmatmul.msk.f32.gmra.mxu0 %vm492_vm0, %v6313_v61 }
 0x53c   : > { %5948 = vmatmul.msk.f32.gmra.mxu1 %vm492_vm0, %v6313_v61 }
 0x542   : > { %5941 = vmatmul.msk.f32.gmra.mxu0 %vm492_vm0, %v6314_v45 }
 0x544   : > { %5949 = vmatmul.msk.f32.gmra.mxu1 %vm492_vm0, %v6314_v45 }
 0x54a   : > { %5942 = vmatmul.msk.f32.gmra.mxu0 %vm492_vm0, %v6315_v17 }
 0x54c   : > { %5950 = vmatmul.msk.f32.gmra.mxu1 %vm492_vm0, %v6315_v17 }
 0x552   : > { %5943 = vmatmul.msk.f32.gmra.mxu0 %vm492_vm0, %v6316_v4 }
 0x554   : > { %5951 = vmatmul.msk.f32.gmra.mxu1 %vm492_vm0, %v6316_v4 }
 0x55a   : > { %5944 = vmatmul.msk.f32.gmra.mxu0 %vm492_vm0, %v6317_v58 }
 0x55c   : > { %5952 = vmatmul.msk.f32.gmra.mxu1 %vm492_vm0, %v6317_v58 }
 0x562   : > { %5945 = vmatmul.msk.f32.gmra.mxu0 %vm492_vm0, %v6318_v53 }
 0x564   : > { %5953 = vmatmul.msk.f32.gmra.mxu1 %vm492_vm0, %v6318_v53 }
 0x56a   : > { %5946 = vmatmul.msk.f32.gmra.mxu0 %vm492_vm0, %v6319_v42 }
 0x56c   : > { %5954 = vmatmul.msk.f32.gmra.mxu1 %vm492_vm0, %v6319_v42 }
 0x5af   : > { %v3131_v7 = vpop.f32.mrf.mxu0 }
 0x5b0   : > { %v3196_v11 = vmul.f32 %v3131_v7, %v3131_v7  ;;  %3214 = vperm.xlu0 %6151, %v3131_v7  }
 0x5b1   : > { %v3172_v27 = vpop.f32.mrf.mxu1 }
 0x5b2   : > { %v3204_v49 = vsub.f32 %v3172_v27, %v3196_v11 }
 0x5b4   : > { %v3268_v37 = vadd.f32 1e-05, %v3204_v49 }
 0x5b6   : > { %6232 = vrsqrt.f32 %v3268_v37  ;;  %vm3282_vm9 = vweird.f32 %v3268_v37 }
 0x5b7   : > { %v3134_v52 = vpop.f32.mrf.mxu0 }
 0x5b8   : > { %v3197_v54 = vmul.f32 %v3134_v52, %v3134_v52  ;;  %3219 = vperm.xlu1 %6150, %v3134_v52  }
 0x5b9   : > { %v3175_v59 = vpop.f32.mrf.mxu1 }
 0x5ba   : > { %v3205_v48 = vsub.f32 %v3175_v59, %v3197_v54 }
 0x5bc   : > { %v6233_v19 = vpop.eup %6232  ;;  %v3269_v55 = vadd.f32 1e-05, %v3205_v48 }
 0x5bd   : > { %v3277_v28 = vmul.f32 %v6233_v19, %v3268_v37  ;;  %vm3283_vm8 = vweird.f32 %v6233_v19 }
 0x5be   : > { %6234 = vrsqrt.f32 %v3269_v55  ;;  %vm3284_vm10 = vmor %vm3282_vm9, %vm3283_vm8  ;;  %vm3292_vm13 = vweird.f32 %v3269_v55 }
 0x5bf   : > { %v3278_v34 = vmul.f32 %v6233_v19, %v3277_v28  ;;  %v3137_v57 = vpop.f32.mrf.mxu0 }
 0x5c0   : > { %v3198_v1 = vmul.f32 %v3137_v57, %v3137_v57  ;;  %3224 = vperm.xlu2 %6149, %v3137_v57  }
 0x5c1   : > { %v3178_v41 = vpop.f32.mrf.mxu1  ;;  %v3279_v24 = vmul.f32 0.5, %v3278_v34 }
 0x5c2   : > { %v3206_v35 = vsub.f32 %v3178_v41, %v3198_v1 }
 0x5c3   : > { %v3280_v33 = vsub.f32 1.5, %v3279_v24 }
 0x5c4   : > { %v6235_v10 = vpop.eup %6234  ;;  %v3270_v44 = vadd.f32 1e-05, %v3206_v35 }
 0x5c5   : > { %v3287_v0 = vmul.f32 %v6235_v10, %v3269_v55  ;;  %v3281_v6 = vmul.f32 %v6233_v19, %v3280_v33  ;;  %vm3293_vm11 = vweird.f32 %v6235_v10 }
 0x5c6   : > { %6236 = vrsqrt.f32 %v3270_v44  ;;  %vm3294_vm14 = vmor %vm3292_vm13, %vm3293_vm11  ;;  %vm3302_vm8 = vweird.f32 %v3270_v44 }
 0x5c7   : > { %v3288_v46 = vmul.f32 %v6235_v10, %v3287_v0  ;;  %v3140_v47 = vpop.f32.mrf.mxu0  ;;  %v3285_v15 = vsel %vm3284_vm10, %v6233_v19, %v3281_v6 }
 0x5c8   : > { %v3199_v43 = vmul.f32 %v3140_v47, %v3140_v47  ;;  %3229 = vperm.xlu0 %6151, %v3140_v47  }
 0x5c9   : > { %v3181_v2 = vpop.f32.mrf.mxu1  ;;  %v3289_v3 = vmul.f32 0.5, %v3288_v46 }
 0x5ca   : > { %v3207_v21 = vsub.f32 %v3181_v2, %v3199_v43 }
 0x5cb   : > { %v3290_v50 = vsub.f32 1.5, %v3289_v3  ;;  %v3478_v3 = vld [vmem:[%s11029_s8 + $0x10] sm:$0xff] }
 0x5cc   : > { %v9113_v62 = vadd.f32 1e-05, %v3207_v21  ;;  %v6237_v20 = vpop.eup %6236 }
 0x5cd   : > { %v3297_v36 = vmul.f32 %v6237_v20, %v3270_v44  ;;  %v3291_v16 = vmul.f32 %v6235_v10, %v3290_v50  ;;  %vm3303_vm12 = vweird.f32 %v6237_v20 }
 0x5ce   : > { %6238 = vrsqrt.f32 %v9113_v62  ;;  %vm3304_vm9 = vmor %vm3302_vm8, %vm3303_vm12  ;;  %vm3312_vm11 = vweird.f32 %v9113_v62 }
 0x5cf   : > { %v3143_v63 = vpop.f32.mrf.mxu0  ;;  %v3298_v26 = vmul.f32 %v6237_v20, %v3297_v36  ;;  %v3295_v45 = vsel %vm3294_vm14, %v6235_v10, %v3291_v16  ;;  %v3476_v16 = vld [vmem:[%s11029_s8] sm:$0xff] }
 0x5d0   : > { %v3200_v9 = vmul.f32 %v3143_v63, %v3143_v63  ;;  %3234 = vperm.xlu1 %6150, %v3143_v63   ;;  %3358 = vperm.xlu0 %6151, %v3285_v15  }
 0x5d1   : > { %v3184_v18 = vpop.f32.mrf.mxu1  ;;  %v3299_v42 = vmul.f32 0.5, %v3298_v26 }
 0x5d2   : > { %v3208_v30 = vsub.f32 %v3184_v18, %v3200_v9 }
 0x5d3   : > { %v3300_v49 = vsub.f32 1.5, %v3299_v42 }
 0x5d4   : > { %v9116_v13 = vadd.f32 1e-05, %v3208_v30  ;;  %v6239_v17 = vpop.eup %6238 }
 0x5d5   : > { %v3307_v7 = vmul.f32 %v6239_v17, %v9113_v62  ;;  %v3301_v28 = vmul.f32 %v6237_v20, %v3300_v49  ;;  %vm3313_vm10 = vweird.f32 %v6239_v17 }
 0x5d6   : > { %6240 = vrsqrt.f32 %v9116_v13  ;;  %vm3314_vm13 = vmor %vm3312_vm11, %vm3313_vm10  ;;  %vm3322_vm14 = vweird.f32 %v9116_v13 }
 0x5d7   : > { %v3146_v61 = vpop.f32.mrf.mxu0  ;;  %v3308_v37 = vmul.f32 %v6239_v17, %v3307_v7  ;;  %v3305_v35 = vsel %vm3304_vm9, %v6237_v20, %v3301_v28 }
 0x5d8   : > { %v3201_v4 = vmul.f32 %v3146_v61, %v3146_v61  ;;  %3363 = vperm.xlu0 %6151, %v3295_v45  }
 0x5d9   : > { %v3187_v58 = vpop.f32.mrf.mxu1  ;;  %v3309_v55 = vmul.f32 0.5, %v3308_v37  ;;  %v9144_v37 = vpop.permute.xlu2 %3452 }
 0x5da   : > { %v3209_v53 = vsub.f32 %v3187_v58, %v3201_v4 }
 0x5db   : > { %v3310_v1 = vsub.f32 1.5, %v3309_v55 }
 0x5dc   : > { %v9120_v11 = vadd.f32 1e-05, %v3209_v53  ;;  %v9122_v27 = vpop.eup %6240  ;;  %v3477_v53 = vld [vmem:[%s11029_s8 + $0x8] sm:$0xff] }
 0x5dd   : > { %v3317_v48 = vmul.f32 %v9122_v27, %v9116_v13  ;;  %v3311_v43 = vmul.f32 %v6239_v17, %v3310_v1  ;;  %vm3323_vm12 = vweird.f32 %v9122_v27 }
 0x5de   : > { %6242 = vrsqrt.f32 %v9120_v11  ;;  %vm3324_vm10 = vmor %vm3322_vm14, %vm3323_vm12 }
 0x5df   : > { %v3149_v52 = vpop.f32.mrf.mxu0  ;;  %v3318_v57 = vmul.f32 %v9122_v27, %v3317_v48  ;;  %v3315_v15 = vsel %vm3314_vm13, %v6239_v17, %v3311_v43  ;;  %vm3332_vm13 = vweird.f32 %v9120_v11 }
 0x5e0   : > { %v3202_v54 = vmul.f32 %v3149_v52, %v3149_v52  ;;  %3244 = vperm.xlu2 %6149, %v3149_v52   ;;  %3239 = vperm.xlu0 %6151, %v3146_v61   ;;  %v9149_v52 = vpop.permute.xlu1 %3457 }
 0x5e1   : > { %v3190_v59 = vpop.f32.mrf.mxu1  ;;  %v3319_v33 = vmul.f32 0.5, %v3318_v57 }
 0x5e2   : > { %v3210_v19 = vsub.f32 %v3190_v59, %v3202_v54  ;;  %v9151_v54 = vpop.permute.xlu2 %3447 }
 0x5e3   : > { %v3320_v6 = vsub.f32 1.5, %v3319_v33 }
 0x5e4   : > { %v3274_v34 = vadd.f32 1e-05, %v3210_v19  ;;  %v6243_v24 = vpop.eup %6242 }
 0x5e5   : > { %v3327_v47 = vmul.f32 %v6243_v24, %v9120_v11  ;;  %v3321_v9 = vmul.f32 %v9122_v27, %v3320_v6  ;;  %vm3333_vm7 = vweird.f32 %v6243_v24  ;;  %v3412_v11 = vld [vmem:[%s11028_s7] sm:$0xff] }
 0x5e6   : > { %6244 = vrsqrt.f32 %v3274_v34  ;;  %vm3342_vm8 = vweird.f32 %v3274_v34  ;;  %vm3334_vm6 = vmor %vm3332_vm13, %vm3333_vm7 }
 0x5e7   : > { %v3152_v41 = vpop.f32.mrf.mxu0  ;;  %v3328_v50 = vmul.f32 %v6243_v24, %v3327_v47  ;;  %v3325_v17 = vsel %vm3324_vm10, %v9122_v27, %v3321_v9 }
 0x5e8   : > { %v3203_v10 = vmul.f32 %v3152_v41, %v3152_v41  ;;  %3249 = vperm.xlu1 %6150, %v3152_v41   ;;  %3368 = vperm.xlu0 %6151, %v3305_v35   ;;  %v9153_v59 = vpop.permute.xlu1 %3521 }
 0x5e9   : > { %v3193_v0 = vpop.f32.mrf.mxu1  ;;  %v3329_v18 = vmul.f32 0.5, %v3328_v50 }
 0x5ea   : > { %v3211_v46 = vsub.f32 %v3193_v0, %v3203_v10  ;;  %v9155_v48 = vpop.permute.xlu2 %3442 }
 0x5eb   : > { %v3330_v61 = vsub.f32 1.5, %v3329_v18 }
 0x5ec   : > { %v6245_v2 = vpop.eup %6244  ;;  %v3275_v44 = vadd.f32 1e-05, %v3211_v46 }
 0x5ed   : > { %v3337_v21 = vmul.f32 %v6245_v2, %v3274_v34  ;;  %vm3343_vm9 = vweird.f32 %v6245_v2  ;;  %v3331_v58 = vmul.f32 %v6243_v24, %v3330_v61 }
 0x5ee   : > { %6246 = vrsqrt.f32 %v3275_v44  ;;  %vm3344_vm11 = vmor %vm3342_vm8, %vm3343_vm9  ;;  %vm3352_vm14 = vweird.f32 %v3275_v44 }
 0x5ef   : > { %v3338_v63 = vmul.f32 %v6245_v2, %v3337_v21  ;;  %v3335_v7 = vsel %vm3334_vm6, %v6243_v24, %v3331_v58 }
 0x5f0   : > { %3496 = vperm.xlu1 %6150, %v3478_v3   ;;  %3373 = vperm.xlu0 %6151, %v3315_v15   ;;  %v9157_v19 = vpop.permute.xlu1 %3516 }
 0x5f1   : > { %v3339_v20 = vmul.f32 0.5, %v3338_v63 }
 0x5f2   : > { %v9159_v55 = vpop.permute.xlu2 %3437 }
 0x5f3   : > { %v3340_v30 = vsub.f32 1.5, %v3339_v20 }
 0x5f4   : > { %v6247_v62 = vpop.eup %6246 }
 0x5f5   : > { %v3347_v36 = vmul.f32 %v6247_v62, %v3275_v44  ;;  %v3341_v26 = vmul.f32 %v6245_v2, %v3340_v30  ;;  %vm3353_vm12 = vweird.f32 %v6247_v62 }
 0x5f6   : > { %vm3354_vm8 = vmor %vm3352_vm14, %vm3353_vm12 }
 0x5f7   : > { %v3348_v45 = vmul.f32 %v6247_v62, %v3347_v36  ;;  %v3345_v13 = vsel %vm3344_vm11, %v6245_v2, %v3341_v26 }
 0x5f8   : > { %3486 = vperm.xlu1 %6150, %v3476_v16   ;;  %3378 = vperm.xlu0 %6151, %v3325_v17   ;;  %v9161_v28 = vpop.permute.xlu1 %3511 }
 0x5f9   : > { %3388 = vperm.xlu2 %6149, %v3345_v13   ;;  %v3349_v4 = vmul.f32 0.5, %v3348_v45 }
 0x5fa   : > { %v9163_v34 = vpop.permute.xlu2 %3432 }
 0x5fb   : > { %v3350_v42 = vsub.f32 1.5, %v3349_v4 }
 0x5fd   : > { %v3351_v49 = vmul.f32 %v6247_v62, %v3350_v42 }
 0x5ff   : > { %v3355_v27 = vsel %vm3354_vm8, %v6247_v62, %v3351_v49 }
 0x600   : > { %3383 = vperm.xlu0 %6151, %v3335_v7   ;;  %v9167_v1 = vpop.permute.xlu1 %3506 }
 0x601   : > { %3491 = vperm.xlu2 %6149, %v3477_v53  }
 0x602   : > { %v9171_v35 = vpop.permute.xlu2 %3427 }
 0x608   : > { %3393 = vperm.xlu0 %6151, %v3355_v27   ;;  %v9173_v24 = vpop.permute.xlu1 %3501 }
 0x610   : > { %3422 = vperm.xlu0 %6151, %v3412_v11  }
 0x61a   : > { %v3225_v0 = vpop.permute.xlu2 %3224 }
 0x61b   : > { %v3256_v9 = vsub.f32 %v8862_v40, %v3225_v0 }
 0x622   : > { %v9165_v57 = vpop.permute.xlu0 %3214 }
 0x62a   : > { %v3220_v33 = vpop.permute.xlu1 %3219 }
 0x62b   : > { %v3255_v3 = vsub.f32 %v9015_v31, %v3220_v33 }
 0x63a   : > { %v9169_v41 = vpop.permute.xlu0 %3229  ;;  %v3245_v47 = vpop.permute.xlu2 %3244 }
 0x63b   : > { %v3264_v43 = vsub.f32 %v8965_v14, %v3245_v47  ;;  %v3265_v13 = vsub.f32 %v8970_v56, %v3245_v47  ;;  %v3254_v56 = vsub.f32 %v9013_v8, %v3220_v33 }
 0x642   : > { %v9175_v10 = vpop.permute.xlu0 %3358  ;;  %v9178_v2 = vpop.permute.xlu1 %3234 }
 0x64a   : > { %v3364_v46 = vpop.permute.xlu0 %3363 }
 0x64b   : > { %v3399_v50 = vmul.f32 %v3364_v46, %v3255_v3 }
 0x64d   : > { %v3463_v20 = vmul.f32 %v9171_v35, %v3399_v50 }
 0x652   : > { %v9180_v44 = vpop.permute.xlu0 %3239 }
 0x653   : > { %v3389_v21 = vpop.permute.xlu2 %3388 }
 0x654   : > { %v9183_v6 = vmul.f32 %v3389_v21, %v3264_v43  ;;  %v3409_v58 = vmul.f32 %v3389_v21, %v3265_v13  ;;  %v3257_v13 = vsub.f32 %v8865_v29, %v3225_v0 }
 0x656   : > { %v3473_v27 = vmul.f32 %v9144_v37, %v3409_v58 }
 0x658   : > { %v9208_v47 = vadd.f32 %v9157_v19, %v3473_v27 }
 0x65a   : > { %v9185_v63 = vpop.permute.xlu1 %3249  ;;  %v3369_v15 = vpop.permute.xlu0 %3368 }
 0x65b   : > { %v3492_v18 = vpop.permute.xlu2 %3491  ;;  %v3400_v14 = vmul.f32 %v3369_v15, %v3256_v9  ;;  %v3401_v8 = vmul.f32 %v3369_v15, %v3257_v13 }
 0x65c   : > { %v3527_v30 = vadd.f32 %v3492_v18, %v3463_v20  ;;  %v3261_v20 = vsub.f32 %v8907_v12, %v9178_v2 }
 0x65d   : > { %v3464_v36 = vmul.f32 %v9163_v34, %v3400_v14 }
 0x65e   : > { %v5958_v62 = vmul.f32 -1.442695, %v3527_v30 }
 0x660   : > { %6248 = vpow2.f32 %v5958_v62 }
 0x662   : > { %v9190_v16 = vpop.permute.xlu1 %3496  ;;  %v9192_v31 = vpop.permute.xlu0 %3373 }
 0x663   : > { %v9195_v26 = vadd.f32 %v9190_v16, %v3464_v36 }
 0x665   : > { %v5959_v45 = vmul.f32 -1.442695, %v9195_v26 }
 0x666   : > { %v6249_v61 = vpop.eup %6248 }
 0x667   : > { %v3591_v17 = vadd.f32 1.0, %v6249_v61  ;;  %v3398_v61 = vmul.f32 %v3364_v46, %v3254_v56  ;;  %v3262_v46 = vsub.f32 %v8935_v25, %v9180_v44  ;;  %v3259_v25 = vsub.f32 %v8887_v32, %v9169_v41 }
 0x669   : > { %6250 = vrcp.f32 %v3591_v17  ;;  %v3660_v11 = vand.u32 2147483648, %v3591_v17  ;;  %v3658_v3 = vand.u32 2147483647, %v3591_v17  ;;  %vm3654_vm7 = vweird.f32 %v3591_v17 }
 0x66a   : > { %6252 = vpow2.f32 %v5959_v45  ;;  %v9198_v40 = vpop.permute.xlu0 %3378 }
 0x66b   : > { %v3661_v21 = vor.u32 1.1754944e-38, %v3660_v11  ;;  %vm3659_vm10 = vcmp.eq.f32.partialorder %v3658_v3, 8.507059e+37  ;;  %v3405_v62 = vmul.f32 %v9198_v40, %v3261_v20  ;;  %v3465_v11 = vmul.f32 %v9163_v34, %v3401_v8 }
 0x66c   : > { %v3266_v3 = vsub.f32 %v8987_v60, %v9185_v63 }
 0x66d   : > { %v9236_v20 = vadd.f32 %v9190_v16, %v3465_v11 }
 0x66f   : > { %v6251_v4 = vpop.eup %6250 }
 0x670   : > { %v6253_v53 = vpop.eup %6252  ;;  %v3650_v42 = vmul.f32 %v6251_v4, %v3591_v17  ;;  %vm3655_vm6 = vweird.f32 %v6251_v4  ;;  %v5968_v17 = vmul.f32 -1.442695, %v9208_v47 }
 0x671   : > { %v3592_v7 = vadd.f32 1.0, %v6253_v53  ;;  %vm3656_vm9 = vmor %vm3654_vm7, %vm3655_vm6  ;;  %v3469_v53 = vmul.f32 %v9155_v48, %v3405_v62  ;;  %v3252_v62 = vsub.f32 %v9021_v5, %v9165_v57 }
 0x672   : > { %v3651_v49 = vsub.f32 1.0, %v3650_v42  ;;  %v9202_v50 = vpop.permute.xlu0 %3383 }
 0x673   : > { %6254 = vrcp.f32 %v3592_v7  ;;  %v3675_v42 = vand.u32 2147483648, %v3592_v7  ;;  %v3673_v29 = vand.u32 2147483647, %v3592_v7  ;;  %v9226_v27 = vadd.f32 %v9167_v1, %v3469_v53 }
 0x674   : > { %v3652_v43 = vmul.f32 %v6251_v4, %v3651_v49  ;;  %6256 = vpow2.f32 %v5968_v17  ;;  %vm3669_vm13 = vweird.f32 %v3592_v7  ;;  %v3396_v13 = vmul.f32 %v9175_v10, %v3252_v62 }
 0x675   : > { %vm3674_vm12 = vcmp.eq.f32.partialorder %v3673_v29, 8.507059e+37 }
 0x676   : > { %v3653_v9 = vadd.f32 %v6251_v4, %v3652_v43  ;;  %v3406_v43 = vmul.f32 %v9202_v50, %v3262_v46 }
 0x678   : > { %v3657_v14 = vsel %vm3656_vm9, %v6251_v4, %v3653_v9  ;;  %v3462_v4 = vmul.f32 %v9171_v35, %v3398_v61  ;;  %v3470_v34 = vmul.f32 %v9151_v54, %v3406_v43 }
 0x679   : > { %v6255_v36 = vpop.eup %6254  ;;  %v3662_v45 = vsel %vm3659_vm10, %v3661_v21, %v3657_v14 }
 0x67a   : > { %v9212_v58 = vmul.f32 %v3662_v45, %v3527_v30  ;;  %v3665_v12 = vmul.f32 %v6255_v36, %v3592_v7  ;;  %vm3670_vm11 = vweird.f32 %v6255_v36  ;;  %v3394_v0 = vpop.permute.xlu0 %3393  ;;  %v3258_v30 = vsub.f32 %v8884_v23, %v9169_v41  ;;  %v6257_v60 = vpop.eup %6256 }
 0x67b   : > { %v9223_v15 = vadd.f32 %v3492_v18, %v3462_v4  ;;  %vm3671_vm14 = vmor %vm3669_vm13, %vm3670_vm11  ;;  %v3676_v23 = vor.u32 1.1754944e-38, %v3675_v42  ;;  %v5964_v18 = vmul.f32 -1.442695, %v9226_v27  ;;  %v3403_v41 = vmul.f32 %v9192_v31, %v3259_v25 }
 0x67c   : > { %v3666_v33 = vsub.f32 1.0, %v3665_v12  ;;  %3950 = vrot.lane.b32.xlu2 %v9212_v58, %s6382_s14  ;;  %v3402_v21 = vmul.f32 %v9192_v31, %v3258_v30  ;;  %v9246_v14 = vadd.f32 %v9161_v28, %v3470_v34  ;;  %v9248_v16 = vmul.f32 %v3394_v0, %v3266_v3 }
 0x67d   : > { %v5957_v7 = vmul.f32 -1.442695, %v9223_v15  ;;  %6258 = vpow2.f32 %v5964_v18  ;;  %v3253_v45 = vsub.f32 %v9023_v51, %v9165_v57  ;;  %v9262_v17 = vadd.f32 1.0, %v6257_v60 }
 0x67e   : > { %v3667_v49 = vmul.f32 %v6255_v36, %v3666_v33  ;;  %v3466_v61 = vmul.f32 %v9159_v55, %v3402_v21  ;;  %v5965_v31 = vmul.f32 -1.442695, %v9246_v14  ;;  %v3467_v8 = vmul.f32 %v9159_v55, %v3403_v41 }
 0x67f   : > { %6260 = vpow2.f32 %v5957_v7  ;;  %v3260_v51 = vsub.f32 %v8904_v22, %v9178_v2 }
 0x680   : > { %v3668_v35 = vadd.f32 %v6255_v36, %v3667_v49  ;;  %6262 = vpow2.f32 %v5965_v31  ;;  %v9267_v53 = vadd.f32 %v9173_v24, %v3466_v61  ;;  %v9273_v55 = vadd.f32 %v9173_v24, %v3467_v8 }
 0x681   : > { %v3404_v49 = vmul.f32 %v9198_v40, %v3260_v51  ;;  %v3263_v40 = vsub.f32 %v8941_v38, %v9180_v44 }
 0x682   : > { %v3672_v9 = vsel %vm3671_vm14, %v6255_v36, %v3668_v35  ;;  %v5960_v36 = vmul.f32 -1.442695, %v9236_v20  ;;  %v3423_v12 = vpop.permute.xlu0 %3422  ;;  %v5962_v24 = vmul.f32 -1.442695, %v9273_v55 }
 0x683   : > { %v3677_v56 = vsel %vm3674_vm12, %v3676_v23, %v3672_v9  ;;  %v6259_v5 = vpop.eup %6258  ;;  %v3460_v4 = vmul.f32 %v3423_v12, %v3396_v13  ;;  %v3468_v3 = vmul.f32 %v9155_v48, %v3404_v49  ;;  %v3407_v7 = vmul.f32 %v9202_v50, %v3263_v40 }
 0x684   : > { %v9242_v32 = vmul.f32 %v3677_v56, %v9195_v26  ;;  %v3267_v26 = vsub.f32 %v8993_v39, %v9185_v63  ;;  %v3397_v39 = vmul.f32 %v9175_v10, %v3253_v45  ;;  %6264 = vpow2.f32 %v5960_v36  ;;  %v3487_v10 = vpop.permute.xlu1 %3486 }
 0x685   : > { %v3597_v63 = vadd.f32 1.0, %v6259_v5  ;;  %v6261_v42 = vpop.eup %6260  ;;  %v9278_v30 = vadd.f32 %v3487_v10, %v3460_v4  ;;  %v9306_v21 = vadd.f32 %v9167_v1, %v3468_v3  ;;  %v3471_v36 = vmul.f32 %v9151_v54, %v3407_v7 }
 0x686   : > { %3936 = vrot.lane.b32.xlu2 %v9242_v32, %s6382_s14  ;;  %v3411_v33 = vmul.f32 %v3394_v0, %v3267_v26  ;;  %v3461_v57 = vmul.f32 %v3423_v12, %v3397_v39  ;;  %v6263_v29 = vpop.eup %6262  ;;  %v5961_v0 = vmul.f32 -1.442695, %v9267_v53  ;;  %v9280_v22 = vadd.f32 1.0, %v6261_v42 }
 0x687   : > { %6266 = vrcp.f32 %v3597_v63  ;;  %v9282_v2 = vadd.f32 1.0, %v6263_v29  ;;  %v5955_v23 = vmul.f32 -1.442695, %v9278_v30  ;;  %v3750_v60 = vand.u32 2147483648, %v3597_v63 }
 0x688   : > { %6268 = vrcp.f32 %v9262_v17  ;;  %v3475_v46 = vmul.f32 %v9149_v52, %v3411_v33  ;;  %v9284_v35 = vadd.f32 %v3487_v10, %v3461_v57  ;;  %v3748_v62 = vand.u32 2147483647, %v3597_v63 }
 0x689   : > { %6270 = vrcp.f32 %v9282_v2  ;;  %vm3744_vm6 = vweird.f32 %v3597_v63  ;;  %v3472_v1 = vmul.f32 %v9144_v37, %v9183_v6  ;;  %v5963_v12 = vmul.f32 -1.442695, %v9306_v21 }
 0x68a   : > { %v6265_v11 = vpop.eup %6264  ;;  %v9288_v43 = vadd.f32 %v9153_v59, %v3475_v46  ;;  %6272 = vpow2.f32 %v5961_v0  ;;  %v5956_v56 = vmul.f32 -1.442695, %v9284_v35  ;;  %v3751_v5 = vor.u32 1.1754944e-38, %v3750_v60 }
 0x68b   : > { %v9297_v9 = vadd.f32 1.0, %v6265_v11  ;;  %6274 = vrcp.f32 %v9280_v22  ;;  %vm3749_vm9 = vcmp.eq.f32.partialorder %v3748_v62, 8.507059e+37  ;;  %v9319_v51 = vadd.f32 %v9161_v28, %v3471_v36 }
 0x68c   : > { %6276 = vpow2.f32 %v5962_v24  ;;  %v5970_v48 = vmul.f32 -1.442695, %v9288_v43  ;;  %v3765_v57 = vand.u32 2147483648, %v9282_v2  ;;  %v3763_v46 = vand.u32 2147483647, %v9282_v2 }
 0x68d   : > { %v6267_v25 = vpop.eup %6266  ;;  %6278 = vpow2.f32 %v5955_v23  ;;  %v9329_v49 = vadd.f32 %v9157_v19, %v3472_v1  ;;  %vm3759_vm11 = vweird.f32 %v9282_v2  ;;  %v5966_v19 = vmul.f32 -1.442695, %v9319_v51 }
 0x68e   : > { %v9295_v18 = vpop.eup %6268  ;;  %v3740_v34 = vmul.f32 %v6267_v25, %v3597_v63  ;;  %6280 = vrcp.f32 %v9297_v9  ;;  %vm3745_vm8 = vweird.f32 %v6267_v25  ;;  %vm3764_vm14 = vcmp.eq.f32.partialorder %v3763_v46, 8.507059e+37 }
 0x68f   : > { %v3800_v44 = vmul.f32 %v9295_v18, %v9262_v17  ;;  %v6271_v50 = vpop.eup %6270  ;;  %6282 = vpow2.f32 %v5956_v56  ;;  %vm3746_vm7 = vmor %vm3744_vm6, %vm3745_vm8  ;;  %v5967_v7 = vmul.f32 -1.442695, %v9329_v49  ;;  %vm3805_vm12 = vweird.f32 %v9295_v18 }
 0x690   : > { %v3741_v38 = vsub.f32 1.0, %v3740_v34  ;;  %v6273_v26 = vpop.eup %6272  ;;  %v3755_v31 = vmul.f32 %v6271_v50, %v9282_v2  ;;  %6284 = vpow2.f32 %v5970_v48  ;;  %vm3760_vm10 = vweird.f32 %v6271_v50 }
 0x691   : > { %v9311_v45 = vpop.eup %6274  ;;  %v3801_v13 = vsub.f32 1.0, %v3800_v44  ;;  %v9316_v4 = vadd.f32 1.0, %v6273_v26  ;;  %6286 = vpow2.f32 %v5963_v12  ;;  %vm3761_vm13 = vmor %vm3759_vm11, %vm3760_vm10  ;;  %v3808_v44 = vand.u32 2147483647, %v9262_v17 }
 0x692   : > { %v3742_v41 = vmul.f32 %v6267_v25, %v3741_v38  ;;  %v6277_v8 = vpop.eup %6276  ;;  %v3756_v54 = vsub.f32 1.0, %v3755_v31  ;;  %v3635_v2 = vmul.f32 %v9311_v45, %v9280_v22  ;;  %v3810_v60 = vand.u32 2147483648, %v9262_v17 }
 0x693   : > { %v6279_v39 = vpop.eup %6278  ;;  %v3802_v29 = vmul.f32 %v9295_v18, %v3801_v13  ;;  %v9332_v0 = vadd.f32 1.0, %v6277_v8  ;;  %6288 = vrcp.f32 %v9316_v4  ;;  %vm3804_vm8 = vweird.f32 %v9262_v17 }
 0x694   : > { %v3743_v61 = vadd.f32 %v6267_v25, %v3742_v41  ;;  %v9322_v42 = vpop.eup %6280  ;;  %v3757_v6 = vmul.f32 %v6271_v50, %v3756_v54  ;;  %v9335_v24 = vadd.f32 1.0, %v6279_v39  ;;  %vm9365_vm6 = vmor %vm3804_vm8, %vm3805_vm12  ;;  %v3811_v1 = vor.u32 1.1754944e-38, %v3810_v60 }
 0x695   : > { %v6283_v10 = vpop.eup %6282  ;;  %v3803_v48 = vadd.f32 %v9295_v18, %v3802_v29  ;;  %v3643_v13 = vand.u32 2147483647, %v9280_v22  ;;  %vm3639_vm10 = vweird.f32 %v9280_v22  ;;  %vm3684_vm11 = vweird.f32 %v9297_v9 }
 0x696   : > { %v3747_v33 = vsel %vm3746_vm7, %v6267_v25, %v3743_v61  ;;  %v6285_v28 = vpop.eup %6284  ;;  %v3758_v11 = vadd.f32 %v6271_v50, %v3757_v6  ;;  %v3766_v25 = vor.u32 1.1754944e-38, %v3765_v57  ;;  %v9344_v3 = vadd.f32 1.0, %v6283_v10 }
 0x697   : > { %v3752_v63 = vsel %vm3749_vm9, %v3751_v5, %v3747_v33  ;;  %6290 = vrcp.f32 %v9335_v24  ;;  %v9349_v34 = vadd.f32 1.0, %v6285_v28  ;;  %v6287_v38 = vpop.eup %6286  ;;  %v3807_v61 = vsel %vm9365_vm6, %v9295_v18, %v3803_v48 }
 0x698   : > { %v9325_v37 = vmul.f32 %v3752_v63, %v9226_v27  ;;  %v3680_v27 = vmul.f32 %v9322_v42, %v9297_v9  ;;  %v3762_v40 = vsel %vm3761_vm13, %v6271_v50, %v3758_v11  ;;  %6292 = vrcp.f32 %v9332_v0 }
 0x699   : > { %v3767_v23 = vsel %vm3764_vm14, %v3766_v25, %v3762_v40  ;;  %6294 = vpow2.f32 %v5966_v19  ;;  %v9361_v62 = vpop.eup %6288  ;;  %v3636_v50 = vsub.f32 1.0, %v3635_v2  ;;  %v9369_v26 = vadd.f32 1.0, %v6287_v38 }
 0x69a   : > { %3956 = vrot.lane.b32.xlu2 %v9325_v37, %s6382_s14  ;;  %v9354_v56 = vmul.f32 %v3767_v23, %v9246_v14  ;;  %v3681_v41 = vsub.f32 1.0, %v3680_v27  ;;  %6296 = vrcp.f32 %v9344_v3  ;;  %vm3809_vm7 = vcmp.eq.f32.partialorder %v3808_v44, 8.507059e+37 }
 0x69b   : > { %6298 = vrcp.f32 %v9349_v34  ;;  %v3695_v5 = vmul.f32 %v9361_v62, %v9316_v4  ;;  %v3637_v33 = vmul.f32 %v9311_v45, %v3636_v50  ;;  %vm3640_vm9 = vweird.f32 %v9311_v45 }
 0x69c   : > { %6300 = vpow2.f32 %v5967_v7  ;;  %v3682_v12 = vmul.f32 %v9322_v42, %v3681_v41  ;;  %v3645_v18 = vand.u32 2147483648, %v9280_v22  ;;  %v3812_v63 = vsel %vm3809_vm7, %v3811_v1, %v3807_v61 }
 0x69d   : > { %v6291_v14 = vpop.eup %6290  ;;  %6302 = vrcp.f32 %v9369_v26  ;;  %v3613_v57 = vand.u32 2147483647, %v9335_v24  ;;  %v3615_v6 = vand.u32 2147483648, %v9335_v24  ;;  %vm3685_vm14 = vweird.f32 %v9322_v42 }
 0x69e   : > { %v3605_v17 = vmul.f32 %v6291_v14, %v9335_v24  ;;  %v9377_v31 = vpop.eup %6292  ;;  %vm3610_vm13 = vweird.f32 %v6291_v14  ;;  %v3683_v28 = vadd.f32 %v9322_v42, %v3682_v12  ;;  %v3696_v11 = vsub.f32 1.0, %v3695_v5 }
 0x69f   : > { %v6295_v8 = vpop.eup %6294  ;;  %v3710_v27 = vmul.f32 %v9377_v31, %v9332_v0  ;;  %vm3609_vm12 = vweird.f32 %v9335_v24  ;;  %vm3614_vm6 = vcmp.eq.f32.partialorder %v3613_v57, 8.507059e+37  ;;  %v3616_v7 = vor.u32 1.1754944e-38, %v3615_v6 }
 0x6a0   : > { %v3606_v54 = vsub.f32 1.0, %v3605_v17  ;;  %v6297_v39 = vpop.eup %6296  ;;  %v9398_v25 = vadd.f32 1.0, %v6295_v8  ;;  %vm3611_vm8 = vmor %vm3609_vm12, %vm3610_vm13  ;;  %v3630_v38 = vand.u32 2147483648, %v9344_v3  ;;  %v3628_v60 = vand.u32 2147483647, %v9344_v3 }
 0x6a1   : > { %v9389_v46 = vpop.eup %6298  ;;  %v3620_v29 = vmul.f32 %v6297_v39, %v9344_v3  ;;  %vm3625_vm7 = vweird.f32 %v6297_v39  ;;  %v3638_v24 = vadd.f32 %v9311_v45, %v3637_v33  ;;  %vm9414_vm13 = vmor %vm3684_vm11, %vm3685_vm14  ;;  %v3688_v36 = vand.u32 2147483647, %v9297_v9 }
 0x6a2   : > { %3942 = vrot.lane.b32.xlu2 %v9354_v56, %s6382_s14  ;;  %v3607_v10 = vmul.f32 %v6291_v14, %v3606_v54  ;;  %v6301_v19 = vpop.eup %6300  ;;  %v3830_v23 = vmul.f32 %v9389_v46, %v9349_v34  ;;  %v3687_v17 = vsel %vm9414_vm13, %v9322_v42, %v3683_v28  ;;  %vm3624_vm12 = vweird.f32 %v9344_v3 }
 0x6a3   : > { %v3621_v2 = vsub.f32 1.0, %v3620_v29  ;;  %v9407_v41 = vpop.eup %6302  ;;  %v3711_v5 = vsub.f32 1.0, %v3710_v27  ;;  %6304 = vrcp.f32 %v9398_v25  ;;  %vm3626_vm11 = vmor %vm3624_vm12, %vm3625_vm7  ;;  %v3631_v33 = vor.u32 1.1754944e-38, %v3630_v38 }
 0x6a4   : > { %v3608_v40 = vadd.f32 %v6291_v14, %v3607_v10  ;;  %v3831_v8 = vsub.f32 1.0, %v3830_v23  ;;  %v3725_v54 = vmul.f32 %v9407_v41, %v9369_v26  ;;  %vm3629_vm14 = vcmp.eq.f32.partialorder %v3628_v60, 8.507059e+37 }
 0x6a5   : > { %v3622_v44 = vmul.f32 %v6297_v39, %v3621_v2  ;;  %v9434_v42 = vadd.f32 1.0, %v6301_v19  ;;  %v3474_v29 = vmul.f32 %v9149_v52, %v9248_v16  ;;  %vm3699_vm7 = vweird.f32 %v9316_v4 }
 0x6a6   : > { %v3612_v48 = vsel %vm3611_vm8, %v6291_v14, %v3608_v40  ;;  %v3690_v14 = vand.u32 2147483648, %v9297_v9  ;;  %v3697_v9 = vmul.f32 %v9361_v62, %v3696_v11  ;;  %vm9443_vm8 = vmor %vm3639_vm10, %vm3640_vm9  ;;  %v3712_v11 = vmul.f32 %v9377_v31, %v3711_v5 }
 0x6a7   : > { %v3617_v61 = vsel %vm3614_vm6, %v3616_v7, %v3612_v48  ;;  %v3623_v1 = vadd.f32 %v6297_v39, %v3622_v44  ;;  %vm3689_vm6 = vcmp.eq.f32.partialorder %v3688_v36, 8.507059e+37  ;;  %v3832_v27 = vmul.f32 %v9389_v46, %v3831_v8 }
 0x6a8   : > { %v9425_v12 = vmul.f32 %v3617_v61, %v9278_v30  ;;  %v9437_v30 = vmul.f32 %v3812_v63, %v9208_v47  ;;  %v3691_v6 = vor.u32 1.1754944e-38, %v3690_v14  ;;  %v3646_v63 = vor.u32 1.1754944e-38, %v3645_v18 }
 0x6a9   : > { %v3627_v57 = vsel %vm3626_vm11, %v6297_v39, %v3623_v1  ;;  %v3642_v39 = vsel %vm9443_vm8, %v9311_v45, %v3638_v24  ;;  %vm3644_vm9 = vcmp.eq.f32.partialorder %v3643_v13, 8.507059e+37  ;;  %v3698_v45 = vadd.f32 %v9361_v62, %v3697_v9  ;;  %v9465_v16 = vpop.eup %6304 }
 0x6aa   : > { %4227 = vrot.lane.b32.xlu2 %v9354_v56, %s6383_s15  ;;  %3932 = vrot.lane.b32.xlu1 %v9425_v12, %s6382_s14  ;;  %v3632_v10 = vsel %vm3629_vm14, %v3631_v33, %v3627_v57  ;;  %v3692_v28 = vsel %vm3689_vm6, %v3691_v6, %v3687_v17  ;;  %vm3700_vm10 = vweird.f32 %v9361_v62  ;;  %v3726_v52 = vsub.f32 1.0, %v3725_v54 }
 0x6ab   : > { %v9453_v47 = vmul.f32 %v3632_v10, %v9284_v35  ;;  %v3647_v35 = vsel %vm3644_vm9, %v3646_v63, %v3642_v39  ;;  %v3703_v18 = vand.u32 2147483647, %v9316_v4  ;;  %v3705_v19 = vand.u32 2147483648, %v9316_v4  ;;  %vm9478_vm11 = vmor %vm3699_vm7, %vm3700_vm10 }
 0x6ac   : > { %v9471_v22 = vmul.f32 %v3692_v28, %v9236_v20  ;;  %vm3714_vm13 = vweird.f32 %v9332_v0  ;;  %vm3715_vm12 = vweird.f32 %v9377_v31  ;;  %v9476_v13 = vadd.f32 %v9153_v59, %v3474_v29 }
 0x6ad   : > { %3948 = vrot.lane.b32.xlu0 %v9453_v47, %s6382_s14  ;;  %v3713_v2 = vadd.f32 %v9377_v31, %v3712_v11  ;;  %v3718_v23 = vand.u32 2147483647, %v9332_v0  ;;  %v3833_v4 = vadd.f32 %v9389_v46, %v3832_v27  ;;  %vm3835_vm14 = vweird.f32 %v9389_v46  ;;  %vm9495_vm8 = vmor %vm3714_vm13, %vm3715_vm12 }
 0x6ae   : > { %v3702_v20 = vsel %vm9478_vm11, %v9361_v62, %v3698_v45  ;;  %v3727_v7 = vmul.f32 %v9407_v41, %v3726_v52  ;;  %v3770_v59 = vmul.f32 %v9465_v16, %v9398_v25  ;;  %v3840_v38 = vand.u32 2147483648, %v9349_v34 }
 0x6af   : > { %v3706_v48 = vor.u32 1.1754944e-38, %v3705_v19  ;;  %v3720_v60 = vand.u32 2147483648, %v9332_v0  ;;  %vm3834_vm6 = vweird.f32 %v9349_v34  ;;  %v3838_v62 = vand.u32 2147483647, %v9349_v34 }
 0x6b0   : > { %6306 = vrcp.f32 %v9434_v42  ;;  %v9504_v24 = vmul.f32 %v3647_v35, %v9223_v15  ;;  %vm3704_vm9 = vcmp.eq.f32.partialorder %v3703_v18, 8.507059e+37  ;;  %v5969_v50 = vmul.f32 -1.442695, %v9476_v13  ;;  %vm9509_vm10 = vmor %vm3834_vm6, %vm3835_vm14 }
 0x6b1   : > { %v3707_v14 = vsel %vm3704_vm9, %v3706_v48, %v3702_v20  ;;  %v3717_v0 = vsel %vm9495_vm8, %v9377_v31, %v3713_v2  ;;  %vm9516_vm7 = vcmp.eq.f32.partialorder %v3718_v23, 8.507059e+37  ;;  %v3837_v15 = vsel %vm9509_vm10, %v9389_v46, %v3833_v4 }
 0x6b2   : > { %4245 = vrot.lane.b32.xlu2 %v9437_v30, %s6383_s15  ;;  %3952 = vrot.lane.b32.xlu1 %v9471_v22, %s6382_s14  ;;  %v3728_v61 = vadd.f32 %v9407_v41, %v3727_v7  ;;  %vm3730_vm13 = vweird.f32 %v9407_v41  ;;  %v3771_v17 = vsub.f32 1.0, %v3770_v59  ;;  %v3841_v1 = vor.u32 1.1754944e-38, %v3840_v38 }
 0x6b3   : > { %v3721_v31 = vor.u32 1.1754944e-38, %v3720_v60  ;;  %vm3729_vm12 = vweird.f32 %v9369_v26  ;;  %v3735_v5 = vand.u32 2147483648, %v9369_v26  ;;  %vm3839_vm11 = vcmp.eq.f32.partialorder %v3838_v62, 8.507059e+37 }
 0x6b4   : > { %v9532_v46 = vmul.f32 %v3707_v14, %v9267_v53  ;;  %v3733_v8 = vand.u32 2147483647, %v9369_v26  ;;  %6308 = vpow2.f32 %v5969_v50  ;;  %v3842_v33 = vsel %vm3839_vm11, %v3841_v1, %v3837_v15  ;;  %vm3731_vm14 = vmor %vm3729_vm12, %vm3730_vm13 }
 0x6b5   : > { %3934 = vrot.lane.b32.xlu0 %v9504_v24, %s6382_s14  ;;  %v3722_v9 = vsel %vm9516_vm7, %v3721_v31, %v3717_v0  ;;  %v3732_v57 = vsel %vm3731_vm14, %v9407_v41, %v3728_v61  ;;  %v3772_v3 = vmul.f32 %v9465_v16, %v3771_v17  ;;  %v3736_v6 = vor.u32 1.1754944e-38, %v3735_v5  ;;  %v11258_v31 = vld [vmem:[#allocation5_spill] sm:$0xff] }
 0x6b6   : > { %v6307_v54 = vpop.eup %6306  ;;  %v9542_v53 = vmul.f32 %v3842_v33, %v9288_v43  ;;  %v9545_v26 = vmul.f32 %v3722_v9, %v9273_v55  ;;  %vm3734_vm8 = vcmp.eq.f32.partialorder %v3733_v8, 8.507059e+37  ;;  %vm3775_vm6 = vweird.f32 %v9465_v16 }
 0x6b7   : > { %v3737_v10 = vsel %vm3734_vm8, %v3736_v6, %v3732_v57  ;;  %v3785_v41 = vmul.f32 %v6307_v54, %v9434_v42  ;;  %v3773_v29 = vadd.f32 %v9465_v16, %v3772_v3  ;;  %v3780_v43 = vand.u32 2147483648, %v9398_v25 }
 0x6b8   : > { %v9556_v55 = vmul.f32 %v3737_v10, %v9306_v21  ;;  %vm3774_vm9 = vweird.f32 %v9398_v25  ;;  %v3778_v63 = vand.u32 2147483647, %v9398_v25  ;;  %vm3790_vm13 = vweird.f32 %v6307_v54 }
 0x6b9   : > { %vm3776_vm10 = vmor %vm3774_vm9, %vm3775_vm6  ;;  %v3786_v11 = vsub.f32 1.0, %v3785_v41  ;;  %v3781_v45 = vor.u32 1.1754944e-38, %v3780_v43  ;;  %v3795_v18 = vand.u32 2147483648, %v9434_v42  ;;  %vm3789_vm12 = vweird.f32 %v9434_v42 }
 0x6ba   : > { %3888 = vrot.lane.b32.xlu2 %v9437_v30, %s6384_s16  ;;  %3938 = vrot.lane.b32.xlu1 %v9532_v46, %s6382_s14  ;;  %v6309_v39 = vpop.eup %6308  ;;  %v3777_v27 = vsel %vm3776_vm10, %v9465_v16, %v3773_v29  ;;  %vm3779_vm7 = vcmp.eq.f32.partialorder %v3778_v63, 8.507059e+37  ;;  %v3793_v19 = vand.u32 2147483647, %v9434_v42  ;;  %vm3791_vm11 = vmor %vm3789_vm12, %vm3790_vm13 }
 0x6bb   : > { %v3602_v28 = vadd.f32 1.0, %v6309_v39  ;;  %v3782_v52 = vsel %vm3779_vm7, %v3781_v45, %v3777_v27  ;;  %v3787_v21 = vmul.f32 %v6307_v54, %v3786_v11  ;;  %vm11281_vm7 = vcmp.lt.s32.totalorder %v11258_v31, 112 }
 0x6bc   : > { %v9568_v25 = vmul.f32 %v3782_v52, %v9319_v51  ;;  %v3796_v51 = vor.u32 1.1754944e-38, %v3795_v18  ;;  %vm3794_vm14 = vcmp.eq.f32.partialorder %v3793_v19, 8.507059e+37  ;;  %vm11282_vm13 = vmmov %vm11281_vm7 }
 0x6bd   : > { %3954 = vrot.lane.b32.xlu0 %v9545_v26, %s6382_s14  ;;  %6310 = vrcp.f32 %v3602_v28  ;;  %v3788_v35 = vadd.f32 %v6307_v54, %v3787_v21  ;;  %v3825_v59 = vand.u32 2147483648, %v3602_v28  ;;  %vm3819_vm6 = vweird.f32 %v3602_v28  ;;  %vm11283_vm12 = vmmov %vm11281_vm7 }
 0x6be   : > { %v3823_v38 = vand.u32 2147483647, %v3602_v28 }
 0x6bf   : > { %v3792_v40 = vsel %vm3791_vm11, %v6307_v54, %v3788_v35  ;;  %v3826_v44 = vor.u32 1.1754944e-38, %v3825_v59  ;;  %vm11284_vm11 = vmmov %vm11281_vm7 }
 0x6c0   : > { %v3797_v23 = vsel %vm3794_vm14, %v3796_v51, %v3792_v40  ;;  %vm3824_vm10 = vcmp.eq.f32.partialorder %v3823_v38, 8.507059e+37 }
 0x6c1   : > { %v9582_v20 = vmul.f32 %v3797_v23, %v9329_v49 }
 0x6c2   : > { %3962 = vrot.lane.b32.xlu2 %v9542_v53, %s6382_s14  ;;  %4225 = vrot.lane.b32.xlu1 %v9556_v55, %s6383_s15 }
 0x6c3   : > { %v6311_v16 = vpop.eup %6310 }
 0x6c4   : > { %v3815_v2 = vmul.f32 %v6311_v16, %v3602_v28  ;;  %vm3820_vm8 = vweird.f32 %v6311_v16 }
 0x6c5   : > { %3940 = vrot.lane.b32.xlu0 %v9556_v55, %s6382_s14  ;;  %vm3821_vm9 = vmor %vm3819_vm6, %vm3820_vm8 }
 0x6c6   : > { %v3816_v4 = vsub.f32 1.0, %v3815_v2  ;;  %vm11289_vm6 = vmmov %vm11281_vm7 }
 0x6c8   : > { %v3817_v42 = vmul.f32 %v6311_v16, %v3816_v4 }
 0x6ca   : > { %3870 = vrot.lane.b32.xlu2 %v9354_v56, %s6384_s16  ;;  %3958 = vrot.lane.b32.xlu1 %v9568_v25, %s6382_s14  ;;  %v3818_v7 = vadd.f32 %v6311_v16, %v3817_v42 }
 0x6cc   : > { %v3822_v49 = vsel %vm3821_vm9, %v6311_v16, %v3818_v7  ;;  %vm11290_vm9 = vmmov %vm11289_vm6 }
 0x6cd   : > { %3960 = vrot.lane.b32.xlu0 %v9437_v30, %s6382_s14  ;;  %v3827_v60 = vsel %vm3824_vm10, %v3826_v44, %v3822_v49  ;;  %v11259_v44 = vld [vmem:[#allocation6_spill] sm:$0xff]  ;;  %vm11291_vm10 = vmmov %vm11289_vm6 }
 0x6ce   : > { %v9599_v62 = vmul.f32 %v3827_v60, %v9476_v13 }
 0x6d2   : > { %4239 = vrot.lane.b32.xlu2 %v9545_v26, %s6383_s15  ;;  %4243 = vrot.lane.b32.xlu1 %v9568_v25, %s6383_s15 }
 0x6d5   : > { %4229 = vrot.lane.b32.xlu0 %v9582_v20, %s6383_s15 }
 0x6d6   : > { %v9590_v48 = vpop.permute.xlu2 %3950 }
 0x6da   : > { %4221 = vrot.lane.b32.xlu2 %v9242_v32, %s6383_s15  ;;  %3944 = vrot.lane.b32.xlu1 %v9582_v20, %s6382_s14 }
 0x6dd   : > { %3872 = vrot.lane.b32.xlu0 %v9582_v20, %s6384_s16 }
 0x6e0   : > { %v9605_v50 = vpop.permute.xlu2 %3936 }
 0x6e2   : > { %3882 = vrot.lane.b32.xlu2 %v9545_v26, %s6384_s16  ;;  %3886 = vrot.lane.b32.xlu1 %v9568_v25, %s6384_s16 }
 0x6e5   : > { %3946 = vrot.lane.b32.xlu0 %v9599_v62, %s6382_s14  ;;  %s11261_s14 = smov 111  }
 0x6ea   : > { %3864 = vrot.lane.b32.xlu2 %v9242_v32, %s6384_s16  ;;  %3868 = vrot.lane.b32.xlu1 %v9556_v55, %s6384_s16 }
 0x6ed   : > { %4241 = vrot.lane.b32.xlu0 %v9325_v37, %s6383_s15 }
 0x6f2   : > { %4233 = vrot.lane.b32.xlu2 %v9453_v47, %s6383_s15  ;;  %4237 = vrot.lane.b32.xlu1 %v9471_v22, %s6383_s15 }
 0x6f4   : > { %v9613_v36 = vpop.permute.xlu2 %3956 }
 0x6f5   : > { %4223 = vrot.lane.b32.xlu0 %v9532_v46, %s6383_s15 }
 0x6fa   : > { %3860 = vrot.lane.b32.xlu2 %v9425_v12, %s6384_s16  ;;  %4219 = vrot.lane.b32.xlu1 %v9504_v24, %s6383_s15 }
 0x6fc   : > { %v9621_v13 = vpop.permute.xlu2 %3942 }
 0x6fd   : > { %3884 = vrot.lane.b32.xlu0 %v9325_v37, %s6384_s16 }
 0x702   : > { %4231 = vrot.lane.b32.xlu2 %v9599_v62, %s6383_s15  ;;  %3880 = vrot.lane.b32.xlu1 %v9471_v22, %s6384_s16 }
 0x704   : > { %v4228_v14 = vpop.permute.xlu2 %4227 }
 0x705   : > { %3866 = vrot.lane.b32.xlu0 %v9532_v46, %s6384_s16 }
 0x70a   : > { %4422 = vrot.lane.b32.xlu2 %v9354_v56, %s6385_s18  ;;  %3862 = vrot.lane.b32.xlu1 %v9504_v24, %s6384_s16 }
 0x70c   : > { %v4246_v0 = vpop.permute.xlu2 %4245 }
 0x70d   : > { %4235 = vrot.lane.b32.xlu0 %v9212_v58, %s6383_s15 }
 0x712   : > { %4436 = vrot.lane.b32.xlu2 %v9325_v37, %s6385_s18  ;;  %3876 = vrot.lane.b32.xlu1 %v9453_v47, %s6384_s16 }
 0x714   : > { %v3889_v34 = vpop.permute.xlu2 %3888 }
 0x715   : > { %4217 = vrot.lane.b32.xlu0 %v9425_v12, %s6383_s15 }
 0x71a   : > { %4416 = vrot.lane.b32.xlu2 %v9242_v32, %s6385_s18  ;;  %4247 = vrot.lane.b32.xlu1 %v9542_v53, %s6383_s15  ;;  %s11264_s15 = smov 112  }
 0x71c   : > { %v3963_v15 = vpop.permute.xlu2 %3962  ;;  %v3933_v61 = vpop.permute.xlu1 %3932 }
 0x71d   : > { %3878 = vrot.lane.b32.xlu0 %v9212_v58, %s6384_s16 }
 0x71f   : > { %v3949_v1 = vpop.permute.xlu0 %3948 }
 0x720   : > { %v9655_v5 = vsel %vm1376_vm15, %v3933_v61, %v3949_v1  ;;  %v9659_v8 = vsel %vm1376_vm15, %v3949_v1, %v3933_v61 }
 0x722   : > { %4430 = vrot.lane.b32.xlu2 %v9212_v58, %s6385_s18  ;;  %3874 = vrot.lane.b32.xlu1 %v9599_v62, %s6384_s16 }
 0x724   : > { %v3871_v17 = vpop.permute.xlu2 %3870  ;;  %v9663_v33 = vpop.permute.xlu1 %3952 }
 0x725   : > { %4440 = vrot.lane.b32.xlu0 %v9437_v30, %s6385_s18 }
 0x727   : > { %v9671_v54 = vpop.permute.xlu0 %3934 }
 0x72a   : > { %4961 = vrot.lane.b32.xlu2 %v9437_v30, %s6386_s19  ;;  %4424 = vrot.lane.b32.xlu1 %v9582_v20, %s6385_s18 }
 0x72c   : > { %v9669_v9 = vpop.permute.xlu2 %4239  ;;  %v9675_v57 = vpop.permute.xlu1 %3938 }
 0x72d   : > { %3890 = vrot.lane.b32.xlu0 %v9542_v53, %s6384_s16  ;;  %s11308_s16 = sshll.u32 %s11310_s21, 7 }
 0x72f   : > { %v9683_v6 = vpop.permute.xlu0 %3954 }
 0x732   : > { %4943 = vrot.lane.b32.xlu2 %v9354_v56, %s6386_s19  ;;  %4438 = vrot.lane.b32.xlu1 %v9568_v25, %s6385_s18 }
 0x734   : > { %v9681_v3 = vpop.permute.xlu2 %4221  ;;  %v9687_v10 = vpop.permute.xlu1 %4225 }
 0x735   : > { %4420 = vrot.lane.b32.xlu0 %v9556_v55, %s6385_s18 }
 0x737   : > { %v3941_v41 = vpop.permute.xlu0 %3940 }
 0x738   : > { %v3976_v1 = vsel %vm1376_vm15, %v9613_v36, %v3941_v41 }
 0x73a   : > { %4766 = vrot.lane.b32.xlu2 %v9437_v30, %s6387_s20  ;;  %4418 = vrot.lane.b32.xlu1 %v9532_v46, %s6385_s18 }
 0x73c   : > { %v9693_v39 = vpop.permute.xlu2 %3882  ;;  %v3959_v29 = vpop.permute.xlu1 %3958 }
 0x73d   : > { %4434 = vrot.lane.b32.xlu0 %v9545_v26, %s6385_s18  ;;  %v3969_v61 = vsel %vm1376_vm15, %v9621_v13, %v3959_v29 }
 0x73f   : > { %v3961_v43 = vpop.permute.xlu0 %3960 }
 0x742   : > { %4748 = vrot.lane.b32.xlu2 %v9354_v56, %s6387_s20  ;;  %4432 = vrot.lane.b32.xlu1 %v9471_v22, %s6385_s18 }
 0x744   : > { %v9701_v63 = vpop.permute.xlu2 %3864  ;;  %v4244_v28 = vpop.permute.xlu1 %4243 }
 0x745   : > { %v9707_v11 = vsel %vm1669_vm2, %v4228_v14, %v4244_v28  ;;  %v9711_v27 = vsel %vm1669_vm2, %v4244_v28, %v4228_v14  ;;  %4414 = vrot.lane.b32.xlu0 %v9504_v24, %s6385_s18  ;;  %v11260_v14 = vld [vmem:[#allocation7_spill] sm:$0xff]  ;;  %v3968_v28 = vsel %vm1376_vm15, %v3941_v41, %v9613_v36  ;;  %v3967_v36 = vsel %vm1376_vm15, %v9675_v57, %v9683_v6 }
 0x746   : > { %v3988_v41 = vmul.f32 %v3976_v1, %v11259_v44 }
 0x747   : > { %v4230_v45 = vpop.permute.xlu0 %4229 }
 0x748   : > { %v9719_v52 = vsel %vm1669_vm2, %v4230_v45, %v4246_v0  ;;  %v9723_v21 = vsel %vm1669_vm2, %v4246_v0, %v4230_v45  ;;  %v3975_v45 = vsel %vm1376_vm15, %v9683_v6, %v9675_v57  ;;  %v3973_v6 = vsel %vm1376_vm15, %v9590_v48, %v9671_v54 }
 0x749   : > { %v3986_v57 = vmul.f32 %v3975_v45, %v11259_v44 }
 0x74a   : > { %4442 = vrot.lane.b32.xlu2 %v9542_v53, %s6385_s18  ;;  %4412 = vrot.lane.b32.xlu1 %v9425_v12, %s6385_s18 }
 0x74c   : > { %v9725_v35 = vpop.permute.xlu2 %4233  ;;  %v3945_v16 = vpop.permute.xlu1 %3944 }
 0x74d   : > { %4428 = vrot.lane.b32.xlu0 %v9453_v47, %s6385_s18  ;;  %v3978_v7 = vsel %vm1376_vm15, %v3961_v43, %v3945_v16  ;;  %v3970_v49 = vsel %vm1376_vm15, %v3945_v16, %v3961_v43  ;;  %v3991_v16 = vmul.f32 %v3969_v61, %v11260_v14  ;;  %v3997_v61 = vld [vmem:[#allocation2 + $0x40] sm:$0xff] }
 0x74e   : > { %v3993_v43 = vmul.f32 %v3970_v49, %v11260_v14 }
 0x74f   : > { %v3873_v18 = vpop.permute.xlu0 %3872 }
 0x750   : > { %v9735_v19 = vsel %vm1297_vm3, %v3873_v18, %v3889_v34  ;;  %v9739_v40 = vsel %vm1297_vm3, %v3889_v34, %v3873_v18  ;;  %v3977_v34 = vsel %vm1376_vm15, %v3959_v29, %v9621_v13 }
 0x751   : > { %v3990_v13 = vmul.f32 %v3977_v34, %v11259_v44 }
 0x752   : > { %4955 = vrot.lane.b32.xlu2 %v9545_v26, %s6386_s19  ;;  %4959 = vrot.lane.b32.xlu1 %v9568_v25, %s6386_s19 }
 0x754   : > { %v9743_v2 = vpop.permute.xlu2 %3860  ;;  %v3887_v51 = vpop.permute.xlu1 %3886 }
 0x755   : > { %v9747_v23 = vsel %vm1297_vm3, %v3871_v17, %v3887_v51  ;;  %v9751_v4 = vsel %vm1297_vm3, %v3887_v51, %v3871_v17  ;;  %4945 = vrot.lane.b32.xlu0 %v9582_v20, %s6386_s19  ;;  %v3974_v51 = vsel %vm1376_vm15, %v9663_v33, %v9605_v50 }
 0x757   : > { %v3947_v42 = vpop.permute.xlu0 %3946 }
 0x758   : > { %v3971_v59 = vsel %vm1376_vm15, %v3947_v42, %v3963_v15  ;;  %v3979_v38 = vsel %vm1376_vm15, %v3963_v15, %v3947_v42  ;;  %v3992_v15 = vmul.f32 %v3978_v7, %v11259_v44  ;;  %v3989_v42 = vmul.f32 %v3968_v28, %v11260_v14  ;;  %v3999_v28 = vld [vmem:[#allocation2 + $0x50] sm:$0xff] }
 0x759   : > { %v3994_v60 = vmul.f32 %v3979_v38, %v11259_v44  ;;  %v3995_v0 = vmul.f32 %v3971_v59, %v11260_v14  ;;  %v3966_v7 = vsel %vm1376_vm15, %v9605_v50, %v9663_v33  ;;  %v3987_v59 = vmul.f32 %v3967_v36, %v11260_v14  ;;  %v4000_v36 = vld [vmem:[#allocation2 + $0x58] sm:$0xff] }
 0x75a   : > { %4937 = vrot.lane.b32.xlu2 %v9242_v32, %s6386_s19  ;;  %4941 = vrot.lane.b32.xlu1 %v9556_v55, %s6386_s19  ;;  %v3984_v38 = vmul.f32 %v3974_v51, %v11259_v44  ;;  %v3965_v50 = vsel %vm1376_vm15, %v9671_v54, %v9590_v48  ;;  %v3985_v49 = vmul.f32 %v3966_v7, %v11260_v14  ;;  %v4001_v7 = vld [vmem:[#allocation2 + $0x60] sm:$0xff]  ;;  %vm11273_vm15 = vcmp.lt.s32.totalorder %v11258_v31, 111  ;;  %v5389_v31 = vld [vmem:[#allocation2 + $0x208] sm:$0xff] }
 0x75b   : > { %4037 = vmatpush.msrb.mxu2 %v3994_v60  ;;  %4078 = vmatpush.msrb.mxu3 %v3995_v0  ;;  %v3982_v60 = vmul.f32 %v3973_v6, %v11259_v44  ;;  %v3983_v0 = vmul.f32 %v3965_v50, %v11260_v14  ;;  %v3980_v48 = vmul.f32 %v9659_v8, %v11259_v44 }
 0x75c   : > { %v9776_v17 = vpop.permute.xlu1 %3868  ;;  %v9788_v29 = vpop.permute.xlu2 %4231 }
 0x75d   : > { %4750 = vrot.lane.b32.xlu0 %v9582_v20, %s6387_s20  ;;  %4038 = vmatpush.msrb.mxu2 %v3992_v15  ;;  %v3981_v15 = vmul.f32 %v9655_v5, %v11260_v14  ;;  %v3998_v5 = vld [vmem:[#allocation2 + $0x48] sm:$0xff] }
 0x75e   : > { %4079 = vmatpush.msrb.mxu3 %v3993_v43 }
 0x75f   : > { %4039 = vmatpush.msrb.mxu2 %v3990_v13  ;;  %v9802_v18 = vpop.permute.xlu0 %4241 }
 0x760   : > { %4080 = vmatpush.msrb.mxu3 %v3991_v16 }
 0x761   : > { %4040 = vmatpush.msrb.mxu2 %v3988_v41 }
 0x762   : > { %4760 = vrot.lane.b32.xlu2 %v9545_v26, %s6387_s20  ;;  %4764 = vrot.lane.b32.xlu1 %v9568_v25, %s6387_s20 }
 0x763   : > { %4081 = vmatpush.msrb.mxu3 %v3989_v42  ;;  %4041 = vmatpush.msrb.mxu2 %v3986_v57 }
 0x764   : > { %v9826_v33 = vpop.permute.xlu1 %4237  ;;  %v9837_v54 = vpop.permute.xlu2 %4422 }
 0x765   : > { %4082 = vmatpush.msrb.mxu3 %v3987_v59  ;;  %4957 = vrot.lane.b32.xlu0 %v9325_v37, %s6386_s19 }
 0x766   : > { %4042 = vmatpush.msrb.mxu2 %v3984_v38  ;;  %v11262_v38 = vld [vmem:[#allocation12_spill] sm:$0xff] }
 0x767   : > { %4083 = vmatpush.msrb.mxu3 %v3985_v49  ;;  %v9839_v34 = vpop.permute.xlu0 %4223  ;;  %v11263_v49 = vld [vmem:[#allocation15_spill] sm:$0xff] }
 0x768   : > { %4043 = vmatpush.msrb.mxu2 %v3982_v60 }
 0x769   : > { %4084 = vmatpush.msrb.mxu3 %v3983_v0  ;;  %v4277_v0 = vmul.f32 %v9723_v21, %v11262_v38  ;;  %v4253_v21 = vsel %vm1669_vm2, %v9687_v10, %v9802_v18 }
 0x76a   : > { %4742 = vrot.lane.b32.xlu2 %v9242_v32, %s6387_s20  ;;  %4044 = vmatpush.msrb.mxu2 %v3980_v48 }
 0x76b   : > { %4746 = vrot.lane.b32.xlu1 %v9556_v55, %s6387_s20  ;;  %4085 = vmatpush.msrb.mxu3 %v3981_v15  ;;  %v4002_v15 = vld [vmem:[#allocation2 + $0x68] sm:$0xff] }
 0x76c   : > { %5971 = vmatmul.msk.f32.vlgmr.msrb.gmra.mxu2 %vm492_vm0, %v3997_v61  ;;  %5979 = vmatmul.msk.f32.vlgmr.msrb.gmra.mxu3 %vm492_vm0, %v3997_v61  ;;  %v9847_v8 = vpop.permute.xlu1 %4219  ;;  %v9855_v14 = vpop.permute.xlu2 %4436 }
 0x76d   : > { %4426 = vrot.lane.b32.xlu0 %v9599_v62, %s6385_s18 }
 0x76f   : > { %v9853_v44 = vpop.permute.xlu0 %3884 }
 0x772   : > { %4949 = vrot.lane.b32.xlu2 %v9453_v47, %s6386_s19 }
 0x773   : > { %4953 = vrot.lane.b32.xlu1 %v9471_v22, %s6386_s19 }
 0x774   : > { %5972 = vmatmul.msk.f32.gmra.mxu2 %vm492_vm0, %v3998_v5  ;;  %5980 = vmatmul.msk.f32.gmra.mxu3 %vm492_vm0, %v3998_v5  ;;  %v9861_v1 = vpop.permute.xlu1 %3880  ;;  %v9872_v13 = vpop.permute.xlu2 %4416  ;;  %v4261_v5 = vsel %vm1669_vm2, %v9802_v18, %v9687_v10  ;;  %v4252_v10 = vsel %vm1669_vm2, %v9839_v34, %v9669_v9 }
 0x775   : > { %4939 = vrot.lane.b32.xlu0 %v9532_v46, %s6386_s19 }
 0x777   : > { %v9867_v43 = vpop.permute.xlu0 %3866 }
 0x77a   : > { %4738 = vrot.lane.b32.xlu2 %v9425_v12, %s6387_s20 }
 0x77b   : > { %4935 = vrot.lane.b32.xlu1 %v9504_v24, %s6386_s19 }
 0x77c   : > { %5973 = vmatmul.msk.f32.gmra.mxu2 %vm492_vm0, %v3999_v28  ;;  %5981 = vmatmul.msk.f32.gmra.mxu3 %vm492_vm0, %v3999_v28  ;;  %v9875_v45 = vpop.permute.xlu1 %3862  ;;  %v9889_v51 = vpop.permute.xlu2 %4430  ;;  %v4275_v28 = vmul.f32 %v9711_v27, %v11262_v38  ;;  %v4273_v27 = vmul.f32 %v4261_v5, %v11262_v38 }
 0x77d   : > { %4762 = vrot.lane.b32.xlu0 %v9325_v37, %s6387_s20 }
 0x77f   : > { %v4236_v16 = vpop.permute.xlu0 %4235 }
 0x782   : > { %4947 = vrot.lane.b32.xlu2 %v9599_v62, %s6386_s19 }
 0x783   : > { %4758 = vrot.lane.b32.xlu1 %v9471_v22, %s6387_s20 }
 0x784   : > { %5974 = vmatmul.msk.f32.gmra.mxu2 %vm492_vm0, %v4000_v36  ;;  %5982 = vmatmul.msk.f32.gmra.mxu3 %vm492_vm0, %v4000_v36  ;;  %v9885_v41 = vpop.permute.xlu1 %3876  ;;  %v9911_v48 = vpop.permute.xlu2 %4961  ;;  %v4260_v36 = vsel %vm1669_vm2, %v9669_v9, %v9839_v34  ;;  %v4251_v9 = vsel %vm1669_vm2, %v9681_v3, %v9826_v33 }
 0x785   : > { %4744 = vrot.lane.b32.xlu0 %v9532_v46, %s6387_s20  ;;  %v4271_v34 = vmul.f32 %v4260_v36, %v11262_v38 }
 0x787   : > { %v4218_v42 = vpop.permute.xlu0 %4217 }
 0x78a   : > { %5349 = vrot.lane.b32.xlu2 %v9568_v25, %s11261_s14 }
 0x78b   : > { %4740 = vrot.lane.b32.xlu1 %v9504_v24, %s6387_s20 }
 0x78c   : > { %5975 = vmatmul.msk.f32.gmra.mxu2 %vm492_vm0, %v4001_v7  ;;  %5983 = vmatmul.msk.f32.gmra.mxu3 %vm492_vm0, %v4001_v7  ;;  %v4248_v57 = vpop.permute.xlu1 %4247  ;;  %v4259_v7 = vsel %vm1669_vm2, %v9826_v33, %v9681_v3  ;;  %v4003_v33 = vld [vmem:[#allocation2 + $0x70] sm:$0xff]  ;;  %v9972_v5 = vpop.permute.xlu2 %4943 }
 0x78d   : > { %v4256_v6 = vsel %vm1669_vm2, %v9788_v29, %v4248_v57  ;;  %v4264_v59 = vsel %vm1669_vm2, %v4248_v57, %v9788_v29  ;;  %4951 = vrot.lane.b32.xlu0 %v9212_v58, %s6386_s19  ;;  %v4278_v29 = vmul.f32 %v9719_v52, %v11263_v49  ;;  %v4276_v52 = vmul.f32 %v9707_v11, %v11263_v49 }
 0x78e   : > { %v4279_v50 = vmul.f32 %v4264_v59, %v11262_v38  ;;  %v4280_v60 = vmul.f32 %v4256_v6, %v11263_v49  ;;  %v4274_v11 = vmul.f32 %v4253_v21, %v11263_v49  ;;  %v4272_v57 = vmul.f32 %v4252_v10, %v11263_v49 }
 0x78f   : > { %v9913_v61 = vpop.permute.xlu0 %3878  ;;  %v4258_v6 = vsel %vm1669_vm2, %v4236_v16, %v9847_v8  ;;  %v4269_v59 = vmul.f32 %v4259_v7, %v11262_v38 }
 0x790   : > { %4322 = vmatpush.msra.mxu2 %v4279_v50  ;;  %4363 = vmatpush.msra.mxu3 %v4280_v60  ;;  %v4250_v50 = vsel %vm1669_vm2, %v9847_v8, %v4236_v16  ;;  %v4270_v60 = vmul.f32 %v4251_v9, %v11263_v49 }
 0x791   : > { %v4268_v8 = vmul.f32 %v4250_v50, %v11263_v49  ;;  %v3896_v50 = vsel %vm1297_vm3, %v9776_v17, %v9853_v44 }
 0x792   : > { %5331 = vrot.lane.b32.xlu2 %v9556_v55, %s11261_s14  ;;  %4323 = vmatpush.msra.mxu2 %v4277_v0  ;;  %v4257_v0 = vsel %vm1669_vm2, %v9725_v35, %v4218_v42 }
 0x793   : > { %4754 = vrot.lane.b32.xlu1 %v9453_v47, %s6387_s20  ;;  %4364 = vmatpush.msra.mxu3 %v4278_v29  ;;  %v4249_v29 = vsel %vm1669_vm2, %v4218_v42, %v9725_v35  ;;  %v4265_v16 = vmul.f32 %v4257_v0, %v11262_v38  ;;  %vm11274_vm2 = vmmov %vm11273_vm15 }
 0x794   : > { %5976 = vmatmul.msk.f32.gmra.mxu2 %vm492_vm0, %v4002_v15  ;;  %5984 = vmatmul.msk.f32.gmra.mxu3 %vm492_vm0, %v4002_v15  ;;  %v3875_v18 = vpop.permute.xlu1 %3874  ;;  %v4267_v15 = vmul.f32 %v4258_v6, %v11262_v38  ;;  %v4266_v21 = vmul.f32 %v4249_v29, %v11263_v49  ;;  %v4004_v49 = vld [vmem:[#allocation2 + $0x78] sm:$0xff]  ;;  %v3904_v6 = vsel %vm1297_vm3, %v9853_v44, %v9776_v17 }
 0x795   : > { %4324 = vmatpush.msra.mxu2 %v4275_v28  ;;  %4365 = vmatpush.msra.mxu3 %v4276_v52  ;;  %v3895_v17 = vsel %vm1297_vm3, %v9867_v43, %v9693_v39 }
 0x796   : > { %4933 = vrot.lane.b32.xlu0 %v9425_v12, %s6386_s19 }
 0x797   : > { %4325 = vmatpush.msra.mxu2 %v4273_v27  ;;  %4366 = vmatpush.msra.mxu3 %v4274_v11  ;;  %v4441_v3 = vpop.permute.xlu0 %4440  ;;  %v11265_v27 = vld [vmem:[#allocation13_spill] sm:$0xff]  ;;  %v11266_v11 = vld [vmem:[#allocation14_spill] sm:$0xff] }
 0x798   : > { %v3920_v9 = vmul.f32 %v9739_v40, %v11265_v27  ;;  %v3917_v44 = vmul.f32 %v3896_v50, %v11266_v11 }
 0x799   : > { %4326 = vmatpush.msra.mxu2 %v4271_v34  ;;  %4367 = vmatpush.msra.mxu3 %v4272_v57  ;;  %v3921_v34 = vmul.f32 %v9735_v19, %v11266_v11 }
 0x79a   : > { %5154 = vrot.lane.b32.xlu2 %v9568_v25, %s11264_s15 }
 0x79b   : > { %4963 = vrot.lane.b32.xlu1 %v9542_v53, %s6386_s19  ;;  %4327 = vmatpush.msra.mxu2 %v4269_v59  ;;  %v3918_v59 = vmul.f32 %v9751_v4, %v11265_v27  ;;  %v3916_v4 = vmul.f32 %v3904_v6, %v11265_v27 }
 0x79c   : > { %4368 = vmatpush.msra.mxu3 %v4270_v60  ;;  %5977 = vmatmul.msk.f32.gmra.mxu2 %vm492_vm0, %v4003_v33  ;;  %v4425_v28 = vpop.permute.xlu1 %4424  ;;  %v3894_v60 = vsel %vm1297_vm3, %v9701_v63, %v9861_v1 }
 0x79d   : > { %5985 = vmatmul.msk.f32.gmra.mxu3 %vm492_vm0, %v4003_v33  ;;  %4328 = vmatpush.msra.mxu2 %v4267_v15  ;;  %v9985_v35 = vsel %vm1872_vm4, %v4425_v28, %v4441_v3  ;;  %v9989_v42 = vsel %vm1872_vm4, %v4441_v3, %v4425_v28  ;;  %v3919_v3 = vmul.f32 %v9747_v23, %v11266_v11  ;;  %v4282_v15 = vld [vmem:[#allocation2 + $0x80] sm:$0xff] }
 0x79e   : > { %4369 = vmatpush.msra.mxu3 %v4268_v8  ;;  %4756 = vrot.lane.b32.xlu0 %v9212_v58, %s6387_s20  ;;  %v3913_v29 = vmul.f32 %v3894_v60, %v11266_v11 }
 0x79f   : > { %4329 = vmatpush.msra.mxu2 %v4265_v16  ;;  %v3891_v38 = vpop.permute.xlu0 %3890  ;;  %v3892_v16 = vsel %vm1297_vm3, %v9743_v2, %v9885_v41 }
 0x7a0   : > { %4370 = vmatpush.msra.mxu3 %v4266_v21  ;;  %v3899_v52 = vsel %vm1297_vm3, %v3875_v18, %v3891_v38  ;;  %v3907_v36 = vsel %vm1297_vm3, %v3891_v38, %v3875_v18  ;;  %v10010_v18 = vpop.permute.xlu2 %4766  ;;  %v3924_v38 = vld [vmem:[#allocation2] sm:$0xff] }
 0x7a1   : > { %4648 = vmatpush.msrb.mxu2 %v9599_v62  ;;  %v3922_v10 = vmul.f32 %v3907_v36, %v11265_v27  ;;  %v3923_v7 = vmul.f32 %v3899_v52, %v11266_v11  ;;  %v4283_v52 = vld [vmem:[#allocation2 + $0x88] sm:$0xff] }
 0x7a2   : > { %5136 = vrot.lane.b32.xlu2 %v9556_v55, %s11264_s15  ;;  %4689 = vmatpush.msrb.mxu3 %v9542_v53 }
 0x7a3   : > { %4649 = vmatpush.msrb.mxu2 %v9582_v20  ;;  %4752 = vrot.lane.b32.xlu1 %v9599_v62, %s6387_s20 }
 0x7a4   : > { %4690 = vmatpush.msrb.mxu3 %v9437_v30  ;;  %5978 = vmatmul.msk.f32.gmra.mxu2 %vm492_vm0, %v4004_v49  ;;  %v4439_v57 = vpop.permute.xlu1 %4438 }
 0x7a5   : > { %4143 = vmatpush.msra.mxu0 %v3922_v10  ;;  %4184 = vmatpush.msra.mxu1 %v3923_v7  ;;  %v10021_v40 = vsel %vm1872_vm4, %v9837_v54, %v4439_v57  ;;  %v10026_v19 = vsel %vm1872_vm4, %v4439_v57, %v9837_v54  ;;  %v3903_v54 = vsel %vm1297_vm3, %v9693_v39, %v9867_v43  ;;  %v3925_v10 = vld [vmem:[#allocation2 + $0x8] sm:$0xff]  ;;  %v4284_v7 = vld [vmem:[#allocation2 + $0x90] sm:$0xff]  ;;  %v4285_v57 = vld [vmem:[#allocation2 + $0x98] sm:$0xff] }
 0x7a6   : > { %5986 = vmatmul.msk.f32.gmra.mxu3 %vm492_vm0, %v4004_v49  ;;  %4650 = vmatpush.msrb.mxu2 %v9354_v56  ;;  %v3902_v39 = vsel %vm1297_vm3, %v9861_v1, %v9701_v63  ;;  %v3914_v43 = vmul.f32 %v3903_v54, %v11265_v27  ;;  %v3893_v63 = vsel %vm1297_vm3, %v9875_v45, %v9913_v61  ;;  %v4286_v54 = vld [vmem:[#allocation2 + $0xa0] sm:$0xff] }
 0x7a7   : > { %5351 = vrot.lane.b32.xlu0 %v9437_v30, %s11261_s14  ;;  %4144 = vmatpush.msra.mxu0 %v3920_v9  ;;  %v4421_v23 = vpop.permute.xlu0 %4420  ;;  %v3912_v0 = vmul.f32 %v3902_v39, %v11265_v27  ;;  %v3901_v1 = vsel %vm1297_vm3, %v9913_v61, %v9875_v45  ;;  %v3900_v45 = vsel %vm1297_vm3, %v9885_v41, %v9743_v2  ;;  %v3926_v9 = vld [vmem:[#allocation2 + $0x10] sm:$0xff]  ;;  %vm11277_vm3 = vmmov %vm11274_vm2 }
 0x7a8   : > { %4185 = vmatpush.msra.mxu1 %v3921_v34  ;;  %4691 = vmatpush.msrb.mxu3 %v9568_v25  ;;  %v10054_v33 = vsel %vm1872_vm4, %v4421_v23, %v9855_v14  ;;  %v10059_v25 = vsel %vm1872_vm4, %v9855_v14, %v4421_v23  ;;  %v3915_v14 = vmul.f32 %v3895_v17, %v11266_v11  ;;  %v10088_v8 = vpop.permute.xlu2 %4748 }
 0x7a9   : > { %4145 = vmatpush.msra.mxu0 %v3918_v59  ;;  %4651 = vmatpush.msrb.mxu2 %v9556_v55  ;;  %v3910_v28 = vmul.f32 %v3901_v1, %v11265_v27  ;;  %v3911_v21 = vmul.f32 %v3893_v63, %v11266_v11  ;;  %v3908_v2 = vmul.f32 %v3900_v45, %v11265_v27 }
 0x7aa   : > { %5343 = vrot.lane.b32.xlu2 %v9471_v22, %s11261_s14  ;;  %4186 = vmatpush.msra.mxu1 %v3919_v3  ;;  %v3909_v41 = vmul.f32 %v3892_v16, %v11266_v11  ;;  %v11268_v16 = vld [vmem:[#allocation17_spill] sm:$0xff] }
 0x7ab   : > { %4692 = vmatpush.msrb.mxu3 %v9325_v37  ;;  %4146 = vmatpush.msra.mxu0 %v3916_v4 }
 0x7ac   : > { %4187 = vmatpush.msra.mxu1 %v3917_v44  ;;  %4652 = vmatpush.msrb.mxu2 %v9532_v46  ;;  %v10075_v55 = vpop.permute.xlu1 %4418  ;;  %v4287_v44 = vld [vmem:[#allocation2 + $0xa8] sm:$0xff] }
 0x7ad   : > { %4693 = vmatpush.msrb.mxu3 %v9545_v26  ;;  %4147 = vmatpush.msra.mxu0 %v3914_v43 }
 0x7ae   : > { %4188 = vmatpush.msra.mxu1 %v3915_v14  ;;  %4653 = vmatpush.msrb.mxu2 %v9242_v32 }
 0x7af   : > { %4694 = vmatpush.msrb.mxu3 %v9471_v22  ;;  %5335 = vrot.lane.b32.xlu1 %v9582_v20, %s11261_s14  ;;  %v10104_v61 = vpop.permute.xlu0 %4434 }
 0x7b0   : > { %4768 = vrot.lane.b32.xlu0 %v9542_v53, %s6387_s20  ;;  %4148 = vmatpush.msra.mxu0 %v3912_v0  ;;  %v10125_v36 = vpop.permute.xlu2 %4442  ;;  %v4288_v0 = vld [vmem:[#allocation2 + $0xb0] sm:$0xff]  ;;  %s10952_s20 = scalar_lea.vmem %s11032_s11, %s11308_s16 }
 0x7b1   : > { %4189 = vmatpush.msra.mxu1 %v3913_v29  ;;  %6003 = vmatmul.msk.f32.vlgmr.msra.gmra.mxu2 %vm492_vm0, %v4282_v15 }
 0x7b2   : > { %6011 = vmatmul.msk.f32.vlgmr.msra.gmra.mxu3 %vm492_vm0, %v4282_v15  ;;  %4654 = vmatpush.msrb.mxu2 %v9504_v24 }
 0x7b3   : > { %4695 = vmatpush.msrb.mxu3 %v9212_v58  ;;  %5325 = vrot.lane.b32.xlu2 %v9504_v24, %s11261_s14 }
 0x7b4   : > { %4149 = vmatpush.msra.mxu0 %v3910_v28  ;;  %4190 = vmatpush.msra.mxu1 %v3911_v21  ;;  %v10117_v49 = vpop.permute.xlu1 %4432  ;;  %v3930_v28 = vld [vmem:[#allocation2 + $0x30] sm:$0xff] }
 0x7b5   : > { %4655 = vmatpush.msrb.mxu2 %v9425_v12  ;;  %4696 = vmatpush.msrb.mxu3 %v9453_v47 }
 0x7b6   : > { %4150 = vmatpush.msra.mxu0 %v3908_v2  ;;  %4191 = vmatpush.msra.mxu1 %v3909_v41  ;;  %v4473_v41 = vmul.f32 %v9985_v35, %v11268_v16 }
 0x7b7   : > { %5987 = vmatmul.msk.f32.vlgmr.msra.gmra.mxu0 %vm492_vm0, %v3924_v38  ;;  %5995 = vmatmul.msk.f32.vlgmr.msra.gmra.mxu1 %vm492_vm0, %v3924_v38  ;;  %v10128_v27 = vpop.permute.xlu0 %4414  ;;  %v4289_v38 = vld [vmem:[#allocation2 + $0xb8] sm:$0xff] }
 0x7b8   : > { %5140 = vrot.lane.b32.xlu1 %v9582_v20, %s11264_s15  ;;  %5333 = vrot.lane.b32.xlu0 %v9354_v56, %s11261_s14 }
 0x7b9   : > { %6004 = vmatmul.msk.f32.gmra.mxu2 %vm492_vm0, %v4283_v52 }
 0x7ba   : > { %6012 = vmatmul.msk.f32.gmra.mxu3 %vm492_vm0, %v4283_v52  ;;  %v5523_v52 = vld [vmem:[%s11027_s6 + $0x28] sm:$0xff] }
 0x7bb   : > { %5148 = vrot.lane.b32.xlu2 %v9471_v22, %s11264_s15  ;;  %v10145_v22 = vpop.permute.xlu2 %4955 }
 0x7bc   : > { %v10133_v11 = vpop.permute.xlu1 %4412 }
 0x7bf   : > { %5988 = vmatmul.msk.f32.gmra.mxu0 %vm492_vm0, %v3925_v10  ;;  %5996 = vmatmul.msk.f32.gmra.mxu1 %vm492_vm0, %v3925_v10  ;;  %v10142_v20 = vpop.permute.xlu0 %4428 }
 0x7c0   : > { %5347 = vrot.lane.b32.xlu1 %v9325_v37, %s11261_s14  ;;  %5156 = vrot.lane.b32.xlu0 %v9437_v30, %s11264_s15 }
 0x7c1   : > { %6005 = vmatmul.msk.f32.gmra.mxu2 %vm492_vm0, %v4284_v7 }
 0x7c2   : > { %6013 = vmatmul.msk.f32.gmra.mxu3 %vm492_vm0, %v4284_v7  ;;  %v3931_v7 = vld [vmem:[#allocation2 + $0x38] sm:$0xff] }
 0x7c3   : > { %5353 = vrot.lane.b32.xlu2 %v9542_v53, %s11261_s14  ;;  %v10171_v50 = vpop.permute.xlu2 %4937 }
 0x7c4   : > { %v4960_v34 = vpop.permute.xlu1 %4959 }
 0x7c5   : > { %v10152_v6 = vsel %vm2409_vm1, %v9972_v5, %v4960_v34  ;;  %v10157_v30 = vsel %vm2409_vm1, %v4960_v34, %v9972_v5  ;;  %v3927_v5 = vld [vmem:[#allocation2 + $0x18] sm:$0xff] }
 0x7c7   : > { %5989 = vmatmul.msk.f32.gmra.mxu0 %vm492_vm0, %v3926_v9  ;;  %5997 = vmatmul.msk.f32.gmra.mxu1 %vm492_vm0, %v3926_v9  ;;  %v10166_v59 = vpop.permute.xlu0 %4945  ;;  %v4454_v9 = vsel %vm1872_vm4, %v10117_v49, %v9872_v13 }
 0x7c8   : > { %5329 = vrot.lane.b32.xlu1 %v9532_v46, %s11261_s14  ;;  %5138 = vrot.lane.b32.xlu0 %v9354_v56, %s11264_s15 }
 0x7c9   : > { %6006 = vmatmul.msk.f32.gmra.mxu2 %vm492_vm0, %v4285_v57 }
 0x7ca   : > { %6014 = vmatmul.msk.f32.gmra.mxu3 %vm492_vm0, %v4285_v57  ;;  %v4453_v57 = vsel %vm1872_vm4, %v9889_v51, %v10128_v27 }
 0x7cb   : > { %5142 = vrot.lane.b32.xlu2 %v9599_v62, %s11264_s15  ;;  %v10205_v60 = vpop.permute.xlu2 %4760 }
 0x7cc   : > { %v10173_v3 = vpop.permute.xlu1 %4941 }
 0x7cf   : > { %5990 = vmatmul.msk.f32.gmra.mxu0 %vm492_vm0, %v3927_v5  ;;  %5998 = vmatmul.msk.f32.gmra.mxu1 %vm492_vm0, %v3927_v5  ;;  %v4751_v56 = vpop.permute.xlu0 %4750 }
 0x7d0   : > { %5152 = vrot.lane.b32.xlu1 %v9325_v37, %s11264_s15  ;;  %5345 = vrot.lane.b32.xlu0 %v9545_v26, %s11261_s14  ;;  %v10186_v4 = vsel %vm2206_vm5, %v4751_v56, %v10010_v18  ;;  %v10191_v17 = vsel %vm2206_vm5, %v10010_v18, %v4751_v56  ;;  %v3928_v37 = vld [vmem:[#allocation2 + $0x20] sm:$0xff]  ;;  %v3929_v18 = vld [vmem:[#allocation2 + $0x28] sm:$0xff] }
 0x7d1   : > { %6007 = vmatmul.msk.f32.gmra.mxu2 %vm492_vm0, %v4286_v54 }
 0x7d2   : > { %6015 = vmatmul.msk.f32.gmra.mxu3 %vm492_vm0, %v4286_v54  ;;  %v4608_v54 = vld [vmem:[#allocation2 + $0x100] sm:$0xff] }
 0x7d3   : > { %5130 = vrot.lane.b32.xlu2 %v9504_v24, %s11264_s15  ;;  %v10230_v15 = vpop.permute.xlu2 %4742 }
 0x7d4   : > { %v4765_v23 = vpop.permute.xlu1 %4764 }
 0x7d5   : > { %v10198_v39 = vsel %vm2206_vm5, %v10088_v8, %v4765_v23  ;;  %v10203_v43 = vsel %vm2206_vm5, %v4765_v23, %v10088_v8 }
 0x7d7   : > { %5991 = vmatmul.msk.f32.gmra.mxu0 %vm492_vm0, %v3928_v37  ;;  %5999 = vmatmul.msk.f32.gmra.mxu1 %vm492_vm0, %v3928_v37  ;;  %v10214_v24 = vpop.permute.xlu0 %4957 }
 0x7d8   : > { %5134 = vrot.lane.b32.xlu1 %v9532_v46, %s11264_s15  ;;  %5327 = vrot.lane.b32.xlu0 %v9242_v32, %s11261_s14  ;;  %v5520_v46 = vld [vmem:[%s11027_s6 + $0x10] sm:$0xff] }
 0x7d9   : > { %6008 = vmatmul.msk.f32.gmra.mxu2 %vm492_vm0, %v4287_v44 }
 0x7da   : > { %6016 = vmatmul.msk.f32.gmra.mxu3 %vm492_vm0, %v4287_v44 }
 0x7db   : > { %5144 = vrot.lane.b32.xlu2 %v9453_v47, %s11264_s15  ;;  %v10275_v10 = vpop.permute.xlu2 %4949 }
 0x7dd   : > { %v10219_v14 = vpop.permute.xlu1 %4746 }
 0x7df   : > { %5992 = vmatmul.msk.f32.gmra.mxu0 %vm492_vm0, %v3929_v18  ;;  %6000 = vmatmul.msk.f32.gmra.mxu1 %vm492_vm0, %v3929_v18  ;;  %v4427_v29 = vpop.permute.xlu0 %4426  ;;  %v4477_v18 = vld [vmem:[#allocation2 + $0xc0] sm:$0xff] }
 0x7e0   : > { %5341 = vrot.lane.b32.xlu1 %v9212_v58, %s11261_s14  ;;  %5150 = vrot.lane.b32.xlu0 %v9545_v26, %s11264_s15  ;;  %v4451_v63 = vsel %vm1872_vm4, %v4427_v29, %v10125_v36  ;;  %v4459_v1 = vsel %vm1872_vm4, %v10125_v36, %v4427_v29  ;;  %v11267_v26 = vld [vmem:[#allocation16_spill] sm:$0xff]  ;;  %v4471_v36 = vmul.f32 %v10021_v40, %v11268_v16  ;;  %v4609_v29 = vld [vmem:[#allocation2 + $0x108] sm:$0xff] }
 0x7e1   : > { %6009 = vmatmul.msk.f32.gmra.mxu2 %vm492_vm0, %v4288_v0  ;;  %v4474_v8 = vmul.f32 %v4459_v1, %v11267_v26  ;;  %v4475_v45 = vmul.f32 %v4451_v63, %v11268_v16  ;;  %v4472_v2 = vmul.f32 %v9989_v42, %v11267_v26  ;;  %v4470_v42 = vmul.f32 %v10026_v19, %v11267_v26 }
 0x7e2   : > { %6017 = vmatmul.msk.f32.gmra.mxu3 %vm492_vm0, %v4288_v0  ;;  %v4455_v19 = vsel %vm1872_vm4, %v10104_v61, %v10075_v55  ;;  %v4469_v40 = vmul.f32 %v10054_v33, %v11268_v16  ;;  %v4445_v33 = vsel %vm1872_vm4, %v10128_v27, %v9889_v51  ;;  %v4444_v51 = vsel %vm1872_vm4, %v10133_v11, %v10142_v20 }
 0x7e3   : > { %5538 = vperm.xlu2 %6149, %v5520_v46   ;;  %4517 = vmatpush.msrb.mxu0 %v4474_v8  ;;  %v4452_v27 = vsel %vm1872_vm4, %v10142_v20, %v10133_v11  ;;  %v4462_v23 = vmul.f32 %v4453_v57, %v11267_v26  ;;  %v4463_v44 = vmul.f32 %v4445_v33, %v11268_v16 }
 0x7e4   : > { %4558 = vmatpush.msrb.mxu1 %v4475_v45  ;;  %v4460_v11 = vmul.f32 %v4452_v27, %v11267_v26  ;;  %v4461_v20 = vmul.f32 %v4444_v51, %v11268_v16  ;;  %v4979_v57 = vsel %vm2409_vm1, %v9911_v48, %v10166_v59 }
 0x7e5   : > { %v10242_v21 = vpop.permute.xlu1 %4953  ;;  %4518 = vmatpush.msrb.mxu0 %v4472_v2 }
 0x7e6   : > { %4559 = vmatpush.msrb.mxu1 %v4473_v41  ;;  %v4479_v41 = vld [vmem:[#allocation2 + $0xd0] sm:$0xff] }
 0x7e7   : > { %5993 = vmatmul.msk.f32.gmra.mxu0 %vm492_vm0, %v3930_v28  ;;  %6001 = vmatmul.msk.f32.gmra.mxu1 %vm492_vm0, %v3930_v28  ;;  %v10259_v35 = vpop.permute.xlu0 %4939 }
 0x7e8   : > { %5158 = vrot.lane.b32.xlu1 %v9542_v53, %s11264_s15  ;;  %5337 = vrot.lane.b32.xlu0 %v9599_v62, %s11261_s14  ;;  %v4468_v53 = vmul.f32 %v10059_v25, %v11267_v26  ;;  %v4447_v62 = vsel %vm1872_vm4, %v10075_v55, %v10104_v61  ;;  %v4446_v25 = vsel %vm1872_vm4, %v9872_v13, %v10117_v49  ;;  %vm11278_vm4 = vmmov %vm11274_vm2 }
 0x7e9   : > { %6010 = vmatmul.msk.f32.gmra.mxu2 %vm492_vm0, %v4289_v38  ;;  %4519 = vmatpush.msrb.mxu0 %v4470_v42  ;;  %v4466_v61 = vmul.f32 %v4455_v19, %v11267_v26  ;;  %v4467_v34 = vmul.f32 %v4447_v62, %v11268_v16  ;;  %v4464_v49 = vmul.f32 %v4454_v9, %v11267_v26  ;;  %v4478_v26 = vld [vmem:[#allocation2 + $0xc8] sm:$0xff]  ;;  %v5524_v9 = vld [vmem:[%s11027_s6 + $0x30] sm:$0xff] }
 0x7ea   : > { %6018 = vmatmul.msk.f32.gmra.mxu3 %vm492_vm0, %v4289_v38  ;;  %4560 = vmatpush.msrb.mxu1 %v4471_v36  ;;  %v4465_v5 = vmul.f32 %v4446_v25, %v11268_v16  ;;  %v5518_v16 = vld [vmem:[%s11027_s6] sm:$0xff]  ;;  %v5519_v42 = vld [vmem:[%s11027_s6 + $0x8] sm:$0xff]  ;;  %v4611_v36 = vld [vmem:[#allocation2 + $0x118] sm:$0xff]  ;;  %v4971_v25 = vsel %vm2409_vm1, %v10166_v59, %v9911_v48  ;;  %v4969_v59 = vsel %vm2409_vm1, %v10173_v3, %v10214_v24 }
 0x7eb   : > { %5553 = vperm.xlu2 %6149, %v5523_v52   ;;  %4520 = vmatpush.msrb.mxu0 %v4468_v53  ;;  %v5521_v52 = vld [vmem:[%s11027_s6 + $0x18] sm:$0xff] }
 0x7ec   : > { %4561 = vmatpush.msrb.mxu1 %v4469_v40  ;;  %v4480_v40 = vld [vmem:[#allocation2 + $0xd8] sm:$0xff] }
 0x7ed   : > { %v10287_v55 = vpop.permute.xlu1 %4935  ;;  %4521 = vmatpush.msrb.mxu0 %v4466_v61  ;;  %v5522_v61 = vld [vmem:[%s11027_s6 + $0x20] sm:$0xff] }
 0x7ee   : > { %4562 = vmatpush.msrb.mxu1 %v4467_v34 }
 0x7ef   : > { %5994 = vmatmul.msk.f32.gmra.mxu0 %vm492_vm0, %v3931_v7  ;;  %6002 = vmatmul.msk.f32.gmra.mxu1 %vm492_vm0, %v3931_v7  ;;  %v10301_v13 = vpop.f32.mrf.mxu2  ;;  %v10305_v56 = vpop.f32.mrf.mxu3 }
 0x7f0   : > { %5323 = vrot.lane.b32.xlu1 %v9425_v12, %s11261_s14  ;;  %5132 = vrot.lane.b32.xlu0 %v9242_v32, %s11264_s15  ;;  %v10319_v37 = vpop.permute.xlu0 %4762  ;;  %v10327_v32 = vpop.permute.xlu2 %4738 }
 0x7f1   : > { %4522 = vmatpush.msrb.mxu0 %v4464_v49  ;;  %4563 = vmatpush.msrb.mxu1 %v4465_v5  ;;  %v11269_v49 = vld [vmem:[#allocation18_spill] sm:$0xff] }
 0x7f2   : > { %6035 = vmatmul.msk.f32.vlgmr.msrb.gmra.mxu2 %vm492_vm0, %v4608_v54  ;;  %6043 = vmatmul.msk.f32.vlgmr.msrb.gmra.mxu3 %vm492_vm0, %v4608_v54  ;;  %v11270_v54 = vld [vmem:[#allocation19_spill] sm:$0xff] }
 0x7f3   : > { %4523 = vmatpush.msrb.mxu0 %v4462_v23  ;;  %4564 = vmatpush.msrb.mxu1 %v4463_v44  ;;  %v4612_v23 = vld [vmem:[#allocation2 + $0x120] sm:$0xff]  ;;  %v4994_v48 = vmul.f32 %v4979_v57, %v11270_v54  ;;  %v4482_v57 = vld [vmem:[#allocation2 + $0xe8] sm:$0xff] }
 0x7f5   : > { %v10329_v0 = vpop.permute.xlu1 %4758  ;;  %4524 = vmatpush.msrb.mxu0 %v4460_v11  ;;  %4565 = vmatpush.msrb.mxu1 %v4461_v20  ;;  %v4993_v20 = vmul.f32 %v4971_v25, %v11269_v49 }
 0x7f7   : > { %6019 = vmatmul.msk.f32.vlgmr.msrb.gmra.mxu0 %vm492_vm0, %v4477_v18  ;;  %6027 = vmatmul.msk.f32.vlgmr.msrb.gmra.mxu1 %vm492_vm0, %v4477_v18  ;;  %v10333_v46 = vpop.f32.mrf.mxu2  ;;  %v10335_v63 = vpop.f32.mrf.mxu3  ;;  %v4977_v18 = vsel %vm2409_vm1, %v10214_v24, %v10173_v3  ;;  %v4968_v3 = vsel %vm2409_vm1, %v10259_v35, %v10145_v22  ;;  %v4976_v24 = vsel %vm2409_vm1, %v10145_v22, %v10259_v35 }
 0x7f8   : > { %5146 = vrot.lane.b32.xlu1 %v9212_v58, %s11264_s15  ;;  %5339 = vrot.lane.b32.xlu0 %v9453_v47, %s11261_s14  ;;  %v10341_v1 = vpop.permute.xlu0 %4744  ;;  %v4948_v45 = vpop.permute.xlu2 %4947  ;;  %v4610_v47 = vld [vmem:[#allocation2 + $0x110] sm:$0xff]  ;;  %v4975_v22 = vsel %vm2409_vm1, %v10242_v21, %v10171_v50 }
 0x7fa   : > { %6036 = vmatmul.msk.f32.gmra.mxu2 %vm492_vm0, %v4609_v29  ;;  %6044 = vmatmul.msk.f32.gmra.mxu3 %vm492_vm0, %v4609_v29 }
 0x7fd   : > { %v10345_v8 = vpop.permute.xlu1 %4740 }
 0x7ff   : > { %6020 = vmatmul.msk.f32.gmra.mxu0 %vm492_vm0, %v4478_v26  ;;  %6028 = vmatmul.msk.f32.gmra.mxu1 %vm492_vm0, %v4478_v26  ;;  %v10352_v58 = vpop.f32.mrf.mxu2  ;;  %v10354_v28 = vpop.f32.mrf.mxu3  ;;  %v4991_v26 = vmul.f32 %v10152_v6, %v11269_v49  ;;  %v4990_v6 = vmul.f32 %v4977_v18, %v11270_v54  ;;  %v11271_v18 = vld [vmem:[#allocation20_spill] sm:$0xff] }
 0x800   : > { %5528 = vperm.xlu1 %6150, %v5518_v16   ;;  %5128 = vrot.lane.b32.xlu0 %v9425_v12, %s11264_s15  ;;  %v10358_v2 = vpop.permute.xlu0 %4951  ;;  %v10376_v62 = vpop.permute.xlu2 %5349  ;;  %v4992_v16 = vmul.f32 %v10157_v30, %v11270_v54  ;;  %v5525_v30 = vld [vmem:[%s11027_s6 + $0x38] sm:$0xff] }
 0x802   : > { %6037 = vmatmul.msk.f32.gmra.mxu2 %vm492_vm0, %v4610_v47  ;;  %6045 = vmatmul.msk.f32.gmra.mxu3 %vm492_vm0, %v4610_v47  ;;  %v4989_v47 = vmul.f32 %v4969_v59, %v11269_v49 }
 0x805   : > { %v10362_v38 = vpop.permute.xlu1 %4754 }
 0x807   : > { %6021 = vmatmul.msk.f32.gmra.mxu0 %vm492_vm0, %v4479_v41  ;;  %6029 = vmatmul.msk.f32.gmra.mxu1 %vm492_vm0, %v4479_v41  ;;  %v10372_v12 = vpop.f32.mrf.mxu2  ;;  %v10374_v53 = vpop.f32.mrf.mxu3  ;;  %v4967_v41 = vsel %vm2409_vm1, %v10171_v50, %v10242_v21  ;;  %v4966_v50 = vsel %vm2409_vm1, %v10287_v55, %v10358_v2  ;;  %v4974_v21 = vsel %vm2409_vm1, %v10358_v2, %v10287_v55 }
 0x808   : > { %5543 = vperm.xlu1 %6150, %v5521_v52   ;;  %5533 = vperm.xlu0 %6151, %v5519_v42   ;;  %v10378_v19 = vpop.permute.xlu0 %4933  ;;  %v10420_v29 = vpop.permute.xlu2 %5331  ;;  %v4987_v42 = vmul.f32 %v4968_v3, %v11269_v49  ;;  %v4983_v55 = vmul.f32 %v4966_v50, %v11269_v49  ;;  %v4984_v2 = vmul.f32 %v4974_v21, %v11270_v54 }
 0x80a   : > { %6038 = vmatmul.msk.f32.gmra.mxu2 %vm492_vm0, %v4611_v36  ;;  %6046 = vmatmul.msk.f32.gmra.mxu3 %vm492_vm0, %v4611_v36  ;;  %v4988_v36 = vmul.f32 %v4976_v24, %v11270_v54  ;;  %v4798_v24 = vmul.f32 %v10186_v4, %v11271_v18  ;;  %v4615_v4 = vld [vmem:[#allocation2 + $0x138] sm:$0xff] }
 0x80d   : > { %v4964_v7 = vpop.permute.xlu1 %4963 }
 0x80e   : > { %v4972_v34 = vsel %vm2409_vm1, %v4948_v45, %v4964_v7  ;;  %v4980_v33 = vsel %vm2409_vm1, %v4964_v7, %v4948_v45  ;;  %v4481_v45 = vld [vmem:[#allocation2 + $0xe0] sm:$0xff] }
 0x80f   : > { %6022 = vmatmul.msk.f32.gmra.mxu0 %vm492_vm0, %v4480_v40  ;;  %6030 = vmatmul.msk.f32.gmra.mxu1 %vm492_vm0, %v4480_v40  ;;  %v4995_v5 = vmul.f32 %v4972_v34, %v11269_v49  ;;  %v4996_v51 = vmul.f32 %v4980_v33, %v11270_v54  ;;  %v10404_v27 = vpop.f32.mrf.mxu2  ;;  %v10406_v44 = vpop.f32.mrf.mxu3  ;;  %v4613_v40 = vld [vmem:[#allocation2 + $0x128] sm:$0xff]  ;;  %v4965_v34 = vsel %vm2409_vm1, %v10378_v19, %v10275_v10 }
 0x810   : > { %5558 = vperm.xlu1 %6150, %v5524_v9   ;;  %5548 = vperm.xlu0 %6151, %v5522_v61   ;;  %v10408_v11 = vpop.permute.xlu0 %4756  ;;  %v4985_v9 = vmul.f32 %v4967_v41, %v11269_v49  ;;  %v4986_v61 = vmul.f32 %v4975_v22, %v11270_v54  ;;  %v4973_v33 = vsel %vm2409_vm1, %v10275_v10, %v10378_v19  ;;  %v4614_v10 = vld [vmem:[#allocation2 + $0x130] sm:$0xff]  ;;  %vm11279_vm1 = vmmov %vm11274_vm2 }
 0x811   : > { %5038 = vmatpush.msra.mxu2 %v4995_v5  ;;  %5079 = vmatpush.msra.mxu3 %v4996_v51  ;;  %v10481_v5 = vpop.permute.xlu2 %5154  ;;  %v4981_v51 = vmul.f32 %v4965_v34, %v11269_v49  ;;  %v4796_v41 = vmul.f32 %v10198_v39, %v11271_v18  ;;  %v4782_v22 = vsel %vm2206_vm5, %v10319_v37, %v10219_v14  ;;  %vm11285_vm14 = vmmov %vm11279_vm1 }
 0x812   : > { %6039 = vmatmul.msk.f32.gmra.mxu2 %vm492_vm0, %v4612_v23  ;;  %6047 = vmatmul.msk.f32.gmra.mxu3 %vm492_vm0, %v4612_v23  ;;  %v4982_v23 = vmul.f32 %v4973_v33, %v11270_v54  ;;  %v4779_v33 = vsel %vm2206_vm5, %v10408_v11, %v10345_v8  ;;  %vm11288_vm8 = vmmov %vm11279_vm1 }
 0x813   : > { %5039 = vmatpush.msra.mxu2 %v4993_v20  ;;  %5080 = vmatpush.msra.mxu3 %v4994_v48 }
 0x815   : > { %5040 = vmatpush.msra.mxu2 %v4991_v26  ;;  %5081 = vmatpush.msra.mxu3 %v4992_v16  ;;  %v4753_v35 = vpop.permute.xlu1 %4752  ;;  %v4483_v16 = vld [vmem:[#allocation2 + $0xf0] sm:$0xff] }
 0x817   : > { %6023 = vmatmul.msk.f32.gmra.mxu0 %vm492_vm0, %v4481_v45  ;;  %6031 = vmatmul.msk.f32.gmra.mxu1 %vm492_vm0, %v4481_v45  ;;  %v10451_v52 = vpop.f32.mrf.mxu2  ;;  %v10455_v7 = vpop.f32.mrf.mxu3  ;;  %v11272_v45 = vld [vmem:[#allocation21_spill] sm:$0xff] }
 0x818   : > { %5041 = vmatpush.msra.mxu2 %v4989_v47  ;;  %5082 = vmatpush.msra.mxu3 %v4990_v6  ;;  %v4774_v47 = vsel %vm2206_vm5, %v10219_v14, %v10319_v37  ;;  %v4772_v14 = vsel %vm2206_vm5, %v10230_v15, %v10329_v0  ;;  %v4781_v37 = vsel %vm2206_vm5, %v10205_v60, %v10341_v1 }
 0x819   : > { %5563 = vperm.xlu0 %6151, %v5525_v30   ;;  %v10465_v25 = vpop.permute.xlu0 %5351  ;;  %v10507_v6 = vpop.permute.xlu2 %5136  ;;  %v4799_v30 = vmul.f32 %v10191_v17, %v11272_v45  ;;  %v4794_v17 = vmul.f32 %v4774_v47, %v11271_v18  ;;  %v4793_v34 = vmul.f32 %v4781_v37, %v11272_v45 }
 0x81a   : > { %5042 = vmatpush.msra.mxu2 %v4987_v42  ;;  %5083 = vmatpush.msra.mxu3 %v4988_v36  ;;  %v4797_v42 = vmul.f32 %v10203_v43, %v11272_v45 }
 0x81b   : > { %6040 = vmatmul.msk.f32.gmra.mxu2 %vm492_vm0, %v4613_v40  ;;  %6048 = vmatmul.msk.f32.gmra.mxu3 %vm492_vm0, %v4613_v40  ;;  %v4795_v40 = vmul.f32 %v4782_v22, %v11272_v45 }
 0x81c   : > { %5043 = vmatpush.msra.mxu2 %v4985_v9  ;;  %5084 = vmatpush.msra.mxu3 %v4986_v61  ;;  %v4484_v9 = vld [vmem:[#allocation2 + $0xf8] sm:$0xff]  ;;  %v4790_v61 = vmul.f32 %v4772_v14, %v11271_v18 }
 0x81e   : > { %5044 = vmatpush.msra.mxu2 %v4983_v55  ;;  %5085 = vmatpush.msra.mxu3 %v4984_v2  ;;  %v4998_v2 = vld [vmem:[#allocation2 + $0x180] sm:$0xff] }
 0x81f   : > { %6024 = vmatmul.msk.f32.gmra.mxu0 %vm492_vm0, %v4482_v57  ;;  %6032 = vmatmul.msk.f32.gmra.mxu1 %vm492_vm0, %v4482_v57  ;;  %v10489_v20 = vpop.f32.mrf.mxu2 }
 0x820   : > { %5045 = vmatpush.msra.mxu2 %v4981_v51  ;;  %5086 = vmatpush.msra.mxu3 %v4982_v23  ;;  %v10491_v59 = vpop.f32.mrf.mxu3 }
 0x821   : > { %v10487_v19 = vpop.permute.xlu1 %5335  ;;  %v10568_v57 = vpop.permute.xlu2 %5343 }
 0x822   : > { %v4769_v48 = vpop.permute.xlu0 %4768 }
 0x823   : > { %6041 = vmatmul.msk.f32.gmra.mxu2 %vm492_vm0, %v4614_v10  ;;  %6049 = vmatmul.msk.f32.gmra.mxu3 %vm492_vm0, %v4614_v10  ;;  %v4777_v49 = vsel %vm2206_vm5, %v4753_v35, %v4769_v48  ;;  %v4785_v54 = vsel %vm2206_vm5, %v4769_v48, %v4753_v35  ;;  %v4773_v35 = vsel %vm2206_vm5, %v10341_v1, %v10205_v60 }
 0x824   : > { %v4800_v26 = vmul.f32 %v4777_v49, %v11271_v18  ;;  %v4801_v3 = vmul.f32 %v4785_v54, %v11272_v45  ;;  %v4792_v50 = vmul.f32 %v4773_v35, %v11271_v18  ;;  %v4780_v60 = vsel %vm2206_vm5, %v10329_v0, %v10230_v15 }
 0x825   : > { %v4771_v1 = vsel %vm2206_vm5, %v10345_v8, %v10408_v11  ;;  %v4791_v15 = vmul.f32 %v4780_v60, %v11272_v45  ;;  %v4770_v0 = vsel %vm2206_vm5, %v10327_v32, %v10362_v38  ;;  %v4778_v8 = vsel %vm2206_vm5, %v10362_v38, %v10327_v32  ;;  %v4803_v32 = vld [vmem:[#allocation2 + $0x140] sm:$0xff]  ;;  %v4805_v60 = vld [vmem:[#allocation2 + $0x150] sm:$0xff]  ;;  %vm11280_vm5 = vmmov %vm11279_vm1 }
 0x826   : > { %4843 = vmatpush.msra.mxu0 %v4800_v26  ;;  %4884 = vmatpush.msra.mxu1 %v4801_v3  ;;  %v4788_v55 = vmul.f32 %v4771_v1, %v11271_v18  ;;  %v4789_v11 = vmul.f32 %v4779_v33, %v11272_v45  ;;  %v4786_v10 = vmul.f32 %v4770_v0, %v11271_v18 }
 0x827   : > { %6025 = vmatmul.msk.f32.gmra.mxu0 %vm492_vm0, %v4483_v16  ;;  %6033 = vmatmul.msk.f32.gmra.mxu1 %vm492_vm0, %v4483_v16  ;;  %v10540_v43 = vpop.f32.mrf.mxu2  ;;  %v4787_v48 = vmul.f32 %v4778_v8, %v11272_v45  ;;  %v4999_v45 = vld [vmem:[#allocation2 + $0x188] sm:$0xff] }
 0x828   : > { %4844 = vmatpush.msra.mxu0 %v4798_v24  ;;  %4885 = vmatpush.msra.mxu1 %v4799_v30 }
 0x829   : > { %v10544_v21 = vpop.f32.mrf.mxu3 }
 0x82a   : > { %v10526_v39 = vpop.permute.xlu1 %5140  ;;  %4845 = vmatpush.msra.mxu0 %v4796_v41  ;;  %v10528_v36 = vpop.permute.xlu0 %5333  ;;  %4886 = vmatpush.msra.mxu1 %v4797_v42 }
 0x82b   : > { %6042 = vmatmul.msk.f32.gmra.mxu2 %vm492_vm0, %v4615_v4  ;;  %6050 = vmatmul.msk.f32.gmra.mxu3 %vm492_vm0, %v4615_v4  ;;  %v4804_v4 = vld [vmem:[#allocation2 + $0x148] sm:$0xff] }
 0x82c   : > { %4846 = vmatpush.msra.mxu0 %v4794_v17  ;;  %4887 = vmatpush.msra.mxu1 %v4795_v40  ;;  %v5000_v40 = vld [vmem:[#allocation2 + $0x190] sm:$0xff] }
 0x82e   : > { %4847 = vmatpush.msra.mxu0 %v4792_v50  ;;  %4888 = vmatpush.msra.mxu1 %v4793_v34 }
 0x82f   : > { %6026 = vmatmul.msk.f32.gmra.mxu0 %vm492_vm0, %v4484_v9  ;;  %6034 = vmatmul.msk.f32.gmra.mxu1 %vm492_vm0, %v4484_v9 }
 0x830   : > { %4848 = vmatpush.msra.mxu0 %v4790_v61  ;;  %4889 = vmatpush.msra.mxu1 %v4791_v15 }
 0x832   : > { %v10575_v51 = vpop.permute.xlu1 %5347  ;;  %4849 = vmatpush.msra.mxu0 %v4788_v55  ;;  %v10577_v23 = vpop.permute.xlu0 %5156  ;;  %4890 = vmatpush.msra.mxu1 %v4789_v11 }
 0x833   : > { %6067 = vmatmul.msk.f32.vlgmr.msra.gmra.mxu2 %vm492_vm0, %v4998_v2  ;;  %6075 = vmatmul.msk.f32.vlgmr.msra.gmra.mxu3 %vm492_vm0, %v4998_v2  ;;  %v5001_v2 = vld [vmem:[#allocation2 + $0x198] sm:$0xff] }
 0x834   : > { %v4152_v49 = vpop.f32.mrf.mxu0  ;;  %v4193_v54 = vpop.f32.mrf.mxu1  ;;  %4850 = vmatpush.msra.mxu0 %v4786_v10  ;;  %4891 = vmatpush.msra.mxu1 %v4787_v48  ;;  %v4806_v10 = vld [vmem:[#allocation2 + $0x158] sm:$0xff] }
 0x835   : > { %v4153_v38 = vadd.f32 %v4152_v49, %v10301_v13  ;;  %v4194_v26 = vadd.f32 %v4193_v54, %v10305_v56  ;;  %v4331_v16 = vpop.f32.mrf.mxu2  ;;  %v4372_v3 = vpop.f32.mrf.mxu3 }
 0x836   : > { %v10595_v13 = vpop.permute.xlu2 %5325 }
 0x837   : > { %v10585_v24 = vadd.f32 %v4331_v16, %v4153_v38  ;;  %v10587_v18 = vadd.f32 %v4372_v3, %v4194_v26  ;;  %6051 = vmatmul.msk.f32.vlgmr.msra.gmra.mxu0 %vm492_vm0, %v4803_v32  ;;  %6059 = vmatmul.msk.f32.vlgmr.msra.gmra.mxu1 %vm492_vm0, %v4803_v32  ;;  %v5002_v3 = vld [vmem:[#allocation2 + $0x1a0] sm:$0xff] }
 0x83a   : > { %v10591_v47 = vpop.permute.xlu1 %5329  ;;  %v10593_v30 = vpop.permute.xlu0 %5138 }
 0x83b   : > { %6068 = vmatmul.msk.f32.gmra.mxu2 %vm492_vm0, %v4999_v45  ;;  %6076 = vmatmul.msk.f32.gmra.mxu3 %vm492_vm0, %v4999_v45 }
 0x83c   : > { %v4155_v56 = vpop.f32.mrf.mxu0  ;;  %v4196_v41 = vpop.f32.mrf.mxu1 }
 0x83d   : > { %v4156_v22 = vadd.f32 %v4155_v56, %v10333_v46  ;;  %v4197_v35 = vadd.f32 %v4196_v41, %v10335_v63  ;;  %v4334_v42 = vpop.f32.mrf.mxu2  ;;  %v4375_v17 = vpop.f32.mrf.mxu3  ;;  %v4807_v41 = vld [vmem:[#allocation2 + $0x160] sm:$0xff] }
 0x83e   : > { %v10613_v1 = vpop.permute.xlu2 %5148 }
 0x83f   : > { %v10601_v14 = vadd.f32 %v4334_v42, %v4156_v22  ;;  %v10603_v37 = vadd.f32 %v4375_v17, %v4197_v35  ;;  %6052 = vmatmul.msk.f32.gmra.mxu0 %vm492_vm0, %v4804_v4  ;;  %6060 = vmatmul.msk.f32.gmra.mxu1 %vm492_vm0, %v4804_v4  ;;  %v5361_v42 = vsel %vm11273_vm15, %v10487_v19, %v10465_v25  ;;  %vm11292_vm15 = vmmov %vm11289_vm6 }
 0x840   : > { %v5369_v17 = vsel %vm11274_vm2, %v10465_v25, %v10487_v19  ;;  %v5360_v25 = vsel %vm11277_vm3, %v10528_v36, %v10376_v62  ;;  %v5368_v19 = vsel %vm11278_vm4, %v10376_v62, %v10528_v36  ;;  %v5174_v62 = vsel %vm11282_vm13, %v10577_v23, %v10526_v39  ;;  %vm11293_vm2 = vmmov %vm11279_vm1 }
 0x841   : > { %vm11294_vm3 = vmmov %vm11279_vm1 }
 0x842   : > { %v10607_v50 = vpop.permute.xlu1 %5152  ;;  %v10609_v9 = vpop.permute.xlu0 %5345  ;;  %vm11295_vm4 = vmmov %vm11289_vm6 }
 0x843   : > { %6069 = vmatmul.msk.f32.gmra.mxu2 %vm492_vm0, %v5000_v40  ;;  %6077 = vmatmul.msk.f32.gmra.mxu3 %vm492_vm0, %v5000_v40  ;;  %vm11298_vm13 = vmmov %vm11295_vm4 }
 0x844   : > { %v4158_v46 = vpop.f32.mrf.mxu0  ;;  %v4199_v63 = vpop.f32.mrf.mxu1 }
 0x845   : > { %v4159_v61 = vadd.f32 %v4158_v46, %v10352_v58  ;;  %v4200_v34 = vadd.f32 %v4199_v63, %v10354_v28  ;;  %v4337_v33 = vpop.f32.mrf.mxu2  ;;  %v4378_v15 = vpop.f32.mrf.mxu3 }
 0x846   : > { %v5354_v38 = vpop.permute.xlu2 %5353 }
 0x847   : > { %v10617_v0 = vadd.f32 %v4337_v33, %v4159_v61  ;;  %v10619_v55 = vadd.f32 %v4378_v15, %v4200_v34  ;;  %6053 = vmatmul.msk.f32.gmra.mxu0 %vm492_vm0, %v4805_v60  ;;  %6061 = vmatmul.msk.f32.gmra.mxu1 %vm492_vm0, %v4805_v60  ;;  %v11276_v61 = vld [vmem:[#allocation34_spill] sm:$0xff]  ;;  %v5359_v15 = vsel %vm11279_vm1, %v10420_v29, %v10575_v51 }
 0x848   : > { %v5384_v34 = vmul.f32 %v5369_v17, %v11276_v61 }
 0x84a   : > { %v10623_v8 = vpop.permute.xlu1 %5134  ;;  %v10625_v11 = vpop.permute.xlu0 %5327 }
 0x84b   : > { %6070 = vmatmul.msk.f32.gmra.mxu2 %vm492_vm0, %v5001_v2  ;;  %6078 = vmatmul.msk.f32.gmra.mxu3 %vm492_vm0, %v5001_v2  ;;  %v5367_v2 = vsel %vm11280_vm5, %v10575_v51, %v10420_v29  ;;  %vm11296_vm5 = vmmov %vm11295_vm4 }
 0x84c   : > { %v4161_v58 = vpop.f32.mrf.mxu0  ;;  %v4202_v28 = vpop.f32.mrf.mxu1 }
 0x84d   : > { %v4162_v48 = vadd.f32 %v4161_v58, %v10372_v12  ;;  %v4203_v49 = vadd.f32 %v4202_v28, %v10374_v53  ;;  %v4340_v54 = vpop.f32.mrf.mxu2  ;;  %v4381_v32 = vpop.f32.mrf.mxu3  ;;  %v5166_v58 = vsel %vm11281_vm7, %v10526_v39, %v10577_v23  ;;  %vm11297_vm7 = vmmov %vm11279_vm1 }
 0x84e   : > { %v5143_v33 = vpop.permute.xlu2 %5142 }
 0x84f   : > { %v10631_v26 = vadd.f32 %v4340_v54, %v4162_v48  ;;  %v10633_v16 = vadd.f32 %v4381_v32, %v4203_v49  ;;  %6054 = vmatmul.msk.f32.gmra.mxu0 %vm492_vm0, %v4806_v10  ;;  %6062 = vmatmul.msk.f32.gmra.mxu1 %vm492_vm0, %v4806_v10  ;;  %v11286_v48 = vld [vmem:[#allocation38_spill] sm:$0xff]  ;;  %v11287_v54 = vld [vmem:[#allocation39_spill] sm:$0xff] }
 0x850   : > { %v5189_v17 = vmul.f32 %v5174_v62, %v11287_v54  ;;  %v5004_v62 = vld [vmem:[#allocation2 + $0x1b0] sm:$0xff] }
 0x852   : > { %v10637_v45 = vpop.permute.xlu1 %5341  ;;  %v10639_v56 = vpop.permute.xlu0 %5150 }
 0x853   : > { %6071 = vmatmul.msk.f32.gmra.mxu2 %vm492_vm0, %v5002_v3  ;;  %6079 = vmatmul.msk.f32.gmra.mxu3 %vm492_vm0, %v5002_v3 }
 0x854   : > { %v4164_v12 = vpop.f32.mrf.mxu0  ;;  %v4205_v53 = vpop.f32.mrf.mxu1 }
 0x855   : > { %v4165_v4 = vadd.f32 %v4164_v12, %v10404_v27  ;;  %v4206_v22 = vadd.f32 %v4205_v53, %v10406_v44  ;;  %v4343_v35 = vpop.f32.mrf.mxu2  ;;  %v4384_v40 = vpop.f32.mrf.mxu3  ;;  %v5003_v27 = vld [vmem:[#allocation2 + $0x1a8] sm:$0xff]  ;;  %v11275_v44 = vld [vmem:[#allocation33_spill] sm:$0xff] }
 0x856   : > { %v5383_v60 = vmul.f32 %v5361_v42, %v11275_v44  ;;  %v4808_v53 = vld [vmem:[#allocation2 + $0x168] sm:$0xff] }
 0x857   : > { %v10653_v46 = vadd.f32 %v4343_v35, %v4165_v4  ;;  %v10655_v63 = vadd.f32 %v4384_v40, %v4206_v22  ;;  %6055 = vmatmul.msk.f32.gmra.mxu0 %vm492_vm0, %v4807_v41  ;;  %6063 = vmatmul.msk.f32.gmra.mxu1 %vm492_vm0, %v4807_v41  ;;  %v5188_v41 = vmul.f32 %v5166_v58, %v11286_v48 }
 0x858   : > { %v5165_v40 = vsel %vm11289_vm6, %v10593_v30, %v10481_v5  ;;  %v5381_v58 = vmul.f32 %v5360_v25, %v11275_v44  ;;  %vm11303_vm6 = vmmov %vm11295_vm4 }
 0x859   : > { %v5186_v25 = vmul.f32 %v5165_v40, %v11286_v48 }
 0x85a   : > { %v5159_v36 = vpop.permute.xlu1 %5158  ;;  %v5338_v28 = vpop.permute.xlu0 %5337 }
 0x85b   : > { %6072 = vmatmul.msk.f32.gmra.mxu2 %vm492_vm0, %v5003_v27  ;;  %6080 = vmatmul.msk.f32.gmra.mxu3 %vm492_vm0, %v5003_v27  ;;  %v5167_v10 = vsel %vm11283_vm12, %v5143_v33, %v5159_v36  ;;  %v5175_v29 = vsel %vm11284_vm11, %v5159_v36, %v5143_v33  ;;  %v5362_v51 = vsel %vm11285_vm14, %v5338_v28, %v5354_v38  ;;  %vm11299_vm12 = vmmov %vm11295_vm4 }
 0x85c   : > { %v5190_v49 = vmul.f32 %v5167_v10, %v11286_v48  ;;  %v5191_v32 = vmul.f32 %v5175_v29, %v11287_v54  ;;  %v4167_v39 = vpop.f32.mrf.mxu0  ;;  %v4208_v23 = vpop.f32.mrf.mxu1  ;;  %v5370_v3 = vsel %vm11288_vm8, %v5354_v38, %v5338_v28  ;;  %v5385_v12 = vmul.f32 %v5362_v51, %v11275_v44  ;;  %vm11300_vm11 = vmmov %vm11279_vm1 }
 0x85d   : > { %v4168_v4 = vadd.f32 %v4167_v39, %v10451_v52  ;;  %v4209_v22 = vadd.f32 %v4208_v23, %v10455_v7  ;;  %v5386_v35 = vmul.f32 %v5370_v3, %v11276_v61  ;;  %v4346_v42 = vpop.f32.mrf.mxu2  ;;  %v5173_v38 = vsel %vm11290_vm9, %v10481_v5, %v10593_v30  ;;  %v4387_v27 = vpop.f32.mrf.mxu3  ;;  %vm11301_vm14 = vmmov %vm11279_vm1 }
 0x85e   : > { %5233 = vmatpush.msrb.mxu0 %v5190_v49  ;;  %5274 = vmatpush.msrb.mxu1 %v5191_v32  ;;  %v5164_v52 = vsel %vm11291_vm10, %v10507_v6, %v10607_v50  ;;  %v5382_v5 = vmul.f32 %v5368_v19, %v11276_v61  ;;  %v5172_v30 = vsel %vm11292_vm15, %v10607_v50, %v10507_v6  ;;  %vm11302_vm8 = vmmov %vm11295_vm4 }
 0x85f   : > { %v10715_v7 = vadd.f32 %v4346_v42, %v4168_v4  ;;  %v10717_v33 = vadd.f32 %v4387_v27, %v4209_v22  ;;  %6056 = vmatmul.msk.f32.gmra.mxu0 %vm492_vm0, %v4808_v53  ;;  %6064 = vmatmul.msk.f32.gmra.mxu1 %vm492_vm0, %v4808_v53  ;;  %v5379_v36 = vmul.f32 %v5359_v15, %v11275_v44  ;;  %v5131_v22 = vpop.permute.xlu2 %5130  ;;  %vm11304_vm9 = vmmov %vm11279_vm1 }
 0x860   : > { %5428 = vmatpush.msrb.mxu2 %v5385_v12  ;;  %5469 = vmatpush.msrb.mxu3 %v5386_v35  ;;  %v5380_v28 = vmul.f32 %v5367_v2, %v11276_v61  ;;  %v5358_v10 = vsel %vm11293_vm2, %v10591_v47, %v10609_v9  ;;  %v5187_v19 = vmul.f32 %v5173_v38, %v11287_v54  ;;  %v4809_v12 = vld [vmem:[#allocation2 + $0x170] sm:$0xff]  ;;  %v5005_v38 = vld [vmem:[#allocation2 + $0x1b8] sm:$0xff]  ;;  %vm11305_vm10 = vmmov %vm11279_vm1 }
 0x861   : > { %5234 = vmatpush.msrb.mxu0 %v5188_v41  ;;  %5275 = vmatpush.msrb.mxu1 %v5189_v17  ;;  %v5184_v6 = vmul.f32 %v5164_v52, %v11286_v48  ;;  %v5185_v50 = vmul.f32 %v5172_v30, %v11287_v54  ;;  %v5366_v15 = vsel %vm11294_vm3, %v10609_v9, %v10591_v47  ;;  %vm11306_vm15 = vmmov %vm11295_vm4 }
 0x862   : > { %5429 = vmatpush.msrb.mxu2 %v5383_v60  ;;  %5470 = vmatpush.msrb.mxu3 %v5384_v34  ;;  %v5163_v2 = vsel %vm11295_vm4, %v10623_v8, %v10639_v56  ;;  %v10747_v29 = vpop.permute.xlu1 %5323  ;;  %v5133_v60 = vpop.permute.xlu0 %5132  ;;  %v5377_v34 = vmul.f32 %v5358_v10, %v11275_v44  ;;  %v5357_v51 = vsel %vm11279_vm1, %v10625_v11, %v10568_v57  ;;  %vm11307_vm2 = vmmov %vm11295_vm4 }
 0x863   : > { %6073 = vmatmul.msk.f32.gmra.mxu2 %vm492_vm0, %v5004_v62  ;;  %6081 = vmatmul.msk.f32.gmra.mxu3 %vm492_vm0, %v5004_v62  ;;  %v5171_v47 = vsel %vm11296_vm5, %v10639_v56, %v10623_v8  ;;  %v5365_v32 = vsel %vm11297_vm7, %v10568_v57, %v10625_v11  ;;  %v5182_v53 = vmul.f32 %v5163_v2, %v11286_v48 }
 0x864   : > { %v4170_v9 = vpop.f32.mrf.mxu0  ;;  %v4211_v49 = vpop.f32.mrf.mxu1  ;;  %5235 = vmatpush.msrb.mxu0 %v5186_v25  ;;  %5276 = vmatpush.msrb.mxu1 %v5187_v19  ;;  %v5162_v8 = vsel %vm11298_vm13, %v5133_v60, %v10613_v1  ;;  %v5170_v56 = vsel %vm11299_vm12, %v10613_v1, %v5133_v60  ;;  %v5378_v11 = vmul.f32 %v5366_v15, %v11276_v61 }
 0x865   : > { %v4171_v39 = vadd.f32 %v4170_v9, %v10489_v20  ;;  %v4212_v23 = vadd.f32 %v4211_v49, %v10491_v59  ;;  %5430 = vmatpush.msrb.mxu2 %v5381_v58  ;;  %5471 = vmatpush.msrb.mxu3 %v5382_v5  ;;  %v4349_v3 = vpop.f32.mrf.mxu2  ;;  %v4390_v41 = vpop.f32.mrf.mxu3  ;;  %v5183_v20 = vmul.f32 %v5171_v47, %v11287_v54 }
 0x866   : > { %5236 = vmatpush.msrb.mxu0 %v5184_v6  ;;  %5277 = vmatpush.msrb.mxu1 %v5185_v50  ;;  %v5356_v4 = vsel %vm11300_vm11, %v10595_v13, %v10637_v45  ;;  %v5364_v1 = vsel %vm11301_vm14, %v10637_v45, %v10595_v13  ;;  %v5180_v35 = vmul.f32 %v5162_v8, %v11286_v48  ;;  %v4810_v6 = vld [vmem:[#allocation2 + $0x178] sm:$0xff] }
 0x867   : > { %v10772_v59 = vadd.f32 %v4349_v3, %v4171_v39  ;;  %v10774_v57 = vadd.f32 %v4390_v41, %v4212_v23  ;;  %5431 = vmatpush.msrb.mxu2 %v5379_v36  ;;  %5472 = vmatpush.msrb.mxu3 %v5380_v28  ;;  %v5181_v42 = vmul.f32 %v5170_v56, %v11287_v54  ;;  %v5145_v47 = vpop.permute.xlu2 %5144 }
 0x868   : > { %6057 = vmatmul.msk.f32.gmra.mxu0 %vm492_vm0, %v4809_v12  ;;  %6065 = vmatmul.msk.f32.gmra.mxu1 %vm492_vm0, %v4809_v12  ;;  %v5375_v17 = vmul.f32 %v5357_v51, %v11275_v44  ;;  %v5376_v40 = vmul.f32 %v5365_v32, %v11276_v61  ;;  %v5373_v13 = vmul.f32 %v5356_v4, %v11275_v44  ;;  %v5193_v12 = vld [vmem:[#allocation2 + $0x1c0] sm:$0xff] }
 0x869   : > { %5237 = vmatpush.msrb.mxu0 %v5182_v53  ;;  %5278 = vmatpush.msrb.mxu1 %v5183_v20  ;;  %v5374_v45 = vmul.f32 %v5364_v1, %v11276_v61  ;;  %v5194_v20 = vld [vmem:[#allocation2 + $0x1c8] sm:$0xff] }
 0x86a   : > { %5432 = vmatpush.msrb.mxu2 %v5377_v34  ;;  %5473 = vmatpush.msrb.mxu3 %v5378_v11  ;;  %v5147_v27 = vpop.permute.xlu1 %5146  ;;  %v5340_v52 = vpop.permute.xlu0 %5339 }
 0x86b   : > { %5238 = vmatpush.msrb.mxu0 %v5180_v35  ;;  %5279 = vmatpush.msrb.mxu1 %v5181_v42  ;;  %v5161_v58 = vsel %vm11302_vm8, %v5131_v22, %v5147_v27  ;;  %v5169_v5 = vsel %vm11303_vm6, %v5147_v27, %v5131_v22  ;;  %v5355_v36 = vsel %vm11304_vm9, %v10747_v29, %v5340_v52  ;;  %v5390_v35 = vld [vmem:[#allocation2 + $0x210] sm:$0xff] }
 0x86c   : > { %5433 = vmatpush.msrb.mxu2 %v5375_v17  ;;  %5474 = vmatpush.msrb.mxu3 %v5376_v40  ;;  %v4173_v30 = vpop.f32.mrf.mxu0  ;;  %v4214_v62 = vpop.f32.mrf.mxu1  ;;  %v5178_v28 = vmul.f32 %v5161_v58, %v11286_v48  ;;  %v5179_v10 = vmul.f32 %v5169_v5, %v11287_v54  ;;  %v5363_v15 = vsel %vm11305_vm10, %v5340_v52, %v10747_v29  ;;  %v5195_v40 = vld [vmem:[#allocation2 + $0x1d0] sm:$0xff]  ;;  %v5391_v52 = vld [vmem:[#allocation2 + $0x218] sm:$0xff] }
 0x86d   : > { %6074 = vmatmul.msk.f32.gmra.mxu2 %vm492_vm0, %v5005_v38  ;;  %6082 = vmatmul.msk.f32.gmra.mxu3 %vm492_vm0, %v5005_v38  ;;  %v4174_v25 = vadd.f32 %v4173_v30, %v10540_v43  ;;  %v4352_v19 = vpop.f32.mrf.mxu2  ;;  %v4215_v50 = vadd.f32 %v4214_v62, %v10544_v21  ;;  %v5371_v2 = vmul.f32 %v5355_v36, %v11275_v44  ;;  %v4393_v60 = vpop.f32.mrf.mxu3  ;;  %v5388_v21 = vld [vmem:[#allocation2 + $0x200] sm:$0xff]  ;;  %v5196_v30 = vld [vmem:[#allocation2 + $0x1d8] sm:$0xff] }
 0x86e   : > { %5434 = vmatpush.msrb.mxu2 %v5373_v13  ;;  %5475 = vmatpush.msrb.mxu3 %v5374_v45  ;;  %v5372_v34 = vmul.f32 %v5363_v15, %v11276_v61 }
 0x86f   : > { %v10811_v51 = vadd.f32 %v4352_v19, %v4174_v25  ;;  %5239 = vmatpush.msrb.mxu0 %v5178_v28  ;;  %5280 = vmatpush.msrb.mxu1 %v5179_v10  ;;  %v10813_v43 = vadd.f32 %v4393_v60, %v4215_v50  ;;  %v5392_v25 = vld [vmem:[#allocation2 + $0x220] sm:$0xff] }
 0x870   : > { %6058 = vmatmul.msk.f32.gmra.mxu0 %vm492_vm0, %v4810_v6  ;;  %6066 = vmatmul.msk.f32.gmra.mxu1 %vm492_vm0, %v4810_v6  ;;  %v5197_v50 = vld [vmem:[#allocation2 + $0x1e0] sm:$0xff] }
 0x871   : > { %5435 = vmatpush.msrb.mxu2 %v5371_v2  ;;  %5476 = vmatpush.msrb.mxu3 %v5372_v34 }
 0x872   : > { %v5129_v29 = vpop.permute.xlu0 %5128 }
 0x873   : > { %v5160_v61 = vsel %vm11306_vm15, %v5129_v29, %v5145_v47  ;;  %v5168_v49 = vsel %vm11307_vm2, %v5145_v47, %v5129_v29 }
 0x874   : > { %v4526_v9 = vpop.f32.mrf.mxu0  ;;  %v4567_v44 = vpop.f32.mrf.mxu1  ;;  %v5176_v23 = vmul.f32 %v5160_v61, %v11286_v48  ;;  %v5177_v3 = vmul.f32 %v5168_v49, %v11287_v54 }
 0x875   : > { %v4591_v32 = vadd.f32 %v4526_v9, %v10585_v24  ;;  %v4592_v39 = vadd.f32 %v4567_v44, %v10587_v18  ;;  %6099 = vmatmul.msk.f32.vlgmr.msrb.gmra.mxu2 %vm492_vm0, %v5388_v21  ;;  %6107 = vmatmul.msk.f32.vlgmr.msrb.gmra.mxu3 %vm492_vm0, %v5388_v21  ;;  %v4657_v53 = vpop.f32.mrf.mxu2  ;;  %v4698_v8 = vpop.f32.mrf.mxu3  ;;  %v5393_v21 = vld [vmem:[#allocation2 + $0x228] sm:$0xff] }
 0x876   : > { %5240 = vmatpush.msrb.mxu0 %v5176_v23  ;;  %5281 = vmatpush.msrb.mxu1 %v5177_v3  ;;  %v5198_v9 = vld [vmem:[#allocation2 + $0x1e8] sm:$0xff] }
 0x877   : > { %v10827_v56 = vadd.f32 %v4657_v53, %v4591_v32  ;;  %v10829_v41 = vadd.f32 %v4698_v8, %v4592_v39  ;;  %v5394_v39 = vld [vmem:[#allocation2 + $0x230] sm:$0xff] }
 0x878   : > { %6083 = vmatmul.msk.f32.vlgmr.msrb.gmra.mxu0 %vm492_vm0, %v5193_v12  ;;  %6091 = vmatmul.msk.f32.vlgmr.msrb.gmra.mxu1 %vm492_vm0, %v5193_v12  ;;  %v5199_v12 = vld [vmem:[#allocation2 + $0x1f0] sm:$0xff] }
 0x87c   : > { %v4529_v24 = vpop.f32.mrf.mxu0  ;;  %v4570_v18 = vpop.f32.mrf.mxu1 }
 0x87d   : > { %v4593_v48 = vadd.f32 %v4529_v24, %v10601_v14  ;;  %v4594_v54 = vadd.f32 %v4570_v18, %v10603_v37  ;;  %6100 = vmatmul.msk.f32.gmra.mxu2 %vm492_vm0, %v5389_v31  ;;  %6108 = vmatmul.msk.f32.gmra.mxu3 %vm492_vm0, %v5389_v31  ;;  %v4660_v11 = vpop.f32.mrf.mxu2  ;;  %v4701_v4 = vpop.f32.mrf.mxu3  ;;  %v5395_v18 = vld [vmem:[#allocation2 + $0x238] sm:$0xff] }
 0x87f   : > { %v10837_v1 = vadd.f32 %v4660_v11, %v4593_v48  ;;  %v10839_v22 = vadd.f32 %v4701_v4, %v4594_v54 }
 0x880   : > { %6084 = vmatmul.msk.f32.gmra.mxu0 %vm492_vm0, %v5194_v20  ;;  %6092 = vmatmul.msk.f32.gmra.mxu1 %vm492_vm0, %v5194_v20  ;;  %v5200_v20 = vld [vmem:[#allocation2 + $0x1f8] sm:$0xff] }
 0x884   : > { %v4532_v42 = vpop.f32.mrf.mxu0  ;;  %v4573_v14 = vpop.f32.mrf.mxu1 }
 0x885   : > { %v4595_v37 = vadd.f32 %v4532_v42, %v10617_v0  ;;  %v4596_v17 = vadd.f32 %v4573_v14, %v10619_v55  ;;  %6101 = vmatmul.msk.f32.gmra.mxu2 %vm492_vm0, %v5390_v35  ;;  %6109 = vmatmul.msk.f32.gmra.mxu3 %vm492_vm0, %v5390_v35  ;;  %v4663_v38 = vpop.f32.mrf.mxu2  ;;  %v4704_v13 = vpop.f32.mrf.mxu3 }
 0x887   : > { %v10847_v45 = vadd.f32 %v4663_v38, %v4595_v37  ;;  %v10849_v27 = vadd.f32 %v4704_v13, %v4596_v17 }
 0x888   : > { %6085 = vmatmul.msk.f32.gmra.mxu0 %vm492_vm0, %v5195_v40  ;;  %6093 = vmatmul.msk.f32.gmra.mxu1 %vm492_vm0, %v5195_v40 }
 0x88c   : > { %v4535_v58 = vpop.f32.mrf.mxu0  ;;  %v4576_v0 = vpop.f32.mrf.mxu1 }
 0x88d   : > { %v4597_v55 = vadd.f32 %v4535_v58, %v10631_v26  ;;  %v4598_v5 = vadd.f32 %v4576_v0, %v10633_v16  ;;  %6102 = vmatmul.msk.f32.gmra.mxu2 %vm492_vm0, %v5391_v52  ;;  %6110 = vmatmul.msk.f32.gmra.mxu3 %vm492_vm0, %v5391_v52  ;;  %v4666_v62 = vpop.f32.mrf.mxu2  ;;  %v4707_v36 = vpop.f32.mrf.mxu3 }
 0x88f   : > { %v10857_v28 = vadd.f32 %v4666_v62, %v4597_v55  ;;  %v10859_v10 = vadd.f32 %v4707_v36, %v4598_v5 }
 0x890   : > { %6086 = vmatmul.msk.f32.gmra.mxu0 %vm492_vm0, %v5196_v30  ;;  %6094 = vmatmul.msk.f32.gmra.mxu1 %vm492_vm0, %v5196_v30 }
 0x894   : > { %v4538_v19 = vpop.f32.mrf.mxu0  ;;  %v4579_v26 = vpop.f32.mrf.mxu1 }
 0x895   : > { %v4599_v16 = vadd.f32 %v4538_v19, %v10653_v46  ;;  %v4600_v6 = vadd.f32 %v4579_v26, %v10655_v63  ;;  %6103 = vmatmul.msk.f32.gmra.mxu2 %vm492_vm0, %v5392_v25  ;;  %6111 = vmatmul.msk.f32.gmra.mxu3 %vm492_vm0, %v5392_v25  ;;  %v4669_v15 = vpop.f32.mrf.mxu2  ;;  %v4710_v2 = vpop.f32.mrf.mxu3 }
 0x897   : > { %v10867_v60 = vadd.f32 %v4669_v15, %v4599_v16  ;;  %v10869_v34 = vadd.f32 %v4710_v2, %v4600_v6 }
 0x898   : > { %6087 = vmatmul.msk.f32.gmra.mxu0 %vm492_vm0, %v5197_v50  ;;  %6095 = vmatmul.msk.f32.gmra.mxu1 %vm492_vm0, %v5197_v50 }
 0x89c   : > { %v4541_v47 = vpop.f32.mrf.mxu0  ;;  %v4582_v46 = vpop.f32.mrf.mxu1 }
 0x89d   : > { %v4601_v63 = vadd.f32 %v4541_v47, %v10715_v7  ;;  %v4602_v29 = vadd.f32 %v4582_v46, %v10717_v33  ;;  %6104 = vmatmul.msk.f32.gmra.mxu2 %vm492_vm0, %v5393_v21  ;;  %6112 = vmatmul.msk.f32.gmra.mxu3 %vm492_vm0, %v5393_v21 }
 0x89e   : > { %v4672_v44 = vpop.f32.mrf.mxu2  ;;  %v4713_v61 = vpop.f32.mrf.mxu3 }
 0x89f   : > { %v10877_v49 = vadd.f32 %v4672_v44, %v4601_v63  ;;  %v10879_v32 = vadd.f32 %v4713_v61, %v4602_v29 }
 0x8a0   : > { %6088 = vmatmul.msk.f32.gmra.mxu0 %vm492_vm0, %v5198_v9  ;;  %6096 = vmatmul.msk.f32.gmra.mxu1 %vm492_vm0, %v5198_v9 }
 0x8a4   : > { %v4544_v23 = vpop.f32.mrf.mxu0  ;;  %v4585_v7 = vpop.f32.mrf.mxu1 }
 0x8a5   : > { %v4603_v33 = vadd.f32 %v4544_v23, %v10772_v59  ;;  %v4604_v3 = vadd.f32 %v4585_v7, %v10774_v57  ;;  %6105 = vmatmul.msk.f32.gmra.mxu2 %vm492_vm0, %v5394_v39  ;;  %6113 = vmatmul.msk.f32.gmra.mxu3 %vm492_vm0, %v5394_v39 }
 0x8a6   : > { %v4675_v53 = vpop.f32.mrf.mxu2  ;;  %v4716_v8 = vpop.f32.mrf.mxu3 }
 0x8a7   : > { %v10887_v31 = vadd.f32 %v4675_v53, %v4603_v33  ;;  %v10889_v24 = vadd.f32 %v4716_v8, %v4604_v3 }
 0x8a8   : > { %6089 = vmatmul.msk.f32.gmra.mxu0 %vm492_vm0, %v5199_v12  ;;  %6097 = vmatmul.msk.f32.gmra.mxu1 %vm492_vm0, %v5199_v12 }
 0x8ac   : > { %v4547_v48 = vpop.f32.mrf.mxu0  ;;  %v4588_v59 = vpop.f32.mrf.mxu1 }
 0x8ad   : > { %v4605_v57 = vadd.f32 %v4547_v48, %v10811_v51  ;;  %v4606_v54 = vadd.f32 %v4588_v59, %v10813_v43  ;;  %6106 = vmatmul.msk.f32.gmra.mxu2 %vm492_vm0, %v5395_v18  ;;  %6114 = vmatmul.msk.f32.gmra.mxu3 %vm492_vm0, %v5395_v18 }
 0x8ae   : > { %v4678_v11 = vpop.f32.mrf.mxu2  ;;  %v4719_v4 = vpop.f32.mrf.mxu3 }
 0x8af   : > { %v10897_v35 = vadd.f32 %v4678_v11, %v4605_v57  ;;  %v10899_v42 = vadd.f32 %v4719_v4, %v4606_v54  ;;  %v5529_v57 = vpop.permute.xlu1 %5528 }
 0x8b0   : > { %6090 = vmatmul.msk.f32.gmra.mxu0 %vm492_vm0, %v5200_v20  ;;  %6098 = vmatmul.msk.f32.gmra.mxu1 %vm492_vm0, %v5200_v20 }
 0x8b4   : > { %v4852_v14 = vpop.f32.mrf.mxu0  ;;  %v4893_v37 = vpop.f32.mrf.mxu1 }
 0x8b5   : > { %v4917_v44 = vadd.f32 %v4852_v14, %v10827_v56  ;;  %v4918_v61 = vadd.f32 %v4893_v37, %v10829_v41  ;;  %v6320_v14 = vld [vmem:[%s6469_s29] sm:$0xff] }
 0x8b6   : > { %v5047_v51 = vpop.f32.mrf.mxu2  ;;  %v5088_v17 = vpop.f32.mrf.mxu3 }
 0x8b7   : > { %v5112_v7 = vadd.f32 %v5047_v51, %v4917_v44  ;;  %v5113_v33 = vadd.f32 %v5088_v17, %v4918_v61  ;;  %v6321_v17 = vld [vmem:[%s6469_s29 + $0x8] sm:$0xff] }
 0x8bc   : > { %v4855_v43 = vpop.f32.mrf.mxu0  ;;  %v4896_v40 = vpop.f32.mrf.mxu1 }
 0x8bd   : > { %v4919_v18 = vadd.f32 %v4855_v43, %v10837_v1  ;;  %v4920_v48 = vadd.f32 %v4896_v40, %v10839_v22 }
 0x8be   : > { %v5050_v38 = vpop.f32.mrf.mxu2  ;;  %v5091_v13 = vpop.f32.mrf.mxu3 }
 0x8bf   : > { %v5114_v11 = vadd.f32 %v5050_v38, %v4919_v18  ;;  %v5115_v4 = vadd.f32 %v5091_v13, %v4920_v48 }
 0x8c4   : > { %v4858_v52 = vpop.f32.mrf.mxu0  ;;  %v4899_v58 = vpop.f32.mrf.mxu1 }
 0x8c5   : > { %v4921_v61 = vadd.f32 %v4858_v52, %v10847_v45  ;;  %v6323_v45 = vld [vmem:[%s6469_s29 + $0x18] sm:$0xff] }
 0x8c6   : > { %v5053_v0 = vpop.f32.mrf.mxu2  ;;  %v5094_v55 = vpop.f32.mrf.mxu3 }
 0x8cc   : > { %v10903_v5 = vpop.f32.mrf.mxu0  ;;  %v10905_v30 = vpop.f32.mrf.mxu1 }
 0x8ce   : > { %v10907_v62 = vpop.f32.mrf.mxu2  ;;  %v10909_v36 = vpop.f32.mrf.mxu3 }
 0x8d4   : > { %v10911_v25 = vpop.f32.mrf.mxu0  ;;  %v10913_v19 = vpop.f32.mrf.mxu1 }
 0x8d6   : > { %v10915_v26 = vpop.f32.mrf.mxu2  ;;  %v10917_v16 = vpop.f32.mrf.mxu3 }
 0x8dc   : > { %v10919_v6 = vpop.f32.mrf.mxu0  ;;  %v10921_v50 = vpop.f32.mrf.mxu1 }
 0x8de   : > { %v10923_v15 = vpop.f32.mrf.mxu2  ;;  %v10925_v2 = vpop.f32.mrf.mxu3 }
 0x8e5   : > { %v10927_v21 = vpop.f32.mrf.mxu0  ;;  %v10929_v47 = vpop.f32.mrf.mxu1 }
 0x8e6   : > { %v10931_v46 = vpop.f32.mrf.mxu2  ;;  %v10933_v63 = vpop.f32.mrf.mxu3 }
 0x8ed   : > { %v10935_v29 = vpop.f32.mrf.mxu0  ;;  %v10937_v9 = vpop.f32.mrf.mxu1 }
 0x8f0   : > { %v10941_v39 = vpop.f32.mrf.mxu2  ;;  %v10943_v23 = vpop.f32.mrf.mxu3 }
 0x8f5   : > { %v5242_v3 = vpop.f32.mrf.mxu0  ;;  %v5283_v12 = vpop.f32.mrf.mxu1 }
 0x8f6   : > { %v5307_v53 = vadd.f32 %v5242_v3, %v5112_v7  ;;  %v5308_v8 = vadd.f32 %v5283_v12, %v5113_v33  ;;  %v4922_v7 = vadd.f32 %v4899_v58, %v10849_v27  ;;  %v5534_v3 = vpop.permute.xlu0 %5533 }
 0x8f8   : > { %v5437_v56 = vpop.f32.mrf.mxu2  ;;  %v5478_v41 = vpop.f32.mrf.mxu3  ;;  %v5117_v18 = vadd.f32 %v5094_v55, %v4922_v7 }
 0x8f9   : > { %v5502_v59 = vadd.f32 %v5437_v56, %v5307_v53  ;;  %v5503_v54 = vadd.f32 %v5478_v41, %v5308_v8  ;;  %v5116_v8 = vadd.f32 %v5053_v0, %v4921_v61  ;;  %v6322_v56 = vld [vmem:[%s6469_s29 + $0x10] sm:$0xff]  ;;  %v4925_v61 = vadd.f32 %v10911_v25, %v10867_v60 }
 0x8fb   : > { %v5566_v20 = vadd.f32 %v5529_v57, %v5502_v59  ;;  %v5567_v1 = vadd.f32 %v5529_v57, %v5503_v54  ;;  %v4923_v54 = vadd.f32 %v10903_v5, %v10857_v28 }
 0x8fd   : > { %v5582_v37 = vadd.f32 %v6320_v14, %v5566_v20  ;;  %v5245_v22 = vpop.f32.mrf.mxu0  ;;  %v5286_v51 = vpop.f32.mrf.mxu1  ;;  %v5583_v43 = vadd.f32 %v6321_v17, %v5567_v1  ;;  %v4924_v20 = vadd.f32 %v10905_v30, %v10859_v10  ;;  %v6324_v17 = vld [vmem:[%s6469_s29 + $0x20] sm:$0xff] }
 0x8fe   : > { %v5309_v40 = vadd.f32 %v5245_v22, %v5114_v11  ;;  %v5310_v44 = vadd.f32 %v5286_v51, %v5115_v4  ;;  %v5539_v4 = vpop.permute.xlu2 %5538 }
 0x8ff   : > { %5598 = vst [vmem:[%s10952_s20] sm:$0xff] %v5582_v37  ;;  %v5118_v37 = vadd.f32 %v10907_v62, %v4923_v54  ;;  %v5119_v22 = vadd.f32 %v10909_v36, %v4924_v20  ;;  %v4926_v62 = vadd.f32 %v10913_v19, %v10869_v34 }
 0x900   : > { %5599 = vst [vmem:[%s10952_s20 + $0x8] sm:$0xff] %v5583_v43  ;;  %v5440_v33 = vpop.f32.mrf.mxu2  ;;  %v5481_v13 = vpop.f32.mrf.mxu3 }
 0x901   : > { %v5504_v38 = vadd.f32 %v5440_v33, %v5309_v40  ;;  %v5505_v12 = vadd.f32 %v5481_v13, %v5310_v44  ;;  %v6325_v40 = vld [vmem:[%s6469_s29 + $0x28] sm:$0xff] }
 0x903   : > { %v5568_v53 = vadd.f32 %v5534_v3, %v5504_v38  ;;  %v5569_v48 = vadd.f32 %v5534_v3, %v5505_v12  ;;  %v5544_v38 = vpop.permute.xlu1 %5543  ;;  %v5120_v12 = vadd.f32 %v10915_v26, %v4925_v61  ;;  %v4928_v26 = vadd.f32 %v10921_v50, %v10879_v32 }
 0x905   : > { %v5584_v59 = vadd.f32 %v6322_v56, %v5568_v53  ;;  %v5248_v41 = vpop.f32.mrf.mxu0  ;;  %v5289_v57 = vpop.f32.mrf.mxu1  ;;  %v5585_v52 = vadd.f32 %v6323_v45, %v5569_v48  ;;  %v5121_v53 = vadd.f32 %v10917_v16, %v4926_v62  ;;  %v6327_v56 = vld [vmem:[%s6469_s29 + $0x38] sm:$0xff]  ;;  %v5123_v20 = vadd.f32 %v10925_v2, %v4928_v26 }
 0x906   : > { %v5311_v27 = vadd.f32 %v5248_v41, %v5116_v8  ;;  %v5312_v58 = vadd.f32 %v5289_v57, %v5117_v18  ;;  %v6326_v18 = vld [vmem:[%s6469_s29 + $0x30] sm:$0xff]  ;;  %v4927_v41 = vadd.f32 %v10919_v6, %v10877_v49  ;;  %v4931_v62 = vadd.f32 %v10935_v29, %v10897_v35 }
 0x907   : > { %5600 = vst [vmem:[%s10952_s20 + $0x10] sm:$0xff] %v5584_v59 }
 0x908   : > { %5601 = vst [vmem:[%s10952_s20 + $0x18] sm:$0xff] %v5585_v52  ;;  %v5443_v0 = vpop.f32.mrf.mxu2  ;;  %v5484_v11 = vpop.f32.mrf.mxu3  ;;  %v5122_v54 = vadd.f32 %v10923_v15, %v4927_v41  ;;  %v4930_v15 = vadd.f32 %v10929_v47, %v10889_v24  ;;  %v6334_v41 = vld [vmem:[%s6469_s29 + $0x70] sm:$0xff] }
 0x909   : > { %v5506_v55 = vadd.f32 %v5443_v0, %v5311_v27  ;;  %v5507_v1 = vadd.f32 %v5484_v11, %v5312_v58  ;;  %v5549_v52 = vpop.permute.xlu0 %5548 }
 0x90b   : > { %v5570_v14 = vadd.f32 %v5539_v4, %v5506_v55  ;;  %v5571_v51 = vadd.f32 %v5539_v4, %v5507_v1  ;;  %v6328_v55 = vld [vmem:[%s6469_s29 + $0x40] sm:$0xff]  ;;  %v6329_v4 = vld [vmem:[%s6469_s29 + $0x48] sm:$0xff] }
 0x90d   : > { %v5586_v28 = vadd.f32 %v6324_v17, %v5570_v14  ;;  %v5251_v5 = vpop.f32.mrf.mxu0  ;;  %v5292_v43 = vpop.f32.mrf.mxu1  ;;  %v5587_v10 = vadd.f32 %v6325_v40, %v5571_v51  ;;  %v4929_v14 = vadd.f32 %v10927_v21, %v10887_v31 }
 0x90e   : > { %v5313_v30 = vadd.f32 %v5251_v5, %v5118_v37  ;;  %v5314_v44 = vadd.f32 %v5292_v43, %v5119_v22  ;;  %v5554_v51 = vpop.permute.xlu2 %5553  ;;  %v5125_v43 = vadd.f32 %v10933_v63, %v4930_v15 }
 0x90f   : > { %5602 = vst [vmem:[%s10952_s20 + $0x20] sm:$0xff] %v5586_v28  ;;  %v5124_v5 = vadd.f32 %v10931_v46, %v4929_v14  ;;  %v4932_v46 = vadd.f32 %v10937_v9, %v10899_v42  ;;  %v6333_v42 = vld [vmem:[%s6469_s29 + $0x68] sm:$0xff] }
 0x910   : > { %5603 = vst [vmem:[%s10952_s20 + $0x28] sm:$0xff] %v5587_v10  ;;  %v5446_v36 = vpop.f32.mrf.mxu2  ;;  %v5487_v33 = vpop.f32.mrf.mxu3  ;;  %v6330_v10 = vld [vmem:[%s6469_s29 + $0x50] sm:$0xff] }
 0x911   : > { %v5508_v7 = vadd.f32 %v5446_v36, %v5313_v30  ;;  %v5509_v13 = vadd.f32 %v5487_v33, %v5314_v44  ;;  %v6331_v44 = vld [vmem:[%s6469_s29 + $0x58] sm:$0xff]  ;;  %v5559_v33 = vpop.permute.xlu1 %5558 }
 0x913   : > { %v5572_v3 = vadd.f32 %v5544_v38, %v5508_v7  ;;  %v5573_v8 = vadd.f32 %v5544_v38, %v5509_v13 }
 0x915   : > { %v5588_v60 = vadd.f32 %v6326_v18, %v5572_v3  ;;  %v5254_v25 = vpop.f32.mrf.mxu0  ;;  %v5295_v48 = vpop.f32.mrf.mxu1  ;;  %v5589_v34 = vadd.f32 %v6327_v56, %v5573_v8  ;;  %v5126_v3 = vadd.f32 %v10941_v39, %v4931_v62  ;;  %v6332_v8 = vld [vmem:[%s6469_s29 + $0x60] sm:$0xff] }
 0x916   : > { %v5315_v19 = vadd.f32 %v5254_v25, %v5120_v12  ;;  %v5316_v59 = vadd.f32 %v5295_v48, %v5121_v53  ;;  %v5127_v12 = vadd.f32 %v10943_v23, %v4932_v46 }
 0x917   : > { %5604 = vst [vmem:[%s10952_s20 + $0x30] sm:$0xff] %v5588_v60 }
 0x918   : > { %5605 = vst [vmem:[%s10952_s20 + $0x38] sm:$0xff] %v5589_v34  ;;  %v5449_v16 = vpop.f32.mrf.mxu2  ;;  %v5490_v45 = vpop.f32.mrf.mxu3 }
 0x919   : > { %v5510_v57 = vadd.f32 %v5449_v16, %v5315_v19  ;;  %v5511_v27 = vadd.f32 %v5490_v45, %v5316_v59  ;;  %v5564_v34 = vpop.permute.xlu0 %5563  ;;  %v6335_v16 = vld [vmem:[%s6469_s29 + $0x78] sm:$0xff] }
 0x91b   : > { %v5574_v58 = vadd.f32 %v5549_v52, %v5510_v57  ;;  %v5575_v0 = vadd.f32 %v5549_v52, %v5511_v27 }
 0x91d   : > { %v5590_v49 = vadd.f32 %v6328_v55, %v5574_v58  ;;  %v5257_v6 = vpop.f32.mrf.mxu0  ;;  %v5298_v11 = vpop.f32.mrf.mxu1  ;;  %v5591_v32 = vadd.f32 %v6329_v4, %v5575_v0 }
 0x91e   : > { %v5317_v50 = vadd.f32 %v5257_v6, %v5122_v54  ;;  %v5318_v1 = vadd.f32 %v5298_v11, %v5123_v20 }
 0x91f   : > { %5606 = vst [vmem:[%s10952_s20 + $0x40] sm:$0xff] %v5590_v49 }
 0x920   : > { %5607 = vst [vmem:[%s10952_s20 + $0x48] sm:$0xff] %v5591_v32  ;;  %v5452_v2 = vpop.f32.mrf.mxu2  ;;  %v5493_v22 = vpop.f32.mrf.mxu3 }
 0x921   : > { %v5512_v37 = vadd.f32 %v5452_v2, %v5317_v50  ;;  %v5513_v17 = vadd.f32 %v5493_v22, %v5318_v1 }
 0x923   : > { %v5576_v28 = vadd.f32 %v5554_v51, %v5512_v37  ;;  %v5577_v40 = vadd.f32 %v5554_v51, %v5513_v17 }
 0x925   : > { %v5592_v31 = vadd.f32 %v6330_v10, %v5576_v28  ;;  %v5260_v21 = vpop.f32.mrf.mxu0  ;;  %v5301_v30 = vpop.f32.mrf.mxu1  ;;  %v5593_v24 = vadd.f32 %v6331_v44, %v5577_v40 }
 0x926   : > { %v5319_v47 = vadd.f32 %v5260_v21, %v5124_v5  ;;  %v5320_v61 = vadd.f32 %v5301_v30, %v5125_v43 }
 0x927   : > { %5608 = vst [vmem:[%s10952_s20 + $0x50] sm:$0xff] %v5592_v31 }
 0x928   : > { %5609 = vst [vmem:[%s10952_s20 + $0x58] sm:$0xff] %v5593_v24  ;;  %v5455_v63 = vpop.f32.mrf.mxu2  ;;  %v5496_v7 = vpop.f32.mrf.mxu3 }
 0x929   : > { %v5514_v36 = vadd.f32 %v5455_v63, %v5319_v47  ;;  %v5515_v38 = vadd.f32 %v5496_v7, %v5320_v61 }
 0x92b   : > { %v5578_v13 = vadd.f32 %v5559_v33, %v5514_v36  ;;  %v5579_v53 = vadd.f32 %v5559_v33, %v5515_v38 }
 0x92d   : > { %v5594_v35 = vadd.f32 %v6332_v8, %v5578_v13  ;;  %v5263_v29 = vpop.f32.mrf.mxu0  ;;  %v5304_v18 = vpop.f32.mrf.mxu1  ;;  %v5595_v9 = vadd.f32 %v6333_v42, %v5579_v53 }
 0x92e   : > { %v5321_v60 = vadd.f32 %v5263_v29, %v5126_v3  ;;  %v5322_v25 = vadd.f32 %v5304_v18, %v5127_v12 }
 0x92f   : > { %5610 = vst [vmem:[%s10952_s20 + $0x60] sm:$0xff] %v5594_v35 }
 0x930   : > { %5611 = vst [vmem:[%s10952_s20 + $0x68] sm:$0xff] %v5595_v9  ;;  %v5458_v48 = vpop.f32.mrf.mxu2  ;;  %v5499_v39 = vpop.f32.mrf.mxu3 }
 0x931   : > { %v5516_v56 = vadd.f32 %v5458_v48, %v5321_v60  ;;  %v5517_v23 = vadd.f32 %v5499_v39, %v5322_v25 }
 0x933   : > { %v5580_v19 = vadd.f32 %v5564_v34, %v5516_v56  ;;  %v5581_v59 = vadd.f32 %v5564_v34, %v5517_v23 }
 0x935   : > { %v5596_v26 = vadd.f32 %v6334_v41, %v5580_v19  ;;  %v5597_v57 = vadd.f32 %v6335_v16, %v5581_v59 }
 0x937   : > { %5612 = vst [vmem:[%s10952_s20 + $0x70] sm:$0xff] %v5596_v26 }
 0x938   : > { %5613 = vst [vmem:[%s10952_s20 + $0x78] sm:$0xff] %v5597_v57 }
 0x939 PF: > { %s22_s17 = sadd.s32 1, %s6376_s17  }
 0x93a   : > { %p19_p7 = scmp.ge.s32.totalorder %s22_s17, 4  }
 0x93c   :  { %21 = sbr.rel (!%p19_p7) target bundleno = 1 (0x1), region = 122 }
 0x941   :  { %5635 = vsyncpa [#allocation3], 1 }
 0x942   :  { %5637 = vsyncpa [#allocation3 + $0x1], 1 }

</bundles_post_ra>
